<compile_context>
chip_gen: v7x
topology: tpu7x:2x2x1
jax: 0.10.0
libtpu: 0.0.40
codegen_flags: <defaults>
</compile_context>

<pallas_src>
import jax
import jax.numpy as jnp
from jax.experimental import pallas as pl
from jax.experimental.pallas import tpu as pltpu


def _round_up(x, m):
    return ((x + m - 1) // m) * m


# ---------------------------------------------------------------------------
# Kernel
# ---------------------------------------------------------------------------
def _attr_embed_kernel(ent_sr_ref, attr_sr_ref, exp_sr_ref,
                       ent_tg_ref, attr_tg_ref, exp_tg_ref,
                       w_ent_ref, w_attr_ref, w_exp_ref, b_ref,
                       o_sr_ref, o_tg_ref):
    """One row tile: fused (concat + Linear) for both sides.

    o_sr = [ent_sr | attr_sr | exp_sr] @ W^T + b
    o_tg = [ent_tg | attr_tg | exp_tg] @ W^T + b
    """
    w_ent = w_ent_ref[...]
    w_attr = w_attr_ref[...]
    w_exp = w_exp_ref[...]
    # Hoisted: one bias load + one broadcast per tile (shared by both sides), f32.
    bias = jnp.broadcast_to(b_ref[...], o_sr_ref.shape)

    def one_side(ent_ref, attr_ref, exp_ref):
        acc = jnp.dot(attr_ref[...], w_attr, preferred_element_type=jnp.float32)
        acc = acc + jnp.dot(ent_ref[...], w_ent, preferred_element_type=jnp.float32)
        # exp_out_* arrives f32 from HBM; cast in VMEM right before the MXU dot
        # (avoids a separate HBM cast pass in the wrapper).
        acc = acc + jnp.dot(exp_ref[...].astype(w_exp.dtype), w_exp,
                            preferred_element_type=jnp.float32)
        return acc + bias

    o_sr_ref[...] = one_side(ent_sr_ref, attr_sr_ref, exp_sr_ref).astype(o_sr_ref.dtype)
    o_tg_ref[...] = one_side(ent_tg_ref, attr_tg_ref, exp_tg_ref).astype(o_tg_ref.dtype)


# ---------------------------------------------------------------------------
# Row-tile selection (VMEM-budget driven, generation-agnostic)
# ---------------------------------------------------------------------------
_TM_CANDIDATES = (2048, 1024, 512, 256, 128, 64, 32, 16, 8)
_VMEM_TILE_BUDGET = 18 * 1024 * 1024   # leave headroom under the 32 MiB scoped limit
_VMEM_LIMIT_BYTES = 32 * 1024 * 1024   # raises v5e's 16 MiB default; = default on v6e/v7x


def _pick_tm(n, dim, d768, d2):
    # Per-row VMEM bytes for double-buffered tiles: bf16 ent/attr, f32 exp (both
    # sides) plus two f32 [*, dim] output tiles.
    in_row = 2 * (2 * dim + 2 * d768 + 4 * d2)
    out_row = 2 * 4 * dim
    per_row = 2 * (in_row + out_row)          # x2 for double buffering
    tm = 8
    for cand in _TM_CANDIDATES:
        if cand * per_row <= _VMEM_TILE_BUDGET:
            tm = cand
            break
    # For large N keep >= ~8 grid steps (megacore sharding + DMA pipelining),
    # but never shrink below 512 rows (per-step fixed overhead ~0.35 us).
    tm = min(tm, max(512, _round_up(-(-n // 8), 8)))
    # Never exceed N (rounded to the 8-sublane granule).
    tm = min(tm, _round_up(n, 8))
    return max(tm, 8)


# ---------------------------------------------------------------------------
# Wrapper
# ---------------------------------------------------------------------------
def attribute_linear(ent_sr, attr_sr, exp_sr, ent_tg, attr_tg, exp_tg,
                     w_ent_t, w_attr_t, w_exp_t, b_row, *, tm=None):
    """Fused concat + nn.Linear for both sides in a single row-tiled pallas_call.

    ent_*/attr_* are expected pre-cast (bf16); exp_* may stay f32 (cast in-kernel).
    Returns (topic_vec_sr, topic_vec_tg), each [N, dim] float32.
    """
    N, dim = ent_sr.shape
    d768 = attr_sr.shape[1]
    d2 = exp_sr.shape[1]
    indim = dim + d768 + d2

    if tm is None:
        tm = _pick_tm(N, dim, d768, d2)
    tm = max(8, min(_round_up(tm, 8), _round_up(N, 8)))
    grid = (pl.cdiv(N, tm),)   # ragged last block is masked by Pallas

    def row_spec(f):
        return pl.BlockSpec((tm, f), lambda i: (i, 0))

    def full_spec(r, c):
        return pl.BlockSpec((r, c), lambda i: (0, 0))

    inputs = (ent_sr, attr_sr, exp_sr, ent_tg, attr_tg, exp_tg,
              w_ent_t, w_attr_t, w_exp_t, b_row)
    bytes_in = sum(int(a.size) * a.dtype.itemsize for a in inputs)
    bytes_out = 2 * N * dim * 4
    cost = pl.CostEstimate(
        flops=2 * 2 * N * indim * dim,   # two sides, 2*M*K*N each
        transcendentals=0,
        bytes_accessed=bytes_in + bytes_out,
    )

    out_sr, out_tg = pl.pallas_call(
        _attr_embed_kernel,
        out_shape=(jax.ShapeDtypeStruct((N, dim), jnp.float32),
                   jax.ShapeDtypeStruct((N, dim), jnp.float32)),
        grid=grid,
        in_specs=[
            row_spec(dim), row_spec(d768), row_spec(d2),      # sr activations
            row_spec(dim), row_spec(d768), row_spec(d2),      # tg activations
            full_spec(dim, dim), full_spec(d768, dim), full_spec(d2, dim),  # W chunks
            full_spec(1, dim),                                # bias
        ],
        out_specs=(pl.BlockSpec((tm, dim), lambda i: (i, 0)),
                   pl.BlockSpec((tm, dim), lambda i: (i, 0))),
        compiler_params=pltpu.CompilerParams(
            dimension_semantics=("parallel",),
            vmem_limit_bytes=_VMEM_LIMIT_BYTES),
        cost_estimate=cost,
    )(*inputs)

    return out_sr, out_tg


# ---------------------------------------------------------------------------
# Module
# ---------------------------------------------------------------------------
class AttributeEmbedPallas:
    """JAX/Pallas re-implementation of AttributeEmbed's forward pass."""

    def __init__(self, dim, key,
                 attention_property_vec_sr, attention_property_vec_tg,
                 entity_vec_sr, entity_vec_tg,
                 value_vec_sr=None, value_vec_tg=None,
                 property_vec_sr=None, property_vec_tg=None,
                 compute_dtype=jnp.bfloat16,
                 pallas_min_rows=512):
        self.dim = dim
        self.compute_dtype = compute_dtype
        self.pallas_min_rows = pallas_min_rows
        indim = 768 + 2 * dim + dim  # same as the PyTorch module

        # Deterministic parameter init (mirrors nn.Linear default U(-1/sqrt(fan_in), .)).
        k_lw, k_lb, k_psr, k_ptg = jax.random.split(key, 4)
        bound = 1.0 / jnp.sqrt(jnp.float32(indim))
        self.linear_w = jax.random.uniform(k_lw, (dim, indim), jnp.float32, -bound, bound)
        self.linear_b = jax.random.uniform(k_lb, (dim,), jnp.float32, -bound, bound)

        # Pre-split + pre-transpose + pre-cast the weight ONCE (no per-call .T copy).
        # Column order matches concat: [entity (dim) | attention_property (768) | exp_out (2*dim)].
        self.w_ent_t = self.linear_w[:, :dim].T.astype(compute_dtype)             # [dim, dim]
        self.w_attr_t = self.linear_w[:, dim:dim + 768].T.astype(compute_dtype)   # [768, dim]
        self.w_exp_t = self.linear_w[:, dim + 768:].T.astype(compute_dtype)       # [2*dim, dim]
        self.b_row = self.linear_b[None, :]                                       # [1, dim] f32

        # Parameters declared in __init__ but unused by this forward pass
        # (kept only for shape fidelity / determinism).
        self.Weight_Attribute_sr = jnp.ones((1, 768), jnp.float32)
        self.Weight_Attribute_tg = jnp.ones((1, 768), jnp.float32)
        bnd_p = 1.0 / jnp.sqrt(jnp.float32(768))
        self.proj_sr_w = jax.random.uniform(k_psr, (2 * dim, 768), jnp.float32, -bnd_p, bnd_p)
        self.proj_tg_w = jax.random.uniform(k_ptg, (2 * dim, 768), jnp.float32, -bnd_p, bnd_p)
        self.alpha = jnp.zeros((1,), jnp.float32)
        self.beta = jnp.zeros((1,), jnp.float32)

        # Persistent activations: cast to the MXU compute dtype ONCE here, so the
        # per-call wrapper moves no extra HBM bytes for casting/padding.
        self.attention_property_vec_sr = attention_property_vec_sr.astype(compute_dtype)  # [N, 768]
        self.attention_property_vec_tg = attention_property_vec_tg.astype(compute_dtype)  # [N, 768]
        self.entity_vec_sr = entity_vec_sr.astype(compute_dtype)                          # [N, dim]
        self.entity_vec_tg = entity_vec_tg.astype(compute_dtype)                          # [N, dim]

    def _xla_linear(self, ent, attr, exp):
        # Tiny-N fast path: a single fused XLA dot — a 1-tile Pallas grid would pay
        # launch + DMA priming with nothing to pipeline.
        cdt = self.compute_dtype
        x = jnp.concatenate([ent.astype(cdt), attr.astype(cdt), exp.astype(cdt)], axis=1)
        w_t = jnp.concatenate([self.w_ent_t, self.w_attr_t, self.w_exp_t], axis=0)
        return jnp.dot(x, w_t, preferred_element_type=jnp.float32) + self.linear_b

    def forward(self, sr_ent_seeds, tg_ent_seeds, exp_out_sr, exp_out_tg):
        # TODO(synk): exp_out_sr / exp_out_tg are undefined globals in the original
        # PyTorch forward; they are taken here as explicit [N, 2*dim] inputs.
        n_rows = self.entity_vec_sr.shape[0]
        if n_rows < self.pallas_min_rows:
            topic_vec_sr = self._xla_linear(self.entity_vec_sr,
                                            self.attention_property_vec_sr, exp_out_sr)
            topic_vec_tg = self._xla_linear(self.entity_vec_tg,
                                            self.attention_property_vec_tg, exp_out_tg)
        else:
            topic_vec_sr, topic_vec_tg = attribute_linear(
                self.entity_vec_sr, self.attention_property_vec_sr, exp_out_sr,
                self.entity_vec_tg, self.attention_property_vec_tg, exp_out_tg,
                self.w_ent_t, self.w_attr_t, self.w_exp_t, self.b_row)

        # Row gather (equivalent of PyTorch `.type(torch.long)` indexing) — cheap glue.
        sr_seed_hid = topic_vec_sr[sr_ent_seeds.astype(jnp.int32)]
        tg_seed_hid = topic_vec_tg[tg_ent_seeds.astype(jnp.int32)]
        return sr_seed_hid, tg_seed_hid, topic_vec_sr, topic_vec_tg


# ---------------------------------------------------------------------------
# Demo / self-check
# ---------------------------------------------------------------------------
if __name__ == "__main__":
    dim = 32
    N = 640          # >= pallas_min_rows -> Pallas path; ragged vs the row tile
    n_seeds = 4

    key = jax.random.PRNGKey(0)
    (k_apsr, k_aptg, k_esr, k_etg, k_xsr, k_xtg,
     k_ssr, k_stg, k_params) = jax.random.split(key, 9)

    attention_property_vec_sr = jax.random.normal(k_apsr, (N, 768), jnp.float32)
    attention_property_vec_tg = jax.random.normal(k_aptg, (N, 768), jnp.float32)
    entity_vec_sr = jax.random.normal(k_esr, (N, dim), jnp.float32)
    entity_vec_tg = jax.random.normal(k_etg, (N, dim), jnp.float32)
    exp_out_sr = jax.random.normal(k_xsr, (N, 2 * dim), jnp.float32)
    exp_out_tg = jax.random.normal(k_xtg, (N, 2 * dim), jnp.float32)

    # Seed indices kept int32 end-to-end (PyTorch used float + .long()).
    sr_ent_seeds = jax.random.randint(k_ssr, (n_seeds,), 0, N, jnp.int32)
    tg_ent_seeds = jax.random.randint(k_stg, (n_seeds,), 0, N, jnp.int32)

    model = AttributeEmbedPallas(
        dim, k_params,
        attention_property_vec_sr, attention_property_vec_tg,
        entity_vec_sr, entity_vec_tg)

    sr_seed_hid, tg_seed_hid, topic_vec_sr, topic_vec_tg = model.forward(
        sr_ent_seeds, tg_ent_seeds, exp_out_sr, exp_out_tg)
    jax.block_until_ready((sr_seed_hid, tg_seed_hid, topic_vec_sr, topic_vec_tg))

    # Cross-check against a pure-JAX reference of the same math
    # (same bf16-input / f32-accumulate path as the kernel).
    cdt = model.compute_dtype

    def ref_linear(ent, attr, exp):
        x = jnp.concatenate([ent, attr, exp], axis=1).astype(cdt)
        w_t = model.linear_w.T.astype(cdt)
        return jnp.dot(x, w_t, preferred_element_type=jnp.float32) + model.linear_b

    ref_sr = ref_linear(entity_vec_sr, attention_property_vec_sr, exp_out_sr)
    ref_tg = ref_linear(entity_vec_tg, attention_property_vec_tg, exp_out_tg)
    assert jnp.allclose(topic_vec_sr, ref_sr, atol=3e-2, rtol=3e-2), \
        float(jnp.max(jnp.abs(topic_vec_sr - ref_sr)))
    assert jnp.allclose(topic_vec_tg, ref_tg, atol=3e-2, rtol=3e-2), \
        float(jnp.max(jnp.abs(topic_vec_tg - ref_tg)))
    assert jnp.allclose(sr_seed_hid, ref_sr[sr_ent_seeds], atol=3e-2, rtol=3e-2)
    assert jnp.allclose(tg_seed_hid, ref_tg[tg_ent_seeds], atol=3e-2, rtol=3e-2)
    assert sr_seed_hid.shape == (n_seeds, dim)
    assert tg_seed_hid.shape == (n_seeds, dim)
    assert topic_vec_sr.shape == (N, dim) and topic_vec_tg.shape == (N, dim)

    print("KERNEL_OK")
</pallas_src>

<mosaic_0001>
module attributes {stable_mosaic.version = 11 : i64} {
  func.func @_attr_embed_kernel(%arg0: i32, %arg1: memref<512x32xbf16, #tpu.memory_space<vmem>>, %arg2: memref<512x768xbf16, #tpu.memory_space<vmem>>, %arg3: memref<512x64xf32, #tpu.memory_space<vmem>>, %arg4: memref<512x32xbf16, #tpu.memory_space<vmem>>, %arg5: memref<512x768xbf16, #tpu.memory_space<vmem>>, %arg6: memref<512x64xf32, #tpu.memory_space<vmem>>, %arg7: memref<32x32xbf16, #tpu.memory_space<vmem>>, %arg8: memref<768x32xbf16, #tpu.memory_space<vmem>>, %arg9: memref<64x32xbf16, #tpu.memory_space<vmem>>, %arg10: memref<1x32xf32, #tpu.memory_space<vmem>>, %arg11: memref<512x32xf32, #tpu.memory_space<vmem>>, %arg12: memref<512x32xf32, #tpu.memory_space<vmem>>) attributes {dimension_semantics = [#tpu.dimension_semantics<parallel>], iteration_bounds = array<i64: 2>, scalar_prefetch = 0 : i64, scratch_operands = 0 : i64, tpu.core_type = #tpu.core_type<tc>, window_params = [{transform_indices = @transform_0, window_bounds = array<i64: 512, 32>}, {transform_indices = @transform_1, window_bounds = array<i64: 512, 768>}, {transform_indices = @transform_2, window_bounds = array<i64: 512, 64>}, {transform_indices = @transform_3, window_bounds = array<i64: 512, 32>}, {transform_indices = @transform_4, window_bounds = array<i64: 512, 768>}, {transform_indices = @transform_5, window_bounds = array<i64: 512, 64>}, {pipeline_mode = #tpu.pipeline_mode<synchronous>, transform_indices = @transform_6, window_bounds = array<i64: 32, 32>}, {pipeline_mode = #tpu.pipeline_mode<synchronous>, transform_indices = @transform_7, window_bounds = array<i64: 768, 32>}, {pipeline_mode = #tpu.pipeline_mode<synchronous>, transform_indices = @transform_8, window_bounds = array<i64: 64, 32>}, {pipeline_mode = #tpu.pipeline_mode<synchronous>, transform_indices = @transform_9, window_bounds = array<i64: 1, 32>}, {transform_indices = @transform_10, window_bounds = array<i64: 512, 32>}, {transform_indices = @transform_11, window_bounds = array<i64: 512, 32>}]} {
    %c0 = arith.constant 0 : index
    %c0_0 = arith.constant 0 : index
    %0 = vector.load %arg7[%c0, %c0_0] : memref<32x32xbf16, #tpu.memory_space<vmem>>, vector<32x32xbf16>
    %c0_1 = arith.constant 0 : index
    %c0_2 = arith.constant 0 : index
    %1 = vector.load %arg8[%c0_1, %c0_2] : memref<768x32xbf16, #tpu.memory_space<vmem>>, vector<768x32xbf16>
    %c0_3 = arith.constant 0 : index
    %c0_4 = arith.constant 0 : index
    %2 = vector.load %arg9[%c0_3, %c0_4] : memref<64x32xbf16, #tpu.memory_space<vmem>>, vector<64x32xbf16>
    %c0_5 = arith.constant 0 : index
    %c0_6 = arith.constant 0 : index
    %3 = vector.load %arg10[%c0_5, %c0_6] : memref<1x32xf32, #tpu.memory_space<vmem>>, vector<1x32xf32>
    %4 = vector.shape_cast %3 : vector<1x32xf32> to vector<1x32xf32>
    %5 = vector.broadcast %4 : vector<1x32xf32> to vector<512x32xf32>
    %c0_7 = arith.constant 0 : index
    %c0_8 = arith.constant 0 : index
    %6 = vector.load %arg2[%c0_7, %c0_8] : memref<512x768xbf16, #tpu.memory_space<vmem>>, vector<512x768xbf16>
    %cst = arith.constant dense<0.000000e+00> : vector<512x32xf32>
    %7 = tpu.matmul %6, %1, %cst {dimension_numbers = #tpu.dot_dimension_numbers<[1], [0], [0], [1], [0, 0, 1, 1], [], []>} : vector<512x768xbf16>, vector<768x32xbf16>, vector<512x32xf32> -> vector<512x32xf32>
    %c0_9 = arith.constant 0 : index
    %c0_10 = arith.constant 0 : index
    %8 = vector.load %arg1[%c0_9, %c0_10] : memref<512x32xbf16, #tpu.memory_space<vmem>>, vector<512x32xbf16>
    %cst_11 = arith.constant dense<0.000000e+00> : vector<512x32xf32>
    %9 = tpu.matmul %8, %0, %cst_11 {dimension_numbers = #tpu.dot_dimension_numbers<[1], [0], [0], [1], [0, 0, 1, 1], [], []>} : vector<512x32xbf16>, vector<32x32xbf16>, vector<512x32xf32> -> vector<512x32xf32>
    %10 = arith.addf %7, %9 : vector<512x32xf32>
    %c0_12 = arith.constant 0 : index
    %c0_13 = arith.constant 0 : index
    %11 = vector.load %arg3[%c0_12, %c0_13] : memref<512x64xf32, #tpu.memory_space<vmem>>, vector<512x64xf32>
    %12 = arith.truncf %11 : vector<512x64xf32> to vector<512x64xbf16>
    %cst_14 = arith.constant dense<0.000000e+00> : vector<512x32xf32>
    %13 = tpu.matmul %12, %2, %cst_14 {dimension_numbers = #tpu.dot_dimension_numbers<[1], [0], [0], [1], [0, 0, 1, 1], [], []>} : vector<512x64xbf16>, vector<64x32xbf16>, vector<512x32xf32> -> vector<512x32xf32>
    %14 = arith.addf %10, %13 : vector<512x32xf32>
    %15 = arith.addf %14, %5 : vector<512x32xf32>
    %c0_15 = arith.constant 0 : index
    %c0_16 = arith.constant 0 : index
    %16 = vector.load %arg11[%c0_15, %c0_16] : memref<512x32xf32, #tpu.memory_space<vmem>>, vector<512x32xf32>
    tpu.vector_store %arg11[%c0_15, %c0_16], %15 {strides = array<i32>} : memref<512x32xf32, #tpu.memory_space<vmem>>, vector<512x32xf32>,
    %c0_17 = arith.constant 0 : index
    %c0_18 = arith.constant 0 : index
    %17 = vector.load %arg5[%c0_17, %c0_18] : memref<512x768xbf16, #tpu.memory_space<vmem>>, vector<512x768xbf16>
    %cst_19 = arith.constant dense<0.000000e+00> : vector<512x32xf32>
    %18 = tpu.matmul %17, %1, %cst_19 {dimension_numbers = #tpu.dot_dimension_numbers<[1], [0], [0], [1], [0, 0, 1, 1], [], []>} : vector<512x768xbf16>, vector<768x32xbf16>, vector<512x32xf32> -> vector<512x32xf32>
    %c0_20 = arith.constant 0 : index
    %c0_21 = arith.constant 0 : index
    %19 = vector.load %arg4[%c0_20, %c0_21] : memref<512x32xbf16, #tpu.memory_space<vmem>>, vector<512x32xbf16>
    %cst_22 = arith.constant dense<0.000000e+00> : vector<512x32xf32>
    %20 = tpu.matmul %19, %0, %cst_22 {dimension_numbers = #tpu.dot_dimension_numbers<[1], [0], [0], [1], [0, 0, 1, 1], [], []>} : vector<512x32xbf16>, vector<32x32xbf16>, vector<512x32xf32> -> vector<512x32xf32>
    %21 = arith.addf %18, %20 : vector<512x32xf32>
    %c0_23 = arith.constant 0 : index
    %c0_24 = arith.constant 0 : index
    %22 = vector.load %arg6[%c0_23, %c0_24] : memref<512x64xf32, #tpu.memory_space<vmem>>, vector<512x64xf32>
    %23 = arith.truncf %22 : vector<512x64xf32> to vector<512x64xbf16>
    %cst_25 = arith.constant dense<0.000000e+00> : vector<512x32xf32>
    %24 = tpu.matmul %23, %2, %cst_25 {dimension_numbers = #tpu.dot_dimension_numbers<[1], [0], [0], [1], [0, 0, 1, 1], [], []>} : vector<512x64xbf16>, vector<64x32xbf16>, vector<512x32xf32> -> vector<512x32xf32>
    %25 = arith.addf %21, %24 : vector<512x32xf32>
    %26 = arith.addf %25, %5 : vector<512x32xf32>
    %c0_26 = arith.constant 0 : index
    %c0_27 = arith.constant 0 : index
    %27 = vector.load %arg12[%c0_26, %c0_27] : memref<512x32xf32, #tpu.memory_space<vmem>>, vector<512x32xf32>
    tpu.vector_store %arg12[%c0_26, %c0_27], %26 {strides = array<i32>} : memref<512x32xf32, #tpu.memory_space<vmem>>, vector<512x32xf32>,
    return
  }
  func.func @transform_0(%arg0: i32) -> (i32, i32) {
    %c0_i32 = arith.constant 0 : i32
    %c0_i32_0 = arith.constant 0 : i32
    return %arg0, %c0_i32 : i32, i32
  }
  func.func @transform_1(%arg0: i32) -> (i32, i32) {
    %c0_i32 = arith.constant 0 : i32
    %c0_i32_0 = arith.constant 0 : i32
    return %arg0, %c0_i32 : i32, i32
  }
  func.func @transform_2(%arg0: i32) -> (i32, i32) {
    %c0_i32 = arith.constant 0 : i32
    %c0_i32_0 = arith.constant 0 : i32
    return %arg0, %c0_i32 : i32, i32
  }
  func.func @transform_3(%arg0: i32) -> (i32, i32) {
    %c0_i32 = arith.constant 0 : i32
    %c0_i32_0 = arith.constant 0 : i32
    return %arg0, %c0_i32 : i32, i32
  }
  func.func @transform_4(%arg0: i32) -> (i32, i32) {
    %c0_i32 = arith.constant 0 : i32
    %c0_i32_0 = arith.constant 0 : i32
    return %arg0, %c0_i32 : i32, i32
  }
  func.func @transform_5(%arg0: i32) -> (i32, i32) {
    %c0_i32 = arith.constant 0 : i32
    %c0_i32_0 = arith.constant 0 : i32
    return %arg0, %c0_i32 : i32, i32
  }
  func.func @transform_6(%arg0: i32) -> (i32, i32) {
    %c0_i32 = arith.constant 0 : i32
    %c0_i32_0 = arith.constant 0 : i32
    %c0_i32_1 = arith.constant 0 : i32
    return %c0_i32, %c0_i32_0 : i32, i32
  }
  func.func @transform_7(%arg0: i32) -> (i32, i32) {
    %c0_i32 = arith.constant 0 : i32
    %c0_i32_0 = arith.constant 0 : i32
    %c0_i32_1 = arith.constant 0 : i32
    return %c0_i32, %c0_i32_0 : i32, i32
  }
  func.func @transform_8(%arg0: i32) -> (i32, i32) {
    %c0_i32 = arith.constant 0 : i32
    %c0_i32_0 = arith.constant 0 : i32
    %c0_i32_1 = arith.constant 0 : i32
    return %c0_i32, %c0_i32_0 : i32, i32
  }
  func.func @transform_9(%arg0: i32) -> (i32, i32) {
    %c0_i32 = arith.constant 0 : i32
    %c0_i32_0 = arith.constant 0 : i32
    %c0_i32_1 = arith.constant 0 : i32
    return %c0_i32, %c0_i32_0 : i32, i32
  }
  func.func @transform_10(%arg0: i32) -> (i32, i32) {
    %c0_i32 = arith.constant 0 : i32
    %c0_i32_0 = arith.constant 0 : i32
    return %arg0, %c0_i32 : i32, i32
  }
  func.func @transform_11(%arg0: i32) -> (i32, i32) {
    %c0_i32 = arith.constant 0 : i32
    %c0_i32_0 = arith.constant 0 : i32
    return %arg0, %c0_i32 : i32, i32
  }
}

</mosaic_0001>

<bundles_post_ra>
// kernel: tpu_custom_call.1
= control target key start
LH: loop header
LB: loop body
LE: loop exit
PB: predicated region body
PF: predicated region fallthrough
CT: control target
= control target key end

     0   :  { %s14642_s0 = inlined_call_operand.vmem [shape: bf16[640,32], index: 0, kind: input, shape index: {}]   ;;  %s14643_s1 = inlined_call_operand.vmem [shape: bf16[640,768], index: 1, kind: input, shape index: {}]   ;;  %s14644_s2 = inlined_call_operand.vmem [shape: f32[640,64], index: 2, kind: input, shape index: {}]   ;;  %s14645_s3 = inlined_call_operand.vmem [shape: bf16[640,32], index: 3, kind: input, shape index: {}]   ;;  %s14646_s4 = inlined_call_operand.hbm [shape: bf16[640,768], index: 4, kind: input, shape index: {}]   ;;  %s14647_s5 = inlined_call_operand.vmem [shape: f32[640,64], index: 5, kind: input, shape index: {}]   ;;  %s14648_s6 = inlined_call_operand.vmem [shape: bf16[32,32], index: 6, kind: input, shape index: {}]   ;;  %s14649_s7 = inlined_call_operand.vmem [shape: bf16[768,32], index: 7, kind: input, shape index: {}]   ;;  %s14650_s8 = inlined_call_operand.vmem [shape: bf16[64,32], index: 8, kind: input, shape index: {}]   ;;  %s14651_s9 = inlined_call_operand.vmem [shape: f32[1,32], index: 9, kind: input, shape index: {}]   ;;  %s14652_s10 = inlined_call_operand.vmem [shape: f32[640,32], index: 10, kind: output, shape index: {0}]   ;;  %s14653_s11 = inlined_call_operand.vmem [shape: f32[640,32], index: 11, kind: output, shape index: {1}]  }
   0x1   :  { %14657 = sst [smem:[#allocation46_spill]] %s14642_s0 }
   0x2   :  { %14658 = sst [smem:[#allocation47_spill]] %s14643_s1 }
   0x3   :  { %14659 = sst [smem:[#allocation48_spill]] %s14644_s2 }
   0x4   :  { %17 = vsyncpa [#allocation3], 0 }
   0x5   :  { %19 = vsyncpa [#allocation3 + $0x1], 0  ;;  %s11173_s17 = smov 0   ;;  %s11175_s18 = smov 0  }
   0x6   :  { %s11177_s19 = smov 0   ;;  %s11179_s20 = smov 0  }
   0x7 LB: > { %14660 = sst [smem:[#allocation7_spill]] %s11039_s19  ;;  %s11192_s21 = sadd.s32 4294967295, %s11043_s20   ;;  %s11043_s20 = sphi %s11179_s20, %s14856_s20   ;;  %s11039_s19 = sphi %s11177_s19, %s14853_s19   ;;  %s11035_s18 = sphi %s11175_s18, %s14855_s18   ;;  %s11031_s17 = sphi %s11173_s17, %s14854_s17  }
   0x8   : > { %s11195_s22 = sadd.s32 1, %s11043_s20   ;;  %s136_s24 = sadd.s32 1, %s11039_s19 }
   0x9   : > { %s133_s23 = ssub.s32 %s11043_s20, %s11195_s22  ;;  %p143_p1 = scmp.ne.s32.totalorder %s11039_s19, %s11035_s18 }
   0xa   : > { %p134_p0 = scmp.eq.s32.totalorder %s133_s23, 0  ;;  %p144_p2 = scmp.eq.s32.totalorder %s11043_s20, 0 }
   0xb   : > { %p149_p3 = scmp.ne.s32.totalorder %s11035_s18, %s11031_s17  ;;  %p150_p5 = scmp.eq.s32.totalorder %s11192_s21, 0 }
   0xc   : > { %s11205_s25 = scalar_select %p134_p0, %s11039_s19, %s136_s24  }
   0xd   : > { %p145_p4 = por %p144_p2, %p143_p1  ;;  %p283_p6 = scmp.eq.s32.totalorder %s11192_s21, 1 }
   0xe   : > { %14661 = sst [smem:[#allocation8_spill]] %s11205_s25  ;;  %p11209_p7 = por %p150_p5, %p149_p3 }
   0xf   : > { %p11213_p8 = por %p283_p6, %p143_p1  ;;  %p8678_p9 = scmp.ge.s32.totalorder %s11043_s20, 2 }
  0x11   : > { %343 = sbr.rel (%p8678_p9) target bundleno = 60 (0x3c), region = 32 }
  0x18   : > { %417 = sbr.rel (!%p145_p4) target bundleno = 60 (0x3c), region = 52  ;;  %s418_s28 = sand.u32 (%p145_p4), 1, %s11039_s19  }
  0x19   : > { %s8679_s29 = sshll.u32 (%p145_p4), %s11043_s20, 6  ;;  %s10000_s30 = smul.u32 (%p145_p4), 1536, %s418_s28 }
  0x1a   : > { %s424_s12 = ssub.s32 (%p145_p4), 80, %s8679_s29  ;;  %s11223_s15 = scalar_lea.sflag (%p145_p4), [#allocation3], %s418_s28 }
  0x1b   : > { %p425_p10 = scmp.lt.s32.totalorder (%p145_p4), %s424_s12, 64  ;;  %s422_s16 = scalar_lea.vmem (%p145_p4), [#allocation2], %s10000_s30 }
  0x1f   : > { %s14858_s12 = smov (!%p425_p10, %s424_s12), 64 }
  0x20   : > { %s11220_s13 = smul.u32 384, %s14858_s12 }
  0x22   : > { %s430_s14 = ssub.s32 24576, %s11220_s13 }
  0x23   : > { %431 = vsyncadd %s11223_s15, %s430_s14  ;;  %p8682_p11 = scmp.ne.s32.totalorder %s11220_s13, 0  ;;  %s10001_s17 = smul.u32 24576, %s11043_s20 }
  0x24   : > { %s437_s23 = sshll.u32 %s422_s16, 4  ;;  %s10921_s14 = scalar_lea.hbm %s14646_s4, 30720  ;;  %s11233_s23 = int_to_ptr.vmem [resolvable:$true] %s437_s23 }
  0x25   : > { %s11231_s25 = scalar_lea.hbm %s14646_s4, %s10001_s17 }
  0x26   : > { %s10917_s28 = scalar_lea.hbm %s11231_s25, %s11220_s13  ;;  %p10922_p1 = scmp.lt.u32.totalorder %s11231_s25, %s14646_s4 }
  0x27   : > { %p10918_p12 = scmp.ne.s32.totalorder %s11231_s25, %s10917_s28  ;;  %p10923_p2 = scmp.lt.u32.totalorder %s10921_s14, %s10917_s28 }
  0x28   : > { %p10925_p4 = scmp.lt.u32.totalorder %s10917_s28, %s11231_s25 }
  0x29   : > { %p10919_p13 = pnand %p10918_p12, %p8682_p11  ;;  %p10924_p3 = por %p10923_p2, %p10922_p1 }
  0x2b   : > { %p10920_p0 = pneg %p10919_p13  ;;  %p10926_p5 = por %p10925_p4, %p10924_p3 }
  0x2d   : > { %p10927_p6 = pnand %p10926_p5, %p10920_p0 }
  0x2f   : > { %10930 = shalt.err (!%p10927_p6)
}
  0x30   : > { %s10931_s17 = scalar_lea.vmem %s11233_s23, %s11220_s13  ;;  %s11109_s24 = smov [#allocation2]  }
  0x31   : > { %p10932_p9 = scmp.ne.s32.totalorder %s11233_s23, %s10931_s17  ;;  %s10935_s29 = sshll.u32 %s11109_s24, 4  ;;  %s10936_s29 = int_to_ptr.vmem [resolvable:$false] %s10935_s29 }
  0x32   : > { %s10937_s19 = scalar_lea.vmem %s10936_s29, 49152  ;;  %p10938_p13 = scmp.lt.s32.totalorder %s11233_s23, %s10936_s29 }
  0x33   : > { %p10933_p10 = pnand %p10932_p9, %p8682_p11  ;;  %p10939_p1 = scmp.lt.s32.totalorder %s10937_s19, %s10931_s17 }
  0x35   : > { %p10934_p12 = pneg %p10933_p10  ;;  %p10940_p2 = por %p10939_p1, %p10938_p13 }
  0x37   : > { %p10941_p3 = pnand %p10940_p2, %p10934_p12 }
  0x39   : > { %10944 = shalt.err (!%p10941_p3)
}
  0x3a   : > { %s11110_s28 = smov 384   ;;  %s11111_s30 = smov 24  }
  0x3b   : > { %443 = dma.hbm_to_vmem [thread:$0]  (%p8682_p11), %s11231_s25, %s11220_s13, %s11233_s23, %s11223_s15, %s11110_s28, %s11110_s28, %s11111_s30  }
  0x3c PF: > { %p8686_p0 = scmp.ge.s32.totalorder %s11043_s20, 1  ;;  %p462_p4 = scmp.lt.s32.totalorder %s11043_s20, 3 }
  0x3e   : > { %p463_p5 = pnand %p8686_p0, %p462_p4 }
  0x40   : > { %466 = sbr.rel (%p463_p5) target bundleno = 1505 (0x5e1), region = 60 }
  0x47   : > { %s11263_s12 = sand.u32 1, %s11035_s18  }
  0x48   : > { %s10002_s14 = smul.u32 1536, %s11263_s12  ;;  %s469_s16 = scalar_lea.sflag [#allocation3], %s11263_s12 }
  0x4a   : > { %s11267_s17 = scalar_lea.vmem [#allocation2], %s10002_s14 }
  0x4b   : > { %11026 = dma.done.wait (%p11209_p7), %s469_s16, 24576  }
  0x4c   : > { %11028 = vsyncadd (%p11209_p7), %s469_s16, 4294942720  ;;  %s11274_s25 = sshll.u32 %s11192_s21, 6  ;;  %v14655_v0 = vmov 0   ;;  %v10168_v1 = vld [vmem:[%s14648_s6] sm:$0xff]   ;;  %s14664_s0 = sld [smem:[#allocation46_spill]]  ;;  %v10170_v3 = vld [vmem:[%s14648_s6 + $0x8] sm:$0xff]  }
  0x4d   : > { %2828 = vmatprep.subr.bf16.mxu1 %v14655_v0  ;;  %p566_p11 = scmp.lt.s32.totalorder %s11274_s25, 79  ;;  %v10169_v2 = vld [vmem:[%s14649_s7] sm:$0xff]   ;;  %9508 = vmatprep.subr.bf16.mxu0 %v10168_v1  ;;  %v10171_v4 = vld [vmem:[%s14649_s7 + $0x8] sm:$0xff]   ;;  %vm1194_vm0 = vcmask 261120   ;;  %v10174_v7 = vld [vmem:[%s14649_s7 + $0x10] sm:$0xff]   ;;  %s14665_s1 = sld [smem:[#allocation47_spill]] }
  0x4e   : > { %2829 = vmatpush1.bf16.msra.mxu1 %v10169_v2  ;;  %9509 = vmatpush3.bf16.msra.mxu0 %v10168_v1  ;;  %v11311_v8 = vld [vmem:[%s14649_s7 + $0x80] sm:$0xff]   ;;  %v10176_v10 = vld [vmem:[%s14649_s7 + $0x18] sm:$0xff]   ;;  %v11326_v11 = vld [vmem:[%s14649_s7 + $0x88] sm:$0xff]   ;;  %s14685_s2 = sld [smem:[#allocation48_spill]]  ;;  %vm3815_vm1 = vcmask 523264  }
  0x4f   : > { %s11279_s20 = scalar_select %p566_p11, %s11274_s25, 79  ;;  %2830 = vmatprep.subr.bf16.mxu1 %v14655_v0  ;;  %9510 = vmatprep.subr.bf16.mxu0 %v10170_v3  ;;  %v10179_v13 = vld [vmem:[%s14649_s7 + $0x20] sm:$0xff]   ;;  %v11340_v15 = vld [vmem:[%s14649_s7 + $0x90] sm:$0xff]   ;;  %v10181_v16 = vld [vmem:[%s14649_s7 + $0x28] sm:$0xff]  }
  0x50   : > { %v10184_v18 = vld [vmem:[%s14649_s7 + $0x30] sm:$0xff]   ;;  %v11357_v19 = vld [vmem:[%s14649_s7 + $0x98] sm:$0xff]   ;;  %v11371_v22 = vld [vmem:[%s14649_s7 + $0xa0] sm:$0xff]  }
  0x51   : > { %s8690_s13 = sshll.u32 %s11279_s20, 2  ;;  %v10186_v21 = vld [vmem:[%s14649_s7 + $0x38] sm:$0xff]   ;;  %v10189_v24 = vld [vmem:[%s14649_s7 + $0x40] sm:$0xff]   ;;  %v11385_v26 = vld [vmem:[%s14649_s7 + $0xa8] sm:$0xff]   ;;  %s10003_s15 = smul.u32 24, %s11279_s20 }
  0x52   : > { %s11293_s28 = scalar_lea.vmem %s14664_s0, %s8690_s13  ;;  %2831 = vmatpush1.bf16.msra.mxu1 %v10171_v4  ;;  %9511 = vmatpush3.bf16.msra.mxu0 %v10170_v3  ;;  %v10191_v27 = vld [vmem:[%s14649_s7 + $0x48] sm:$0xff]   ;;  %v11405_v29 = vld [vmem:[%s14649_s7 + $0xb0] sm:$0xff]   ;;  %v10196_v33 = vld [vmem:[%s14649_s7 + $0x58] sm:$0xff]   ;;  %s11672_s29 = scalar_lea.vmem %s14645_s3, %s8690_s13 }
  0x53   : > { %v10172_v5 = vld [vmem:[%s11293_s28] sm:$0xff]   ;;  %v10173_v6 = vld [vmem:[%s11293_s28 + $0x8] sm:$0xff]   ;;  %2832 = vmatprep.subr.bf16.mxu1 %v14655_v0  ;;  %3117 = vmatprep.subr.bf16.mxu0 %v14655_v0  ;;  %v10177_v9 = vld [vmem:[%s11293_s28 + $0x10] sm:$0xff]   ;;  %s11399_s19 = scalar_lea.vmem %s14665_s1, %s10003_s15  ;;  %s8694_s23 = sshll.u32 %s11279_s20, 3 }
  0x54   : > { %9512 = vmatprep.mubr.msk.bf16.mxu0 %vm1194_vm0, %v10172_v5  ;;  %v10178_v12 = vld [vmem:[%s11293_s28 + $0x18] sm:$0xff]   ;;  %v10182_v14 = vld [vmem:[%s11293_s28 + $0x20] sm:$0xff]   ;;  %v10183_v17 = vld [vmem:[%s11293_s28 + $0x28] sm:$0xff]   ;;  %s12134_s24 = scalar_lea.vmem %s14685_s2, %s8694_s23  ;;  %s8687_s13 = sshll.u32 %s11263_s12, 9 }
  0x55   : > { %9513 = vmatmul.mubr.msk.bf16.vlgmr.msra.gmra.mrb[0].mxu0 %vm1194_vm0, %v10173_v6  ;;  %v10187_v20 = vld [vmem:[%s11293_s28 + $0x30] sm:$0xff]   ;;  %v10188_v23 = vld [vmem:[%s11293_s28 + $0x38] sm:$0xff]   ;;  %v10192_v25 = vld [vmem:[%s11293_s28 + $0x40] sm:$0xff]   ;;  %s7706_s12 = ssub.s32 (%p11213_p8), 80, %s11274_s25 }
  0x56   : > { %2833 = vmatpush1.bf16.msra.mxu1 %v10174_v7  ;;  %3118 = vmatpush1.bf16.msra.mxu0 %v11311_v8  ;;  %v10193_v28 = vld [vmem:[%s11293_s28 + $0x48] sm:$0xff]   ;;  %v10194_v30 = vld [vmem:[%s14649_s7 + $0x50] sm:$0xff]   ;;  %v10209_v32 = vld [vmem:[%s11399_s19 + $0x4] ss:$24 sps:$4 sm:$0xff]   ;;  %p7707_p7 = scmp.lt.s32.totalorder (%p11213_p8), %s7706_s12, 64 }
  0x57   : > { %2834 = vmatprep.subr.bf16.mxu1 %v14655_v0  ;;  %9516 = vmatprep.mubr.msk.bf16.mxu0 %vm1194_vm0, %v10177_v9  ;;  %v10197_v31 = vld [vmem:[%s11293_s28 + $0x50] sm:$0xff]   ;;  %v11423_v34 = vld [vmem:[%s14649_s7 + $0xb8] sm:$0xff]   ;;  %v10199_v36 = vld [vmem:[%s14649_s7 + $0x60] sm:$0xff]  }
  0x58   : > { %3119 = vmatprep.subr.bf16.mxu0 %v14655_v0  ;;  %2860 = vmatprep.mubr.bf16.mxu1 %v10209_v32  ;;  %v10198_v35 = vld [vmem:[%s11293_s28 + $0x58] sm:$0xff]   ;;  %v10202_v37 = vld [vmem:[%s11293_s28 + $0x60] sm:$0xff]   ;;  %v10201_v39 = vld [vmem:[%s14649_s7 + $0x68] sm:$0xff]  }
  0x59   : > { %v11436_v38 = vld [vmem:[%s14649_s7 + $0xc0] sm:$0xff]   ;;  %v11449_v40 = vld [vmem:[%s14649_s7 + $0xc8] sm:$0xff]   ;;  %v10204_v42 = vld [vmem:[%s14649_s7 + $0x70] sm:$0xff]  }
  0x5a   : > { %2835 = vmatpush1.bf16.msra.mxu1 %v10176_v10  ;;  %3120 = vmatpush1.bf16.msra.mxu0 %v11326_v11  ;;  %v10203_v41 = vld [vmem:[%s11293_s28 + $0x68] sm:$0xff]   ;;  %v10210_v43 = vld [vmem:[%s11293_s28 + $0x70] sm:$0xff]   ;;  %v10206_v45 = vld [vmem:[%s14649_s7 + $0x78] sm:$0xff]  }
  0x5b   : > { %2836 = vmatprep.subr.bf16.mxu1 %v14655_v0  ;;  %3121 = vmatprep.subr.bf16.mxu0 %v14655_v0  ;;  %v11463_v44 = vld [vmem:[%s14649_s7 + $0xd0] sm:$0xff]   ;;  %v11475_v46 = vld [vmem:[%s14649_s7 + $0xd8] sm:$0xff]   ;;  %v10215_v50 = vld [vmem:[%s11293_s28 + $0x80] sm:$0xff]  }
  0x5c   : > { %v10207_v47 = vld [vmem:[%s11399_s19] ss:$24 sps:$4 sm:$0xff]   ;;  %v10213_v49 = vld [vmem:[%s11399_s19 + $0x34] ss:$24 sps:$4 sm:$0xff]   ;;  %v10216_v52 = vld [vmem:[%s11399_s19 + $0x30] ss:$24 sps:$4 sm:$0xff]  }
  0x5d   : > { %9517 = vmatmul.mubr.msk.bf16.gmra.mrb[4].mxu0 %vm1194_vm0, %v10178_v12  ;;  %v10211_v48 = vld [vmem:[%s11293_s28 + $0x78] sm:$0xff]   ;;  %v11487_v51 = vld [vmem:[%s14649_s7 + $0xe0] sm:$0xff]   ;;  %v11500_v53 = vld [vmem:[%s14649_s7 + $0xe8] sm:$0xff]  }
  0x5e   : > { %2837 = vmatpush1.bf16.msra.mxu1 %v10179_v13  ;;  %9520 = vmatprep.mubr.msk.bf16.mxu0 %vm1194_vm0, %v10182_v14  ;;  %v10217_v54 = vld [vmem:[%s11293_s28 + $0x88] sm:$0xff]   ;;  %v10219_v55 = vld [vmem:[%s11399_s19 + $0x64] ss:$24 sps:$4 sm:$0xff]   ;;  %v10221_v56 = vld [vmem:[%s11293_s28 + $0x90] sm:$0xff]  }
  0x5f   : > { %2838 = vmatprep.subr.bf16.mxu1 %v14655_v0  ;;  %3122 = vmatpush1.bf16.msra.mxu0 %v11340_v15  ;;  %v11512_v57 = vld [vmem:[%s14649_s7 + $0xf0] sm:$0xff]   ;;  %v10222_v58 = vld [vmem:[%s11399_s19 + $0x60] ss:$24 sps:$4 sm:$0xff]   ;;  %v10229_v1 = vld [vmem:[%s11293_s28 + $0xa8] sm:$0xff]  }
  0x60   : > { %3123 = vmatprep.subr.bf16.mxu0 %v14655_v0  ;;  %v10223_v59 = vld [vmem:[%s11293_s28 + $0x98] sm:$0xff]   ;;  %v10225_v61 = vld [vmem:[%s11399_s19 + $0x94] ss:$24 sps:$4 sm:$0xff]   ;;  %v10227_v62 = vld [vmem:[%s11293_s28 + $0xa0] sm:$0xff]  }
  0x61   : > { %v11525_v60 = vld [vmem:[%s14649_s7 + $0xf8] sm:$0xff]   ;;  %v10228_v63 = vld [vmem:[%s11399_s19 + $0x90] ss:$24 sps:$4 sm:$0xff]   ;;  %v10237_v6 = vld [vmem:[%s11399_s19 + $0xf4] ss:$24 sps:$4 sm:$0xff]  }
  0x62   : > { %2839 = vmatpush1.bf16.msra.mxu1 %v10181_v16  ;;  %v10231_v2 = vld [vmem:[%s11399_s19 + $0xc4] ss:$24 sps:$4 sm:$0xff]   ;;  %v10233_v3 = vld [vmem:[%s11293_s28 + $0xb0] sm:$0xff]   ;;  %v10234_v4 = vld [vmem:[%s11399_s19 + $0xc0] ss:$24 sps:$4 sm:$0xff]  }
  0x63   : > { %2840 = vmatprep.subr.bf16.mxu1 %v14655_v0  ;;  %3124 = vmatpush1.bf16.msra.mxu0 %v11357_v19  ;;  %v10235_v5 = vld [vmem:[%s11293_s28 + $0xb8] sm:$0xff]   ;;  %v10239_v7 = vld [vmem:[%s11293_s28 + $0xc0] sm:$0xff]   ;;  %v10241_v9 = vld [vmem:[%s11293_s28 + $0xc8] sm:$0xff]  }
  0x64   : > { %3125 = vmatprep.subr.bf16.mxu0 %v14655_v0  ;;  %v10243_v10 = vld [vmem:[%s11399_s19 + $0x124] ss:$24 sps:$4 sm:$0xff]   ;;  %v10246_v12 = vld [vmem:[%s11399_s19 + $0x120] ss:$24 sps:$4 sm:$0xff]   ;;  %v10249_v14 = vld [vmem:[%s11399_s19 + $0x154] ss:$24 sps:$4 sm:$0xff]  }
  0x65   : > { %9521 = vmatmul.mubr.msk.bf16.gmra.mrb[8].mxu0 %vm1194_vm0, %v10183_v17  ;;  %v10247_v13 = vld [vmem:[%s11293_s28 + $0xd8] sm:$0xff]   ;;  %v10252_v16 = vld [vmem:[%s11399_s19 + $0x150] ss:$24 sps:$4 sm:$0xff]   ;;  %v10275_v32 = vld [vmem:[%s11399_s19 + $0x214] ss:$24 sps:$4 sm:$0xff]  }
  0x66   : > { %2841 = vmatpush1.bf16.msra.mxu1 %v10184_v18  ;;  %9524 = vmatprep.mubr.msk.bf16.mxu0 %vm1194_vm0, %v10187_v20  ;;  %v10253_v17 = vld [vmem:[%s11293_s28 + $0xe8] sm:$0xff]   ;;  %v10255_v18 = vld [vmem:[%s11399_s19 + $0x184] ss:$24 sps:$4 sm:$0xff]   ;;  %v10258_v20 = vld [vmem:[%s11399_s19 + $0x180] ss:$24 sps:$4 sm:$0xff]  }
  0x67   : > { %2842 = vmatprep.subr.bf16.mxu1 %v14655_v0  ;;  %3126 = vmatpush1.bf16.msra.mxu0 %v11371_v22 }
  0x68   : > { %3127 = vmatprep.subr.bf16.mxu0 %v14655_v0 }
  0x6a   : > { %2843 = vmatpush1.bf16.msra.mxu1 %v10186_v21  ;;  %v10259_v21 = vld [vmem:[%s11293_s28 + $0xf8] sm:$0xff]  }
  0x6b   : > { %2844 = vmatprep.subr.bf16.mxu1 %v14655_v0  ;;  %3128 = vmatpush1.bf16.msra.mxu0 %v11385_v26 }
  0x6c   : > { %3129 = vmatprep.subr.bf16.mxu0 %v14655_v0 }
  0x6d   : > { %9525 = vmatmul.mubr.msk.bf16.gmra.mrb[12].mxu0 %vm1194_vm0, %v10188_v23  ;;  %v10266_v23 = vld [vmem:[%s11399_s19 + $0xc] ss:$24 sps:$4 sm:$0xff]  }
  0x6e   : > { %2845 = vmatpush1.bf16.msra.mxu1 %v10189_v24  ;;  %9528 = vmatprep.mubr.msk.bf16.mxu0 %vm1194_vm0, %v10192_v25  ;;  %v10263_v24 = vld [vmem:[%s11399_s19 + $0x1b0] ss:$24 sps:$4 sm:$0xff]  }
  0x6f   : > { %2846 = vmatprep.subr.bf16.mxu1 %v14655_v0  ;;  %3130 = vmatpush1.bf16.msra.mxu0 %v11405_v29  ;;  %v10264_v25 = vld [vmem:[%s11399_s19 + $0x8] ss:$24 sps:$4 sm:$0xff]  }
  0x70   : > { %3131 = vmatprep.subr.bf16.mxu0 %v14655_v0 }
  0x72   : > { %2847 = vmatpush1.bf16.msra.mxu1 %v10191_v27  ;;  %v10268_v27 = vld [vmem:[%s11399_s19 + $0x1e4] ss:$24 sps:$4 sm:$0xff]  }
  0x73   : > { %2848 = vmatprep.subr.bf16.mxu1 %v14655_v0  ;;  %3132 = vmatpush1.bf16.msra.mxu0 %v11423_v34 }
  0x74   : > { %3133 = vmatprep.subr.bf16.mxu0 %v14655_v0 }
  0x75   : > { %9529 = vmatmul.mubr.msk.bf16.gmra.mrb[16].mxu0 %vm1194_vm0, %v10193_v28  ;;  %v10271_v28 = vld [vmem:[%s11399_s19 + $0x3c] ss:$24 sps:$4 sm:$0xff]  }
  0x76   : > { %2849 = vmatpush1.bf16.msra.mxu1 %v10194_v30  ;;  %9532 = vmatprep.mubr.msk.bf16.mxu0 %vm1194_vm0, %v10197_v31  ;;  %v10270_v30 = vld [vmem:[%s11399_s19 + $0x1e0] ss:$24 sps:$4 sm:$0xff]  }
  0x77   : > { %2850 = vmatprep.subr.bf16.mxu1 %v14655_v0  ;;  %3134 = vmatpush1.bf16.msra.mxu0 %v11436_v38  ;;  %v10273_v31 = vld [vmem:[%s11399_s19 + $0x38] ss:$24 sps:$4 sm:$0xff]  }
  0x78   : > { %3135 = vmatprep.subr.bf16.mxu0 %v14655_v0 }
  0x7a   : > { %2851 = vmatpush1.bf16.msra.mxu1 %v10196_v33  ;;  %v10278_v33 = vld [vmem:[%s11399_s19 + $0x6c] ss:$24 sps:$4 sm:$0xff]  }
  0x7b   : > { %2852 = vmatprep.subr.bf16.mxu1 %v14655_v0  ;;  %3136 = vmatpush1.bf16.msra.mxu0 %v11449_v40 }
  0x7c   : > { %3137 = vmatprep.subr.bf16.mxu0 %v14655_v0 }
  0x7d   : > { %9533 = vmatmul.mubr.msk.bf16.gmra.mrb[20].mxu0 %vm1194_vm0, %v10198_v35  ;;  %v10293_v35 = vld [vmem:[%s14649_s7 + $0x118] sm:$0xff]  }
  0x7e   : > { %2853 = vmatpush1.bf16.msra.mxu1 %v10199_v36  ;;  %9536 = vmatprep.mubr.msk.bf16.mxu0 %vm1194_vm0, %v10202_v37  ;;  %v10277_v36 = vld [vmem:[%s11399_s19 + $0x210] ss:$24 sps:$4 sm:$0xff]  }
  0x7f   : > { %2854 = vmatprep.subr.bf16.mxu1 %v14655_v0  ;;  %3138 = vmatpush1.bf16.msra.mxu0 %v11463_v44  ;;  %v10280_v37 = vld [vmem:[%s11399_s19 + $0x68] ss:$24 sps:$4 sm:$0xff]  }
  0x80   : > { %3139 = vmatprep.subr.bf16.mxu0 %v14655_v0 }
  0x82   : > { %2855 = vmatpush1.bf16.msra.mxu1 %v10201_v39  ;;  %v10285_v39 = vld [vmem:[%s11399_s19 + $0x9c] ss:$24 sps:$4 sm:$0xff]  }
  0x83   : > { %2856 = vmatprep.subr.bf16.mxu1 %v14655_v0  ;;  %3140 = vmatpush1.bf16.msra.mxu0 %v11475_v46 }
  0x84   : > { %3141 = vmatprep.subr.bf16.mxu0 %v14655_v0 }
  0x85   : > { %9537 = vmatmul.mubr.msk.bf16.gmra.mrb[24].mxu0 %vm1194_vm0, %v10203_v41  ;;  %v10308_v41 = vld [vmem:[%s14649_s7 + $0x128] sm:$0xff]  }
  0x86   : > { %2857 = vmatpush1.bf16.msra.mxu1 %v10204_v42  ;;  %9540 = vmatprep.mubr.msk.bf16.mxu0 %vm1194_vm0, %v10210_v43  ;;  %v10284_v42 = vld [vmem:[%s11399_s19 + $0x240] ss:$24 sps:$4 sm:$0xff]  }
  0x87   : > { %2858 = vmatprep.subr.bf16.mxu1 %v14655_v0  ;;  %3142 = vmatpush1.bf16.msra.mxu0 %v11487_v51  ;;  %v10287_v43 = vld [vmem:[%s11399_s19 + $0x98] ss:$24 sps:$4 sm:$0xff]  }
  0x88   : > { %3143 = vmatprep.subr.bf16.mxu0 %v14655_v0 }
  0x8a   : > { %2859 = vmatpush1.bf16.msra.mxu1 %v10206_v45  ;;  %v10291_v45 = vld [vmem:[%s11399_s19 + $0xcc] ss:$24 sps:$4 sm:$0xff]  }
  0x8b   : > { %9788 = vmatprep.subr.bf16.mxu1 %v14655_v0  ;;  %3144 = vmatpush1.bf16.msra.mxu0 %v11500_v53 }
  0x8c   : > { %3145 = vmatprep.subr.bf16.mxu0 %v14655_v0 }
  0x8d   : > { %2861 = vmatmul.mubr.bf16.vlgmr.msra.gmra.mrb[0].mxu1 %v10207_v47  ;;  %9541 = vmatmul.mubr.msk.bf16.gmra.mrb[28].mxu0 %vm1194_vm0, %v10211_v48  ;;  %v10327_v47 = vld [vmem:[%s14649_s7 + $0x138] sm:$0xff]   ;;  %v10290_v48 = vld [vmem:[%s11399_s19 + $0x270] ss:$24 sps:$4 sm:$0xff]  }
  0x8e   : > { %2868 = vmatprep.mubr.bf16.mxu1 %v10213_v49  ;;  %9544 = vmatprep.mubr.msk.bf16.mxu0 %vm1194_vm0, %v10215_v50  ;;  %v10294_v49 = vld [vmem:[%s11399_s19 + $0xc8] ss:$24 sps:$4 sm:$0xff]   ;;  %v10295_v50 = vld [vmem:[%s11399_s19 + $0x2a4] ss:$24 sps:$4 sm:$0xff]  }
  0x8f   : > { %9804 = vmatpush1.bf16.msra.mxu1 %v11311_v8  ;;  %3146 = vmatpush1.bf16.msra.mxu0 %v11512_v57  ;;  %v10240_v8 = vld [vmem:[%s11399_s19 + $0xf0] ss:$24 sps:$4 sm:$0xff]  }
  0x90   : > { %9789 = vmatprep.subr.bf16.mxu1 %v14655_v0  ;;  %3147 = vmatprep.subr.bf16.mxu0 %v14655_v0 }
  0x93   : > { %9805 = vmatpush1.bf16.msra.mxu1 %v11326_v11  ;;  %3148 = vmatpush1.bf16.msra.mxu0 %v11525_v60  ;;  %v10245_v11 = vld [vmem:[%s11293_s28 + $0xd0] sm:$0xff]  }
  0x94   : > { %9790 = vmatprep.subr.bf16.mxu1 %v14655_v0  ;;  %3406 = vmatprep.subr.bf16.mxu0 %v14655_v0 }
  0x95   : > { %2869 = vmatmul.mubr.bf16.gmra.mrb[4].mxu1 %v10216_v52  ;;  %9545 = vmatmul.mubr.msk.bf16.gmra.mrb[32].mxu0 %vm1194_vm0, %v10217_v54  ;;  %v10335_v52 = vld [vmem:[%s14649_s7 + $0x140] sm:$0xff]  }
  0x96   : > { %2876 = vmatprep.mubr.bf16.mxu1 %v10219_v55  ;;  %9548 = vmatprep.mubr.msk.bf16.mxu0 %vm1194_vm0, %v10221_v56  ;;  %v10297_v54 = vld [vmem:[%s11399_s19 + $0x2a0] ss:$24 sps:$4 sm:$0xff]   ;;  %v10302_v56 = vld [vmem:[%s11399_s19 + $0x2d4] ss:$24 sps:$4 sm:$0xff]  }
  0x97   : > { %9806 = vmatpush1.bf16.msra.mxu1 %v11340_v15  ;;  %v10251_v15 = vld [vmem:[%s11293_s28 + $0xe0] sm:$0xff]   ;;  %v10300_v55 = vld [vmem:[%s11399_s19 + $0xf8] ss:$24 sps:$4 sm:$0xff]  }
  0x98   : > { %9791 = vmatprep.subr.bf16.mxu1 %v14655_v0 }
  0x9b   : > { %9807 = vmatpush1.bf16.msra.mxu1 %v11357_v19  ;;  %v10257_v19 = vld [vmem:[%s11293_s28 + $0xf0] sm:$0xff]  }
  0x9c   : > { %9792 = vmatprep.subr.bf16.mxu1 %v14655_v0 }
  0x9d   : > { %2877 = vmatmul.mubr.bf16.gmra.mrb[8].mxu1 %v10222_v58  ;;  %9549 = vmatmul.mubr.msk.bf16.gmra.mrb[36].mxu0 %vm1194_vm0, %v10223_v59  ;;  %v10349_v58 = vld [vmem:[%s14649_s7 + $0x150] sm:$0xff]   ;;  %v10361_v59 = vld [vmem:[%s14649_s7 + $0x158] sm:$0xff]  }
  0x9e   : > { %2884 = vmatprep.mubr.bf16.mxu1 %v10225_v61  ;;  %9552 = vmatprep.mubr.msk.bf16.mxu0 %vm1194_vm0, %v10227_v62  ;;  %v10307_v61 = vld [vmem:[%s11399_s19 + $0x128] ss:$24 sps:$4 sm:$0xff]   ;;  %v10309_v62 = vld [vmem:[%s11399_s19 + $0x304] ss:$24 sps:$4 sm:$0xff]  }
  0x9f   : > { %9808 = vmatpush1.bf16.msra.mxu1 %v11371_v22  ;;  %v10261_v22 = vld [vmem:[%s11399_s19 + $0x1b4] ss:$24 sps:$4 sm:$0xff]  }
  0xa0   : > { %9793 = vmatprep.subr.bf16.mxu1 %v14655_v0 }
  0xa3   : > { %9809 = vmatpush1.bf16.msra.mxu1 %v11385_v26  ;;  %v10267_v26 = vld [vmem:[%s14649_s7 + $0x100] sm:$0xff]  }
  0xa4   : > { %9794 = vmatprep.subr.bf16.mxu1 %v14655_v0 }
  0xa5   : > { %2885 = vmatmul.mubr.bf16.gmra.mrb[12].mxu1 %v10228_v63  ;;  %9553 = vmatmul.mubr.msk.bf16.gmra.mrb[40].mxu0 %vm1194_vm0, %v10229_v1  ;;  %v10312_v63 = vld [vmem:[%s11399_s19 + $0x15c] ss:$24 sps:$4 sm:$0xff]   ;;  %v10369_v1 = vld [vmem:[%s14649_s7 + $0x160] sm:$0xff]  }
  0xa6   : > { %2892 = vmatprep.mubr.bf16.mxu1 %v10231_v2  ;;  %9556 = vmatprep.mubr.msk.bf16.mxu0 %vm1194_vm0, %v10233_v3  ;;  %v10376_v2 = vld [vmem:[%s14649_s7 + $0x168] sm:$0xff]   ;;  %v10311_v3 = vld [vmem:[%s11399_s19 + $0x300] ss:$24 sps:$4 sm:$0xff]  }
  0xa7   : > { %9810 = vmatpush1.bf16.msra.mxu1 %v11405_v29  ;;  %v10274_v29 = vld [vmem:[%s14649_s7 + $0x108] sm:$0xff]  }
  0xa8   : > { %9795 = vmatprep.subr.bf16.mxu1 %v14655_v0 }
  0xab   : > { %9811 = vmatpush1.bf16.msra.mxu1 %v11423_v34  ;;  %v10281_v34 = vld [vmem:[%s14649_s7 + $0x110] sm:$0xff]  }
  0xac   : > { %9796 = vmatprep.subr.bf16.mxu1 %v14655_v0 }
  0xad   : > { %2893 = vmatmul.mubr.bf16.gmra.mrb[16].mxu1 %v10234_v4  ;;  %9557 = vmatmul.mubr.msk.bf16.gmra.mrb[44].mxu0 %vm1194_vm0, %v10235_v5  ;;  %v10314_v4 = vld [vmem:[%s11399_s19 + $0x158] ss:$24 sps:$4 sm:$0xff]   ;;  %v10316_v5 = vld [vmem:[%s11399_s19 + $0x334] ss:$24 sps:$4 sm:$0xff]  }
  0xae   : > { %2900 = vmatprep.mubr.bf16.mxu1 %v10237_v6  ;;  %9560 = vmatprep.mubr.msk.bf16.mxu0 %vm1194_vm0, %v10239_v7  ;;  %v10319_v6 = vld [vmem:[%s11399_s19 + $0x18c] ss:$24 sps:$4 sm:$0xff]   ;;  %v10383_v7 = vld [vmem:[%s14649_s7 + $0x170] sm:$0xff]  }
  0xaf   : > { %9812 = vmatpush1.bf16.msra.mxu1 %v11436_v38  ;;  %v10282_v38 = vld [vmem:[%s11399_s19 + $0x244] ss:$24 sps:$4 sm:$0xff]  }
  0xb0   : > { %9797 = vmatprep.subr.bf16.mxu1 %v14655_v0 }
  0xb3   : > { %9813 = vmatpush1.bf16.msra.mxu1 %v11449_v40  ;;  %v10301_v40 = vld [vmem:[%s14649_s7 + $0x120] sm:$0xff]  }
  0xb4   : > { %9798 = vmatprep.subr.bf16.mxu1 %v14655_v0 }
  0xb5   : > { %2901 = vmatmul.mubr.bf16.gmra.mrb[20].mxu1 %v10240_v8  ;;  %9561 = vmatmul.mubr.msk.bf16.gmra.mrb[48].mxu0 %vm1194_vm0, %v10241_v9  ;;  %v10395_v8 = vld [vmem:[%s14649_s7 + $0x178] sm:$0xff]   ;;  %v10318_v9 = vld [vmem:[%s11399_s19 + $0x330] ss:$24 sps:$4 sm:$0xff]  }
  0xb6   : > { %2908 = vmatprep.mubr.bf16.mxu1 %v10243_v10  ;;  %9564 = vmatprep.mubr.msk.bf16.mxu0 %vm1194_vm0, %v10245_v11  ;;  %v10321_v10 = vld [vmem:[%s11399_s19 + $0x188] ss:$24 sps:$4 sm:$0xff]   ;;  %v10322_v11 = vld [vmem:[%s11399_s19 + $0x364] ss:$24 sps:$4 sm:$0xff]  }
  0xb7   : > { %9814 = vmatpush1.bf16.msra.mxu1 %v11463_v44  ;;  %v10288_v44 = vld [vmem:[%s11399_s19 + $0x274] ss:$24 sps:$4 sm:$0xff]  }
  0xb8   : > { %9799 = vmatprep.subr.bf16.mxu1 %v14655_v0 }
  0xbb   : > { %9815 = vmatpush1.bf16.msra.mxu1 %v11475_v46  ;;  %v10315_v46 = vld [vmem:[%s14649_s7 + $0x130] sm:$0xff]  }
  0xbc   : > { %9800 = vmatprep.subr.bf16.mxu1 %v14655_v0 }
  0xbd   : > { %2909 = vmatmul.mubr.bf16.gmra.mrb[24].mxu1 %v10246_v12  ;;  %9565 = vmatmul.mubr.msk.bf16.gmra.mrb[52].mxu0 %vm1194_vm0, %v10247_v13  ;;  %v10325_v12 = vld [vmem:[%s11399_s19 + $0x1bc] ss:$24 sps:$4 sm:$0xff]   ;;  %v11703_v13 = vld [vmem:[%s14650_s8] sm:$0xff]  }
  0xbe   : > { %2916 = vmatprep.mubr.bf16.mxu1 %v10249_v14  ;;  %9568 = vmatprep.mubr.msk.bf16.mxu0 %vm1194_vm0, %v10251_v15  ;;  %v10324_v14 = vld [vmem:[%s11399_s19 + $0x360] ss:$24 sps:$4 sm:$0xff]  }
  0xbf   : > { %9816 = vmatpush1.bf16.msra.mxu1 %v11487_v51  ;;  %v10298_v51 = vld [vmem:[%s11399_s19 + $0xfc] ss:$24 sps:$4 sm:$0xff]   ;;  %v10328_v15 = vld [vmem:[%s11399_s19 + $0x1b8] ss:$24 sps:$4 sm:$0xff]  }
  0xc0   : > { %9801 = vmatprep.subr.bf16.mxu1 %v14655_v0 }
  0xc3   : > { %9817 = vmatpush1.bf16.msra.mxu1 %v11500_v53  ;;  %v10342_v53 = vld [vmem:[%s14649_s7 + $0x148] sm:$0xff]  }
  0xc4   : > { %9802 = vmatprep.subr.bf16.mxu1 %v14655_v0 }
  0xc5   : > { %2917 = vmatmul.mubr.bf16.gmra.mrb[28].mxu1 %v10252_v16  ;;  %9569 = vmatmul.mubr.msk.bf16.gmra.mrb[56].mxu0 %vm1194_vm0, %v10253_v17  ;;  %v10329_v16 = vld [vmem:[%s11399_s19 + $0x394] ss:$24 sps:$4 sm:$0xff]  }
  0xc6   : > { %2924 = vmatprep.mubr.bf16.mxu1 %v10255_v18  ;;  %9572 = vmatprep.mubr.msk.bf16.mxu0 %vm1194_vm0, %v10257_v19  ;;  %v10332_v17 = vld [vmem:[%s11399_s19 + $0x1ec] ss:$24 sps:$4 sm:$0xff]   ;;  %v10331_v18 = vld [vmem:[%s11399_s19 + $0x390] ss:$24 sps:$4 sm:$0xff]  }
  0xc7   : > { %9818 = vmatpush1.bf16.msra.mxu1 %v11512_v57  ;;  %v10305_v57 = vld [vmem:[%s11399_s19 + $0x12c] ss:$24 sps:$4 sm:$0xff]   ;;  %v10334_v19 = vld [vmem:[%s11399_s19 + $0x1e8] ss:$24 sps:$4 sm:$0xff]  }
  0xc8   : > { %9803 = vmatprep.subr.bf16.mxu1 %v14655_v0 }
  0xcb   : > { %9819 = vmatpush1.bf16.msra.mxu1 %v11525_v60  ;;  %v10304_v60 = vld [vmem:[%s11399_s19 + $0x2d0] ss:$24 sps:$4 sm:$0xff]  }
  0xcc   : > { %9576 = vmatprep.subr.bf16.mxu1 %v11703_v13 }
  0xcd   : > { %2925 = vmatmul.mubr.bf16.gmra.mrb[32].mxu1 %v10258_v20  ;;  %9573 = vmatmul.mubr.msk.bf16.gmra.mrb[60].mxu0 %vm1194_vm0, %v10259_v21  ;;  %v10336_v20 = vld [vmem:[%s11399_s19 + $0x3c4] ss:$24 sps:$4 sm:$0xff]  }
  0xce   : > { %2932 = vmatprep.mubr.bf16.mxu1 %v10261_v22  ;;  %3149 = vmatprep.mubr.bf16.mxu0 %v10266_v23  ;;  %v10339_v21 = vld [vmem:[%s11399_s19 + $0x21c] ss:$24 sps:$4 sm:$0xff]   ;;  %v10338_v22 = vld [vmem:[%s11399_s19 + $0x3c0] ss:$24 sps:$4 sm:$0xff]  }
  0xcf   : > { %v10341_v23 = vld [vmem:[%s11399_s19 + $0x218] ss:$24 sps:$4 sm:$0xff]  }
  0xd5   : > { %2933 = vmatmul.mubr.bf16.gmra.mrb[36].mxu1 %v10263_v24  ;;  %3150 = vmatmul.mubr.bf16.vlgmr.msra.gmra.mrb[64].mxu0 %v10264_v25  ;;  %v10343_v25 = vld [vmem:[%s11399_s19 + $0x3f4] ss:$24 sps:$4 sm:$0xff]  }
  0xd6   : > { %3407 = vmatpush1.bf16.msra.mxu0 %v10267_v26  ;;  %2940 = vmatprep.mubr.bf16.mxu1 %v10268_v27 }
  0xd7   : > { %3157 = vmatprep.mubr.bf16.mxu0 %v10271_v28  ;;  %3408 = vmatprep.subr.bf16.mxu0 %v14655_v0  ;;  %v10346_v28 = vld [vmem:[%s11399_s19 + $0x24c] ss:$24 sps:$4 sm:$0xff]  }
  0xda   : > { %3409 = vmatpush1.bf16.msra.mxu0 %v10274_v29 }
  0xdb   : > { %3410 = vmatprep.subr.bf16.mxu0 %v14655_v0 }
  0xdd   : > { %2941 = vmatmul.mubr.bf16.gmra.mrb[40].mxu1 %v10270_v30  ;;  %3158 = vmatmul.mubr.bf16.gmra.mrb[68].mxu0 %v10273_v31  ;;  %v10345_v30 = vld [vmem:[%s11399_s19 + $0x3f0] ss:$24 sps:$4 sm:$0xff]  }
  0xde   : > { %2948 = vmatprep.mubr.bf16.mxu1 %v10275_v32  ;;  %3165 = vmatprep.mubr.bf16.mxu0 %v10278_v33  ;;  %v10348_v31 = vld [vmem:[%s11399_s19 + $0x248] ss:$24 sps:$4 sm:$0xff]   ;;  %v10350_v33 = vld [vmem:[%s11399_s19 + $0x424] ss:$24 sps:$4 sm:$0xff]  }
  0xdf   : > { %3411 = vmatpush1.bf16.msra.mxu0 %v10281_v34 }
  0xe0   : > { %3412 = vmatprep.subr.bf16.mxu0 %v14655_v0 }
  0xe3   : > { %3413 = vmatpush1.bf16.msra.mxu0 %v10293_v35 }
  0xe4   : > { %3414 = vmatprep.subr.bf16.mxu0 %v14655_v0 }
  0xe5   : > { %2949 = vmatmul.mubr.bf16.gmra.mrb[44].mxu1 %v10277_v36  ;;  %3166 = vmatmul.mubr.bf16.gmra.mrb[72].mxu0 %v10280_v37  ;;  %v10353_v36 = vld [vmem:[%s11399_s19 + $0x27c] ss:$24 sps:$4 sm:$0xff]  }
  0xe6   : > { %2956 = vmatprep.mubr.bf16.mxu1 %v10282_v38  ;;  %3173 = vmatprep.mubr.bf16.mxu0 %v10285_v39  ;;  %v10352_v38 = vld [vmem:[%s11399_s19 + $0x420] ss:$24 sps:$4 sm:$0xff]  }
  0xe7   : > { %3415 = vmatpush1.bf16.msra.mxu0 %v10301_v40  ;;  %v10355_v39 = vld [vmem:[%s11399_s19 + $0x278] ss:$24 sps:$4 sm:$0xff]  }
  0xe8   : > { %3416 = vmatprep.subr.bf16.mxu0 %v14655_v0 }
  0xeb   : > { %3417 = vmatpush1.bf16.msra.mxu0 %v10308_v41  ;;  %v10356_v41 = vld [vmem:[%s11399_s19 + $0x454] ss:$24 sps:$4 sm:$0xff]  }
  0xec   : > { %3418 = vmatprep.subr.bf16.mxu0 %v14655_v0 }
  0xed   : > { %2957 = vmatmul.mubr.bf16.gmra.mrb[48].mxu1 %v10284_v42  ;;  %3174 = vmatmul.mubr.bf16.gmra.mrb[76].mxu0 %v10287_v43 }
  0xee   : > { %2964 = vmatprep.mubr.bf16.mxu1 %v10288_v44  ;;  %3181 = vmatprep.mubr.bf16.mxu0 %v10291_v45  ;;  %v10359_v44 = vld [vmem:[%s11399_s19 + $0x2ac] ss:$24 sps:$4 sm:$0xff]  }
  0xef   : > { %3419 = vmatpush1.bf16.msra.mxu0 %v10315_v46  ;;  %v10358_v46 = vld [vmem:[%s11399_s19 + $0x450] ss:$24 sps:$4 sm:$0xff]  }
  0xf0   : > { %3420 = vmatprep.subr.bf16.mxu0 %v14655_v0 }
  0xf3   : > { %3421 = vmatpush1.bf16.msra.mxu0 %v10327_v47  ;;  %v10362_v47 = vld [vmem:[%s11399_s19 + $0x2a8] ss:$24 sps:$4 sm:$0xff]  }
  0xf4   : > { %3422 = vmatprep.subr.bf16.mxu0 %v14655_v0 }
  0xf5   : > { %2965 = vmatmul.mubr.bf16.gmra.mrb[52].mxu1 %v10290_v48  ;;  %3182 = vmatmul.mubr.bf16.gmra.mrb[80].mxu0 %v10294_v49  ;;  %v10363_v49 = vld [vmem:[%s11399_s19 + $0x484] ss:$24 sps:$4 sm:$0xff]  }
  0xf6   : > { %2972 = vmatprep.mubr.bf16.mxu1 %v10295_v50  ;;  %3189 = vmatprep.mubr.bf16.mxu0 %v10298_v51 }
  0xf7   : > { %3423 = vmatpush1.bf16.msra.mxu0 %v10335_v52  ;;  %v10366_v52 = vld [vmem:[%s11399_s19 + $0x2dc] ss:$24 sps:$4 sm:$0xff]  }
  0xf8   : > { %3424 = vmatprep.subr.bf16.mxu0 %v14655_v0 }
  0xfb   : > { %3425 = vmatpush1.bf16.msra.mxu0 %v10342_v53 }
  0xfc   : > { %3426 = vmatprep.subr.bf16.mxu0 %v14655_v0 }
  0xfd   : > { %2973 = vmatmul.mubr.bf16.gmra.mrb[56].mxu1 %v10297_v54  ;;  %3190 = vmatmul.mubr.bf16.gmra.mrb[84].mxu0 %v10300_v55  ;;  %v10365_v54 = vld [vmem:[%s11399_s19 + $0x480] ss:$24 sps:$4 sm:$0xff]  }
  0xfe   : > { %2980 = vmatprep.mubr.bf16.mxu1 %v10302_v56  ;;  %3197 = vmatprep.mubr.bf16.mxu0 %v10305_v57  ;;  %v10368_v55 = vld [vmem:[%s11399_s19 + $0x2d8] ss:$24 sps:$4 sm:$0xff]   ;;  %v10370_v57 = vld [vmem:[%s11399_s19 + $0x4b4] ss:$24 sps:$4 sm:$0xff]  }
  0xff   : > { %3427 = vmatpush1.bf16.msra.mxu0 %v10349_v58 }
 0x100   : > { %3428 = vmatprep.subr.bf16.mxu0 %v14655_v0 }
 0x103   : > { %3429 = vmatpush1.bf16.msra.mxu0 %v10361_v59 }
 0x104   : > { %3430 = vmatprep.subr.bf16.mxu0 %v14655_v0 }
 0x105   : > { %2981 = vmatmul.mubr.bf16.gmra.mrb[60].mxu1 %v10304_v60  ;;  %3198 = vmatmul.mubr.bf16.gmra.mrb[88].mxu0 %v10307_v61  ;;  %v10373_v60 = vld [vmem:[%s11399_s19 + $0x30c] ss:$24 sps:$4 sm:$0xff]  }
 0x106   : > { %2988 = vmatprep.mubr.bf16.mxu1 %v10309_v62  ;;  %3205 = vmatprep.mubr.bf16.mxu0 %v10312_v63  ;;  %v10372_v62 = vld [vmem:[%s11399_s19 + $0x4b0] ss:$24 sps:$4 sm:$0xff]  }
 0x107   : > { %3431 = vmatpush1.bf16.msra.mxu0 %v10369_v1  ;;  %v10375_v63 = vld [vmem:[%s11399_s19 + $0x308] ss:$24 sps:$4 sm:$0xff]  }
 0x108   : > { %3432 = vmatprep.subr.bf16.mxu0 %v14655_v0 }
 0x10b   : > { %3433 = vmatpush1.bf16.msra.mxu0 %v10376_v2  ;;  %v10377_v2 = vld [vmem:[%s11399_s19 + $0x4e4] ss:$24 sps:$4 sm:$0xff]  }
 0x10c   : > { %3434 = vmatprep.subr.bf16.mxu0 %v14655_v0 }
 0x10d   : > { %2989 = vmatmul.mubr.bf16.gmra.mrb[64].mxu1 %v10311_v3  ;;  %3206 = vmatmul.mubr.bf16.gmra.mrb[92].mxu0 %v10314_v4 }
 0x10e   : > { %2996 = vmatprep.mubr.bf16.mxu1 %v10316_v5  ;;  %3213 = vmatprep.mubr.bf16.mxu0 %v10319_v6  ;;  %v10380_v5 = vld [vmem:[%s11399_s19 + $0x33c] ss:$24 sps:$4 sm:$0xff]  }
 0x10f   : > { %3435 = vmatpush1.bf16.msra.mxu0 %v10383_v7  ;;  %v10379_v7 = vld [vmem:[%s11399_s19 + $0x4e0] ss:$24 sps:$4 sm:$0xff]  }
 0x110   : > { %3436 = vmatprep.subr.bf16.mxu0 %v14655_v0 }
 0x113   : > { %3437 = vmatpush1.bf16.msra.mxu0 %v10395_v8  ;;  %v10382_v8 = vld [vmem:[%s11399_s19 + $0x338] ss:$24 sps:$4 sm:$0xff]  }
 0x114   : > { %6443 = vmatprep.subr.bf16.mxu0 %v14655_v0 }
 0x115   : > { %2997 = vmatmul.mubr.bf16.gmra.mrb[68].mxu1 %v10318_v9  ;;  %3214 = vmatmul.mubr.bf16.gmra.mrb[96].mxu0 %v10321_v10  ;;  %v10384_v10 = vld [vmem:[%s11399_s19 + $0x514] ss:$24 sps:$4 sm:$0xff]  }
 0x116   : > { %3004 = vmatprep.mubr.bf16.mxu1 %v10322_v11  ;;  %3221 = vmatprep.mubr.bf16.mxu0 %v10325_v12 }
 0x11d   : > { %3005 = vmatmul.mubr.bf16.gmra.mrb[72].mxu1 %v10324_v14  ;;  %3222 = vmatmul.mubr.bf16.gmra.mrb[100].mxu0 %v10328_v15  ;;  %v10387_v14 = vld [vmem:[%s11399_s19 + $0x36c] ss:$24 sps:$4 sm:$0xff]  }
 0x11e   : > { %3012 = vmatprep.mubr.bf16.mxu1 %v10329_v16  ;;  %3229 = vmatprep.mubr.bf16.mxu0 %v10332_v17  ;;  %v10386_v16 = vld [vmem:[%s11399_s19 + $0x510] ss:$24 sps:$4 sm:$0xff]  }
 0x11f   : > { %v10389_v17 = vld [vmem:[%s11399_s19 + $0x368] ss:$24 sps:$4 sm:$0xff]  }
 0x125   : > { %3013 = vmatmul.mubr.bf16.gmra.mrb[76].mxu1 %v10331_v18  ;;  %3230 = vmatmul.mubr.bf16.gmra.mrb[104].mxu0 %v10334_v19 }
 0x126   : > { %3020 = vmatprep.mubr.bf16.mxu1 %v10336_v20  ;;  %3237 = vmatprep.mubr.bf16.mxu0 %v10339_v21  ;;  %v10390_v20 = vld [vmem:[%s11399_s19 + $0x544] ss:$24 sps:$4 sm:$0xff]  }
 0x128   : > { %v11716_v24 = vpop.f32.mrb[0].mxu0 }
 0x129   : > { %v11719_v26 = vpop.f32.mrb[1].mxu0 }
 0x12a   : > { %v11721_v27 = vpop.f32.mrb[2].mxu0 }
 0x12b   : > { %v11724_v29 = vpop.f32.mrb[3].mxu0 }
 0x12d   : > { %3021 = vmatmul.mubr.bf16.gmra.mrb[80].mxu1 %v10338_v22  ;;  %3238 = vmatmul.mubr.bf16.gmra.mrb[108].mxu0 %v10341_v23 }
 0x12e   : > { %3028 = vmatprep.mubr.bf16.mxu1 %v10343_v25  ;;  %3245 = vmatprep.mubr.bf16.mxu0 %v10346_v28 }
 0x130   : > { %v11728_v32 = vpop.f32.mrb[4].mxu0 }
 0x131   : > { %v11731_v34 = vpop.f32.mrb[5].mxu0 }
 0x132   : > { %v11733_v35 = vpop.f32.mrb[6].mxu0 }
 0x133   : > { %v11736_v37 = vpop.f32.mrb[7].mxu0 }
 0x135   : > { %3029 = vmatmul.mubr.bf16.gmra.mrb[84].mxu1 %v10345_v30  ;;  %3246 = vmatmul.mubr.bf16.gmra.mrb[112].mxu0 %v10348_v31  ;;  %v10393_v30 = vld [vmem:[%s11399_s19 + $0x39c] ss:$24 sps:$4 sm:$0xff]  }
 0x136   : > { %3036 = vmatprep.mubr.bf16.mxu1 %v10350_v33  ;;  %3253 = vmatprep.mubr.bf16.mxu0 %v10353_v36 }
 0x138   : > { %v11740_v40 = vpop.f32.mrb[8].mxu0 }
 0x139   : > { %v11743_v42 = vpop.f32.mrb[9].mxu0 }
 0x13a   : > { %v11745_v43 = vpop.f32.mrb[10].mxu0 }
 0x13b   : > { %v11748_v45 = vpop.f32.mrb[11].mxu0 }
 0x13d   : > { %3037 = vmatmul.mubr.bf16.gmra.mrb[88].mxu1 %v10352_v38  ;;  %3254 = vmatmul.mubr.bf16.gmra.mrb[116].mxu0 %v10355_v39  ;;  %v10396_v38 = vld [vmem:[%s11399_s19 + $0x398] ss:$24 sps:$4 sm:$0xff]  }
 0x13e   : > { %3044 = vmatprep.mubr.bf16.mxu1 %v10356_v41  ;;  %3261 = vmatprep.mubr.bf16.mxu0 %v10359_v44 }
 0x140   : > { %v11752_v48 = vpop.f32.mrb[12].mxu0 }
 0x141   : > { %v11755_v50 = vpop.f32.mrb[13].mxu0 }
 0x142   : > { %v11757_v51 = vpop.f32.mrb[14].mxu0 }
 0x143   : > { %v11760_v53 = vpop.f32.mrb[15].mxu0 }
 0x145   : > { %3045 = vmatmul.mubr.bf16.gmra.mrb[92].mxu1 %v10358_v46  ;;  %3262 = vmatmul.mubr.bf16.gmra.mrb[120].mxu0 %v10362_v47 }
 0x146   : > { %3052 = vmatprep.mubr.bf16.mxu1 %v10363_v49  ;;  %3269 = vmatprep.mubr.bf16.mxu0 %v10366_v52 }
 0x148   : > { %v11764_v56 = vpop.f32.mrb[16].mxu0 }
 0x149   : > { %v11767_v58 = vpop.f32.mrb[17].mxu0 }
 0x14a   : > { %v11769_v59 = vpop.f32.mrb[18].mxu0 }
 0x14b   : > { %v11772_v61 = vpop.f32.mrb[19].mxu0 }
 0x14d   : > { %3053 = vmatmul.mubr.bf16.gmra.mrb[96].mxu1 %v10365_v54  ;;  %3270 = vmatmul.mubr.bf16.gmra.mrb[124].mxu0 %v10368_v55  ;;  %v10402_v54 = vld [vmem:[%s11399_s19 + $0x14] ss:$24 sps:$4 sm:$0xff]  }
 0x14e   : > { %3060 = vmatprep.mubr.bf16.mxu1 %v10370_v57  ;;  %3277 = vmatprep.mubr.bf16.mxu0 %v10373_v60 }
 0x150   : > { %v11776_v1 = vpop.f32.mrb[20].mxu0 }
 0x151   : > { %v11779_v3 = vpop.f32.mrb[21].mxu0 }
 0x152   : > { %v11781_v4 = vpop.f32.mrb[22].mxu0 }
 0x153   : > { %v11784_v6 = vpop.f32.mrb[23].mxu0 }
 0x155   : > { %3061 = vmatmul.mubr.bf16.gmra.mrb[100].mxu1 %v10372_v62  ;;  %3278 = vmatmul.mubr.bf16.gmra.mrb[128].mxu0 %v10375_v63 }
 0x156   : > { %3068 = vmatprep.mubr.bf16.mxu1 %v10377_v2  ;;  %3285 = vmatprep.mubr.bf16.mxu0 %v10380_v5 }
 0x158   : > { %v11788_v9 = vpop.f32.mrb[24].mxu0 }
 0x159   : > { %v11791_v11 = vpop.f32.mrb[25].mxu0 }
 0x15a   : > { %v11793_v12 = vpop.f32.mrb[26].mxu0 }
 0x15b   : > { %v11796_v15 = vpop.f32.mrb[27].mxu0 }
 0x15d   : > { %3069 = vmatmul.mubr.bf16.gmra.mrb[104].mxu1 %v10379_v7  ;;  %3286 = vmatmul.mubr.bf16.gmra.mrb[132].mxu0 %v10382_v8  ;;  %v10400_v7 = vld [vmem:[%s11399_s19 + $0x10] ss:$24 sps:$4 sm:$0xff]  }
 0x15e   : > { %3076 = vmatprep.mubr.bf16.mxu1 %v10384_v10  ;;  %3293 = vmatprep.mubr.bf16.mxu0 %v10387_v14  ;;  %v10403_v14 = vld [vmem:[%s11399_s19 + $0x5a4] ss:$24 sps:$4 sm:$0xff]  }
 0x160   : > { %v2862_v18 = vpop.f32.mrb[0].mxu1  ;;  %v11800_v19 = vpop.f32.mrb[28].mxu0 }
 0x161   : > { %v11804_v21 = vadd.f32 %v2862_v18, %v11719_v26  ;;  %v2864_v22 = vpop.f32.mrb[1].mxu1  ;;  %v11806_v23 = vpop.f32.mrb[29].mxu0  ;;  %v10392_v26 = vld [vmem:[%s11399_s19 + $0x540] ss:$24 sps:$4 sm:$0xff]  }
 0x162   : > { %v2865_v25 = vpop.f32.mrb[2].mxu1  ;;  %v11808_v28 = vpop.f32.mrb[30].mxu0 }
 0x163   : > { %14666 = vst [vmem:[#allocation9_spill] sm:$0xff] %v11804_v21  ;;  %v11812_v31 = vadd.f32 %v2865_v25, %v11724_v29  ;;  %v11814_v33 = vpop.f32.mrb[31].mxu0  ;;  %v2867_v36 = vpop.f32.mrb[3].mxu1  ;;  %v10397_v29 = vld [vmem:[%s11399_s19 + $0x574] ss:$24 sps:$4 sm:$0xff]  }
 0x165   : > { %14667 = vst [vmem:[#allocation10_spill] sm:$0xff] %v11812_v31  ;;  %3077 = vmatmul.mubr.bf16.gmra.mrb[108].mxu1 %v10386_v16  ;;  %3294 = vmatmul.mubr.bf16.gmra.mrb[136].mxu0 %v10389_v17 }
 0x166   : > { %3084 = vmatprep.mubr.bf16.mxu1 %v10390_v20  ;;  %3301 = vmatprep.mubr.bf16.mxu0 %v10393_v30  ;;  %v10406_v20 = vld [vmem:[%s11399_s19 + $0x44] ss:$24 sps:$4 sm:$0xff]  }
 0x168   : > { %v2870_v39 = vpop.f32.mrb[4].mxu1  ;;  %v11818_v41 = vpop.f32.mrb[32].mxu0 }
 0x169   : > { %v11821_v44 = vadd.f32 %v11716_v24, %v2870_v39  ;;  %v2872_v46 = vpop.f32.mrb[5].mxu1  ;;  %v11823_v47 = vpop.f32.mrb[33].mxu0 }
 0x16a   : > { %v2873_v49 = vpop.f32.mrb[6].mxu1  ;;  %v11826_v52 = vpop.f32.mrb[34].mxu0 }
 0x16b   : > { %v11830_v55 = vadd.f32 %v11721_v27, %v2873_v49  ;;  %v11832_v57 = vpop.f32.mrb[35].mxu0  ;;  %v2875_v60 = vpop.f32.mrb[7].mxu1  ;;  %v10399_v27 = vld [vmem:[%s11399_s19 + $0x570] ss:$24 sps:$4 sm:$0xff]   ;;  %v10412_v49 = vld [vmem:[%s11399_s19 + $0x74] ss:$24 sps:$4 sm:$0xff]  }
 0x16d   : > { %3085 = vmatmul.mubr.bf16.gmra.mrb[112].mxu1 %v10392_v26  ;;  %3302 = vmatmul.mubr.bf16.gmra.mrb[140].mxu0 %v10396_v38  ;;  %v10405_v26 = vld [vmem:[%s11399_s19 + $0x5a0] ss:$24 sps:$4 sm:$0xff]  }
 0x16e   : > { %3092 = vmatprep.mubr.bf16.mxu1 %v10397_v29  ;;  %3438 = vmatprep.mubr.bf16.mxu0 %v10402_v54  ;;  %v10408_v38 = vld [vmem:[%s11399_s19 + $0x40] ss:$24 sps:$4 sm:$0xff]   ;;  %v10409_v29 = vld [vmem:[%s11399_s19 + $0x5d4] ss:$24 sps:$4 sm:$0xff]  }
 0x16f   : > { %v10863_v54 = vld [vmem:[%s14649_s7 + $0x88] sm:$0xff]  }
 0x170   : > { %v2878_v24 = vpop.f32.mrb[8].mxu1  ;;  %v11834_v62 = vpop.f32.mrb[36].mxu0 }
 0x171   : > { %v11837_v63 = vadd.f32 %v2878_v24, %v11731_v34  ;;  %v2880_v2 = vpop.f32.mrb[9].mxu1  ;;  %v11839_v5 = vpop.f32.mrb[37].mxu0  ;;  %v10862_v34 = vld [vmem:[%s14649_s7 + $0x80] sm:$0xff]  }
 0x172   : > { %v2881_v8 = vpop.f32.mrb[10].mxu1  ;;  %v11843_v10 = vpop.f32.mrb[38].mxu0  ;;  %v10864_v2 = vld [vmem:[%s14649_s7 + $0x90] sm:$0xff]  }
 0x173   : > { %14668 = vst [vmem:[#allocation11_spill] sm:$0xff] %v11837_v63  ;;  %v11847_v16 = vadd.f32 %v2881_v8, %v11736_v37  ;;  %v11849_v17 = vpop.f32.mrb[39].mxu0  ;;  %v2883_v18 = vpop.f32.mrb[11].mxu1 }
 0x174   : > { %v10411_v18 = vld [vmem:[%s11399_s19 + $0x5d0] ss:$24 sps:$4 sm:$0xff]  }
 0x175   : > { %14669 = vst [vmem:[#allocation12_spill] sm:$0xff] %v11847_v16  ;;  %3093 = vmatmul.mubr.bf16.gmra.mrb[116].mxu1 %v10399_v27  ;;  %3439 = vmatmul.mubr.bf16.vlgmr.msra.gmra.mrb[64].mxu0 %v10400_v7 }
 0x176   : > { %6444 = vmatpush1.bf16.msra.mxu0 %v10862_v34  ;;  %3100 = vmatprep.mubr.bf16.mxu1 %v10403_v14 }
 0x177   : > { %3446 = vmatprep.mubr.bf16.mxu0 %v10406_v20  ;;  %6445 = vmatprep.subr.bf16.mxu0 %v14655_v0  ;;  %v10414_v20 = vld [vmem:[%s11399_s19 + $0x70] ss:$24 sps:$4 sm:$0xff]  }
 0x178   : > { %v2886_v37 = vpop.f32.mrb[12].mxu1  ;;  %v11856_v22 = vpop.f32.mrb[40].mxu0 }
 0x179   : > { %v11859_v25 = vadd.f32 %v11728_v32, %v2886_v37  ;;  %v2888_v30 = vpop.f32.mrb[13].mxu1  ;;  %v11861_v36 = vpop.f32.mrb[41].mxu0 }
 0x17a   : > { %v2889_v39 = vpop.f32.mrb[14].mxu1  ;;  %v11865_v46 = vpop.f32.mrb[42].mxu0  ;;  %6446 = vmatpush1.bf16.msra.mxu0 %v10863_v54  ;;  %v10417_v30 = vld [vmem:[%s11399_s19 + $0x3cc] ss:$24 sps:$4 sm:$0xff]  }
 0x17b   : > { %v11873_v60 = vadd.f32 %v11733_v35, %v2889_v39  ;;  %v11875_v32 = vpop.f32.mrb[43].mxu0  ;;  %v2891_v24 = vpop.f32.mrb[15].mxu1  ;;  %6447 = vmatprep.subr.bf16.mxu0 %v14655_v0 }
 0x17d   : > { %3101 = vmatmul.mubr.bf16.gmra.mrb[120].mxu1 %v10405_v26  ;;  %3447 = vmatmul.mubr.bf16.gmra.mrb[144].mxu0 %v10408_v38  ;;  %v10418_v26 = vld [vmem:[%s11399_s19 + $0xa4] ss:$24 sps:$4 sm:$0xff]  }
 0x17e   : > { %3108 = vmatprep.mubr.bf16.mxu1 %v10409_v29  ;;  %3454 = vmatprep.mubr.bf16.mxu0 %v10412_v49 }
 0x17f   : > { %6448 = vmatpush1.bf16.msra.mxu0 %v10864_v2 }
 0x180   : > { %v2894_v35 = vpop.f32.mrb[16].mxu1  ;;  %v11881_v27 = vpop.f32.mrb[44].mxu0  ;;  %6449 = vmatprep.subr.bf16.mxu0 %v14655_v0 }
 0x181   : > { %v11885_v7 = vadd.f32 %v2894_v35, %v11743_v42  ;;  %v2896_v8 = vpop.f32.mrb[17].mxu1  ;;  %v11887_v14 = vpop.f32.mrb[45].mxu0  ;;  %v10865_v42 = vld [vmem:[%s14649_s7 + $0x98] sm:$0xff]  }
 0x182   : > { %v2897_v34 = vpop.f32.mrb[18].mxu1  ;;  %v11891_v37 = vpop.f32.mrb[46].mxu0  ;;  %v10415_v8 = vld [vmem:[%s11399_s19 + $0x3c8] ss:$24 sps:$4 sm:$0xff]  }
 0x183   : > { %14670 = vst [vmem:[#allocation13_spill] sm:$0xff] %v11885_v7  ;;  %v11896_v38 = vadd.f32 %v2897_v34, %v11748_v45  ;;  %v11898_v39 = vpop.f32.mrb[47].mxu0  ;;  %v2899_v29 = vpop.f32.mrb[19].mxu1  ;;  %6450 = vmatpush1.bf16.msra.mxu0 %v10865_v42  ;;  %v10866_v45 = vld [vmem:[%s14649_s7 + $0xa0] sm:$0xff]  }
 0x184   : > { %6451 = vmatprep.subr.bf16.mxu0 %v14655_v0  ;;  %v10431_v7 = vld [vmem:[%s11399_s19 + $0x104] ss:$24 sps:$4 sm:$0xff]  }
 0x185   : > { %14671 = vst [vmem:[#allocation14_spill] sm:$0xff] %v11896_v38  ;;  %3109 = vmatmul.mubr.bf16.gmra.mrb[124].mxu1 %v10411_v18  ;;  %3455 = vmatmul.mubr.bf16.gmra.mrb[72].mxu0 %v10414_v20  ;;  %v10420_v18 = vld [vmem:[%s11399_s19 + $0xa0] ss:$24 sps:$4 sm:$0xff]   ;;  %v10428_v38 = vld [vmem:[%s11399_s19 + $0x42c] ss:$24 sps:$4 sm:$0xff]  }
 0x186   : > { %3309 = vmatprep.mubr.bf16.mxu1 %v10417_v30  ;;  %3462 = vmatprep.mubr.bf16.mxu0 %v10418_v26  ;;  %v10421_v30 = vld [vmem:[%s11399_s19 + $0x3fc] ss:$24 sps:$4 sm:$0xff]  }
 0x187   : > { %6452 = vmatpush1.bf16.msra.mxu0 %v10866_v45  ;;  %v10424_v26 = vld [vmem:[%s11399_s19 + $0xd4] ss:$24 sps:$4 sm:$0xff]  }
 0x188   : > { %v2902_v49 = vpop.f32.mrb[20].mxu1  ;;  %v11907_v54 = vpop.f32.mrb[48].mxu0  ;;  %6453 = vmatprep.subr.bf16.mxu0 %v14655_v0 }
 0x189   : > { %v11911_v24 = vadd.f32 %v11740_v40, %v2902_v49  ;;  %v2904_v2 = vpop.f32.mrb[21].mxu1  ;;  %v11913_v35 = vpop.f32.mrb[49].mxu0  ;;  %v10867_v40 = vld [vmem:[%s14649_s7 + $0xa8] sm:$0xff]  }
 0x18a   : > { %v2905_v20 = vpop.f32.mrb[22].mxu1  ;;  %v11917_v34 = vpop.f32.mrb[50].mxu0  ;;  %v10446_v49 = vld [vmem:[%s14650_s8 + $0x8] sm:$0xff]  }
 0x18b   : > { %v11922_v29 = vadd.f32 %v11745_v43, %v2905_v20  ;;  %v11924_v42 = vpop.f32.mrb[51].mxu0  ;;  %v2907_v45 = vpop.f32.mrb[23].mxu1  ;;  %6454 = vmatpush1.bf16.msra.mxu0 %v10867_v40  ;;  %v10868_v43 = vld [vmem:[%s14649_s7 + $0xb0] sm:$0xff]  }
 0x18c   : > { %6455 = vmatprep.subr.bf16.mxu0 %v14655_v0  ;;  %v10426_v45 = vld [vmem:[%s11399_s19 + $0xd0] ss:$24 sps:$4 sm:$0xff]  }
 0x18d   : > { %3310 = vmatmul.mubr.bf16.vlgmr.msra.gmra.mrb[128].mxu1 %v10415_v8  ;;  %3463 = vmatmul.mubr.bf16.gmra.mrb[148].mxu0 %v10420_v18  ;;  %v10465_v8 = vld [vmem:[%s14650_s8 + $0x10] sm:$0xff]  }
 0x18e   : > { %3317 = vmatprep.mubr.bf16.mxu1 %v10421_v30  ;;  %3470 = vmatprep.mubr.bf16.mxu0 %v10424_v26  ;;  %v10423_v26 = vld [vmem:[%s11399_s19 + $0x3f8] ss:$24 sps:$4 sm:$0xff]  }
 0x18f   : > { %9577 = vmatpush3.bf16.msra.mxu1 %v11703_v13  ;;  %6456 = vmatpush1.bf16.msra.mxu0 %v10868_v43 }
 0x190   : > { %v2910_v2 = vpop.f32.mrb[24].mxu1  ;;  %v11937_v20 = vpop.f32.mrb[52].mxu0  ;;  %9578 = vmatprep.subr.bf16.mxu1 %v10446_v49  ;;  %6457 = vmatprep.subr.bf16.mxu0 %v14655_v0 }
 0x191   : > { %v11944_v18 = vadd.f32 %v2910_v2, %v11755_v50  ;;  %v2912_v13 = vpop.f32.mrb[25].mxu1  ;;  %v11946_v30 = vpop.f32.mrb[53].mxu0  ;;  %v10869_v50 = vld [vmem:[%s14649_s7 + $0xb8] sm:$0xff]  }
 0x192   : > { %v2913_v40 = vpop.f32.mrb[26].mxu1  ;;  %v11950_v43 = vpop.f32.mrb[54].mxu0  ;;  %v10484_v2 = vld [vmem:[%s14650_s8 + $0x18] sm:$0xff]  }
 0x193   : > { %14672 = vst [vmem:[#allocation15_spill] sm:$0xff] %v11944_v18  ;;  %v11955_v16 = vadd.f32 %v2913_v40, %v11760_v53  ;;  %v11957_v63 = vpop.f32.mrb[55].mxu0  ;;  %v2915_v31 = vpop.f32.mrb[27].mxu1  ;;  %9579 = vmatpush3.bf16.msra.mxu1 %v10446_v49  ;;  %6458 = vmatpush1.bf16.msra.mxu0 %v10869_v50  ;;  %v10870_v53 = vld [vmem:[%s14649_s7 + $0xc0] sm:$0xff]   ;;  %v10434_v50 = vld [vmem:[%s11399_s19 + $0x45c] ss:$24 sps:$4 sm:$0xff]  }
 0x194   : > { %9580 = vmatprep.subr.bf16.mxu1 %v10465_v8  ;;  %6459 = vmatprep.subr.bf16.mxu0 %v14655_v0 }
 0x195   : > { %14673 = vst [vmem:[#allocation16_spill] sm:$0xff] %v11955_v16  ;;  %3318 = vmatmul.mubr.bf16.gmra.mrb[132].mxu1 %v10423_v26  ;;  %3471 = vmatmul.mubr.bf16.gmra.mrb[80].mxu0 %v10426_v45  ;;  %v10433_v45 = vld [vmem:[%s11399_s19 + $0x100] ss:$24 sps:$4 sm:$0xff]   ;;  %v10437_v16 = vld [vmem:[%s11399_s19 + $0x134] ss:$24 sps:$4 sm:$0xff]  }
 0x196   : > { %3325 = vmatprep.mubr.bf16.mxu1 %v10428_v38  ;;  %3478 = vmatprep.mubr.bf16.mxu0 %v10431_v7  ;;  %v10430_v7 = vld [vmem:[%s11399_s19 + $0x428] ss:$24 sps:$4 sm:$0xff]  }
 0x197   : > { %9581 = vmatpush3.bf16.msra.mxu1 %v10465_v8  ;;  %6460 = vmatpush1.bf16.msra.mxu0 %v10870_v53 }
 0x198   : > { %v2918_v31 = vpop.f32.mrb[28].mxu1  ;;  %v11969_v49 = vpop.f32.mrb[56].mxu0  ;;  %9582 = vmatprep.subr.bf16.mxu1 %v10484_v2  ;;  %6461 = vmatprep.subr.bf16.mxu0 %v14655_v0 }
 0x199   : > { %14674 = vst [vmem:[#allocation17_spill] sm:$0xff] %v11969_v49  ;;  %v11973_v13 = vadd.f32 %v11752_v48, %v2918_v31  ;;  %v2920_v26 = vpop.f32.mrb[29].mxu1  ;;  %v11975_v38 = vpop.f32.mrb[57].mxu0  ;;  %v10871_v48 = vld [vmem:[%s14649_s7 + $0xc8] sm:$0xff]   ;;  %v11994_v31 = vld [vmem:[%s14648_s6] sm:$0xff]  }
 0x19a   : > { %v2921_v8 = vpop.f32.mrb[30].mxu1  ;;  %v11979_v40 = vpop.f32.mrb[58].mxu0  ;;  %v10443_v49 = vld [vmem:[%s11399_s19 + $0x164] ss:$24 sps:$4 sm:$0xff]  }
 0x19b   : > { %14675 = vst [vmem:[#allocation18_spill] sm:$0xff] %v11979_v40  ;;  %v11984_v53 = vadd.f32 %v11757_v51, %v2921_v8  ;;  %v11986_v18 = vpop.f32.mrb[59].mxu0  ;;  %v2923_v21 = vpop.f32.mrb[31].mxu1  ;;  %9583 = vmatpush3.bf16.msra.mxu1 %v10484_v2  ;;  %6462 = vmatpush1.bf16.msra.mxu0 %v10871_v48  ;;  %v10873_v51 = vld [vmem:[%s14649_s7 + $0xd0] sm:$0xff]   ;;  %v10440_v40 = vld [vmem:[%s11399_s19 + $0x48c] ss:$24 sps:$4 sm:$0xff]  }
 0x19c   : > { %9648 = vmatprep.subr.bf16.mxu1 %v11994_v31  ;;  %6463 = vmatprep.subr.bf16.mxu0 %v14655_v0  ;;  %v10439_v48 = vld [vmem:[%s11399_s19 + $0x130] ss:$24 sps:$4 sm:$0xff]  }
 0x19d   : > { %3326 = vmatmul.mubr.bf16.gmra.mrb[136].mxu1 %v10430_v7  ;;  %3479 = vmatmul.mubr.bf16.gmra.mrb[152].mxu0 %v10433_v45  ;;  %v10436_v45 = vld [vmem:[%s11399_s19 + $0x458] ss:$24 sps:$4 sm:$0xff]  }
 0x19e   : > { %3333 = vmatprep.mubr.bf16.mxu1 %v10434_v50  ;;  %3486 = vmatprep.mubr.bf16.mxu0 %v10437_v16 }
 0x19f   : > { %6464 = vmatpush1.bf16.msra.mxu0 %v10873_v51 }
 0x1a0   : > { %v2926_v21 = vpop.f32.mrb[32].mxu1  ;;  %v12001_v2 = vpop.f32.mrb[60].mxu0  ;;  %6465 = vmatprep.subr.bf16.mxu0 %v14655_v0 }
 0x1a1   : > { %14676 = vst [vmem:[#allocation19_spill] sm:$0xff] %v12001_v2  ;;  %v12005_v26 = vadd.f32 %v2926_v21, %v11767_v58  ;;  %v2928_v8 = vpop.f32.mrb[33].mxu1  ;;  %v12007_v7 = vpop.f32.mrb[61].mxu0  ;;  %v10874_v58 = vld [vmem:[%s14649_s7 + $0xd8] sm:$0xff]   ;;  %v14682_v21 = vmov 0  }
 0x1a2   : > { %14678 = vst [vmem:[#allocation21_spill] sm:$0xff] %v12007_v7  ;;  %v2929_v50 = vpop.f32.mrb[34].mxu1  ;;  %v12011_v16 = vpop.f32.mrb[62].mxu0 }
 0x1a3   : > { %14677 = vst [vmem:[#allocation20_spill] sm:$0xff] %v12005_v26  ;;  %14679 = vst [vmem:[#allocation22_spill] sm:$0xff] %v12011_v16  ;;  %v12016_v51 = vadd.f32 %v2929_v50, %v11772_v61  ;;  %v12018_v2 = vpop.f32.mrb[63].mxu0  ;;  %v2931_v0 = vpop.f32.mrb[35].mxu1  ;;  %6466 = vmatpush1.bf16.msra.mxu0 %v10874_v58  ;;  %v10875_v61 = vld [vmem:[%s14649_s7 + $0xe0] sm:$0xff]  }
 0x1a4   : > { %14681 = vst [vmem:[#allocation24_spill] sm:$0xff] %v12018_v2  ;;  %6467 = vmatprep.subr.bf16.mxu0 %v14682_v21  ;;  %v10442_v58 = vld [vmem:[%s11399_s19 + $0x488] ss:$24 sps:$4 sm:$0xff]   ;;  %v10447_v16 = vld [vmem:[%s11399_s19 + $0x4bc] ss:$24 sps:$4 sm:$0xff]  }
 0x1a5   : > { %14680 = vst [vmem:[#allocation23_spill] sm:$0xff] %v12016_v51  ;;  %3334 = vmatmul.mubr.bf16.gmra.mrb[140].mxu1 %v10436_v45  ;;  %3487 = vmatmul.mubr.bf16.gmra.mrb[88].mxu0 %v10439_v48  ;;  %v10445_v51 = vld [vmem:[%s11399_s19 + $0x160] ss:$24 sps:$4 sm:$0xff]   ;;  %v10450_v45 = vld [vmem:[%s11399_s19 + $0x194] ss:$24 sps:$4 sm:$0xff]  }
 0x1a6   : > { %3341 = vmatprep.mubr.bf16.mxu1 %v10440_v40  ;;  %3494 = vmatprep.mubr.bf16.mxu0 %v10443_v49  ;;  %v10876_v48 = vld [vmem:[%s14649_s7 + $0xe8] sm:$0xff]   ;;  %v10456_v2 = vld [vmem:[%s11399_s19 + $0x1c4] ss:$24 sps:$4 sm:$0xff]  }
 0x1a7   : > { %6468 = vmatpush1.bf16.msra.mxu0 %v10875_v61 }
 0x1a8   : > { %v2934_v8 = vpop.f32.mrb[36].mxu1  ;;  %6469 = vmatprep.subr.bf16.mxu0 %v14682_v21 }
 0x1a9   : > { %v12029_v0 = vadd.f32 %v11764_v56, %v2934_v8  ;;  %v2936_v50 = vpop.f32.mrb[37].mxu1  ;;  %v10877_v56 = vld [vmem:[%s14649_s7 + $0xf0] sm:$0xff]  }
 0x1aa   : > { %v2937_v26 = vpop.f32.mrb[38].mxu1 }
 0x1ab   : > { %v12036_v40 = vadd.f32 %v11769_v59, %v2937_v26  ;;  %v2939_v49 = vpop.f32.mrb[39].mxu1  ;;  %6470 = vmatpush1.bf16.msra.mxu0 %v10876_v48  ;;  %v10453_v48 = vld [vmem:[%s11399_s19 + $0x4ec] ss:$24 sps:$4 sm:$0xff]  }
 0x1ac   : > { %6471 = vmatprep.subr.bf16.mxu0 %v14682_v21 }
 0x1ad   : > { %3342 = vmatmul.mubr.bf16.gmra.mrb[144].mxu1 %v10442_v58  ;;  %3495 = vmatmul.mubr.bf16.gmra.mrb[156].mxu0 %v10445_v51  ;;  %v10449_v58 = vld [vmem:[%s11399_s19 + $0x4b8] ss:$24 sps:$4 sm:$0xff]  }
 0x1ae   : > { %3349 = vmatprep.mubr.bf16.mxu1 %v10447_v16  ;;  %3502 = vmatprep.mubr.bf16.mxu0 %v10450_v45  ;;  %v10452_v51 = vld [vmem:[%s11399_s19 + $0x190] ss:$24 sps:$4 sm:$0xff]  }
 0x1af   : > { %6472 = vmatpush1.bf16.msra.mxu0 %v10877_v56 }
 0x1b0   : > { %v2942_v59 = vpop.f32.mrb[40].mxu1  ;;  %v3159_v26 = vpop.f32.mrb[68].mxu0  ;;  %6473 = vmatprep.subr.bf16.mxu0 %v14682_v21 }
 0x1b1   : > { %v12047_v61 = vadd.f32 %v2942_v59, %v11779_v3  ;;  %v2944_v8 = vpop.f32.mrb[41].mxu1  ;;  %v3161_v50 = vpop.f32.mrb[69].mxu0  ;;  %v12052_v16 = vadd.f32 %v3159_v26, %v11821_v44  ;;  %v10878_v44 = vld [vmem:[%s14649_s7 + $0xf8] sm:$0xff]  }
 0x1b2   : > { %v2945_v45 = vpop.f32.mrb[42].mxu1  ;;  %v3162_v49 = vpop.f32.mrb[70].mxu0  ;;  %v10455_v8 = vld [vmem:[%s11399_s19 + $0x4e8] ss:$24 sps:$4 sm:$0xff]  }
 0x1b3   : > { %v12057_v56 = vadd.f32 %v2945_v45, %v11784_v6  ;;  %v3164_v7 = vpop.f32.mrb[71].mxu0  ;;  %v2947_v3 = vpop.f32.mrb[43].mxu1  ;;  %v12060_v59 = vadd.f32 %v3162_v49, %v11830_v55  ;;  %6474 = vmatpush1.bf16.msra.mxu0 %v10878_v44  ;;  %v10458_v50 = vld [vmem:[%s11399_s19 + $0x1c0] ss:$24 sps:$4 sm:$0xff]   ;;  %v10459_v45 = vld [vmem:[%s11399_s19 + $0x51c] ss:$24 sps:$4 sm:$0xff]  }
 0x1b4   : > { %6732 = vmatprep.subr.bf16.mxu0 %v14682_v21  ;;  %v10462_v49 = vld [vmem:[%s11399_s19 + $0x1f4] ss:$24 sps:$4 sm:$0xff]  }
 0x1b5   : > { %3350 = vmatmul.mubr.bf16.gmra.mrb[148].mxu1 %v10449_v58  ;;  %3503 = vmatmul.mubr.bf16.gmra.mrb[96].mxu0 %v10452_v51 }
 0x1b6   : > { %3357 = vmatprep.mubr.bf16.mxu1 %v10453_v48  ;;  %3510 = vmatprep.mubr.bf16.mxu0 %v10456_v2 }
 0x1b8   : > { %v2950_v6 = vpop.f32.mrb[44].mxu1 }
 0x1b9   : > { %v12067_v7 = vadd.f32 %v11776_v1, %v2950_v6  ;;  %v2952_v26 = vpop.f32.mrb[45].mxu1 }
 0x1ba   : > { %v2953_v55 = vpop.f32.mrb[46].mxu1  ;;  %v10461_v26 = vld [vmem:[%s11399_s19 + $0x518] ss:$24 sps:$4 sm:$0xff]  }
 0x1bb   : > { %v12074_v3 = vadd.f32 %v11781_v4, %v2953_v55  ;;  %v2955_v58 = vpop.f32.mrb[47].mxu1  ;;  %v10464_v4 = vld [vmem:[%s11399_s19 + $0x1f0] ss:$24 sps:$4 sm:$0xff]  }
 0x1bd   : > { %3358 = vmatmul.mubr.bf16.gmra.mrb[152].mxu1 %v10455_v8  ;;  %3511 = vmatmul.mubr.bf16.gmra.mrb[160].mxu0 %v10458_v50  ;;  %v10466_v8 = vld [vmem:[%s11399_s19 + $0x54c] ss:$24 sps:$4 sm:$0xff]  }
 0x1be   : > { %3365 = vmatprep.mubr.bf16.mxu1 %v10459_v45  ;;  %3518 = vmatprep.mubr.bf16.mxu0 %v10462_v49  ;;  %v10469_v50 = vld [vmem:[%s11399_s19 + $0x224] ss:$24 sps:$4 sm:$0xff]  }
 0x1c0   : > { %v2958_v1 = vpop.f32.mrb[48].mxu1  ;;  %v3175_v2 = vpop.f32.mrb[76].mxu0 }
 0x1c1   : > { %v12077_v51 = vadd.f32 %v2958_v1, %v11791_v11  ;;  %v2960_v48 = vpop.f32.mrb[49].mxu1  ;;  %v12080_v44 = vadd.f32 %v3175_v2, %v11859_v25  ;;  %v3177_v6 = vpop.f32.mrb[77].mxu0 }
 0x1c2   : > { %v2961_v55 = vpop.f32.mrb[50].mxu1  ;;  %v3178_v58 = vpop.f32.mrb[78].mxu0  ;;  %v10468_v6 = vld [vmem:[%s11399_s19 + $0x548] ss:$24 sps:$4 sm:$0xff]  }
 0x1c3   : > { %14683 = vst [vmem:[#allocation25_spill] sm:$0xff] %v12077_v51  ;;  %v12087_v45 = vadd.f32 %v2961_v55, %v11796_v15  ;;  %v12090_v11 = vadd.f32 %v3178_v58, %v11873_v60  ;;  %v3180_v49 = vpop.f32.mrb[79].mxu0  ;;  %v2963_v25 = vpop.f32.mrb[51].mxu1  ;;  %v10471_v51 = vld [vmem:[%s11399_s19 + $0x220] ss:$24 sps:$4 sm:$0xff]  }
 0x1c4   : > { %v10472_v55 = vld [vmem:[%s11399_s19 + $0x57c] ss:$24 sps:$4 sm:$0xff]   ;;  %v10474_v49 = vld [vmem:[%s11399_s19 + $0x578] ss:$24 sps:$4 sm:$0xff]  }
 0x1c5   : > { %14684 = vst [vmem:[#allocation26_spill] sm:$0xff] %v12087_v45  ;;  %3366 = vmatmul.mubr.bf16.gmra.mrb[156].mxu1 %v10461_v26  ;;  %3519 = vmatmul.mubr.bf16.gmra.mrb[104].mxu0 %v10464_v4  ;;  %v10475_v45 = vld [vmem:[%s11399_s19 + $0x254] ss:$24 sps:$4 sm:$0xff]   ;;  %v10477_v25 = vld [vmem:[%s11399_s19 + $0x250] ss:$24 sps:$4 sm:$0xff]  }
 0x1c6   : > { %3373 = vmatprep.mubr.bf16.mxu1 %v10466_v8  ;;  %3526 = vmatprep.mubr.bf16.mxu0 %v10469_v50 }
 0x1c8   : > { %v2966_v1 = vpop.f32.mrb[52].mxu1 }
 0x1c9   : > { %v12093_v2 = vadd.f32 %v11788_v9, %v2966_v1  ;;  %v2968_v48 = vpop.f32.mrb[53].mxu1 }
 0x1ca   : > { %v2969_v15 = vpop.f32.mrb[54].mxu1 }
 0x1cb   : > { %v12100_v60 = vadd.f32 %v11793_v12, %v2969_v15  ;;  %v2971_v26 = vpop.f32.mrb[55].mxu1 }
 0x1cd   : > { %3374 = vmatmul.mubr.bf16.gmra.mrb[160].mxu1 %v10468_v6  ;;  %3527 = vmatmul.mubr.bf16.gmra.mrb[164].mxu0 %v10471_v51  ;;  %v10478_v51 = vld [vmem:[%s11399_s19 + $0x5ac] ss:$24 sps:$4 sm:$0xff]  }
 0x1ce   : > { %3381 = vmatprep.mubr.bf16.mxu1 %v10472_v55  ;;  %3534 = vmatprep.mubr.bf16.mxu0 %v10475_v45  ;;  %v10481_v6 = vld [vmem:[%s11399_s19 + $0x284] ss:$24 sps:$4 sm:$0xff]  }
 0x1d0   : > { %v2974_v9 = vpop.f32.mrb[56].mxu1  ;;  %v3191_v4 = vpop.f32.mrb[84].mxu0 }
 0x1d1   : > { %v12103_v58 = vadd.f32 %v2974_v9, %v11806_v23  ;;  %v2976_v8 = vpop.f32.mrb[57].mxu1  ;;  %v3193_v50 = vpop.f32.mrb[85].mxu0  ;;  %v12108_v1 = vadd.f32 %v3191_v4, %v11911_v24  ;;  %v10480_v4 = vld [vmem:[%s11399_s19 + $0x5a8] ss:$24 sps:$4 sm:$0xff]  }
 0x1d2   : > { %v2977_v12 = vpop.f32.mrb[58].mxu1  ;;  %v3194_v48 = vpop.f32.mrb[86].mxu0  ;;  %v10483_v8 = vld [vmem:[%s11399_s19 + $0x280] ss:$24 sps:$4 sm:$0xff]   ;;  %v10485_v50 = vld [vmem:[%s11399_s19 + $0x5dc] ss:$24 sps:$4 sm:$0xff]  }
 0x1d3   : > { %v12113_v45 = vadd.f32 %v2977_v12, %v11814_v33  ;;  %v3196_v23 = vpop.f32.mrb[87].mxu0  ;;  %v2979_v15 = vpop.f32.mrb[59].mxu1  ;;  %v12116_v55 = vadd.f32 %v3194_v48, %v11922_v29  ;;  %v10488_v12 = vld [vmem:[%s11399_s19 + $0x2b4] ss:$24 sps:$4 sm:$0xff]  }
 0x1d4   : > { %v10487_v15 = vld [vmem:[%s11399_s19 + $0x5d8] ss:$24 sps:$4 sm:$0xff]  }
 0x1d5   : > { %3382 = vmatmul.mubr.bf16.gmra.mrb[164].mxu1 %v10474_v49  ;;  %3535 = vmatmul.mubr.bf16.gmra.mrb[112].mxu0 %v10477_v25  ;;  %v3696_v25 = vld [vmem:[%s12134_s24 + $0x8] sm:$0xff] }
 0x1d6   : > { %3389 = vmatprep.mubr.bf16.mxu1 %v10478_v51  ;;  %3542 = vmatprep.mubr.bf16.mxu0 %v10481_v6 }
 0x1d8   : > { %v2982_v24 = vpop.f32.mrb[60].mxu1 }
 0x1d9   : > { %v12119_v26 = vadd.f32 %v11800_v19, %v2982_v24  ;;  %v2984_v9 = vpop.f32.mrb[61].mxu1  ;;  %v3695_v19 = vld [vmem:[%s12134_s24] sm:$0xff]  ;;  %v10490_v24 = vld [vmem:[%s11399_s19 + $0x2b0] ss:$24 sps:$4 sm:$0xff]  }
 0x1da   : > { %v2985_v33 = vpop.f32.mrb[62].mxu1 }
 0x1db   : > { %v12127_v29 = vadd.f32 %v11808_v28, %v2985_v33  ;;  %v2987_v49 = vpop.f32.mrb[63].mxu1  ;;  %v3759_v33 = vpack.c.bf16 %v3696_v25, %v3695_v19  ;;  %v3699_v19 = vld [vmem:[%s12134_s24 + $0x20] sm:$0xff]  ;;  %v3700_v25 = vld [vmem:[%s12134_s24 + $0x28] sm:$0xff] }
 0x1dd   : > { %3390 = vmatmul.mubr.bf16.gmra.mrb[168].mxu1 %v10480_v4  ;;  %3543 = vmatmul.mubr.bf16.gmra.mrb[168].mxu0 %v10483_v8 }
 0x1de   : > { %3397 = vmatprep.mubr.bf16.mxu1 %v10485_v50  ;;  %3550 = vmatprep.mubr.bf16.mxu0 %v10488_v12  ;;  %v10491_v50 = vld [vmem:[%s11399_s19 + $0x2e4] ss:$24 sps:$4 sm:$0xff]  }
 0x1e0   : > { %v2990_v48 = vpop.f32.mrb[64].mxu1  ;;  %v3207_v51 = vpop.f32.mrb[92].mxu0 }
 0x1e1   : > { %v2992_v28 = vpop.f32.mrb[65].mxu1  ;;  %v12139_v6 = vadd.f32 %v3207_v51, %v11973_v13  ;;  %v3209_v23 = vpop.f32.mrb[93].mxu0  ;;  %v12144_v9 = vadd.f32 %v2990_v48, %v11823_v47  ;;  %v3697_v47 = vld [vmem:[%s12134_s24 + $0x10] sm:$0xff]  ;;  %v3698_v48 = vld [vmem:[%s12134_s24 + $0x18] sm:$0xff] }
 0x1e2   : > { %v2993_v4 = vpop.f32.mrb[66].mxu1  ;;  %v3210_v8 = vpop.f32.mrb[94].mxu0 }
 0x1e3   : > { %14686 = vst [vmem:[#allocation27_spill] sm:$0xff] %v12144_v9  ;;  %v12148_v12 = vadd.f32 %v3210_v8, %v11984_v53  ;;  %v3212_v49 = vpop.f32.mrb[95].mxu0  ;;  %v2995_v13 = vpop.f32.mrb[67].mxu1  ;;  %v12151_v51 = vadd.f32 %v2993_v4, %v11832_v57  ;;  %v3760_v57 = vpack.c.bf16 %v3698_v48, %v3697_v47  ;;  %v10493_v4 = vld [vmem:[%s11399_s19 + $0x2e0] ss:$24 sps:$4 sm:$0xff]   ;;  %v3704_v47 = vld [vmem:[%s12134_s24 + $0x48] sm:$0xff] }
 0x1e4   : > { %v10494_v8 = vld [vmem:[%s11399_s19 + $0x314] ss:$24 sps:$4 sm:$0xff]   ;;  %v3702_v49 = vld [vmem:[%s12134_s24 + $0x38] sm:$0xff]  ;;  %v3703_v13 = vld [vmem:[%s12134_s24 + $0x40] sm:$0xff] }
 0x1e5   : > { %14687 = vst [vmem:[#allocation28_spill] sm:$0xff] %v12151_v51  ;;  %3398 = vmatmul.mubr.bf16.gmra.mrb[172].mxu1 %v10487_v15  ;;  %3551 = vmatmul.mubr.bf16.gmra.mrb[120].mxu0 %v10490_v24  ;;  %v3761_v24 = vpack.c.bf16 %v3700_v25, %v3699_v19 }
 0x1e6   : > { %9584 = vmatprep.mubr.msk.bf16.mxu1 %vm3815_vm1, %v3759_v33  ;;  %3558 = vmatprep.mubr.bf16.mxu0 %v10491_v50 }
 0x1e8   : > { %v2998_v53 = vpop.f32.mrb[68].mxu1 }
 0x1e9   : > { %v12159_v28 = vadd.f32 %v11818_v41, %v2998_v53  ;;  %v3000_v23 = vpop.f32.mrb[69].mxu1  ;;  %v3701_v41 = vld [vmem:[%s12134_s24 + $0x30] sm:$0xff] }
 0x1ea   : > { %v3001_v15 = vpop.f32.mrb[70].mxu1  ;;  %v3762_v23 = vpack.c.bf16 %v3702_v49, %v3701_v41  ;;  %v3708_v49 = vld [vmem:[%s12134_s24 + $0x68] sm:$0xff] }
 0x1eb   : > { %v12164_v33 = vadd.f32 %v11826_v52, %v3001_v15  ;;  %v3003_v50 = vpop.f32.mrb[71].mxu1  ;;  %v10879_v52 = vld [vmem:[%s14648_s6 + $0x8] sm:$0xff]  }
 0x1ec   : > { %v10497_v50 = vld [vmem:[%s11399_s19 + $0x344] ss:$24 sps:$4 sm:$0xff]  }
 0x1ed   : > { %9585 = vmatmul.mubr.msk.bf16.vlgmr.msra.gmra.mrb[176].mxu1 %vm3815_vm1, %v3760_v57  ;;  %3559 = vmatmul.mubr.bf16.gmra.mrb[172].mxu0 %v10493_v4  ;;  %v10496_v57 = vld [vmem:[%s11399_s19 + $0x310] ss:$24 sps:$4 sm:$0xff]  }
 0x1ee   : > { %9588 = vmatprep.mubr.msk.bf16.mxu1 %vm3815_vm1, %v3761_v24  ;;  %3566 = vmatprep.mubr.bf16.mxu0 %v10494_v8  ;;  %v3763_v8 = vpack.c.bf16 %v3704_v47, %v3703_v13 }
 0x1ef   : > { %9649 = vmatpush3.bf16.msra.mxu1 %v11994_v31 }
 0x1f0   : > { %v3006_v48 = vpop.f32.mrb[72].mxu1  ;;  %v3223_v19 = vpop.f32.mrb[100].mxu0  ;;  %9650 = vmatprep.subr.bf16.mxu1 %v10879_v52 }
 0x1f1   : > { %v3008_v25 = vpop.f32.mrb[73].mxu1  ;;  %v3225_v53 = vpop.f32.mrb[101].mxu0  ;;  %v12178_v4 = vadd.f32 %v3223_v19, %v12029_v0  ;;  %v12181_v31 = vadd.f32 %v3006_v48, %v11839_v5  ;;  %v3705_v5 = vld [vmem:[%s12134_s24 + $0x50] sm:$0xff]  ;;  %v10499_v48 = vld [vmem:[%s11399_s19 + $0x340] ss:$24 sps:$4 sm:$0xff]  }
 0x1f2   : > { %v3009_v15 = vpop.f32.mrb[74].mxu1  ;;  %v3226_v24 = vpop.f32.mrb[102].mxu0  ;;  %v10500_v25 = vld [vmem:[%s11399_s19 + $0x374] ss:$24 sps:$4 sm:$0xff]  }
 0x1f3   : > { %14688 = vst [vmem:[#allocation29_spill] sm:$0xff] %v12181_v31  ;;  %v3228_v51 = vpop.f32.mrb[103].mxu0  ;;  %v3011_v9 = vpop.f32.mrb[75].mxu1  ;;  %9651 = vmatpush3.bf16.msra.mxu1 %v10879_v52  ;;  %v12185_v41 = vadd.f32 %v3226_v24, %v12036_v40  ;;  %v12188_v0 = vadd.f32 %v3009_v15, %v11849_v17  ;;  %v3711_v15 = vld [vmem:[%s12134_s24 + $0x80] sm:$0xff]  ;;  %v3712_v24 = vld [vmem:[%s12134_s24 + $0x88] sm:$0xff] }
 0x1f4   : > { %6154 = vmatprep.subr.bf16.mxu1 %v14682_v21  ;;  %v3706_v51 = vld [vmem:[%s12134_s24 + $0x58] sm:$0xff]  ;;  %v3707_v9 = vld [vmem:[%s12134_s24 + $0x60] sm:$0xff] }
 0x1f5   : > { %14689 = vst [vmem:[#allocation30_spill] sm:$0xff] %v12188_v0  ;;  %9589 = vmatmul.mubr.msk.bf16.gmra.mrb[180].mxu1 %vm3815_vm1, %v3762_v23  ;;  %3567 = vmatmul.mubr.bf16.gmra.mrb[128].mxu0 %v10496_v57  ;;  %v3764_v47 = vpack.c.bf16 %v3706_v51, %v3705_v5  ;;  %v3765_v52 = vpack.c.bf16 %v3708_v49, %v3707_v9  ;;  %v3710_v57 = vld [vmem:[%s12134_s24 + $0x78] sm:$0xff] }
 0x1f6   : > { %9592 = vmatprep.mubr.msk.bf16.mxu1 %vm3815_vm1, %v3763_v8  ;;  %3574 = vmatprep.mubr.bf16.mxu0 %v10497_v50  ;;  %v14701_v0 = vld [vmem:[#allocation24_spill] sm:$0xff] }
 0x1f8   : > { %v3014_v40 = vpop.f32.mrb[76].mxu1 }
 0x1f9   : > { %v12198_v17 = vadd.f32 %v11834_v62, %v3014_v40  ;;  %v3016_v13 = vpop.f32.mrb[77].mxu1  ;;  %v3709_v62 = vld [vmem:[%s12134_s24 + $0x70] sm:$0xff] }
 0x1fa   : > { %v3017_v19 = vpop.f32.mrb[78].mxu1  ;;  %v3766_v49 = vpack.c.bf16 %v3710_v57, %v3709_v62  ;;  %v10502_v40 = vld [vmem:[%s11399_s19 + $0x370] ss:$24 sps:$4 sm:$0xff]   ;;  %v3714_v62 = vld [vmem:[%s12134_s24 + $0x98] sm:$0xff]  ;;  %v3715_v57 = vld [vmem:[%s12134_s24 + $0xa0] sm:$0xff] }
 0x1fb   : > { %v12203_v53 = vadd.f32 %v11843_v10, %v3017_v19  ;;  %v3019_v23 = vpop.f32.mrb[79].mxu1  ;;  %v10503_v19 = vld [vmem:[%s11399_s19 + $0x3a4] ss:$24 sps:$4 sm:$0xff]  }
 0x1fc   : > { %v3713_v23 = vld [vmem:[%s12134_s24 + $0x90] sm:$0xff] }
 0x1fd   : > { %9593 = vmatmul.mubr.msk.bf16.gmra.mrb[184].mxu1 %vm3815_vm1, %v3764_v47  ;;  %3575 = vmatmul.mubr.bf16.gmra.mrb[176].mxu0 %v10499_v48  ;;  %v3767_v48 = vpack.c.bf16 %v3712_v24, %v3711_v15  ;;  %v3716_v15 = vld [vmem:[%s12134_s24 + $0xa8] sm:$0xff] }
 0x1fe   : > { %9596 = vmatprep.mubr.msk.bf16.mxu1 %vm3815_vm1, %v3765_v52  ;;  %3582 = vmatprep.mubr.bf16.mxu0 %v10500_v25 }
 0x200   : > { %v3022_v8 = vpop.f32.mrb[80].mxu1  ;;  %v3239_v50 = vpop.f32.mrb[108].mxu0 }
 0x201   : > { %v12212_v5 = vadd.f32 %v3022_v8, %v11861_v36  ;;  %v3024_v10 = vpop.f32.mrb[81].mxu1  ;;  %v12215_v51 = vadd.f32 %v3239_v50, %v12067_v7  ;;  %v3241_v9 = vpop.f32.mrb[109].mxu0  ;;  %v3768_v8 = vpack.c.bf16 %v3714_v62, %v3713_v23  ;;  %v10505_v50 = vld [vmem:[%s11399_s19 + $0x3a0] ss:$24 sps:$4 sm:$0xff]  }
 0x202   : > { %v3025_v13 = vpop.f32.mrb[82].mxu1  ;;  %v3242_v47 = vpop.f32.mrb[110].mxu0  ;;  %v3769_v9 = vpack.c.bf16 %v3716_v15, %v3715_v57  ;;  %v10508_v15 = vld [vmem:[%s11399_s19 + $0x3d0] ss:$24 sps:$4 sm:$0xff]  }
 0x203   : > { %v12220_v52 = vadd.f32 %v3025_v13, %v11875_v32  ;;  %v12223_v36 = vadd.f32 %v3242_v47, %v12074_v3  ;;  %v3244_v7 = vpop.f32.mrb[111].mxu0  ;;  %v3027_v25 = vpop.f32.mrb[83].mxu1  ;;  %v3718_v47 = vld [vmem:[%s12134_s24 + $0xb8] sm:$0xff] }
 0x205   : > { %9597 = vmatmul.mubr.msk.bf16.gmra.mrb[188].mxu1 %vm3815_vm1, %v3766_v49  ;;  %3583 = vmatmul.mubr.bf16.gmra.mrb[136].mxu0 %v10502_v40  ;;  %v10506_v49 = vld [vmem:[%s11399_s19 + $0x3d4] ss:$24 sps:$4 sm:$0xff]  }
 0x206   : > { %9600 = vmatprep.mubr.msk.bf16.mxu1 %vm3815_vm1, %v3767_v48  ;;  %3590 = vmatprep.mubr.bf16.mxu0 %v10503_v19  ;;  %v3719_v48 = vld [vmem:[%s12134_s24 + $0xc0] sm:$0xff]  ;;  %v3720_v19 = vld [vmem:[%s12134_s24 + $0xc8] sm:$0xff] }
 0x208   : > { %v3030_v32 = vpop.f32.mrb[84].mxu1 }
 0x209   : > { %v12232_v3 = vadd.f32 %v11856_v22, %v3030_v32  ;;  %v3032_v24 = vpop.f32.mrb[85].mxu1  ;;  %v3717_v22 = vld [vmem:[%s12134_s24 + $0xb0] sm:$0xff] }
 0x20a   : > { %v3033_v10 = vpop.f32.mrb[86].mxu1  ;;  %v3770_v57 = vpack.c.bf16 %v3718_v47, %v3717_v22  ;;  %v3722_v22 = vld [vmem:[%s12134_s24 + $0xd8] sm:$0xff]  ;;  %v3723_v47 = vld [vmem:[%s12134_s24 + $0xe0] sm:$0xff] }
 0x20b   : > { %v12237_v40 = vadd.f32 %v11865_v46, %v3033_v10  ;;  %v3035_v13 = vpop.f32.mrb[87].mxu1  ;;  %v10509_v10 = vld [vmem:[%s11399_s19 + $0x404] ss:$24 sps:$4 sm:$0xff]  }
 0x20d   : > { %9601 = vmatmul.mubr.msk.bf16.gmra.mrb[192].mxu1 %vm3815_vm1, %v3768_v8  ;;  %3591 = vmatmul.mubr.bf16.gmra.mrb[180].mxu0 %v10505_v50  ;;  %v3771_v50 = vpack.c.bf16 %v3720_v19, %v3719_v48  ;;  %v3724_v48 = vld [vmem:[%s12134_s24 + $0xe8] sm:$0xff] }
 0x20e   : > { %9604 = vmatprep.mubr.msk.bf16.mxu1 %vm3815_vm1, %v3769_v9  ;;  %3598 = vmatprep.mubr.bf16.mxu0 %v10506_v49 }
 0x210   : > { %v3038_v7 = vpop.f32.mrb[88].mxu1  ;;  %v3255_v25 = vpop.f32.mrb[116].mxu0 }
 0x211   : > { %v12246_v23 = vadd.f32 %v3038_v7, %v11887_v14  ;;  %v3040_v46 = vpop.f32.mrb[89].mxu1  ;;  %v3257_v62 = vpop.f32.mrb[117].mxu0  ;;  %v12250_v32 = vadd.f32 %v3255_v25, %v12093_v2  ;;  %v3721_v2 = vld [vmem:[%s12134_s24 + $0xd0] sm:$0xff]  ;;  %v10511_v25 = vld [vmem:[%s11399_s19 + $0x400] ss:$24 sps:$4 sm:$0xff]  }
 0x212   : > { %v3041_v24 = vpop.f32.mrb[90].mxu1  ;;  %v3258_v8 = vpop.f32.mrb[118].mxu0  ;;  %v3772_v7 = vpack.c.bf16 %v3722_v22, %v3721_v2  ;;  %v3773_v62 = vpack.c.bf16 %v3724_v48, %v3723_v47 }
 0x213   : > { %v12254_v9 = vadd.f32 %v3041_v24, %v11898_v39  ;;  %v3260_v14 = vpop.f32.mrb[119].mxu0  ;;  %v3043_v49 = vpop.f32.mrb[91].mxu1  ;;  %v12257_v13 = vadd.f32 %v3258_v8, %v12100_v60  ;;  %v3726_v8 = vld [vmem:[%s12134_s24 + $0xf8] sm:$0xff] }
 0x215   : > { %9605 = vmatmul.mubr.msk.bf16.gmra.mrb[196].mxu1 %vm3815_vm1, %v3770_v57  ;;  %3599 = vmatmul.mubr.bf16.gmra.mrb[184].mxu0 %v10508_v15  ;;  %v10512_v57 = vld [vmem:[%s11399_s19 + $0x434] ss:$24 sps:$4 sm:$0xff]  }
 0x216   : > { %9608 = vmatprep.mubr.msk.bf16.mxu1 %vm3815_vm1, %v3771_v50  ;;  %3606 = vmatprep.mubr.bf16.mxu0 %v10509_v10  ;;  %v3727_v50 = vld [vmem:[%s12134_s24 + $0x100] sm:$0xff]  ;;  %v3728_v10 = vld [vmem:[%s12134_s24 + $0x108] sm:$0xff] }
 0x218   : > { %v3046_v39 = vpop.f32.mrb[92].mxu1 }
 0x219   : > { %v12266_v19 = vadd.f32 %v11881_v27, %v3046_v39  ;;  %v3048_v60 = vpop.f32.mrb[93].mxu1  ;;  %v3725_v27 = vld [vmem:[%s12134_s24 + $0xf0] sm:$0xff] }
 0x21a   : > { %v3049_v46 = vpop.f32.mrb[94].mxu1  ;;  %v3774_v48 = vpack.c.bf16 %v3726_v8, %v3725_v27  ;;  %v10514_v39 = vld [vmem:[%s11399_s19 + $0x430] ss:$24 sps:$4 sm:$0xff]   ;;  %v3730_v27 = vld [vmem:[%s12134_s24 + $0x118] sm:$0xff]  ;;  %v3731_v8 = vld [vmem:[%s12134_s24 + $0x120] sm:$0xff] }
 0x21b   : > { %v12271_v15 = vadd.f32 %v11891_v37, %v3049_v46  ;;  %v3051_v24 = vpop.f32.mrb[95].mxu1  ;;  %v10515_v46 = vld [vmem:[%s11399_s19 + $0x464] ss:$24 sps:$4 sm:$0xff]  }
 0x21c   : > { %v3729_v24 = vld [vmem:[%s12134_s24 + $0x110] sm:$0xff] }
 0x21d   : > { %9609 = vmatmul.mubr.msk.bf16.gmra.mrb[200].mxu1 %vm3815_vm1, %v3772_v7  ;;  %3607 = vmatmul.mubr.bf16.gmra.mrb[188].mxu0 %v10511_v25  ;;  %v3775_v25 = vpack.c.bf16 %v3728_v10, %v3727_v50  ;;  %v3732_v50 = vld [vmem:[%s12134_s24 + $0x128] sm:$0xff] }
 0x21e   : > { %9612 = vmatprep.mubr.msk.bf16.mxu1 %vm3815_vm1, %v3773_v62  ;;  %3614 = vmatprep.mubr.bf16.mxu0 %v10512_v57 }
 0x220   : > { %v3054_v14 = vpop.f32.mrb[96].mxu1  ;;  %v3271_v49 = vpop.f32.mrb[124].mxu0 }
 0x221   : > { %v12280_v2 = vadd.f32 %v3054_v14, %v11913_v35  ;;  %v3056_v37 = vpop.f32.mrb[97].mxu1  ;;  %v12283_v22 = vadd.f32 %v3271_v49, %v12119_v26  ;;  %v3273_v47 = vpop.f32.mrb[125].mxu0  ;;  %v3776_v14 = vpack.c.bf16 %v3730_v27, %v3729_v24  ;;  %v10517_v49 = vld [vmem:[%s11399_s19 + $0x460] ss:$24 sps:$4 sm:$0xff]  }
 0x222   : > { %v3057_v60 = vpop.f32.mrb[98].mxu1  ;;  %v3274_v7 = vpop.f32.mrb[126].mxu0  ;;  %v3777_v47 = vpack.c.bf16 %v3732_v50, %v3731_v8  ;;  %v10520_v50 = vld [vmem:[%s11399_s19 + $0x490] ss:$24 sps:$4 sm:$0xff]  }
 0x223   : > { %v12288_v62 = vadd.f32 %v3057_v60, %v11924_v42  ;;  %v12291_v35 = vadd.f32 %v3274_v7, %v12127_v29  ;;  %v3276_v26 = vpop.f32.mrb[127].mxu0  ;;  %v3059_v57 = vpop.f32.mrb[99].mxu1  ;;  %v3734_v7 = vld [vmem:[%s12134_s24 + $0x138] sm:$0xff] }
 0x225   : > { %14690 = vst [vmem:[#allocation31_spill] sm:$0xff] %v12291_v35  ;;  %9613 = vmatmul.mubr.msk.bf16.gmra.mrb[204].mxu1 %vm3815_vm1, %v3774_v48  ;;  %3615 = vmatmul.mubr.bf16.gmra.mrb[192].mxu0 %v10514_v39  ;;  %v10518_v48 = vld [vmem:[%s11399_s19 + $0x494] ss:$24 sps:$4 sm:$0xff]   ;;  %v14705_v35 = vld [vmem:[#allocation12_spill] sm:$0xff] }
 0x226   : > { %9616 = vmatprep.mubr.msk.bf16.mxu1 %vm3815_vm1, %v3775_v25  ;;  %3622 = vmatprep.mubr.bf16.mxu0 %v10515_v46  ;;  %v3735_v25 = vld [vmem:[%s12134_s24 + $0x140] sm:$0xff]  ;;  %v3736_v46 = vld [vmem:[%s12134_s24 + $0x148] sm:$0xff] }
 0x228   : > { %v3062_v42 = vpop.f32.mrb[100].mxu1 }
 0x229   : > { %v12300_v29 = vadd.f32 %v11907_v54, %v3062_v42  ;;  %v3064_v10 = vpop.f32.mrb[101].mxu1  ;;  %v3733_v54 = vld [vmem:[%s12134_s24 + $0x130] sm:$0xff] }
 0x22a   : > { %v3065_v37 = vpop.f32.mrb[102].mxu1  ;;  %v3778_v8 = vpack.c.bf16 %v3734_v7, %v3733_v54  ;;  %v3738_v54 = vld [vmem:[%s12134_s24 + $0x158] sm:$0xff]  ;;  %v3739_v7 = vld [vmem:[%s12134_s24 + $0x160] sm:$0xff] }
 0x22b   : > { %v12305_v39 = vadd.f32 %v11917_v34, %v3065_v37  ;;  %v3067_v60 = vpop.f32.mrb[103].mxu1  ;;  %v10521_v37 = vld [vmem:[%s11399_s19 + $0x4c4] ss:$24 sps:$4 sm:$0xff]  }
 0x22d   : > { %9617 = vmatmul.mubr.msk.bf16.gmra.mrb[208].mxu1 %vm3815_vm1, %v3776_v14  ;;  %3623 = vmatmul.mubr.bf16.gmra.mrb[196].mxu0 %v10517_v49  ;;  %v3779_v49 = vpack.c.bf16 %v3736_v46, %v3735_v25  ;;  %v3740_v25 = vld [vmem:[%s12134_s24 + $0x168] sm:$0xff] }
 0x22e   : > { %9620 = vmatprep.mubr.msk.bf16.mxu1 %vm3815_vm1, %v3777_v47  ;;  %3630 = vmatprep.mubr.bf16.mxu0 %v10518_v48 }
 0x230   : > { %v3070_v26 = vpop.f32.mrb[104].mxu1  ;;  %v3287_v57 = vpop.f32.mrb[132].mxu0 }
 0x231   : > { %v12314_v24 = vadd.f32 %v3070_v26, %v11946_v30  ;;  %v3072_v34 = vpop.f32.mrb[105].mxu1  ;;  %v3289_v27 = vpop.f32.mrb[133].mxu0  ;;  %v12318_v42 = vadd.f32 %v3287_v57, %v12159_v28  ;;  %v3737_v28 = vld [vmem:[%s12134_s24 + $0x150] sm:$0xff]  ;;  %v10523_v57 = vld [vmem:[%s11399_s19 + $0x4c0] ss:$24 sps:$4 sm:$0xff]  }
 0x232   : > { %v3073_v10 = vpop.f32.mrb[106].mxu1  ;;  %v3290_v14 = vpop.f32.mrb[134].mxu0  ;;  %v3780_v26 = vpack.c.bf16 %v3738_v54, %v3737_v28  ;;  %v3781_v27 = vpack.c.bf16 %v3740_v25, %v3739_v7  ;;  %v10526_v25 = vld [vmem:[%s11399_s19 + $0x4f0] ss:$24 sps:$4 sm:$0xff]  }
 0x233   : > { %14691 = vst [vmem:[#allocation32_spill] sm:$0xff] %v12318_v42  ;;  %v12322_v47 = vadd.f32 %v3073_v10, %v11957_v63  ;;  %v3292_v30 = vpop.f32.mrb[135].mxu0  ;;  %v3075_v48 = vpop.f32.mrb[107].mxu1  ;;  %v12325_v60 = vadd.f32 %v3290_v14, %v12164_v33  ;;  %v3742_v14 = vld [vmem:[%s12134_s24 + $0x178] sm:$0xff]  ;;  %v14704_v42 = vld [vmem:[#allocation22_spill] sm:$0xff] }
 0x235   : > { %14692 = vst [vmem:[#allocation33_spill] sm:$0xff] %v12325_v60  ;;  %9621 = vmatmul.mubr.msk.bf16.gmra.mrb[212].mxu1 %vm3815_vm1, %v3778_v8  ;;  %3631 = vmatmul.mubr.bf16.gmra.mrb[200].mxu0 %v10520_v50  ;;  %v10524_v8 = vld [vmem:[%s11399_s19 + $0x4f4] ss:$24 sps:$4 sm:$0xff]  }
 0x236   : > { %9624 = vmatprep.mubr.msk.bf16.mxu1 %vm3815_vm1, %v3779_v49  ;;  %3638 = vmatprep.mubr.bf16.mxu0 %v10521_v37  ;;  %v3743_v49 = vld [vmem:[%s12134_s24 + $0x180] sm:$0xff]  ;;  %v3744_v37 = vld [vmem:[%s12134_s24 + $0x188] sm:$0xff] }
 0x237   : > { %v10536_v60 = vld [vmem:[%s11399_s19 + $0x5b4] ss:$24 sps:$4 sm:$0xff]  }
 0x238   : > { %v3078_v63 = vpop.f32.mrb[108].mxu1 }
 0x239   : > { %v12334_v46 = vadd.f32 %v11937_v20, %v3078_v63  ;;  %v3080_v33 = vpop.f32.mrb[109].mxu1  ;;  %v3741_v20 = vld [vmem:[%s12134_s24 + $0x170] sm:$0xff] }
 0x23a   : > { %v3081_v34 = vpop.f32.mrb[110].mxu1  ;;  %v3782_v7 = vpack.c.bf16 %v3742_v14, %v3741_v20  ;;  %v3746_v20 = vld [vmem:[%s12134_s24 + $0x198] sm:$0xff]  ;;  %v3747_v14 = vld [vmem:[%s12134_s24 + $0x1a0] sm:$0xff] }
 0x23b   : > { %v12339_v50 = vadd.f32 %v11950_v43, %v3081_v34  ;;  %v3083_v10 = vpop.f32.mrb[111].mxu1  ;;  %v10527_v34 = vld [vmem:[%s11399_s19 + $0x524] ss:$24 sps:$4 sm:$0xff]  }
 0x23d   : > { %9625 = vmatmul.mubr.msk.bf16.gmra.mrb[216].mxu1 %vm3815_vm1, %v3780_v26  ;;  %3639 = vmatmul.mubr.bf16.gmra.mrb[204].mxu0 %v10523_v57  ;;  %v3783_v57 = vpack.c.bf16 %v3744_v37, %v3743_v49  ;;  %v3748_v49 = vld [vmem:[%s12134_s24 + $0x1a8] sm:$0xff] }
 0x23e   : > { %9628 = vmatprep.mubr.msk.bf16.mxu1 %vm3815_vm1, %v3781_v27  ;;  %3646 = vmatprep.mubr.bf16.mxu0 %v10524_v8 }
 0x240   : > { %v3086_v30 = vpop.f32.mrb[112].mxu1  ;;  %v3303_v48 = vpop.f32.mrb[140].mxu0 }
 0x241   : > { %v12348_v28 = vadd.f32 %v3086_v30, %v11975_v38  ;;  %v3088_v43 = vpop.f32.mrb[113].mxu1  ;;  %v3305_v54 = vpop.f32.mrb[141].mxu0  ;;  %v12352_v63 = vadd.f32 %v3303_v48, %v12198_v17  ;;  %v3745_v17 = vld [vmem:[%s12134_s24 + $0x190] sm:$0xff]  ;;  %v14695_v30 = vld [vmem:[#allocation17_spill] sm:$0xff] }
 0x242   : > { %v3089_v33 = vpop.f32.mrb[114].mxu1  ;;  %v3306_v26 = vpop.f32.mrb[142].mxu0 }
 0x243   : > { %14693 = vst [vmem:[#allocation34_spill] sm:$0xff] %v12352_v63  ;;  %v12356_v27 = vadd.f32 %v3089_v33, %v11986_v18  ;;  %v3308_v38 = vpop.f32.mrb[143].mxu0  ;;  %v3091_v8 = vpop.f32.mrb[115].mxu1  ;;  %v12359_v10 = vadd.f32 %v3306_v26, %v12203_v53  ;;  %v14696_v53 = vld [vmem:[#allocation9_spill] sm:$0xff] }
 0x244   : > { %v10529_v33 = vld [vmem:[%s11399_s19 + $0x520] ss:$24 sps:$4 sm:$0xff]   ;;  %v10530_v38 = vld [vmem:[%s11399_s19 + $0x554] ss:$24 sps:$4 sm:$0xff]   ;;  %v10533_v63 = vld [vmem:[%s11399_s19 + $0x584] ss:$24 sps:$4 sm:$0xff]  }
 0x245   : > { %14694 = vst [vmem:[#allocation35_spill] sm:$0xff] %v12359_v10  ;;  %9629 = vmatmul.mubr.msk.bf16.gmra.mrb[220].mxu1 %vm3815_vm1, %v3782_v7  ;;  %3647 = vmatmul.mubr.bf16.gmra.mrb[208].mxu0 %v10526_v25  ;;  %v3784_v25 = vpack.c.bf16 %v3746_v20, %v3745_v17  ;;  %v14697_v8 = vld [vmem:[#allocation18_spill] sm:$0xff]  ;;  %v3749_v17 = vld [vmem:[%s12134_s24 + $0x1b0] sm:$0xff]  ;;  %v3750_v20 = vld [vmem:[%s12134_s24 + $0x1b8] sm:$0xff] }
 0x246   : > { %9632 = vmatprep.mubr.msk.bf16.mxu1 %vm3815_vm1, %v3783_v57  ;;  %3654 = vmatprep.mubr.bf16.mxu0 %v10527_v34  ;;  %v3785_v34 = vpack.c.bf16 %v3748_v49, %v3747_v14  ;;  %v3751_v14 = vld [vmem:[%s12134_s24 + $0x1c0] sm:$0xff]  ;;  %v3752_v49 = vld [vmem:[%s12134_s24 + $0x1c8] sm:$0xff] }
 0x248   : > { %v3094_v37 = vpop.f32.mrb[116].mxu1  ;;  %v3440_v18 = vpop.f32.mrb[64].mxu0 }
 0x249   : > { %v12368_v48 = vadd.f32 %v14695_v30, %v3094_v37  ;;  %v3096_v43 = vpop.f32.mrb[117].mxu1  ;;  %v12371_v54 = vadd.f32 %v3440_v18, %v14696_v53  ;;  %v3442_v7 = vpop.f32.mrb[65].mxu0  ;;  %v14698_v37 = vld [vmem:[#allocation10_spill] sm:$0xff] }
 0x24a   : > { %v3097_v26 = vpop.f32.mrb[118].mxu1  ;;  %v3443_v57 = vpop.f32.mrb[66].mxu0 }
 0x24b   : > { %v12376_v10 = vadd.f32 %v14697_v8, %v3097_v26  ;;  %v12379_v30 = vadd.f32 %v3443_v57, %v14698_v37  ;;  %v3445_v43 = vpop.f32.mrb[67].mxu0  ;;  %v3099_v18 = vpop.f32.mrb[119].mxu1  ;;  %v14700_v26 = vld [vmem:[#allocation21_spill] sm:$0xff] }
 0x24c   : > { %v3787_v18 = vpack.c.bf16 %v3752_v49, %v3751_v14  ;;  %v3755_v14 = vld [vmem:[%s12134_s24 + $0x1e0] sm:$0xff]  ;;  %v3756_v49 = vld [vmem:[%s12134_s24 + $0x1e8] sm:$0xff] }
 0x24d   : > { %14699 = vst [vmem:[#allocation17_spill] sm:$0xff] %v12379_v30  ;;  %9633 = vmatmul.mubr.msk.bf16.gmra.mrb[224].mxu1 %vm3815_vm1, %v3784_v25  ;;  %3655 = vmatmul.mubr.bf16.gmra.mrb[212].mxu0 %v10529_v33  ;;  %v3786_v33 = vpack.c.bf16 %v3750_v20, %v3749_v17  ;;  %v3753_v17 = vld [vmem:[%s12134_s24 + $0x1d0] sm:$0xff]  ;;  %v3754_v20 = vld [vmem:[%s12134_s24 + $0x1d8] sm:$0xff] }
 0x24e   : > { %9636 = vmatprep.mubr.msk.bf16.mxu1 %vm3815_vm1, %v3785_v34  ;;  %3662 = vmatprep.mubr.bf16.mxu0 %v10530_v38  ;;  %v10532_v34 = vld [vmem:[%s11399_s19 + $0x550] ss:$24 sps:$4 sm:$0xff]  }
 0x250   : > { %v3102_v53 = vpop.f32.mrb[120].mxu1  ;;  %v3448_v7 = vpop.f32.mrb[144].mxu0 }
 0x251   : > { %v12388_v8 = vadd.f32 %v3102_v53, %v14700_v26  ;;  %v3104_v57 = vpop.f32.mrb[121].mxu1  ;;  %v12391_v37 = vadd.f32 %v3448_v7, %v12052_v16  ;;  %v3450_v25 = vpop.f32.mrb[145].mxu0 }
 0x252   : > { %v3105_v38 = vpop.f32.mrb[122].mxu1  ;;  %v3451_v43 = vpop.f32.mrb[146].mxu0  ;;  %v14702_v57 = vld [vmem:[#allocation19_spill] sm:$0xff] }
 0x253   : > { %v12396_v31 = vadd.f32 %v3105_v38, %v14701_v0  ;;  %v12399_v53 = vadd.f32 %v3451_v43, %v12060_v59  ;;  %v3453_v26 = vpop.f32.mrb[147].mxu0  ;;  %v3107_v16 = vpop.f32.mrb[123].mxu1  ;;  %v14703_v38 = vld [vmem:[#allocation11_spill] sm:$0xff] }
 0x254   : > { %v3789_v16 = vpack.c.bf16 %v3756_v49, %v3755_v14 }
 0x255   : > { %9637 = vmatmul.mubr.msk.bf16.gmra.mrb[228].mxu1 %vm3815_vm1, %v3786_v33  ;;  %3663 = vmatmul.mubr.bf16.gmra.mrb[216].mxu0 %v10532_v34  ;;  %v3788_v34 = vpack.c.bf16 %v3754_v20, %v3753_v17  ;;  %v3757_v17 = vld [vmem:[%s12134_s24 + $0x1f0] sm:$0xff]  ;;  %v3758_v20 = vld [vmem:[%s12134_s24 + $0x1f8] sm:$0xff]  ;;  %s12796_s24 = scalar_lea.vmem [#allocation4], %s8687_s13  }
 0x256   : > { %9640 = vmatprep.mubr.msk.bf16.mxu1 %vm3815_vm1, %v3787_v18  ;;  %3670 = vmatprep.mubr.bf16.mxu0 %v10533_v63  ;;  %v10535_v18 = vld [vmem:[%s11399_s19 + $0x580] ss:$24 sps:$4 sm:$0xff]  }
 0x258   : > { %v3110_v7 = vpop.f32.mrb[124].mxu1  ;;  %v3456_v0 = vpop.f32.mrb[72].mxu0 }
 0x259   : > { %v12408_v25 = vadd.f32 %v14702_v57, %v3110_v7  ;;  %v3112_v59 = vpop.f32.mrb[125].mxu1  ;;  %v12411_v43 = vadd.f32 %v3456_v0, %v14703_v38  ;;  %v3458_v33 = vpop.f32.mrb[73].mxu0  ;;  %v3790_v38 = vpack.c.bf16 %v3758_v20, %v3757_v17 }
 0x25a   : > { %v3113_v63 = vpop.f32.mrb[126].mxu1  ;;  %v3459_v26 = vpop.f32.mrb[74].mxu0  ;;  %v10538_v33 = vld [vmem:[%s11399_s19 + $0x5b0] ss:$24 sps:$4 sm:$0xff]  }
 0x25b   : > { %v12416_v30 = vadd.f32 %v14704_v42, %v3113_v63  ;;  %v12419_v7 = vadd.f32 %v3459_v26, %v14705_v35  ;;  %v3461_v57 = vpop.f32.mrb[75].mxu0  ;;  %v3115_v59 = vpop.f32.mrb[127].mxu1  ;;  %v10539_v26 = vld [vmem:[%s11672_s29] sm:$0xff]  }
 0x25d   : > { %9641 = vmatmul.mubr.msk.bf16.gmra.mrb[232].mxu1 %vm3815_vm1, %v3788_v34  ;;  %3671 = vmatmul.mubr.bf16.gmra.mrb[220].mxu0 %v10535_v18 }
 0x25e   : > { %9644 = vmatprep.mubr.msk.bf16.mxu1 %vm3815_vm1, %v3789_v16  ;;  %3678 = vmatprep.mubr.bf16.mxu0 %v10536_v60  ;;  %v10540_v60 = vld [vmem:[%s11399_s19 + $0x5e4] ss:$24 sps:$4 sm:$0xff]  }
 0x260   : > { %v3311_v14 = vpop.f32.mrb[128].mxu1  ;;  %v3464_v49 = vpop.f32.mrb[148].mxu0 }
 0x261   : > { %v3313_v42 = vpop.f32.mrb[129].mxu1  ;;  %v12426_v0 = vadd.f32 %v3464_v49, %v12080_v44  ;;  %v3466_v35 = vpop.f32.mrb[149].mxu0  ;;  %v12430_v63 = vadd.f32 %v3311_v14, %v12212_v5  ;;  %v14706_v14 = vld [vmem:[#allocation13_spill] sm:$0xff] }
 0x262   : > { %v3314_v34 = vpop.f32.mrb[130].mxu1  ;;  %v3467_v18 = vpop.f32.mrb[150].mxu0  ;;  %v10542_v42 = vld [vmem:[%s11672_s29 + $0x8] sm:$0xff]   ;;  %v10543_v35 = vld [vmem:[%s11399_s19 + $0x5e0] ss:$24 sps:$4 sm:$0xff]  }
 0x263   : > { %v12435_v16 = vadd.f32 %v3467_v18, %v12090_v11  ;;  %v3469_v57 = vpop.f32.mrb[151].mxu0  ;;  %v3316_v59 = vpop.f32.mrb[131].mxu1  ;;  %v12438_v44 = vadd.f32 %v3314_v34, %v12220_v52 }
 0x264   : > { %v10544_v57 = vld [vmem:[%s11672_s29 + $0x10] sm:$0xff]  }
 0x265   : > { %9645 = vmatmul.mubr.msk.bf16.gmra.mrb[236].mxu1 %vm3815_vm1, %v3790_v38  ;;  %3679 = vmatmul.mubr.bf16.gmra.mrb[224].mxu0 %v10538_v33  ;;  %v10548_v38 = vld [vmem:[%s11267_s17 + $0xc] ss:$24 sps:$4 sm:$0xff]  }
 0x266   : > { %9652 = vmatprep.mubr.msk.bf16.mxu1 %vm1194_vm0, %v10539_v26  ;;  %3686 = vmatprep.mubr.bf16.mxu0 %v10540_v60  ;;  %v14707_v33 = vld [vmem:[#allocation14_spill] sm:$0xff] }
 0x268   : > { %v3319_v5 = vpop.f32.mrb[132].mxu1  ;;  %v3472_v17 = vpop.f32.mrb[80].mxu0 }
 0x269   : > { %v3321_v20 = vpop.f32.mrb[133].mxu1  ;;  %v12443_v49 = vadd.f32 %v3472_v17, %v14706_v14  ;;  %v3474_v11 = vpop.f32.mrb[81].mxu0  ;;  %v12448_v18 = vadd.f32 %v3319_v5, %v12232_v3  ;;  %v10880_v3 = vld [vmem:[%s14649_s7] sm:$0xff]  }
 0x26a   : > { %v3322_v52 = vpop.f32.mrb[134].mxu1  ;;  %v3475_v34 = vpop.f32.mrb[82].mxu0 }
 0x26b   : > { %v12453_v59 = vadd.f32 %v3475_v34, %v14707_v33  ;;  %v3477_v26 = vpop.f32.mrb[83].mxu0  ;;  %v3324_v60 = vpop.f32.mrb[135].mxu1  ;;  %v12456_v17 = vadd.f32 %v3322_v52, %v12237_v40 }
 0x26d   : > { %9653 = vmatmul.mubr.msk.bf16.vlgmr.msra.gmra.mrb[240].mxu1 %vm1194_vm0, %v10542_v42  ;;  %3687 = vmatmul.mubr.bf16.gmra.mrb[228].mxu0 %v10543_v35  ;;  %v10545_v42 = vld [vmem:[%s11672_s29 + $0x18] sm:$0xff]   ;;  %v10546_v35 = vld [vmem:[%s11267_s17 + $0x8] ss:$24 sps:$4 sm:$0xff]  }
 0x26e   : > { %9656 = vmatprep.mubr.msk.bf16.mxu1 %vm1194_vm0, %v10544_v57  ;;  %6475 = vmatprep.mubr.bf16.mxu0 %v10548_v38  ;;  %v10549_v38 = vld [vmem:[%s11672_s29 + $0x20] sm:$0xff]  }
 0x26f   : > { %6155 = vmatpush1.bf16.msra.mxu1 %v10880_v3  ;;  %v10551_v3 = vld [vmem:[%s11267_s17 + $0x3c] ss:$24 sps:$4 sm:$0xff]  }
 0x270   : > { %v3327_v5 = vpop.f32.mrb[136].mxu1  ;;  %v3480_v20 = vpop.f32.mrb[152].mxu0  ;;  %6156 = vmatprep.subr.bf16.mxu1 %v14682_v21 }
 0x271   : > { %v3329_v14 = vpop.f32.mrb[137].mxu1  ;;  %v12465_v40 = vadd.f32 %v3480_v20, %v12108_v1  ;;  %v3482_v11 = vpop.f32.mrb[153].mxu0  ;;  %v12470_v52 = vadd.f32 %v3327_v5, %v12246_v23  ;;  %v10881_v1 = vld [vmem:[%s14649_s7 + $0x8] sm:$0xff]   ;;  %v10883_v5 = vld [vmem:[%s14649_s7 + $0x10] sm:$0xff]  }
 0x272   : > { %v3330_v34 = vpop.f32.mrb[138].mxu1  ;;  %v3483_v57 = vpop.f32.mrb[154].mxu0  ;;  %v14708_v11 = vld [vmem:[#allocation15_spill] sm:$0xff] }
 0x273   : > { %v12474_v33 = vadd.f32 %v3483_v57, %v12116_v55  ;;  %v3485_v26 = vpop.f32.mrb[155].mxu0  ;;  %v3332_v60 = vpop.f32.mrb[139].mxu1  ;;  %6157 = vmatpush1.bf16.msra.mxu1 %v10881_v1  ;;  %v12481_v20 = vadd.f32 %v3330_v34, %v12254_v9  ;;  %v10882_v55 = vld [vmem:[%s14649_s7 + $0x100] sm:$0xff]   ;;  %v10550_v34 = vld [vmem:[%s11672_s29 + $0x28] sm:$0xff]   ;;  %v10553_v57 = vld [vmem:[%s11267_s17 + $0x38] ss:$24 sps:$4 sm:$0xff]  }
 0x274   : > { %6158 = vmatprep.subr.bf16.mxu1 %v14682_v21  ;;  %v10556_v1 = vld [vmem:[%s11267_s17 + $0x6c] ss:$24 sps:$4 sm:$0xff]  }
 0x275   : > { %9657 = vmatmul.mubr.msk.bf16.gmra.mrb[244].mxu1 %vm1194_vm0, %v10545_v42  ;;  %6476 = vmatmul.mubr.bf16.vlgmr.msra.gmra.mrb[232].mxu0 %v10546_v35 }
 0x276   : > { %6733 = vmatpush1.bf16.msra.mxu0 %v10882_v55  ;;  %9660 = vmatprep.mubr.msk.bf16.mxu1 %vm1194_vm0, %v10549_v38  ;;  %v10884_v55 = vld [vmem:[%s14649_s7 + $0x108] sm:$0xff]  }
 0x277   : > { %6483 = vmatprep.mubr.bf16.mxu0 %v10551_v3  ;;  %6734 = vmatprep.subr.bf16.mxu0 %v14682_v21  ;;  %v10554_v3 = vld [vmem:[%s11672_s29 + $0x30] sm:$0xff]  }
 0x278   : > { %v3335_v23 = vpop.f32.mrb[140].mxu1  ;;  %v3488_v9 = vpop.f32.mrb[88].mxu0  ;;  %6159 = vmatpush1.bf16.msra.mxu1 %v10883_v5  ;;  %v14709_v5 = vld [vmem:[#allocation16_spill] sm:$0xff] }
 0x279   : > { %v3337_v14 = vpop.f32.mrb[141].mxu1  ;;  %v12494_v42 = vadd.f32 %v3488_v9, %v14708_v11  ;;  %v3490_v35 = vpop.f32.mrb[89].mxu0  ;;  %6160 = vmatprep.subr.bf16.mxu1 %v14682_v21  ;;  %v12500_v38 = vadd.f32 %v3335_v23, %v12266_v19  ;;  %v10885_v19 = vld [vmem:[%s14649_s7 + $0x18] sm:$0xff]  }
 0x27a   : > { %v3338_v26 = vpop.f32.mrb[142].mxu1  ;;  %v3491_v60 = vpop.f32.mrb[90].mxu0  ;;  %6735 = vmatpush1.bf16.msra.mxu0 %v10884_v55  ;;  %v10558_v55 = vld [vmem:[%s11267_s17 + $0x68] ss:$24 sps:$4 sm:$0xff]  }
 0x27b   : > { %v12508_v9 = vadd.f32 %v3491_v60, %v14709_v5  ;;  %v3493_v14 = vpop.f32.mrb[91].mxu0  ;;  %v3340_v11 = vpop.f32.mrb[143].mxu1  ;;  %6736 = vmatprep.subr.bf16.mxu0 %v14682_v21  ;;  %v12512_v35 = vadd.f32 %v3338_v26, %v12271_v15  ;;  %v10886_v15 = vld [vmem:[%s14649_s7 + $0x110] sm:$0xff]  }
 0x27c   : > { %6161 = vmatpush1.bf16.msra.mxu1 %v10885_v19  ;;  %v10559_v19 = vld [vmem:[%s11672_s29 + $0x40] sm:$0xff]  }
 0x27d   : > { %14710 = vst [vmem:[#allocation9_spill] sm:$0xff] %v12512_v35  ;;  %9661 = vmatmul.mubr.msk.bf16.gmra.mrb[248].mxu1 %vm1194_vm0, %v10550_v34  ;;  %6484 = vmatmul.mubr.bf16.gmra.mrb[236].mxu0 %v10553_v57  ;;  %v10887_v34 = vld [vmem:[%s14649_s7 + $0x20] sm:$0xff]  }
 0x27e   : > { %9664 = vmatprep.mubr.msk.bf16.mxu1 %vm1194_vm0, %v10554_v3  ;;  %6491 = vmatprep.mubr.bf16.mxu0 %v10556_v1  ;;  %v10555_v1 = vld [vmem:[%s11672_s29 + $0x38] sm:$0xff]  }
 0x27f   : > { %6162 = vmatprep.subr.bf16.mxu1 %v14682_v21  ;;  %6737 = vmatpush1.bf16.msra.mxu0 %v10886_v15  ;;  %v10561_v15 = vld [vmem:[%s11267_s17 + $0x9c] ss:$24 sps:$4 sm:$0xff]  }
 0x280   : > { %v3343_v23 = vpop.f32.mrb[144].mxu1  ;;  %v3496_v26 = vpop.f32.mrb[156].mxu0  ;;  %6163 = vmatpush1.bf16.msra.mxu1 %v10887_v34  ;;  %6738 = vmatprep.subr.bf16.mxu0 %v14682_v21 }
 0x281   : > { %v3345_v57 = vpop.f32.mrb[145].mxu1  ;;  %v12528_v60 = vadd.f32 %v3496_v26, %v12139_v6  ;;  %v3498_v3 = vpop.f32.mrb[157].mxu0  ;;  %6164 = vmatprep.subr.bf16.mxu1 %v14682_v21  ;;  %v12534_v5 = vadd.f32 %v3343_v23, %v12280_v2  ;;  %v10888_v6 = vld [vmem:[%s14649_s7 + $0x118] sm:$0xff]   ;;  %v10889_v2 = vld [vmem:[%s14649_s7 + $0x28] sm:$0xff]   ;;  %v10891_v23 = vld [vmem:[%s14649_s7 + $0x30] sm:$0xff]  }
 0x282   : > { %v3346_v14 = vpop.f32.mrb[146].mxu1  ;;  %v3499_v11 = vpop.f32.mrb[158].mxu0 }
 0x283   : > { %14711 = vst [vmem:[#allocation18_spill] sm:$0xff] %v12534_v5  ;;  %v12539_v34 = vadd.f32 %v3499_v11, %v12148_v12  ;;  %v3501_v35 = vpop.f32.mrb[159].mxu0  ;;  %v3348_v57 = vpop.f32.mrb[147].mxu1  ;;  %6739 = vmatpush1.bf16.msra.mxu0 %v10888_v6  ;;  %v12545_v26 = vadd.f32 %v3346_v14, %v12288_v62  ;;  %v10890_v12 = vld [vmem:[%s14649_s7 + $0x120] sm:$0xff]   ;;  %v10560_v11 = vld [vmem:[%s11672_s29 + $0x48] sm:$0xff]  }
 0x284   : > { %6165 = vmatpush1.bf16.msra.mxu1 %v10889_v2  ;;  %6740 = vmatprep.subr.bf16.mxu0 %v14682_v21  ;;  %v10564_v2 = vld [vmem:[%s11672_s29 + $0x50] sm:$0xff]  }
 0x285   : > { %14712 = vst [vmem:[#allocation10_spill] sm:$0xff] %v12545_v26  ;;  %9665 = vmatmul.mubr.msk.bf16.gmra.mrb[252].mxu1 %vm1194_vm0, %v10555_v1  ;;  %6492 = vmatmul.mubr.bf16.gmra.mrb[240].mxu0 %v10558_v55  ;;  %v14713_v1 = vld [vmem:[#allocation20_spill] sm:$0xff]  ;;  %v14714_v26 = vld [vmem:[#allocation23_spill] sm:$0xff] }
 0x286   : > { %9668 = vmatprep.mubr.msk.bf16.mxu1 %vm1194_vm0, %v10559_v19  ;;  %6499 = vmatprep.mubr.bf16.mxu0 %v10561_v15  ;;  %v10563_v19 = vld [vmem:[%s11267_s17 + $0x98] ss:$24 sps:$4 sm:$0xff]  }
 0x287   : > { %6166 = vmatprep.subr.bf16.mxu1 %v14682_v21  ;;  %6741 = vmatpush1.bf16.msra.mxu0 %v10890_v12  ;;  %v10566_v12 = vld [vmem:[%s11267_s17 + $0xcc] ss:$24 sps:$4 sm:$0xff]  }
 0x288   : > { %v3351_v62 = vpop.f32.mrb[148].mxu1  ;;  %v3504_v35 = vpop.f32.mrb[96].mxu0  ;;  %6167 = vmatpush1.bf16.msra.mxu1 %v10891_v23  ;;  %6742 = vmatprep.subr.bf16.mxu0 %v14682_v21 }
 0x289   : > { %v3353_v3 = vpop.f32.mrb[149].mxu1  ;;  %v12562_v55 = vadd.f32 %v3504_v35, %v14713_v1  ;;  %v3506_v14 = vpop.f32.mrb[97].mxu0  ;;  %6168 = vmatprep.subr.bf16.mxu1 %v14682_v21  ;;  %v12568_v15 = vadd.f32 %v3351_v62, %v12300_v29  ;;  %v10892_v35 = vld [vmem:[%s14649_s7 + $0x128] sm:$0xff]   ;;  %v10893_v29 = vld [vmem:[%s14649_s7 + $0x38] sm:$0xff]   ;;  %v10895_v62 = vld [vmem:[%s14649_s7 + $0x40] sm:$0xff]  }
 0x28a   : > { %v3354_v57 = vpop.f32.mrb[150].mxu1  ;;  %v3507_v6 = vpop.f32.mrb[98].mxu0 }
 0x28b   : > { %v12573_v23 = vadd.f32 %v3507_v6, %v14714_v26  ;;  %v3509_v5 = vpop.f32.mrb[99].mxu0  ;;  %v3356_v3 = vpop.f32.mrb[151].mxu1  ;;  %6743 = vmatpush1.bf16.msra.mxu0 %v10892_v35  ;;  %v12579_v1 = vadd.f32 %v3354_v57, %v12305_v39  ;;  %v10894_v39 = vld [vmem:[%s14649_s7 + $0x130] sm:$0xff]   ;;  %v10565_v57 = vld [vmem:[%s11672_s29 + $0x58] sm:$0xff]   ;;  %v10568_v6 = vld [vmem:[%s11267_s17 + $0xc8] ss:$24 sps:$4 sm:$0xff]  }
 0x28c   : > { %6169 = vmatpush1.bf16.msra.mxu1 %v10893_v29  ;;  %6744 = vmatprep.subr.bf16.mxu0 %v14682_v21  ;;  %v10569_v35 = vld [vmem:[%s11672_s29 + $0x60] sm:$0xff]   ;;  %v10571_v29 = vld [vmem:[%s11267_s17 + $0xfc] ss:$24 sps:$4 sm:$0xff]  }
 0x28d   : > { %9669 = vmatmul.mubr.msk.bf16.gmra.mrb[0].mxu1 %vm1194_vm0, %v10560_v11  ;;  %6500 = vmatmul.mubr.bf16.gmra.mrb[244].mxu0 %v10563_v19 }
 0x28e   : > { %9672 = vmatprep.mubr.msk.bf16.mxu1 %vm1194_vm0, %v10564_v2  ;;  %6507 = vmatprep.mubr.bf16.mxu0 %v10566_v12 }
 0x28f   : > { %6170 = vmatprep.subr.bf16.mxu1 %v14682_v21  ;;  %6745 = vmatpush1.bf16.msra.mxu0 %v10894_v39 }
 0x290   : > { %v3359_v5 = vpop.f32.mrb[152].mxu1  ;;  %v3512_v26 = vpop.f32.mrb[160].mxu0  ;;  %6171 = vmatpush1.bf16.msra.mxu1 %v10895_v62  ;;  %6746 = vmatprep.subr.bf16.mxu0 %v14682_v21 }
 0x291   : > { %v3361_v14 = vpop.f32.mrb[153].mxu1  ;;  %v12596_v11 = vadd.f32 %v3512_v26, %v12178_v4  ;;  %v3514_v19 = vpop.f32.mrb[161].mxu0  ;;  %6172 = vmatprep.subr.bf16.mxu1 %v14682_v21  ;;  %v12602_v2 = vadd.f32 %v3359_v5, %v12314_v24  ;;  %v10896_v4 = vld [vmem:[%s14649_s7 + $0x138] sm:$0xff]   ;;  %v10897_v24 = vld [vmem:[%s14649_s7 + $0x48] sm:$0xff]  }
 0x292   : > { %v3362_v12 = vpop.f32.mrb[154].mxu1  ;;  %v3515_v3 = vpop.f32.mrb[162].mxu0  ;;  %v10899_v19 = vld [vmem:[%s14649_s7 + $0x50] sm:$0xff]  }
 0x293   : > { %v12607_v39 = vadd.f32 %v3515_v3, %v12185_v41  ;;  %v3517_v62 = vpop.f32.mrb[163].mxu0  ;;  %v3364_v14 = vpop.f32.mrb[155].mxu1  ;;  %6747 = vmatpush1.bf16.msra.mxu0 %v10896_v4  ;;  %v12613_v26 = vadd.f32 %v3362_v12, %v12322_v47  ;;  %v10898_v41 = vld [vmem:[%s14649_s7 + $0x140] sm:$0xff]   ;;  %v10570_v3 = vld [vmem:[%s11672_s29 + $0x68] sm:$0xff]   ;;  %v10574_v4 = vld [vmem:[%s11672_s29 + $0x70] sm:$0xff]  }
 0x294   : > { %6173 = vmatpush1.bf16.msra.mxu1 %v10897_v24  ;;  %6748 = vmatprep.subr.bf16.mxu0 %v14682_v21  ;;  %v10578_v24 = vld [vmem:[%s11267_s17 + $0x12c] ss:$24 sps:$4 sm:$0xff]  }
 0x295   : > { %9673 = vmatmul.mubr.msk.bf16.gmra.mrb[4].mxu1 %vm1194_vm0, %v10565_v57  ;;  %6508 = vmatmul.mubr.bf16.gmra.mrb[248].mxu0 %v10568_v6 }
 0x296   : > { %9676 = vmatprep.mubr.msk.bf16.mxu1 %vm1194_vm0, %v10569_v35  ;;  %6515 = vmatprep.mubr.bf16.mxu0 %v10571_v29  ;;  %v10573_v35 = vld [vmem:[%s11267_s17 + $0xf8] ss:$24 sps:$4 sm:$0xff]  }
 0x297   : > { %6174 = vmatprep.subr.bf16.mxu1 %v14682_v21  ;;  %6749 = vmatpush1.bf16.msra.mxu0 %v10898_v41 }
 0x298   : > { %v3367_v47 = vpop.f32.mrb[156].mxu1  ;;  %v3520_v5 = vpop.f32.mrb[104].mxu0  ;;  %6175 = vmatpush1.bf16.msra.mxu1 %v10899_v19  ;;  %6750 = vmatprep.subr.bf16.mxu0 %v14682_v21 }
 0x299   : > { %v3369_v57 = vpop.f32.mrb[157].mxu1  ;;  %v12630_v6 = vadd.f32 %v3520_v5, %v12047_v61  ;;  %v3522_v12 = vpop.f32.mrb[105].mxu0  ;;  %6176 = vmatprep.subr.bf16.mxu1 %v14682_v21  ;;  %v12636_v29 = vadd.f32 %v3367_v47, %v12334_v46  ;;  %v10900_v61 = vld [vmem:[%s14649_s7 + $0x148] sm:$0xff]   ;;  %v10901_v46 = vld [vmem:[%s14649_s7 + $0x58] sm:$0xff]  }
 0x29a   : > { %v3370_v62 = vpop.f32.mrb[158].mxu1  ;;  %v3523_v14 = vpop.f32.mrb[106].mxu0  ;;  %v10903_v12 = vld [vmem:[%s14649_s7 + $0x60] sm:$0xff]  }
 0x29b   : > { %v12641_v41 = vadd.f32 %v3523_v14, %v12057_v56  ;;  %v3525_v19 = vpop.f32.mrb[107].mxu0  ;;  %v3372_v57 = vpop.f32.mrb[159].mxu1  ;;  %6751 = vmatpush1.bf16.msra.mxu0 %v10900_v61  ;;  %v12647_v5 = vadd.f32 %v3370_v62, %v12339_v50  ;;  %v10902_v56 = vld [vmem:[%s14649_s7 + $0x150] sm:$0xff]   ;;  %v10575_v14 = vld [vmem:[%s11672_s29 + $0x78] sm:$0xff]   ;;  %v10579_v61 = vld [vmem:[%s11672_s29 + $0x80] sm:$0xff]  }
 0x29c   : > { %6177 = vmatpush1.bf16.msra.mxu1 %v10901_v46  ;;  %6752 = vmatprep.subr.bf16.mxu0 %v14682_v21  ;;  %v10583_v46 = vld [vmem:[%s11267_s17 + $0x15c] ss:$24 sps:$4 sm:$0xff]  }
 0x29d   : > { %9677 = vmatmul.mubr.msk.bf16.gmra.mrb[8].mxu1 %vm1194_vm0, %v10570_v3  ;;  %6516 = vmatmul.mubr.bf16.gmra.mrb[252].mxu0 %v10573_v35 }
 0x29e   : > { %9680 = vmatprep.mubr.msk.bf16.mxu1 %vm1194_vm0, %v10574_v4  ;;  %6523 = vmatprep.mubr.bf16.mxu0 %v10578_v24  ;;  %v10576_v4 = vld [vmem:[%s11267_s17 + $0x128] ss:$24 sps:$4 sm:$0xff]  }
 0x29f   : > { %6178 = vmatprep.subr.bf16.mxu1 %v14682_v21  ;;  %6753 = vmatpush1.bf16.msra.mxu0 %v10902_v56 }
 0x2a0   : > { %v3375_v50 = vpop.f32.mrb[160].mxu1  ;;  %v3528_v47 = vpop.f32.mrb[164].mxu0  ;;  %6179 = vmatpush1.bf16.msra.mxu1 %v10903_v12  ;;  %6754 = vmatprep.subr.bf16.mxu0 %v14682_v21 }
 0x2a1   : > { %v3377_v3 = vpop.f32.mrb[161].mxu1  ;;  %v12664_v35 = vadd.f32 %v3528_v47, %v12215_v51  ;;  %v3530_v62 = vpop.f32.mrb[165].mxu0  ;;  %6180 = vmatprep.subr.bf16.mxu1 %v14682_v21  ;;  %v12670_v24 = vadd.f32 %v3375_v50, %v12348_v28  ;;  %v10904_v51 = vld [vmem:[%s14649_s7 + $0x158] sm:$0xff]   ;;  %v10905_v28 = vld [vmem:[%s14649_s7 + $0x68] sm:$0xff]  }
 0x2a2   : > { %v3378_v19 = vpop.f32.mrb[162].mxu1  ;;  %v3531_v57 = vpop.f32.mrb[166].mxu0  ;;  %v10907_v62 = vld [vmem:[%s14649_s7 + $0x70] sm:$0xff]  }
 0x2a3   : > { %14715 = vst [vmem:[#allocation21_spill] sm:$0xff] %v12670_v24  ;;  %v12675_v56 = vadd.f32 %v3531_v57, %v12223_v36  ;;  %v3533_v12 = vpop.f32.mrb[167].mxu0  ;;  %v3380_v3 = vpop.f32.mrb[163].mxu1  ;;  %6755 = vmatpush1.bf16.msra.mxu0 %v10904_v51  ;;  %v12681_v47 = vadd.f32 %v3378_v19, %v12356_v27  ;;  %v10906_v36 = vld [vmem:[%s14649_s7 + $0x160] sm:$0xff]  }
 0x2a4   : > { %6181 = vmatpush1.bf16.msra.mxu1 %v10905_v28  ;;  %6756 = vmatprep.subr.bf16.mxu0 %v14682_v21  ;;  %v10584_v28 = vld [vmem:[%s11672_s29 + $0x90] sm:$0xff]  }
 0x2a5   : > { %14716 = vst [vmem:[#allocation24_spill] sm:$0xff] %v12681_v47  ;;  %9681 = vmatmul.mubr.msk.bf16.gmra.mrb[12].mxu1 %vm1194_vm0, %v10575_v14  ;;  %6524 = vmatmul.mubr.bf16.gmra.mrb[0].mxu0 %v10576_v4  ;;  %v14717_v4 = vld [vmem:[#allocation25_spill] sm:$0xff]  ;;  %v14718_v47 = vld [vmem:[#allocation26_spill] sm:$0xff] }
 0x2a6   : > { %9684 = vmatprep.mubr.msk.bf16.mxu1 %vm1194_vm0, %v10579_v61  ;;  %6531 = vmatprep.mubr.bf16.mxu0 %v10583_v46  ;;  %v10580_v61 = vld [vmem:[%s11672_s29 + $0x88] sm:$0xff]   ;;  %v10581_v46 = vld [vmem:[%s11267_s17 + $0x158] ss:$24 sps:$4 sm:$0xff]  }
 0x2a7   : > { %6182 = vmatprep.subr.bf16.mxu1 %v14682_v21  ;;  %6757 = vmatpush1.bf16.msra.mxu0 %v10906_v36  ;;  %v10588_v36 = vld [vmem:[%s11267_s17 + $0x18c] ss:$24 sps:$4 sm:$0xff]  }
 0x2a8   : > { %v3383_v27 = vpop.f32.mrb[164].mxu1  ;;  %v3536_v50 = vpop.f32.mrb[112].mxu0  ;;  %6183 = vmatpush1.bf16.msra.mxu1 %v10907_v62  ;;  %6758 = vmatprep.subr.bf16.mxu0 %v14682_v21 }
 0x2a9   : > { %v3385_v14 = vpop.f32.mrb[165].mxu1  ;;  %v12698_v19 = vadd.f32 %v3536_v50, %v14717_v4  ;;  %v3538_v57 = vpop.f32.mrb[113].mxu0  ;;  %6184 = vmatprep.subr.bf16.mxu1 %v14682_v21  ;;  %v12704_v12 = vadd.f32 %v3383_v27, %v12368_v48  ;;  %v10908_v4 = vld [vmem:[%s14649_s7 + $0x168] sm:$0xff]   ;;  %v10909_v48 = vld [vmem:[%s14649_s7 + $0x78] sm:$0xff]  }
 0x2aa   : > { %v3386_v3 = vpop.f32.mrb[166].mxu1  ;;  %v3539_v51 = vpop.f32.mrb[114].mxu0 }
 0x2ab   : > { %v12709_v62 = vadd.f32 %v3539_v51, %v14718_v47  ;;  %v3541_v24 = vpop.f32.mrb[115].mxu0  ;;  %v3388_v14 = vpop.f32.mrb[167].mxu1  ;;  %v12712_v50 = vadd.f32 %v3386_v3, %v12376_v10  ;;  %6759 = vmatpush1.bf16.msra.mxu0 %v10908_v4  ;;  %v12726_v10 = vld [vmem:[%s14650_s8] sm:$0xff]   ;;  %v10585_v3 = vld [vmem:[%s11672_s29 + $0x98] sm:$0xff]  }
 0x2ac   : > { %6185 = vmatpush1.bf16.msra.mxu1 %v10909_v48  ;;  %6760 = vmatprep.subr.bf16.mxu0 %v14682_v21  ;;  %v10911_v24 = vld [vmem:[%s14649_s7 + $0x170] sm:$0xff]   ;;  %v10586_v51 = vld [vmem:[%s11267_s17 + $0x188] ss:$24 sps:$4 sm:$0xff]  }
 0x2ad   : > { %9685 = vmatmul.mubr.msk.bf16.gmra.mrb[16].mxu1 %vm1194_vm0, %v10580_v61  ;;  %6532 = vmatmul.mubr.bf16.gmra.mrb[4].mxu0 %v10581_v46  ;;  %v10589_v4 = vld [vmem:[%s11672_s29 + $0xa0] sm:$0xff]   ;;  %v10593_v48 = vld [vmem:[%s11267_s17 + $0x1bc] ss:$24 sps:$4 sm:$0xff]  }
 0x2ae   : > { %9688 = vmatprep.mubr.msk.bf16.mxu1 %vm1194_vm0, %v10584_v28  ;;  %6539 = vmatprep.mubr.bf16.mxu0 %v10588_v36 }
 0x2af   : > { %9716 = vmatprep.subr.bf16.mxu1 %v12726_v10  ;;  %6761 = vmatpush1.bf16.msra.mxu0 %v10911_v24 }
 0x2b0   : > { %v3391_v47 = vpop.f32.mrb[168].mxu1  ;;  %v3544_v27 = vpop.f32.mrb[168].mxu0  ;;  %6762 = vmatprep.subr.bf16.mxu0 %v14682_v21 }
 0x2b1   : > { %v3393_v57 = vpop.f32.mrb[169].mxu1  ;;  %v12734_v61 = vadd.f32 %v3544_v27, %v12250_v32  ;;  %v3546_v46 = vpop.f32.mrb[169].mxu0  ;;  %v12739_v28 = vadd.f32 %v3391_v47, %v12388_v8  ;;  %v10912_v27 = vld [vmem:[%s14649_s7 + $0x178] sm:$0xff]  }
 0x2b2   : > { %v3394_v36 = vpop.f32.mrb[170].mxu1  ;;  %v3547_v14 = vpop.f32.mrb[170].mxu0 }
 0x2b3   : > { %14719 = vst [vmem:[#allocation19_spill] sm:$0xff] %v12739_v28  ;;  %v12744_v24 = vadd.f32 %v3547_v14, %v12257_v13  ;;  %v3549_v21 = vpop.f32.mrb[171].mxu0  ;;  %v3396_v57 = vpop.f32.mrb[171].mxu1  ;;  %v12747_v32 = vadd.f32 %v3394_v36, %v12396_v31  ;;  %6763 = vmatpush1.bf16.msra.mxu0 %v10912_v27  ;;  %v10590_v36 = vld [vmem:[%s11672_s29 + $0xa8] sm:$0xff]   ;;  %v10591_v14 = vld [vmem:[%s11267_s17 + $0x1b8] ss:$24 sps:$4 sm:$0xff]  }
 0x2b5   : > { %14720 = vst [vmem:[#allocation11_spill] sm:$0xff] %v12747_v32  ;;  %9689 = vmatmul.mubr.msk.bf16.gmra.mrb[20].mxu1 %vm1194_vm0, %v10585_v3  ;;  %6540 = vmatmul.mubr.bf16.gmra.mrb[8].mxu0 %v10586_v51  ;;  %v10594_v3 = vld [vmem:[%s11672_s29 + $0xb0] sm:$0xff]   ;;  %v10598_v51 = vld [vmem:[%s11267_s17 + $0x1ec] ss:$24 sps:$4 sm:$0xff]  }
 0x2b6   : > { %9692 = vmatprep.mubr.msk.bf16.mxu1 %vm1194_vm0, %v10589_v4  ;;  %6547 = vmatprep.mubr.bf16.mxu0 %v10593_v48  ;;  %v14723_v32 = vld [vmem:[#allocation31_spill] sm:$0xff] }
 0x2b8   : > { %v3399_v13 = vpop.f32.mrb[172].mxu1  ;;  %v3552_v8 = vpop.f32.mrb[120].mxu0 }
 0x2b9   : > { %v3401_v47 = vpop.f32.mrb[173].mxu1  ;;  %v12755_v46 = vadd.f32 %v3552_v8, %v12103_v58  ;;  %v3554_v31 = vpop.f32.mrb[121].mxu0  ;;  %v12760_v21 = vadd.f32 %v3399_v13, %v12408_v25 }
 0x2ba   : > { %v3402_v57 = vpop.f32.mrb[174].mxu1  ;;  %v3555_v27 = vpop.f32.mrb[122].mxu0 }
 0x2bb   : > { %14721 = vst [vmem:[#allocation22_spill] sm:$0xff] %v12760_v21  ;;  %v12765_v4 = vadd.f32 %v3555_v27, %v12113_v45  ;;  %v3557_v48 = vpop.f32.mrb[123].mxu0  ;;  %v3404_v47 = vpop.f32.mrb[175].mxu1  ;;  %v12768_v58 = vadd.f32 %v3402_v57, %v12416_v30  ;;  %v12776_v45 = vld [vmem:[%s14651_s9] ss:$0 sm:$0xff] }
 0x2bc   : > { %v10596_v57 = vld [vmem:[%s11267_s17 + $0x1e8] ss:$24 sps:$4 sm:$0xff]   ;;  %v10603_v47 = vld [vmem:[%s11267_s17 + $0x21c] ss:$24 sps:$4 sm:$0xff]  }
 0x2bd   : > { %14722 = vst [vmem:[#allocation12_spill] sm:$0xff] %v12768_v58  ;;  %9693 = vmatmul.mubr.msk.bf16.gmra.mrb[24].mxu1 %vm1194_vm0, %v10590_v36  ;;  %6548 = vmatmul.mubr.bf16.gmra.mrb[12].mxu0 %v10591_v14  ;;  %v10595_v14 = vld [vmem:[%s11672_s29 + $0xb8] sm:$0xff]   ;;  %v10599_v48 = vld [vmem:[%s11672_s29 + $0xc0] sm:$0xff]  }
 0x2be   : > { %9696 = vmatprep.mubr.msk.bf16.mxu1 %vm1194_vm0, %v10594_v3  ;;  %6555 = vmatprep.mubr.bf16.mxu0 %v10598_v51 }
 0x2c0   : > { %v9586_v25 = vpop.f32.mrb[176].mxu1  ;;  %v3560_v13 = vpop.f32.mrb[172].mxu0 }
 0x2c1   : > { %v4203_v8 = vadd.f32 %v9586_v25, %v12391_v37  ;;  %v12780_v30 = vadd.f32 %v3560_v13, %v12283_v22  ;;  %v3946_v31 = vpop.f32.mrb[177].mxu1  ;;  %v3562_v36 = vpop.f32.mrb[173].mxu0 }
 0x2c2   : > { %v4201_v27 = vadd.f32 %v12371_v54, %v3946_v31  ;;  %v9587_v3 = vpop.f32.mrb[178].mxu1  ;;  %v3563_v51 = vpop.f32.mrb[174].mxu0  ;;  %v14724_v36 = vld [vmem:[#allocation17_spill] sm:$0xff] }
 0x2c3   : > { %v4267_v58 = vadd.f32 %v12776_v45, %v4203_v8  ;;  %v4204_v21 = vadd.f32 %v9587_v3, %v12399_v53  ;;  %v12790_v37 = vadd.f32 %v3563_v51, %v14723_v32  ;;  %v3949_v22 = vpop.f32.mrb[179].mxu1  ;;  %v3565_v25 = vpop.f32.mrb[175].mxu0  ;;  %v14725_v8 = vld [vmem:[#allocation27_spill] sm:$0xff] }
 0x2c4   : > { %v4265_v13 = vadd.f32 %v12776_v45, %v4201_v27  ;;  %v4202_v28 = vadd.f32 %v14724_v36, %v3949_v22  ;;  %v10601_v27 = vld [vmem:[%s11267_s17 + $0x218] ss:$24 sps:$4 sm:$0xff]   ;;  %v10608_v22 = vld [vmem:[%s11267_s17 + $0x24c] ss:$24 sps:$4 sm:$0xff]  }
 0x2c5   : > { %4331 = vst.msk [vmem:[%s12796_s24 + $0x10] sm:$0xff] %vm1194_vm0, %v4267_v58  ;;  %v4268_v54 = vadd.f32 %v12776_v45, %v4204_v21  ;;  %9697 = vmatmul.mubr.msk.bf16.gmra.mrb[28].mxu1 %vm1194_vm0, %v10595_v14  ;;  %6556 = vmatmul.mubr.bf16.gmra.mrb[16].mxu0 %v10596_v57 }
 0x2c6   : > { %4329 = vst.msk [vmem:[%s12796_s24] sm:$0xff] %vm1194_vm0, %v4265_v13  ;;  %v4266_v53 = vadd.f32 %v12776_v45, %v4202_v28  ;;  %9700 = vmatprep.mubr.msk.bf16.mxu1 %vm1194_vm0, %v10599_v48  ;;  %6563 = vmatprep.mubr.bf16.mxu0 %v10603_v47  ;;  %v10600_v28 = vld [vmem:[%s11672_s29 + $0xc8] sm:$0xff]   ;;  %v10604_v47 = vld [vmem:[%s11672_s29 + $0xd0] sm:$0xff]   ;;  %v14726_v13 = vld [vmem:[#allocation28_spill] sm:$0xff] }
 0x2c7   : > { %4332 = vst.msk [vmem:[%s12796_s24 + $0x18] sm:$0xff] %vm1194_vm0, %v4268_v54 }
 0x2c8   : > { %4330 = vst.msk [vmem:[%s12796_s24 + $0x8] sm:$0xff] %vm1194_vm0, %v4266_v53  ;;  %v9590_v32 = vpop.f32.mrb[180].mxu1  ;;  %v3568_v58 = vpop.f32.mrb[128].mxu0 }
 0x2c9   : > { %v4207_v21 = vadd.f32 %v9590_v32, %v12426_v0  ;;  %v12812_v31 = vadd.f32 %v3568_v58, %v14725_v8  ;;  %v3962_v14 = vpop.f32.mrb[181].mxu1  ;;  %v3570_v57 = vpop.f32.mrb[129].mxu0 }
 0x2ca   : > { %v4205_v3 = vadd.f32 %v12411_v43, %v3962_v14  ;;  %v9591_v51 = vpop.f32.mrb[182].mxu1  ;;  %v3571_v48 = vpop.f32.mrb[130].mxu0  ;;  %v14727_v14 = vld [vmem:[#allocation32_spill] sm:$0xff] }
 0x2cb   : > { %v4271_v25 = vadd.f32 %v12776_v45, %v4207_v21  ;;  %v4208_v0 = vadd.f32 %v9591_v51, %v12435_v16  ;;  %v12822_v36 = vadd.f32 %v3571_v48, %v14726_v13  ;;  %v3965_v54 = vpop.f32.mrb[183].mxu1  ;;  %v3573_v53 = vpop.f32.mrb[131].mxu0  ;;  %v10606_v51 = vld [vmem:[%s11267_s17 + $0x248] ss:$24 sps:$4 sm:$0xff]  }
 0x2cc   : > { %v4269_v32 = vadd.f32 %v12776_v45, %v4205_v3  ;;  %v4206_v43 = vadd.f32 %v12419_v7, %v3965_v54  ;;  %v10605_v3 = vld [vmem:[%s11672_s29 + $0xd8] sm:$0xff]   ;;  %v14728_v54 = vld [vmem:[#allocation33_spill] sm:$0xff] }
 0x2cd   : > { %4335 = vst.msk [vmem:[%s12796_s24 + $0x30] sm:$0xff] %vm1194_vm0, %v4271_v25  ;;  %v4272_v58 = vadd.f32 %v12776_v45, %v4208_v0  ;;  %9701 = vmatmul.mubr.msk.bf16.gmra.mrb[32].mxu1 %vm1194_vm0, %v10600_v28  ;;  %6564 = vmatmul.mubr.bf16.gmra.mrb[20].mxu0 %v10601_v27  ;;  %v10609_v25 = vld [vmem:[%s11672_s29 + $0xe0] sm:$0xff]   ;;  %v10613_v0 = vld [vmem:[%s11267_s17 + $0x27c] ss:$24 sps:$4 sm:$0xff]  }
 0x2ce   : > { %4333 = vst.msk [vmem:[%s12796_s24 + $0x20] sm:$0xff] %vm1194_vm0, %v4269_v32  ;;  %v4270_v16 = vadd.f32 %v12776_v45, %v4206_v43  ;;  %9704 = vmatprep.mubr.msk.bf16.mxu1 %vm1194_vm0, %v10604_v47  ;;  %6571 = vmatprep.mubr.bf16.mxu0 %v10608_v22 }
 0x2cf   : > { %4336 = vst.msk [vmem:[%s12796_s24 + $0x38] sm:$0xff] %vm1194_vm0, %v4272_v58 }
 0x2d0   : > { %4334 = vst.msk [vmem:[%s12796_s24 + $0x28] sm:$0xff] %vm1194_vm0, %v4270_v16  ;;  %v9594_v7 = vpop.f32.mrb[184].mxu1  ;;  %v3576_v21 = vpop.f32.mrb[176].mxu0 }
 0x2d1   : > { %v4211_v8 = vadd.f32 %v9594_v7, %v12465_v40  ;;  %v12840_v57 = vadd.f32 %v3576_v21, %v14727_v14  ;;  %v3978_v28 = vpop.f32.mrb[185].mxu1  ;;  %v3578_v27 = vpop.f32.mrb[177].mxu0 }
 0x2d2   : > { %v4209_v48 = vadd.f32 %v12443_v49, %v3978_v28  ;;  %v9595_v47 = vpop.f32.mrb[186].mxu1  ;;  %v3579_v22 = vpop.f32.mrb[178].mxu0 }
 0x2d3   : > { %v4275_v13 = vadd.f32 %v12776_v45, %v4211_v8  ;;  %v4212_v40 = vadd.f32 %v9595_v47, %v12474_v33  ;;  %v12850_v53 = vadd.f32 %v3579_v22, %v14728_v54  ;;  %v3981_v32 = vpop.f32.mrb[187].mxu1  ;;  %v3581_v43 = vpop.f32.mrb[179].mxu0  ;;  %v14729_v8 = vld [vmem:[#allocation29_spill] sm:$0xff] }
 0x2d4   : > { %v4273_v58 = vadd.f32 %v12776_v45, %v4209_v48  ;;  %v4210_v49 = vadd.f32 %v12453_v59, %v3981_v32 }
 0x2d5   : > { %4339 = vst.msk [vmem:[%s12796_s24 + $0x50] sm:$0xff] %vm1194_vm0, %v4275_v13  ;;  %v4276_v16 = vadd.f32 %v12776_v45, %v4212_v40  ;;  %9705 = vmatmul.mubr.msk.bf16.gmra.mrb[36].mxu1 %vm1194_vm0, %v10605_v3  ;;  %6572 = vmatmul.mubr.bf16.gmra.mrb[24].mxu0 %v10606_v51  ;;  %v10610_v3 = vld [vmem:[%s11672_s29 + $0xe8] sm:$0xff]   ;;  %v10611_v51 = vld [vmem:[%s11267_s17 + $0x278] ss:$24 sps:$4 sm:$0xff]  }
 0x2d6   : > { %4337 = vst.msk [vmem:[%s12796_s24 + $0x40] sm:$0xff] %vm1194_vm0, %v4273_v58  ;;  %v4274_v33 = vadd.f32 %v12776_v45, %v4210_v49  ;;  %9708 = vmatprep.mubr.msk.bf16.mxu1 %vm1194_vm0, %v10609_v25  ;;  %6579 = vmatprep.mubr.bf16.mxu0 %v10613_v0  ;;  %v10614_v25 = vld [vmem:[%s11672_s29 + $0xf0] sm:$0xff]   ;;  %v10618_v0 = vld [vmem:[%s11267_s17 + $0x2ac] ss:$24 sps:$4 sm:$0xff]  }
 0x2d7   : > { %4340 = vst.msk [vmem:[%s12796_s24 + $0x58] sm:$0xff] %vm1194_vm0, %v4276_v16  ;;  %v14730_v40 = vld [vmem:[#allocation30_spill] sm:$0xff] }
 0x2d8   : > { %4338 = vst.msk [vmem:[%s12796_s24 + $0x48] sm:$0xff] %vm1194_vm0, %v4274_v33  ;;  %v9598_v59 = vpop.f32.mrb[188].mxu1  ;;  %v3584_v7 = vpop.f32.mrb[136].mxu0 }
 0x2d9   : > { %v4215_v21 = vadd.f32 %v9598_v59, %v12528_v60  ;;  %v12868_v14 = vadd.f32 %v3584_v7, %v14729_v8  ;;  %v3994_v28 = vpop.f32.mrb[189].mxu1  ;;  %v3586_v27 = vpop.f32.mrb[137].mxu0  ;;  %v14731_v59 = vld [vmem:[#allocation34_spill] sm:$0xff] }
 0x2da   : > { %v4213_v48 = vadd.f32 %v12494_v42, %v3994_v28  ;;  %v9599_v47 = vpop.f32.mrb[190].mxu1  ;;  %v3587_v22 = vpop.f32.mrb[138].mxu0  ;;  %v10615_v28 = vld [vmem:[%s11672_s29 + $0xf8] sm:$0xff]   ;;  %v10616_v27 = vld [vmem:[%s11267_s17 + $0x2a8] ss:$24 sps:$4 sm:$0xff]   ;;  %s13461_s29 = scalar_lea.vmem %s14647_s5, %s8694_s23  ;;  %s13931_s23 = scalar_lea.vmem [#allocation5], %s8687_s13  }
 0x2db   : > { %v4279_v13 = vadd.f32 %v12776_v45, %v4215_v21  ;;  %v4216_v60 = vadd.f32 %v9599_v47, %v12539_v34  ;;  %v12878_v54 = vadd.f32 %v3587_v22, %v14730_v40  ;;  %v3997_v32 = vpop.f32.mrb[191].mxu1  ;;  %v3589_v43 = vpop.f32.mrb[139].mxu0  ;;  %v10621_v47 = vld [vmem:[%s11267_s17 + $0x4] ss:$24 sps:$4 sm:$0xff]   ;;  %s9362_s13 = sshll.u32 (%p11213_p8), %s11192_s21, 9 }
 0x2dc   : > { %v4277_v58 = vadd.f32 %v12776_v45, %v4213_v48  ;;  %v4214_v42 = vadd.f32 %v12508_v9, %v3997_v32  ;;  %v10624_v22 = vld [vmem:[%s11267_s17 + $0x2dc] ss:$24 sps:$4 sm:$0xff]   ;;  %s14244_s19 = scalar_lea.vmem (%p11213_p8), %s14652_s10, %s9362_s13  }
 0x2dd   : > { %4343 = vst.msk [vmem:[%s12796_s24 + $0x70] sm:$0xff] %vm1194_vm0, %v4279_v13  ;;  %v4280_v49 = vadd.f32 %v12776_v45, %v4216_v60  ;;  %9709 = vmatmul.mubr.msk.bf16.gmra.mrb[40].mxu1 %vm1194_vm0, %v10610_v3  ;;  %6580 = vmatmul.mubr.bf16.gmra.mrb[28].mxu0 %v10611_v51 }
 0x2de   : > { %4341 = vst.msk [vmem:[%s12796_s24 + $0x60] sm:$0xff] %vm1194_vm0, %v4277_v58  ;;  %v4278_v34 = vadd.f32 %v12776_v45, %v4214_v42  ;;  %9712 = vmatprep.mubr.msk.bf16.mxu1 %vm1194_vm0, %v10614_v25  ;;  %6587 = vmatprep.mubr.bf16.mxu0 %v10618_v0  ;;  %v14732_v0 = vld [vmem:[#allocation35_spill] sm:$0xff] }
 0x2df   : > { %4344 = vst.msk [vmem:[%s12796_s24 + $0x78] sm:$0xff] %vm1194_vm0, %v4280_v49 }
 0x2e0   : > { %4342 = vst.msk [vmem:[%s12796_s24 + $0x68] sm:$0xff] %vm1194_vm0, %v4278_v34  ;;  %v9602_v9 = vpop.f32.mrb[192].mxu1  ;;  %v3592_v16 = vpop.f32.mrb[180].mxu0 }
 0x2e1   : > { %v4219_v33 = vadd.f32 %v9602_v9, %v12596_v11  ;;  %v12896_v7 = vadd.f32 %v3592_v16, %v14731_v59  ;;  %v4010_v21 = vpop.f32.mrb[193].mxu1  ;;  %v3594_v8 = vpop.f32.mrb[181].mxu0  ;;  %v10619_v16 = vld [vmem:[%s11267_s17] ss:$24 sps:$4 sm:$0xff]  }
 0x2e2   : > { %v4217_v3 = vadd.f32 %v12562_v55, %v4010_v21  ;;  %v9603_v51 = vpop.f32.mrb[194].mxu1  ;;  %v3595_v48 = vpop.f32.mrb[182].mxu0 }
 0x2e3   : > { %v4283_v25 = vadd.f32 %v12776_v45, %v4219_v33  ;;  %v4220_v11 = vadd.f32 %v9603_v51, %v12607_v39  ;;  %v12906_v13 = vadd.f32 %v3595_v48, %v14732_v0  ;;  %v4013_v60 = vpop.f32.mrb[195].mxu1  ;;  %v3597_v40 = vpop.f32.mrb[183].mxu0  ;;  %v10622_v33 = vld [vmem:[%s11267_s17 + $0x2d8] ss:$24 sps:$4 sm:$0xff]  }
 0x2e4   : > { %v4281_v32 = vadd.f32 %v12776_v45, %v4217_v3  ;;  %v4218_v55 = vadd.f32 %v12573_v23, %v4013_v60 }
 0x2e5   : > { %4347 = vst.msk [vmem:[%s12796_s24 + $0x90] sm:$0xff] %vm1194_vm0, %v4283_v25  ;;  %v4284_v43 = vadd.f32 %v12776_v45, %v4220_v11  ;;  %9713 = vmatmul.mubr.msk.bf16.gmra.mrb[44].mxu1 %vm1194_vm0, %v10615_v28  ;;  %6588 = vmatmul.mubr.bf16.gmra.mrb[32].mxu0 %v10616_v27  ;;  %v10627_v28 = vld [vmem:[%s11267_s17 + $0x34] ss:$24 sps:$4 sm:$0xff]  }
 0x2e6   : > { %4345 = vst.msk [vmem:[%s12796_s24 + $0x80] sm:$0xff] %vm1194_vm0, %v4281_v32  ;;  %v4282_v39 = vadd.f32 %v12776_v45, %v4218_v55  ;;  %6186 = vmatprep.mubr.bf16.mxu1 %v10621_v47  ;;  %6595 = vmatprep.mubr.bf16.mxu0 %v10624_v22  ;;  %v10630_v27 = vld [vmem:[%s11267_s17 + $0x30c] ss:$24 sps:$4 sm:$0xff]   ;;  %v10625_v32 = vld [vmem:[%s11267_s17 + $0x30] ss:$24 sps:$4 sm:$0xff]  }
 0x2e7   : > { %4348 = vst.msk [vmem:[%s12796_s24 + $0x98] sm:$0xff] %vm1194_vm0, %v4284_v43  ;;  %v10913_v25 = vld [vmem:[%s14650_s8 + $0x8] sm:$0xff]  }
 0x2e8   : > { %4346 = vst.msk [vmem:[%s12796_s24 + $0x88] sm:$0xff] %vm1194_vm0, %v4282_v39  ;;  %v9606_v23 = vpop.f32.mrb[196].mxu1  ;;  %v3600_v58 = vpop.f32.mrb[184].mxu0  ;;  %v10628_v55 = vld [vmem:[%s11267_s17 + $0x308] ss:$24 sps:$4 sm:$0xff]  }
 0x2e9   : > { %v4223_v42 = vadd.f32 %v9606_v23, %v12664_v35  ;;  %v12923_v49 = vadd.f32 %v3600_v58, %v12430_v63  ;;  %v4026_v34 = vpop.f32.mrb[197].mxu1  ;;  %v3602_v9 = vpop.f32.mrb[185].mxu0  ;;  %v10633_v23 = vld [vmem:[%s11267_s17 + $0x64] ss:$24 sps:$4 sm:$0xff]  }
 0x2ea   : > { %v4221_v59 = vadd.f32 %v12630_v6, %v4026_v34  ;;  %v9607_v21 = vpop.f32.mrb[198].mxu1  ;;  %v3603_v8 = vpop.f32.mrb[186].mxu0  ;;  %v10636_v58 = vld [vmem:[%s11267_s17 + $0x33c] ss:$24 sps:$4 sm:$0xff]  }
 0x2eb   : > { %v4287_v3 = vadd.f32 %v12776_v45, %v4223_v42  ;;  %v4224_v35 = vadd.f32 %v9607_v21, %v12675_v56  ;;  %v12933_v63 = vadd.f32 %v3603_v8, %v12438_v44  ;;  %v4029_v51 = vpop.f32.mrb[199].mxu1  ;;  %v3605_v48 = vpop.f32.mrb[187].mxu0  ;;  %v10915_v21 = vld [vmem:[%s14650_s8 + $0x18] sm:$0xff]  }
 0x2ec   : > { %v4285_v47 = vadd.f32 %v12776_v45, %v4221_v59  ;;  %v4222_v6 = vadd.f32 %v12641_v41, %v4029_v51  ;;  %v10634_v51 = vld [vmem:[%s11267_s17 + $0x338] ss:$24 sps:$4 sm:$0xff]  }
 0x2ed   : > { %4351 = vst.msk [vmem:[%s12796_s24 + $0xb0] sm:$0xff] %vm1194_vm0, %v4287_v3  ;;  %v4288_v22 = vadd.f32 %v12776_v45, %v4224_v35  ;;  %6187 = vmatmul.mubr.bf16.vlgmr.msra.gmra.mrb[48].mxu1 %v10619_v16  ;;  %6596 = vmatmul.mubr.bf16.gmra.mrb[36].mxu0 %v10622_v33  ;;  %v10914_v33 = vld [vmem:[%s14650_s8 + $0x10] sm:$0xff]   ;;  %v10631_v35 = vld [vmem:[%s11267_s17 + $0x60] ss:$24 sps:$4 sm:$0xff]  }
 0x2ee   : > { %4349 = vst.msk [vmem:[%s12796_s24 + $0xa0] sm:$0xff] %vm1194_vm0, %v4285_v47  ;;  %v4286_v56 = vadd.f32 %v12776_v45, %v4222_v6  ;;  %6194 = vmatprep.mubr.bf16.mxu1 %v10627_v28  ;;  %6603 = vmatprep.mubr.bf16.mxu0 %v10630_v27 }
 0x2ef   : > { %4352 = vst.msk [vmem:[%s12796_s24 + $0xb8] sm:$0xff] %vm1194_vm0, %v4288_v22  ;;  %9717 = vmatpush3.bf16.msra.mxu1 %v12726_v10  ;;  %v10639_v22 = vld [vmem:[%s11267_s17 + $0x94] ss:$24 sps:$4 sm:$0xff]  }
 0x2f0   : > { %4350 = vst.msk [vmem:[%s12796_s24 + $0xa8] sm:$0xff] %vm1194_vm0, %v4286_v56  ;;  %v9610_v44 = vpop.f32.mrb[200].mxu1  ;;  %v3608_v41 = vpop.f32.mrb[188].mxu0  ;;  %9718 = vmatprep.subr.bf16.mxu1 %v10913_v25  ;;  %v10642_v56 = vld [vmem:[%s11267_s17 + $0x36c] ss:$24 sps:$4 sm:$0xff]  }
 0x2f1   : > { %v4227_v11 = vadd.f32 %v9610_v44, %v12734_v61  ;;  %v12953_v0 = vadd.f32 %v3608_v41, %v12448_v18  ;;  %v4042_v60 = vpop.f32.mrb[201].mxu1  ;;  %v3610_v40 = vpop.f32.mrb[189].mxu0 }
 0x2f2   : > { %v4225_v10 = vadd.f32 %v12698_v19, %v4042_v60  ;;  %v9611_v43 = vpop.f32.mrb[202].mxu1  ;;  %v3611_v39 = vpop.f32.mrb[190].mxu0 }
 0x2f3   : > { %v4291_v42 = vadd.f32 %v12776_v45, %v4227_v11  ;;  %v4228_v34 = vadd.f32 %v9611_v43, %v12744_v24  ;;  %v12963_v61 = vadd.f32 %v3611_v39, %v12456_v17  ;;  %v4045_v18 = vpop.f32.mrb[203].mxu1  ;;  %v3613_v9 = vpop.f32.mrb[191].mxu0  ;;  %9719 = vmatpush3.bf16.msra.mxu1 %v10913_v25  ;;  %v10637_v43 = vld [vmem:[%s11267_s17 + $0x90] ss:$24 sps:$4 sm:$0xff]  }
 0x2f4   : > { %v4289_v16 = vadd.f32 %v12776_v45, %v4225_v10  ;;  %v4226_v19 = vadd.f32 %v12709_v62, %v4045_v18  ;;  %9720 = vmatprep.subr.bf16.mxu1 %v10914_v33  ;;  %v10640_v39 = vld [vmem:[%s11267_s17 + $0x368] ss:$24 sps:$4 sm:$0xff]   ;;  %v10648_v18 = vld [vmem:[%s11267_s17 + $0x39c] ss:$24 sps:$4 sm:$0xff]  }
 0x2f5   : > { %4355 = vst.msk [vmem:[%s12796_s24 + $0xd0] sm:$0xff] %vm1194_vm0, %v4291_v42  ;;  %v4292_v24 = vadd.f32 %v12776_v45, %v4228_v34  ;;  %6195 = vmatmul.mubr.bf16.gmra.mrb[52].mxu1 %v10625_v32  ;;  %6604 = vmatmul.mubr.bf16.gmra.mrb[40].mxu0 %v10628_v55  ;;  %v10645_v34 = vld [vmem:[%s11267_s17 + $0xc4] ss:$24 sps:$4 sm:$0xff]  }
 0x2f6   : > { %4353 = vst.msk [vmem:[%s12796_s24 + $0xc0] sm:$0xff] %vm1194_vm0, %v4289_v16  ;;  %v4290_v17 = vadd.f32 %v12776_v45, %v4226_v19  ;;  %6202 = vmatprep.mubr.bf16.mxu1 %v10633_v23  ;;  %6611 = vmatprep.mubr.bf16.mxu0 %v10636_v58 }
 0x2f7   : > { %4356 = vst.msk [vmem:[%s12796_s24 + $0xd8] sm:$0xff] %vm1194_vm0, %v4292_v24  ;;  %9721 = vmatpush3.bf16.msra.mxu1 %v10914_v33 }
 0x2f8   : > { %4354 = vst.msk [vmem:[%s12796_s24 + $0xc8] sm:$0xff] %vm1194_vm0, %v4290_v17  ;;  %v9614_v62 = vpop.f32.mrb[204].mxu1  ;;  %v3616_v59 = vpop.f32.mrb[192].mxu0  ;;  %9722 = vmatprep.subr.bf16.mxu1 %v10915_v21 }
 0x2f9   : > { %v4231_v8 = vadd.f32 %v9614_v62, %v12780_v30  ;;  %v12985_v28 = vadd.f32 %v3616_v59, %v12470_v52  ;;  %v4058_v27 = vpop.f32.mrb[205].mxu1  ;;  %v3618_v3 = vpop.f32.mrb[193].mxu0 }
 0x2fa   : > { %v4229_v48 = vadd.f32 %v12755_v46, %v4058_v27  ;;  %v9615_v47 = vpop.f32.mrb[206].mxu1  ;;  %v3619_v6 = vpop.f32.mrb[194].mxu0 }
 0x2fb   : > { %v4295_v44 = vadd.f32 %v12776_v45, %v4231_v8  ;;  %v4232_v30 = vadd.f32 %v9615_v47, %v12790_v37  ;;  %v12995_v52 = vadd.f32 %v3619_v6, %v12481_v20  ;;  %v4061_v41 = vpop.f32.mrb[207].mxu1  ;;  %v3621_v25 = vpop.f32.mrb[195].mxu0  ;;  %9723 = vmatpush3.bf16.msra.mxu1 %v10915_v21  ;;  %v14734_v21 = vld [vmem:[#allocation18_spill] sm:$0xff] }
 0x2fc   : > { %v4293_v11 = vadd.f32 %v12776_v45, %v4229_v48  ;;  %v4230_v46 = vadd.f32 %v12765_v4, %v4061_v41 }
 0x2fd   : > { %4359 = vst.msk [vmem:[%s12796_s24 + $0xf0] sm:$0xff] %vm1194_vm0, %v4295_v44  ;;  %v4296_v60 = vadd.f32 %v12776_v45, %v4232_v30  ;;  %6203 = vmatmul.mubr.bf16.gmra.mrb[56].mxu1 %v10631_v35  ;;  %6612 = vmatmul.mubr.bf16.gmra.mrb[44].mxu0 %v10634_v51  ;;  %v10643_v35 = vld [vmem:[%s11267_s17 + $0xc0] ss:$24 sps:$4 sm:$0xff]   ;;  %v14735_v30 = vld [vmem:[#allocation10_spill] sm:$0xff] }
 0x2fe   : > { %4357 = vst.msk [vmem:[%s12796_s24 + $0xe0] sm:$0xff] %vm1194_vm0, %v4293_v11  ;;  %v4294_v20 = vadd.f32 %v12776_v45, %v4230_v46  ;;  %6210 = vmatprep.mubr.bf16.mxu1 %v10639_v22  ;;  %6619 = vmatprep.mubr.bf16.mxu0 %v10642_v56  ;;  %v10646_v51 = vld [vmem:[%s11267_s17 + $0x398] ss:$24 sps:$4 sm:$0xff]   ;;  %v10651_v22 = vld [vmem:[%s11267_s17 + $0xf4] ss:$24 sps:$4 sm:$0xff]  }
 0x2ff   : > { %4360 = vst.msk [vmem:[%s12796_s24 + $0xf8] sm:$0xff] %vm1194_vm0, %v4296_v60  ;;  %v10654_v56 = vld [vmem:[%s11267_s17 + $0x3cc] ss:$24 sps:$4 sm:$0xff]  }
 0x300   : > { %4358 = vst.msk [vmem:[%s12796_s24 + $0xe8] sm:$0xff] %vm1194_vm0, %v4294_v20  ;;  %v9618_v4 = vpop.f32.mrb[208].mxu1  ;;  %v3624_v37 = vpop.f32.mrb[196].mxu0 }
 0x301   : > { %v4235_v40 = vadd.f32 %v9618_v4, %v12840_v57  ;;  %v13011_v32 = vadd.f32 %v3624_v37, %v12500_v38  ;;  %v4074_v55 = vpop.f32.mrb[209].mxu1  ;;  %v3626_v10 = vpop.f32.mrb[197].mxu0  ;;  %v14733_v38 = vld [vmem:[#allocation9_spill] sm:$0xff] }
 0x302   : > { %v4233_v23 = vadd.f32 %v12812_v31, %v4074_v55  ;;  %v9619_v58 = vpop.f32.mrb[210].mxu1  ;;  %v3627_v42 = vpop.f32.mrb[198].mxu0  ;;  %v10649_v10 = vld [vmem:[%s11267_s17 + $0xf0] ss:$24 sps:$4 sm:$0xff]  }
 0x303   : > { %v4299_v9 = vadd.f32 %v12776_v45, %v4235_v40  ;;  %v4236_v57 = vadd.f32 %v9619_v58, %v12850_v53  ;;  %v13021_v16 = vadd.f32 %v3627_v42, %v14733_v38  ;;  %v4077_v19 = vpop.f32.mrb[211].mxu1  ;;  %v3629_v33 = vpop.f32.mrb[199].mxu0  ;;  %v10657_v42 = vld [vmem:[%s11267_s17 + $0x124] ss:$24 sps:$4 sm:$0xff]  }
 0x304   : > { %v4297_v24 = vadd.f32 %v12776_v45, %v4233_v23  ;;  %v4234_v31 = vadd.f32 %v12822_v36, %v4077_v19 }
 0x305   : > { %4363 = vst.msk [vmem:[%s12796_s24 + $0x110] sm:$0xff] %vm1194_vm0, %v4299_v9  ;;  %v4300_v17 = vadd.f32 %v12776_v45, %v4236_v57  ;;  %6211 = vmatmul.mubr.bf16.gmra.mrb[60].mxu1 %v10637_v43  ;;  %6620 = vmatmul.mubr.bf16.gmra.mrb[48].mxu0 %v10640_v39  ;;  %v10652_v43 = vld [vmem:[%s11267_s17 + $0x3c8] ss:$24 sps:$4 sm:$0xff]  }
 0x306   : > { %4361 = vst.msk [vmem:[%s12796_s24 + $0x100] sm:$0xff] %vm1194_vm0, %v4297_v24  ;;  %v4298_v53 = vadd.f32 %v12776_v45, %v4234_v31  ;;  %6218 = vmatprep.mubr.bf16.mxu1 %v10645_v34  ;;  %6627 = vmatprep.mubr.bf16.mxu0 %v10648_v18  ;;  %v10660_v34 = vld [vmem:[%s11267_s17 + $0x3fc] ss:$24 sps:$4 sm:$0xff]  }
 0x307   : > { %4364 = vst.msk [vmem:[%s12796_s24 + $0x118] sm:$0xff] %vm1194_vm0, %v4300_v17 }
 0x308   : > { %4362 = vst.msk [vmem:[%s12796_s24 + $0x108] sm:$0xff] %vm1194_vm0, %v4298_v53  ;;  %v9622_v36 = vpop.f32.mrb[212].mxu1  ;;  %v3632_v62 = vpop.f32.mrb[200].mxu0  ;;  %v10655_v53 = vld [vmem:[%s11267_s17 + $0x120] ss:$24 sps:$4 sm:$0xff]  }
 0x309   : > { %v4239_v59 = vadd.f32 %v9622_v36, %v12896_v7  ;;  %v13037_v8 = vadd.f32 %v3632_v62, %v14734_v21  ;;  %v4090_v27 = vpop.f32.mrb[213].mxu1  ;;  %v3634_v3 = vpop.f32.mrb[201].mxu0  ;;  %v10658_v36 = vld [vmem:[%s11267_s17 + $0x3f8] ss:$24 sps:$4 sm:$0xff]  }
 0x30a   : > { %v4237_v48 = vadd.f32 %v12868_v14, %v4090_v27  ;;  %v9623_v47 = vpop.f32.mrb[214].mxu1  ;;  %v3635_v6 = vpop.f32.mrb[202].mxu0  ;;  %v10663_v27 = vld [vmem:[%s11267_s17 + $0x154] ss:$24 sps:$4 sm:$0xff]  }
 0x30b   : > { %v4303_v44 = vadd.f32 %v12776_v45, %v4239_v59  ;;  %v4240_v7 = vadd.f32 %v9623_v47, %v12906_v13  ;;  %v13047_v41 = vadd.f32 %v3635_v6, %v14735_v30  ;;  %v4093_v25 = vpop.f32.mrb[215].mxu1  ;;  %v3637_v11 = vpop.f32.mrb[203].mxu0  ;;  %v10666_v3 = vld [vmem:[%s11267_s17 + $0x42c] ss:$24 sps:$4 sm:$0xff]   ;;  %v10661_v30 = vld [vmem:[%s11267_s17 + $0x150] ss:$24 sps:$4 sm:$0xff]  }
 0x30c   : > { %v4301_v46 = vadd.f32 %v12776_v45, %v4237_v48  ;;  %v4238_v14 = vadd.f32 %v12878_v54, %v4093_v25  ;;  %v10664_v25 = vld [vmem:[%s11267_s17 + $0x428] ss:$24 sps:$4 sm:$0xff]  }
 0x30d   : > { %4367 = vst.msk [vmem:[%s12796_s24 + $0x130] sm:$0xff] %vm1194_vm0, %v4303_v44  ;;  %v4304_v60 = vadd.f32 %v12776_v45, %v4240_v7  ;;  %6219 = vmatmul.mubr.bf16.gmra.mrb[64].mxu1 %v10643_v35  ;;  %6628 = vmatmul.mubr.bf16.gmra.mrb[52].mxu0 %v10646_v51 }
 0x30e   : > { %4365 = vst.msk [vmem:[%s12796_s24 + $0x120] sm:$0xff] %vm1194_vm0, %v4301_v46  ;;  %v4302_v13 = vadd.f32 %v12776_v45, %v4238_v14  ;;  %6226 = vmatprep.mubr.bf16.mxu1 %v10651_v22  ;;  %6635 = vmatprep.mubr.bf16.mxu0 %v10654_v56 }
 0x30f   : > { %4368 = vst.msk [vmem:[%s12796_s24 + $0x138] sm:$0xff] %vm1194_vm0, %v4304_v60  ;;  %v10669_v60 = vld [vmem:[%s11267_s17 + $0x184] ss:$24 sps:$4 sm:$0xff]  }
 0x310   : > { %4366 = vst.msk [vmem:[%s12796_s24 + $0x128] sm:$0xff] %vm1194_vm0, %v4302_v13  ;;  %v9626_v54 = vpop.f32.mrb[216].mxu1  ;;  %v3640_v20 = vpop.f32.mrb[204].mxu0  ;;  %v10672_v13 = vld [vmem:[%s11267_s17 + $0x45c] ss:$24 sps:$4 sm:$0xff]  }
 0x311   : > { %v4243_v4 = vadd.f32 %v9626_v54, %v12953_v0  ;;  %v3641_v37 = vadd.f32 %v3640_v20, %v12568_v15  ;;  %v4106_v40 = vpop.f32.mrb[217].mxu1  ;;  %v3642_v55 = vpop.f32.mrb[205].mxu0 }
 0x312   : > { %v4241_v39 = vadd.f32 %v4106_v40, %v12923_v49  ;;  %v9627_v23 = vpop.f32.mrb[218].mxu1  ;;  %v3643_v58 = vpop.f32.mrb[206].mxu0 }
 0x313   : > { %v4307_v18 = vadd.f32 %v12776_v45, %v4243_v4  ;;  %v4244_v0 = vadd.f32 %v9627_v23, %v12963_v61  ;;  %v3644_v15 = vadd.f32 %v3643_v58, %v12579_v1  ;;  %v4109_v9 = vpop.f32.mrb[219].mxu1  ;;  %v3645_v57 = vpop.f32.mrb[207].mxu0 }
 0x314   : > { %v4305_v38 = vadd.f32 %v12776_v45, %v4241_v39  ;;  %v4242_v19 = vadd.f32 %v4109_v9, %v12933_v63  ;;  %v14736_v39 = vld [vmem:[#allocation21_spill] sm:$0xff]  ;;  %v10675_v57 = vld [vmem:[%s11267_s17 + $0x1b4] ss:$24 sps:$4 sm:$0xff]  }
 0x315   : > { %4371 = vst.msk [vmem:[%s12796_s24 + $0x150] sm:$0xff] %vm1194_vm0, %v4307_v18  ;;  %v4308_v49 = vadd.f32 %v12776_v45, %v4244_v0  ;;  %6227 = vmatmul.mubr.bf16.gmra.mrb[68].mxu1 %v10649_v10  ;;  %6636 = vmatmul.mubr.bf16.gmra.mrb[56].mxu0 %v10652_v43  ;;  %v10670_v18 = vld [vmem:[%s11267_s17 + $0x458] ss:$24 sps:$4 sm:$0xff]  }
 0x316   : > { %4369 = vst.msk [vmem:[%s12796_s24 + $0x140] sm:$0xff] %vm1194_vm0, %v4305_v38  ;;  %v4306_v61 = vadd.f32 %v12776_v45, %v4242_v19  ;;  %6234 = vmatprep.mubr.bf16.mxu1 %v10657_v42  ;;  %6643 = vmatprep.mubr.bf16.mxu0 %v10660_v34  ;;  %v10667_v34 = vld [vmem:[%s11267_s17 + $0x180] ss:$24 sps:$4 sm:$0xff]   ;;  %v10678_v38 = vld [vmem:[%s11267_s17 + $0x48c] ss:$24 sps:$4 sm:$0xff]  }
 0x317   : > { %4372 = vst.msk [vmem:[%s12796_s24 + $0x158] sm:$0xff] %vm1194_vm0, %v4308_v49 }
 0x318   : > { %4370 = vst.msk [vmem:[%s12796_s24 + $0x148] sm:$0xff] %vm1194_vm0, %v4306_v61  ;;  %v9630_v1 = vpop.f32.mrb[220].mxu1  ;;  %v3648_v63 = vpop.f32.mrb[208].mxu0  ;;  %v14737_v61 = vld [vmem:[#allocation24_spill] sm:$0xff] }
 0x319   : > { %v4247_v33 = vadd.f32 %v9630_v1, %v13011_v32  ;;  %v13085_v24 = vadd.f32 %v3648_v63, %v12602_v2  ;;  %v4122_v31 = vpop.f32.mrb[221].mxu1  ;;  %v3650_v17 = vpop.f32.mrb[209].mxu0 }
 0x31a   : > { %v4245_v62 = vadd.f32 %v4122_v31, %v12985_v28  ;;  %v9631_v59 = vpop.f32.mrb[222].mxu1  ;;  %v3651_v21 = vpop.f32.mrb[210].mxu0 }
 0x31b   : > { %v4311_v35 = vadd.f32 %v12776_v45, %v4247_v33  ;;  %v4248_v32 = vadd.f32 %v9631_v59, %v13021_v16  ;;  %v13095_v2 = vadd.f32 %v3651_v21, %v12613_v26  ;;  %v4125_v51 = vpop.f32.mrb[223].mxu1  ;;  %v3653_v48 = vpop.f32.mrb[211].mxu0 }
 0x31c   : > { %v4309_v47 = vadd.f32 %v12776_v45, %v4245_v62  ;;  %v4246_v28 = vadd.f32 %v4125_v51, %v12995_v52  ;;  %v10681_v48 = vld [vmem:[%s11267_s17 + $0x1e4] ss:$24 sps:$4 sm:$0xff]  }
 0x31d   : > { %4375 = vst.msk [vmem:[%s12796_s24 + $0x170] sm:$0xff] %vm1194_vm0, %v4311_v35  ;;  %v4312_v6 = vadd.f32 %v12776_v45, %v4248_v32  ;;  %6235 = vmatmul.mubr.bf16.gmra.mrb[72].mxu1 %v10655_v53  ;;  %6644 = vmatmul.mubr.bf16.gmra.mrb[60].mxu0 %v10658_v36  ;;  %v10676_v35 = vld [vmem:[%s11267_s17 + $0x488] ss:$24 sps:$4 sm:$0xff]  }
 0x31e   : > { %4373 = vst.msk [vmem:[%s12796_s24 + $0x160] sm:$0xff] %vm1194_vm0, %v4309_v47  ;;  %v4310_v16 = vadd.f32 %v12776_v45, %v4246_v28  ;;  %6242 = vmatprep.mubr.bf16.mxu1 %v10663_v27  ;;  %6651 = vmatprep.mubr.bf16.mxu0 %v10666_v3  ;;  %v10673_v3 = vld [vmem:[%s11267_s17 + $0x1b0] ss:$24 sps:$4 sm:$0xff]   ;;  %v10684_v47 = vld [vmem:[%s11267_s17 + $0x4bc] ss:$24 sps:$4 sm:$0xff]  }
 0x31f   : > { %4376 = vst.msk [vmem:[%s12796_s24 + $0x178] sm:$0xff] %vm1194_vm0, %v4312_v6 }
 0x320   : > { %4374 = vst.msk [vmem:[%s12796_s24 + $0x168] sm:$0xff] %vm1194_vm0, %v4310_v16  ;;  %v9634_v26 = vpop.f32.mrb[224].mxu1  ;;  %v3656_v52 = vpop.f32.mrb[212].mxu0 }
 0x321   : > { %v4251_v22 = vadd.f32 %v9634_v26, %v3641_v37  ;;  %v3657_v56 = vadd.f32 %v3656_v52, %v12636_v29  ;;  %v4138_v44 = vpop.f32.mrb[225].mxu1  ;;  %v3658_v7 = vpop.f32.mrb[213].mxu0 }
 0x322   : > { %v4249_v11 = vadd.f32 %v4138_v44, %v13037_v8  ;;  %v9635_v46 = vpop.f32.mrb[226].mxu1  ;;  %v3659_v14 = vpop.f32.mrb[214].mxu0 }
 0x323   : > { %v4315_v54 = vadd.f32 %v12776_v45, %v4251_v22  ;;  %v4252_v20 = vadd.f32 %v9635_v46, %v3644_v15  ;;  %v3660_v4 = vadd.f32 %v3659_v14, %v12647_v5  ;;  %v4141_v29 = vpop.f32.mrb[227].mxu1  ;;  %v3661_v37 = vpop.f32.mrb[215].mxu0 }
 0x324   : > { %v4313_v40 = vadd.f32 %v12776_v45, %v4249_v11  ;;  %v4250_v55 = vadd.f32 %v4141_v29, %v13047_v41  ;;  %v10690_v29 = vld [vmem:[%s11267_s17 + $0x4ec] ss:$24 sps:$4 sm:$0xff]   ;;  %v14739_v37 = vld [vmem:[#allocation11_spill] sm:$0xff] }
 0x325   : > { %4379 = vst.msk [vmem:[%s12796_s24 + $0x190] sm:$0xff] %vm1194_vm0, %v4315_v54  ;;  %v4316_v8 = vadd.f32 %v12776_v45, %v4252_v20  ;;  %6243 = vmatmul.mubr.bf16.gmra.mrb[76].mxu1 %v10661_v30  ;;  %6652 = vmatmul.mubr.bf16.gmra.mrb[68].mxu0 %v10664_v25  ;;  %v14738_v25 = vld [vmem:[#allocation19_spill] sm:$0xff] }
 0x326   : > { %4377 = vst.msk [vmem:[%s12796_s24 + $0x180] sm:$0xff] %vm1194_vm0, %v4313_v40  ;;  %v4314_v10 = vadd.f32 %v12776_v45, %v4250_v55  ;;  %6250 = vmatprep.mubr.bf16.mxu1 %v10669_v60  ;;  %6659 = vmatprep.mubr.bf16.mxu0 %v10672_v13  ;;  %v10679_v60 = vld [vmem:[%s11267_s17 + $0x1e0] ss:$24 sps:$4 sm:$0xff]  }
 0x327   : > { %4380 = vst.msk [vmem:[%s12796_s24 + $0x198] sm:$0xff] %vm1194_vm0, %v4316_v8  ;;  %v10682_v13 = vld [vmem:[%s11267_s17 + $0x4b8] ss:$24 sps:$4 sm:$0xff]  }
 0x328   : > { %4378 = vst.msk [vmem:[%s12796_s24 + $0x188] sm:$0xff] %vm1194_vm0, %v4314_v10  ;;  %v9638_v5 = vpop.f32.mrb[228].mxu1  ;;  %v3664_v41 = vpop.f32.mrb[216].mxu0 }
 0x329   : > { %v4255_v43 = vadd.f32 %v9638_v5, %v3657_v56  ;;  %v3665_v23 = vadd.f32 %v3664_v41, %v14736_v39  ;;  %v4154_v58 = vpop.f32.mrb[229].mxu1  ;;  %v3666_v42 = vpop.f32.mrb[217].mxu0 }
 0x32a   : > { %v4253_v0 = vadd.f32 %v4154_v58, %v13085_v24  ;;  %v9639_v15 = vpop.f32.mrb[230].mxu1  ;;  %v3667_v9 = vpop.f32.mrb[218].mxu0  ;;  %v14740_v58 = vld [vmem:[#allocation22_spill] sm:$0xff] }
 0x32b   : > { %v4319_v19 = vadd.f32 %v12776_v45, %v4255_v43  ;;  %v4256_v49 = vadd.f32 %v9639_v15, %v3660_v4  ;;  %v3668_v1 = vadd.f32 %v3667_v9, %v14737_v61  ;;  %v4157_v63 = vpop.f32.mrb[231].mxu1  ;;  %v3669_v33 = vpop.f32.mrb[219].mxu0  ;;  %v10687_v4 = vld [vmem:[%s11267_s17 + $0x214] ss:$24 sps:$4 sm:$0xff]   ;;  %v14741_v61 = vld [vmem:[#allocation12_spill] sm:$0xff] }
 0x32c   : > { %v4317_v31 = vadd.f32 %v12776_v45, %v4253_v0  ;;  %v4254_v17 = vadd.f32 %v4157_v63, %v13095_v2  ;;  %v10688_v0 = vld [vmem:[%s11267_s17 + $0x4e8] ss:$24 sps:$4 sm:$0xff]  }
 0x32d   : > { %4383 = vst.msk [vmem:[%s12796_s24 + $0x1b0] sm:$0xff] %vm1194_vm0, %v4319_v19  ;;  %v4320_v24 = vadd.f32 %v12776_v45, %v4256_v49  ;;  %6251 = vmatmul.mubr.bf16.gmra.mrb[80].mxu1 %v10667_v34  ;;  %6660 = vmatmul.mubr.bf16.gmra.mrb[76].mxu0 %v10670_v18  ;;  %v10685_v18 = vld [vmem:[%s11267_s17 + $0x210] ss:$24 sps:$4 sm:$0xff]   ;;  %v10696_v19 = vld [vmem:[%s11267_s17 + $0x51c] ss:$24 sps:$4 sm:$0xff]  }
 0x32e   : > { %4381 = vst.msk [vmem:[%s12796_s24 + $0x1a0] sm:$0xff] %vm1194_vm0, %v4317_v31  ;;  %v4318_v53 = vadd.f32 %v12776_v45, %v4254_v17  ;;  %6258 = vmatprep.mubr.bf16.mxu1 %v10675_v57  ;;  %6667 = vmatprep.mubr.bf16.mxu0 %v10678_v38  ;;  %v10693_v38 = vld [vmem:[%s11267_s17 + $0x244] ss:$24 sps:$4 sm:$0xff]  }
 0x32f   : > { %4384 = vst.msk [vmem:[%s12796_s24 + $0x1b8] sm:$0xff] %vm1194_vm0, %v4320_v24 }
 0x330   : > { %4382 = vst.msk [vmem:[%s12796_s24 + $0x1a8] sm:$0xff] %vm1194_vm0, %v4318_v53  ;;  %v9642_v36 = vpop.f32.mrb[232].mxu1  ;;  %v3672_v62 = vpop.f32.mrb[220].mxu0 }
 0x331   : > { %v3673_v59 = vadd.f32 %v3672_v62, %v12704_v12  ;;  %v4170_v21 = vpop.f32.mrb[233].mxu1  ;;  %v3674_v27 = vpop.f32.mrb[221].mxu0  ;;  %v10694_v62 = vld [vmem:[%s11267_s17 + $0x518] ss:$24 sps:$4 sm:$0xff]  }
 0x332   : > { %v4257_v32 = vadd.f32 %v4170_v21, %v3665_v23  ;;  %v9643_v2 = vpop.f32.mrb[234].mxu1  ;;  %v3675_v51 = vpop.f32.mrb[222].mxu0  ;;  %v10699_v27 = vld [vmem:[%s11267_s17 + $0x274] ss:$24 sps:$4 sm:$0xff]  }
 0x333   : > { %v4259_v28 = vadd.f32 %v9642_v36, %v3673_v59  ;;  %v3676_v6 = vadd.f32 %v3675_v51, %v12712_v50  ;;  %v4173_v16 = vpop.f32.mrb[235].mxu1  ;;  %v3677_v26 = vpop.f32.mrb[223].mxu0  ;;  %v10691_v36 = vld [vmem:[%s11267_s17 + $0x240] ss:$24 sps:$4 sm:$0xff]   ;;  %v10697_v51 = vld [vmem:[%s11267_s17 + $0x270] ss:$24 sps:$4 sm:$0xff]  }
 0x334   : > { %v4321_v12 = vadd.f32 %v12776_v45, %v4257_v32  ;;  %v4258_v52 = vadd.f32 %v4173_v16, %v3668_v1  ;;  %v10705_v16 = vld [vmem:[%s11267_s17 + $0x2a4] ss:$24 sps:$4 sm:$0xff]  }
 0x335   : > { %v4323_v22 = vadd.f32 %v12776_v45, %v4259_v28  ;;  %v4260_v56 = vadd.f32 %v9643_v2, %v3676_v6  ;;  %6259 = vmatmul.mubr.bf16.gmra.mrb[84].mxu1 %v10673_v3  ;;  %6668 = vmatmul.mubr.bf16.gmra.mrb[84].mxu0 %v10676_v35  ;;  %v10702_v3 = vld [vmem:[%s11267_s17 + $0x54c] ss:$24 sps:$4 sm:$0xff]   ;;  %v10708_v26 = vld [vmem:[%s11267_s17 + $0x57c] ss:$24 sps:$4 sm:$0xff]  }
 0x336   : > { %4385 = vst.msk [vmem:[%s12796_s24 + $0x1c0] sm:$0xff] %vm1194_vm0, %v4321_v12  ;;  %v4322_v44 = vadd.f32 %v12776_v45, %v4258_v52  ;;  %6266 = vmatprep.mubr.bf16.mxu1 %v10681_v48  ;;  %6675 = vmatprep.mubr.bf16.mxu0 %v10684_v47  ;;  %v10700_v48 = vld [vmem:[%s11267_s17 + $0x548] ss:$24 sps:$4 sm:$0xff]  }
 0x337   : > { %4387 = vst.msk [vmem:[%s12796_s24 + $0x1d0] sm:$0xff] %vm1194_vm0, %v4323_v22  ;;  %v4324_v50 = vadd.f32 %v12776_v45, %v4260_v56  ;;  %v10703_v56 = vld [vmem:[%s11267_s17 + $0x2a0] ss:$24 sps:$4 sm:$0xff]  }
 0x338   : > { %4386 = vst.msk [vmem:[%s12796_s24 + $0x1c8] sm:$0xff] %vm1194_vm0, %v4322_v44  ;;  %v3680_v7 = vpop.f32.mrb[224].mxu0  ;;  %v9646_v30 = vpop.f32.mrb[236].mxu1  ;;  %v10706_v44 = vld [vmem:[%s11267_s17 + $0x578] ss:$24 sps:$4 sm:$0xff]  }
 0x339   : > { %4388 = vst.msk [vmem:[%s12796_s24 + $0x1d8] sm:$0xff] %vm1194_vm0, %v4324_v50  ;;  %v3681_v11 = vadd.f32 %v3680_v7, %v14738_v25  ;;  %v3682_v46 = vpop.f32.mrb[225].mxu0  ;;  %v4186_v14 = vpop.f32.mrb[237].mxu1  ;;  %v10714_v25 = vld [vmem:[%s11267_s17 + $0x5ac] ss:$24 sps:$4 sm:$0xff]  }
 0x33a   : > { %v3683_v54 = vpop.f32.mrb[226].mxu0  ;;  %v9647_v20 = vpop.f32.mrb[238].mxu1 }
 0x33b   : > { %v3684_v40 = vadd.f32 %v3683_v54, %v14739_v37  ;;  %v4261_v55 = vadd.f32 %v4186_v14, %v3681_v11  ;;  %v3685_v8 = vpop.f32.mrb[227].mxu0  ;;  %v4189_v10 = vpop.f32.mrb[239].mxu1  ;;  %v10712_v54 = vld [vmem:[%s11267_s17 + $0x5a8] ss:$24 sps:$4 sm:$0xff]   ;;  %v10717_v37 = vld [vmem:[%s11267_s17 + $0x304] ss:$24 sps:$4 sm:$0xff]  }
 0x33d   : > { %v4325_v5 = vadd.f32 %v12776_v45, %v4261_v55  ;;  %v4262_v41 = vadd.f32 %v4189_v10, %v3684_v40  ;;  %6267 = vmatmul.mubr.bf16.gmra.mrb[88].mxu1 %v10679_v60  ;;  %6676 = vmatmul.mubr.bf16.gmra.mrb[92].mxu0 %v10682_v13  ;;  %v10709_v13 = vld [vmem:[%s11267_s17 + $0x2d0] ss:$24 sps:$4 sm:$0xff]   ;;  %v10720_v40 = vld [vmem:[%s11267_s17 + $0x5dc] ss:$24 sps:$4 sm:$0xff]  }
 0x33e   : > { %6274 = vmatprep.mubr.bf16.mxu1 %v10687_v4  ;;  %6683 = vmatprep.mubr.bf16.mxu0 %v10690_v29 }
 0x33f   : > { %4389 = vst.msk [vmem:[%s12796_s24 + $0x1e0] sm:$0xff] %vm1194_vm0, %v4325_v5  ;;  %v4326_v43 = vadd.f32 %v12776_v45, %v4262_v41  ;;  %v10715_v5 = vld [vmem:[%s11267_s17 + $0x300] ss:$24 sps:$4 sm:$0xff]  }
 0x340   : > { %v3688_v39 = vpop.f32.mrb[228].mxu0  ;;  %v13177_v23 = vpop.f32.mrb[240].mxu1  ;;  %v10718_v41 = vld [vmem:[%s11267_s17 + $0x5d8] ss:$24 sps:$4 sm:$0xff]  }
 0x341   : > { %4390 = vst.msk [vmem:[%s12796_s24 + $0x1e8] sm:$0xff] %vm1194_vm0, %v4326_v43  ;;  %v3689_v42 = vadd.f32 %v3688_v39, %v14740_v58  ;;  %v3690_v34 = vpop.f32.mrb[229].mxu0  ;;  %v13184_v15 = vpop.f32.mrb[241].mxu1  ;;  %v10723_v58 = vld [vmem:[%s11267_s17 + $0x334] ss:$24 sps:$4 sm:$0xff]  }
 0x342   : > { %v3691_v9 = vpop.f32.mrb[230].mxu0  ;;  %v13186_v57 = vpop.f32.mrb[242].mxu1 }
 0x343   : > { %v4263_v49 = vadd.f32 %v9646_v30, %v3689_v42  ;;  %v3692_v1 = vadd.f32 %v3691_v9, %v14741_v61  ;;  %v3693_v63 = vpop.f32.mrb[231].mxu0  ;;  %v13191_v33 = vpop.f32.mrb[243].mxu1  ;;  %v10711_v30 = vld [vmem:[%s11267_s17 + $0x2d4] ss:$24 sps:$4 sm:$0xff]  }
 0x344   : > { %v10726_v42 = vld [vmem:[%s11267_s17 + $0x14] ss:$24 sps:$4 sm:$0xff]   ;;  %v10729_v63 = vld [vmem:[%s11267_s17 + $0x364] ss:$24 sps:$4 sm:$0xff]  }
 0x345   : > { %v4327_v31 = vadd.f32 %v12776_v45, %v4263_v49  ;;  %v4264_v17 = vadd.f32 %v9647_v20, %v3692_v1  ;;  %6275 = vmatmul.mubr.bf16.gmra.mrb[92].mxu1 %v10685_v18  ;;  %6684 = vmatmul.mubr.bf16.gmra.mrb[100].mxu0 %v10688_v0 }
 0x346   : > { %6282 = vmatprep.mubr.bf16.mxu1 %v10693_v38  ;;  %6691 = vmatprep.mubr.bf16.mxu0 %v10696_v19  ;;  %v10721_v38 = vld [vmem:[%s11267_s17 + $0x330] ss:$24 sps:$4 sm:$0xff]  }
 0x347   : > { %4391 = vst.msk [vmem:[%s12796_s24 + $0x1f0] sm:$0xff] %vm1194_vm0, %v4327_v31  ;;  %v4328_v24 = vadd.f32 %v12776_v45, %v4264_v17  ;;  %v10724_v19 = vld [vmem:[%s11267_s17 + $0x10] ss:$24 sps:$4 sm:$0xff]   ;;  %v10732_v31 = vld [vmem:[%s11267_s17 + $0x44] ss:$24 sps:$4 sm:$0xff]  }
 0x348   : > { %v13197_v53 = vpop.f32.mrb[244].mxu1 }
 0x349   : > { %4392 = vst.msk [vmem:[%s12796_s24 + $0x1f8] sm:$0xff] %vm1194_vm0, %v4328_v24  ;;  %v13203_v59 = vpop.f32.mrb[245].mxu1 }
 0x34a   : > { %v13205_v21 = vpop.f32.mrb[246].mxu1 }
 0x34b   : > { %v13209_v35 = vpop.f32.mrb[247].mxu1 }
 0x34d   : > { %6283 = vmatmul.mubr.bf16.gmra.mrb[96].mxu1 %v10691_v36  ;;  %6692 = vmatmul.mubr.bf16.gmra.mrb[108].mxu0 %v10694_v62  ;;  %v10727_v62 = vld [vmem:[%s11267_s17 + $0x360] ss:$24 sps:$4 sm:$0xff]  }
 0x34e   : > { %6290 = vmatprep.mubr.bf16.mxu1 %v10699_v27  ;;  %6699 = vmatprep.mubr.bf16.mxu0 %v10702_v3  ;;  %v10730_v27 = vld [vmem:[%s11267_s17 + $0x40] ss:$24 sps:$4 sm:$0xff]  }
 0x350   : > { %v13211_v45 = vpop.f32.mrb[236].mxu0  ;;  %v13213_v32 = vpop.f32.mrb[248].mxu1 }
 0x351   : > { %v6487_v2 = vpop.f32.mrb[237].mxu0  ;;  %v13217_v47 = vpop.f32.mrb[249].mxu1 }
 0x352   : > { %v13219_v28 = vpop.f32.mrb[238].mxu0  ;;  %v13221_v6 = vpop.f32.mrb[250].mxu1 }
 0x353   : > { %v6490_v12 = vpop.f32.mrb[239].mxu0  ;;  %v13225_v52 = vpop.f32.mrb[251].mxu1 }
 0x355   : > { %6291 = vmatmul.mubr.bf16.gmra.mrb[100].mxu1 %v10697_v51  ;;  %6700 = vmatmul.mubr.bf16.gmra.mrb[116].mxu0 %v10700_v48  ;;  %v10735_v51 = vld [vmem:[%s11267_s17 + $0x394] ss:$24 sps:$4 sm:$0xff]  }
 0x356   : > { %6298 = vmatprep.mubr.bf16.mxu1 %v10705_v16  ;;  %6707 = vmatprep.mubr.bf16.mxu0 %v10708_v26  ;;  %v10736_v48 = vld [vmem:[%s11267_s17 + $0x74] ss:$24 sps:$4 sm:$0xff]  }
 0x358   : > { %v13227_v22 = vpop.f32.mrb[252].mxu1 }
 0x359   : > { %v13231_v50 = vpop.f32.mrb[253].mxu1 }
 0x35a   : > { %v13233_v7 = vpop.f32.mrb[254].mxu1 }
 0x35b   : > { %v13237_v11 = vpop.f32.mrb[255].mxu1 }
 0x35d   : > { %6299 = vmatmul.mubr.bf16.gmra.mrb[104].mxu1 %v10703_v56  ;;  %6708 = vmatmul.mubr.bf16.gmra.mrb[124].mxu0 %v10706_v44  ;;  %v10733_v44 = vld [vmem:[%s11267_s17 + $0x390] ss:$24 sps:$4 sm:$0xff]  }
 0x35e   : > { %6306 = vmatprep.mubr.bf16.mxu1 %v10711_v30  ;;  %6715 = vmatprep.mubr.bf16.mxu0 %v10714_v25  ;;  %v10738_v30 = vld [vmem:[%s11267_s17 + $0x70] ss:$24 sps:$4 sm:$0xff]  }
 0x360   : > { %v13239_v46 = vpop.f32.mrb[244].mxu0  ;;  %v13241_v14 = vpop.f32.mrb[0].mxu1 }
 0x361   : > { %v6503_v60 = vpop.f32.mrb[245].mxu0  ;;  %v13245_v20 = vpop.f32.mrb[1].mxu1 }
 0x362   : > { %v13247_v4 = vpop.f32.mrb[246].mxu0  ;;  %v13249_v29 = vpop.f32.mrb[2].mxu1 }
 0x363   : > { %v6506_v55 = vpop.f32.mrb[247].mxu0  ;;  %v13253_v8 = vpop.f32.mrb[3].mxu1 }
 0x365   : > { %6307 = vmatmul.mubr.bf16.gmra.mrb[108].mxu1 %v10709_v13  ;;  %6716 = vmatmul.mubr.bf16.gmra.mrb[132].mxu0 %v10712_v54  ;;  %v10741_v54 = vld [vmem:[%s11267_s17 + $0x3c4] ss:$24 sps:$4 sm:$0xff]  }
 0x366   : > { %6314 = vmatprep.mubr.bf16.mxu1 %v10717_v37  ;;  %6723 = vmatprep.mubr.bf16.mxu0 %v10720_v40  ;;  %v10744_v37 = vld [vmem:[%s11267_s17 + $0xa4] ss:$24 sps:$4 sm:$0xff]  }
 0x368   : > { %v13255_v10 = vpop.f32.mrb[4].mxu1 }
 0x369   : > { %v13259_v43 = vpop.f32.mrb[5].mxu1 }
 0x36a   : > { %v13261_v39 = vpop.f32.mrb[6].mxu1 }
 0x36b   : > { %v13265_v34 = vpop.f32.mrb[7].mxu1 }
 0x36d   : > { %6315 = vmatmul.mubr.bf16.gmra.mrb[112].mxu1 %v10715_v5  ;;  %6724 = vmatmul.mubr.bf16.gmra.mrb[140].mxu0 %v10718_v41  ;;  %v10739_v41 = vld [vmem:[%s11267_s17 + $0x3c0] ss:$24 sps:$4 sm:$0xff]  }
 0x36e   : > { %6322 = vmatprep.mubr.bf16.mxu1 %v10723_v58  ;;  %6764 = vmatprep.mubr.bf16.mxu0 %v10726_v42  ;;  %v10742_v58 = vld [vmem:[%s11267_s17 + $0xa0] ss:$24 sps:$4 sm:$0xff]  }
 0x370   : > { %v13267_v18 = vpop.f32.mrb[252].mxu0  ;;  %v13269_v0 = vpop.f32.mrb[8].mxu1 }
 0x371   : > { %v6519_v9 = vpop.f32.mrb[253].mxu0  ;;  %v13273_v49 = vpop.f32.mrb[9].mxu1 }
 0x372   : > { %v13275_v61 = vpop.f32.mrb[254].mxu0  ;;  %v13277_v1 = vpop.f32.mrb[10].mxu1 }
 0x373   : > { %v6522_v17 = vpop.f32.mrb[255].mxu0  ;;  %v13281_v24 = vpop.f32.mrb[11].mxu1 }
 0x375   : > { %6323 = vmatmul.mubr.bf16.gmra.mrb[116].mxu1 %v10721_v38  ;;  %6765 = vmatmul.mubr.bf16.vlgmr.msra.gmra.mrb[232].mxu0 %v10724_v19  ;;  %v10747_v38 = vld [vmem:[%s11267_s17 + $0x3f4] ss:$24 sps:$4 sm:$0xff]  }
 0x376   : > { %6330 = vmatprep.mubr.bf16.mxu1 %v10729_v63  ;;  %6772 = vmatprep.mubr.bf16.mxu0 %v10732_v31  ;;  %v10748_v19 = vld [vmem:[%s11267_s17 + $0xd4] ss:$24 sps:$4 sm:$0xff]  }
 0x378   : > { %v13283_v36 = vpop.f32.mrb[12].mxu1 }
 0x379   : > { %v13287_v3 = vpop.f32.mrb[13].mxu1 }
 0x37a   : > { %v13289_v2 = vpop.f32.mrb[14].mxu1 }
 0x37b   : > { %v13293_v16 = vpop.f32.mrb[15].mxu1 }
 0x37d   : > { %6331 = vmatmul.mubr.bf16.gmra.mrb[120].mxu1 %v10727_v62  ;;  %6773 = vmatmul.mubr.bf16.gmra.mrb[64].mxu0 %v10730_v27  ;;  %v10745_v27 = vld [vmem:[%s11267_s17 + $0x3f0] ss:$24 sps:$4 sm:$0xff]  }
 0x37e   : > { %6338 = vmatprep.mubr.bf16.mxu1 %v10735_v51  ;;  %6780 = vmatprep.mubr.bf16.mxu0 %v10736_v48  ;;  %v10750_v51 = vld [vmem:[%s11267_s17 + $0xd0] ss:$24 sps:$4 sm:$0xff]  }
 0x380   : > { %v13295_v26 = vpop.f32.mrb[4].mxu0  ;;  %v13297_v12 = vpop.f32.mrb[16].mxu1 }
 0x381   : > { %14742 = vst [vmem:[#allocation13_spill] sm:$0xff] %v13297_v12  ;;  %v6535_v56 = vpop.f32.mrb[5].mxu0  ;;  %v13301_v25 = vpop.f32.mrb[17].mxu1  ;;  %v10795_v12 = vld [vmem:[%s11267_s17 + $0x574] ss:$24 sps:$4 sm:$0xff]  }
 0x382   : > { %v13303_v60 = vpop.f32.mrb[6].mxu0  ;;  %v13305_v13 = vpop.f32.mrb[18].mxu1 }
 0x383   : > { %14743 = vst [vmem:[#allocation14_spill] sm:$0xff] %v13305_v13  ;;  %v6538_v40 = vpop.f32.mrb[7].mxu0  ;;  %v13309_v55 = vpop.f32.mrb[19].mxu1  ;;  %v10790_v13 = vld [vmem:[%s11267_s17 + $0x220] ss:$24 sps:$4 sm:$0xff]  }
 0x384   : > { %14744 = vst [vmem:[#allocation15_spill] sm:$0xff] %v13309_v55  ;;  %v10798_v55 = vld [vmem:[%s11267_s17 + $0x254] ss:$24 sps:$4 sm:$0xff]  }
 0x385   : > { %6339 = vmatmul.mubr.bf16.gmra.mrb[124].mxu1 %v10733_v44  ;;  %6781 = vmatmul.mubr.bf16.gmra.mrb[240].mxu0 %v10738_v30  ;;  %v10753_v30 = vld [vmem:[%s11267_s17 + $0x424] ss:$24 sps:$4 sm:$0xff]  }
 0x386   : > { %6346 = vmatprep.mubr.bf16.mxu1 %v10741_v54  ;;  %6788 = vmatprep.mubr.bf16.mxu0 %v10744_v37  ;;  %v10756_v54 = vld [vmem:[%s11267_s17 + $0x104] ss:$24 sps:$4 sm:$0xff]  }
 0x388   : > { %v13311_v5 = vpop.f32.mrb[20].mxu1 }
 0x389   : > { %14745 = vst [vmem:[#allocation16_spill] sm:$0xff] %v13311_v5  ;;  %v13315_v42 = vpop.f32.mrb[21].mxu1 }
 0x38a   : > { %14746 = vst [vmem:[#allocation20_spill] sm:$0xff] %v13315_v42  ;;  %v13317_v9 = vpop.f32.mrb[22].mxu1 }
 0x38b   : > { %14747 = vst [vmem:[#allocation23_spill] sm:$0xff] %v13317_v9  ;;  %v13321_v63 = vpop.f32.mrb[23].mxu1 }
 0x38c   : > { %14748 = vst [vmem:[#allocation25_spill] sm:$0xff] %v13321_v63  ;;  %v10786_v63 = vld [vmem:[%s11267_s17 + $0x1f4] ss:$24 sps:$4 sm:$0xff]  }
 0x38d   : > { %6347 = vmatmul.mubr.bf16.gmra.mrb[132].mxu1 %v10739_v41  ;;  %6789 = vmatmul.mubr.bf16.gmra.mrb[144].mxu0 %v10742_v58  ;;  %v10751_v58 = vld [vmem:[%s11267_s17 + $0x420] ss:$24 sps:$4 sm:$0xff]  }
 0x38e   : > { %6354 = vmatprep.mubr.bf16.mxu1 %v10747_v38  ;;  %6796 = vmatprep.mubr.bf16.mxu0 %v10748_v19  ;;  %v10754_v38 = vld [vmem:[%s11267_s17 + $0x100] ss:$24 sps:$4 sm:$0xff]  }
 0x390   : > { %v13323_v31 = vpop.f32.mrb[12].mxu0  ;;  %v13325_v17 = vpop.f32.mrb[24].mxu1 }
 0x391   : > { %14749 = vst [vmem:[#allocation26_spill] sm:$0xff] %v13325_v17  ;;  %v6551_v62 = vpop.f32.mrb[13].mxu0  ;;  %v13329_v48 = vpop.f32.mrb[25].mxu1 }
 0x392   : > { %14750 = vst [vmem:[#allocation31_spill] sm:$0xff] %v13329_v48  ;;  %v13331_v56 = vpop.f32.mrb[14].mxu0  ;;  %v13333_v44 = vpop.f32.mrb[26].mxu1 }
 0x393   : > { %14751 = vst [vmem:[#allocation17_spill] sm:$0xff] %v13333_v44  ;;  %v6554_v37 = vpop.f32.mrb[15].mxu0  ;;  %v13337_v40 = vpop.f32.mrb[27].mxu1  ;;  %v10759_v44 = vld [vmem:[%s11267_s17 + $0x454] ss:$24 sps:$4 sm:$0xff]  }
 0x394   : > { %14752 = vst [vmem:[#allocation27_spill] sm:$0xff] %v13337_v40  ;;  %v10762_v37 = vld [vmem:[%s11267_s17 + $0x134] ss:$24 sps:$4 sm:$0xff]  }
 0x395   : > { %6355 = vmatmul.mubr.bf16.gmra.mrb[140].mxu1 %v10745_v27  ;;  %6797 = vmatmul.mubr.bf16.gmra.mrb[248].mxu0 %v10750_v51 }
 0x396   : > { %6362 = vmatprep.mubr.bf16.mxu1 %v10753_v30  ;;  %6804 = vmatprep.mubr.bf16.mxu0 %v10756_v54  ;;  %v10757_v54 = vld [vmem:[%s11267_s17 + $0x450] ss:$24 sps:$4 sm:$0xff]  }
 0x398   : > { %v13339_v41 = vpop.f32.mrb[28].mxu1 }
 0x399   : > { %14753 = vst [vmem:[#allocation28_spill] sm:$0xff] %v13339_v41  ;;  %v13343_v19 = vpop.f32.mrb[29].mxu1  ;;  %v10760_v41 = vld [vmem:[%s11267_s17 + $0x130] ss:$24 sps:$4 sm:$0xff]  }
 0x39a   : > { %14754 = vst [vmem:[#allocation32_spill] sm:$0xff] %v13343_v19  ;;  %v13345_v62 = vpop.f32.mrb[30].mxu1 }
 0x39b   : > { %14755 = vst [vmem:[#allocation33_spill] sm:$0xff] %v13345_v62  ;;  %v13349_v17 = vpop.f32.mrb[31].mxu1 }
 0x39c   : > { %14756 = vst [vmem:[#allocation29_spill] sm:$0xff] %v13349_v17 }
 0x39d   : > { %6363 = vmatmul.mubr.bf16.gmra.mrb[148].mxu1 %v10751_v58  ;;  %6805 = vmatmul.mubr.bf16.gmra.mrb[72].mxu0 %v10754_v38  ;;  %v10765_v58 = vld [vmem:[%s11267_s17 + $0x484] ss:$24 sps:$4 sm:$0xff]  }
 0x39e   : > { %6370 = vmatprep.mubr.bf16.mxu1 %v10759_v44  ;;  %6812 = vmatprep.mubr.bf16.mxu0 %v10762_v37  ;;  %v10768_v44 = vld [vmem:[%s11267_s17 + $0x164] ss:$24 sps:$4 sm:$0xff]  }
 0x3a0   : > { %v13351_v27 = vpop.f32.mrb[20].mxu0  ;;  %v13353_v51 = vpop.f32.mrb[32].mxu1 }
 0x3a1   : > { %14757 = vst [vmem:[#allocation30_spill] sm:$0xff] %v13353_v51  ;;  %v6567_v30 = vpop.f32.mrb[21].mxu0  ;;  %v13357_v62 = vpop.f32.mrb[33].mxu1  ;;  %v10763_v51 = vld [vmem:[%s11267_s17 + $0x480] ss:$24 sps:$4 sm:$0xff]  }
 0x3a2   : > { %14758 = vst [vmem:[#allocation34_spill] sm:$0xff] %v13357_v62  ;;  %v13359_v19 = vpop.f32.mrb[22].mxu0  ;;  %v13361_v17 = vpop.f32.mrb[34].mxu1  ;;  %v10766_v62 = vld [vmem:[%s11267_s17 + $0x160] ss:$24 sps:$4 sm:$0xff]  }
 0x3a3   : > { %14759 = vst [vmem:[#allocation35_spill] sm:$0xff] %v13361_v17  ;;  %v6570_v38 = vpop.f32.mrb[23].mxu0  ;;  %v13365_v37 = vpop.f32.mrb[35].mxu1  ;;  %v10771_v17 = vld [vmem:[%s11267_s17 + $0x4b4] ss:$24 sps:$4 sm:$0xff]  }
 0x3a4   : > { %14760 = vst [vmem:[#allocation9_spill] sm:$0xff] %v13365_v37  ;;  %v10774_v38 = vld [vmem:[%s11267_s17 + $0x194] ss:$24 sps:$4 sm:$0xff]   ;;  %v10778_v37 = vld [vmem:[%s11267_s17 + $0x1c0] ss:$24 sps:$4 sm:$0xff]  }
 0x3a5   : > { %6371 = vmatmul.mubr.bf16.gmra.mrb[156].mxu1 %v10757_v54  ;;  %6813 = vmatmul.mubr.bf16.gmra.mrb[0].mxu0 %v10760_v41 }
 0x3a6   : > { %6378 = vmatprep.mubr.bf16.mxu1 %v10765_v58  ;;  %6820 = vmatprep.mubr.bf16.mxu0 %v10768_v44  ;;  %v10769_v44 = vld [vmem:[%s11267_s17 + $0x4b0] ss:$24 sps:$4 sm:$0xff]  }
 0x3a8   : > { %v13367_v30 = vpop.f32.mrb[36].mxu1 }
 0x3a9   : > { %14761 = vst [vmem:[#allocation18_spill] sm:$0xff] %v13367_v30  ;;  %v13371_v40 = vpop.f32.mrb[37].mxu1  ;;  %v10772_v30 = vld [vmem:[%s11267_s17 + $0x190] ss:$24 sps:$4 sm:$0xff]  }
 0x3aa   : > { %14762 = vst [vmem:[#allocation10_spill] sm:$0xff] %v13371_v40  ;;  %v13373_v48 = vpop.f32.mrb[38].mxu1 }
 0x3ab   : > { %14763 = vst [vmem:[#allocation21_spill] sm:$0xff] %v13373_v48  ;;  %v13377_v9 = vpop.f32.mrb[39].mxu1 }
 0x3ac   : > { %14764 = vst [vmem:[#allocation24_spill] sm:$0xff] %v13377_v9 }
 0x3ad   : > { %6379 = vmatmul.mubr.bf16.gmra.mrb[164].mxu1 %v10763_v51  ;;  %6821 = vmatmul.mubr.bf16.gmra.mrb[148].mxu0 %v10766_v62  ;;  %v10777_v62 = vld [vmem:[%s11267_s17 + $0x4e4] ss:$24 sps:$4 sm:$0xff]  }
 0x3ae   : > { %6386 = vmatprep.mubr.bf16.mxu1 %v10771_v17  ;;  %6828 = vmatprep.mubr.bf16.mxu0 %v10774_v38  ;;  %v10780_v17 = vld [vmem:[%s11267_s17 + $0x1c4] ss:$24 sps:$4 sm:$0xff]  }
 0x3b0   : > { %v13379_v41 = vpop.f32.mrb[28].mxu0  ;;  %v13381_v54 = vpop.f32.mrb[40].mxu1 }
 0x3b1   : > { %14765 = vst [vmem:[#allocation19_spill] sm:$0xff] %v13381_v54  ;;  %v6583_v58 = vpop.f32.mrb[29].mxu0  ;;  %v13385_v48 = vpop.f32.mrb[41].mxu1  ;;  %v10775_v54 = vld [vmem:[%s11267_s17 + $0x4e0] ss:$24 sps:$4 sm:$0xff]  }
 0x3b2   : > { %14766 = vst [vmem:[#allocation11_spill] sm:$0xff] %v13385_v48  ;;  %v13387_v40 = vpop.f32.mrb[30].mxu0  ;;  %v13389_v9 = vpop.f32.mrb[42].mxu1 }
 0x3b3   : > { %14767 = vst [vmem:[#allocation22_spill] sm:$0xff] %v13389_v9  ;;  %v6586_v51 = vpop.f32.mrb[31].mxu0  ;;  %v13393_v38 = vpop.f32.mrb[43].mxu1  ;;  %v10783_v9 = vld [vmem:[%s11267_s17 + $0x514] ss:$24 sps:$4 sm:$0xff]  }
 0x3b4   : > { %14768 = vst [vmem:[#allocation12_spill] sm:$0xff] %v13393_v38 }
 0x3b5   : > { %6387 = vmatmul.mubr.bf16.gmra.mrb[172].mxu1 %v10769_v44  ;;  %6829 = vmatmul.mubr.bf16.gmra.mrb[8].mxu0 %v10772_v30 }
 0x3b6   : > { %6394 = vmatprep.mubr.bf16.mxu1 %v10777_v62  ;;  %6836 = vmatprep.mubr.bf16.mxu0 %v10780_v17 }
 0x3b8   : > { %v13395_v58 = vpop.f32.mrb[44].mxu1 }
 0x3b9   : > { %14769 = vst [vmem:[#allocation36_spill] sm:$0xff] %v13395_v58  ;;  %v13398_v48 = vpop.f32.mrb[45].mxu1 }
 0x3ba   : > { %14770 = vst [vmem:[#allocation37_spill] sm:$0xff] %v13398_v48  ;;  %v13401_v5 = vpop.f32.mrb[46].mxu1  ;;  %v10781_v48 = vld [vmem:[%s11267_s17 + $0x510] ss:$24 sps:$4 sm:$0xff]  }
 0x3bb   : > { %14771 = vst [vmem:[#allocation38_spill] sm:$0xff] %v13401_v5  ;;  %v13405_v51 = vpop.f32.mrb[47].mxu1  ;;  %v10784_v5 = vld [vmem:[%s11267_s17 + $0x1f0] ss:$24 sps:$4 sm:$0xff]  }
 0x3bc   : > { %14772 = vst [vmem:[#allocation39_spill] sm:$0xff] %v13405_v51 }
 0x3bd   : > { %6395 = vmatmul.mubr.bf16.gmra.mrb[128].mxu1 %v10775_v54  ;;  %6837 = vmatmul.mubr.bf16.gmra.mrb[80].mxu0 %v10778_v37  ;;  %v10789_v54 = vld [vmem:[%s11267_s17 + $0x544] ss:$24 sps:$4 sm:$0xff]  }
 0x3be   : > { %6402 = vmatprep.mubr.bf16.mxu1 %v10783_v9  ;;  %6844 = vmatprep.mubr.bf16.mxu0 %v10786_v63  ;;  %v10792_v9 = vld [vmem:[%s11267_s17 + $0x224] ss:$24 sps:$4 sm:$0xff]  }
 0x3c0   : > { %v6188_v30 = vpop.f32.mrb[48].mxu1  ;;  %v13407_v44 = vpop.f32.mrb[36].mxu0 }
 0x3c1   : > { %v13410_v62 = vadd.f32 %v6188_v30, %v13184_v15  ;;  %v6190_v17 = vpop.f32.mrb[49].mxu1  ;;  %v6599_v58 = vpop.f32.mrb[37].mxu0 }
 0x3c2   : > { %v6191_v38 = vpop.f32.mrb[50].mxu1  ;;  %v13414_v42 = vpop.f32.mrb[38].mxu0  ;;  %v10787_v17 = vld [vmem:[%s11267_s17 + $0x540] ss:$24 sps:$4 sm:$0xff]  }
 0x3c3   : > { %14773 = vst [vmem:[#allocation40_spill] sm:$0xff] %v13410_v62  ;;  %v13419_v63 = vadd.f32 %v6191_v38, %v13191_v33  ;;  %v6602_v37 = vpop.f32.mrb[39].mxu0  ;;  %v6193_v51 = vpop.f32.mrb[51].mxu1 }
 0x3c5   : > { %6403 = vmatmul.mubr.bf16.gmra.mrb[136].mxu1 %v10781_v48  ;;  %6845 = vmatmul.mubr.bf16.gmra.mrb[16].mxu0 %v10784_v5 }
 0x3c6   : > { %6410 = vmatprep.mubr.bf16.mxu1 %v10789_v54  ;;  %6852 = vmatprep.mubr.bf16.mxu0 %v10792_v9  ;;  %v10793_v9 = vld [vmem:[%s11267_s17 + $0x570] ss:$24 sps:$4 sm:$0xff]  }
 0x3c8   : > { %v6196_v15 = vpop.f32.mrb[52].mxu1 }
 0x3c9   : > { %v6197_v58 = vadd.f32 %v13177_v23, %v6196_v15  ;;  %v6198_v30 = vpop.f32.mrb[53].mxu1 }
 0x3ca   : > { %v6199_v62 = vpop.f32.mrb[54].mxu1 }
 0x3cb   : > { %v6200_v33 = vadd.f32 %v13186_v57, %v6199_v62  ;;  %v6201_v38 = vpop.f32.mrb[55].mxu1  ;;  %v13428_v48 = vadd.f32 %v13211_v45, %v6197_v58  ;;  %v10796_v45 = vld [vmem:[%s11267_s17 + $0x250] ss:$24 sps:$4 sm:$0xff]  }
 0x3cc   : > { %v10802_v38 = vld [vmem:[%s11267_s17 + $0x280] ss:$24 sps:$4 sm:$0xff]  }
 0x3cd   : > { %6411 = vmatmul.mubr.bf16.gmra.mrb[144].mxu1 %v10787_v17  ;;  %6853 = vmatmul.mubr.bf16.gmra.mrb[152].mxu0 %v10790_v13  ;;  %v13431_v23 = vadd.f32 %v13219_v28, %v6200_v33  ;;  %v10801_v28 = vld [vmem:[%s11267_s17 + $0x5a4] ss:$24 sps:$4 sm:$0xff]   ;;  %v10799_v33 = vld [vmem:[%s11267_s17 + $0x5a0] ss:$24 sps:$4 sm:$0xff]  }
 0x3ce   : > { %6418 = vmatprep.mubr.bf16.mxu1 %v10795_v12  ;;  %6860 = vmatprep.mubr.bf16.mxu0 %v10798_v55  ;;  %v10804_v12 = vld [vmem:[%s11267_s17 + $0x284] ss:$24 sps:$4 sm:$0xff]  }
 0x3d0   : > { %v6204_v5 = vpop.f32.mrb[56].mxu1  ;;  %v13433_v51 = vpop.f32.mrb[44].mxu0 }
 0x3d1   : > { %v13436_v54 = vadd.f32 %v6204_v5, %v13203_v59  ;;  %v6206_v57 = vpop.f32.mrb[57].mxu1  ;;  %v6615_v62 = vpop.f32.mrb[45].mxu0 }
 0x3d2   : > { %v6207_v37 = vpop.f32.mrb[58].mxu1  ;;  %v13440_v15 = vpop.f32.mrb[46].mxu0  ;;  %v10807_v57 = vld [vmem:[%s11267_s17 + $0x5d4] ss:$24 sps:$4 sm:$0xff]  }
 0x3d3   : > { %14774 = vst [vmem:[#allocation41_spill] sm:$0xff] %v13436_v54  ;;  %v13445_v13 = vadd.f32 %v6207_v37, %v13209_v35  ;;  %v6618_v55 = vpop.f32.mrb[47].mxu0  ;;  %v6209_v58 = vpop.f32.mrb[59].mxu1  ;;  %v10810_v62 = vld [vmem:[%s11267_s17 + $0x2b4] ss:$24 sps:$4 sm:$0xff]  }
 0x3d4   : > { %v10805_v58 = vld [vmem:[%s11267_s17 + $0x5d0] ss:$24 sps:$4 sm:$0xff]  }
 0x3d5   : > { %6419 = vmatmul.mubr.bf16.gmra.mrb[152].mxu1 %v10793_v9  ;;  %6861 = vmatmul.mubr.bf16.gmra.mrb[24].mxu0 %v10796_v45  ;;  %v7022_v9 = vld [vmem:[%s13461_s29 + $0x8] sm:$0xff] }
 0x3d6   : > { %6426 = vmatprep.mubr.bf16.mxu1 %v10801_v28  ;;  %6868 = vmatprep.mubr.bf16.mxu0 %v10804_v12 }
 0x3d8   : > { %v6212_v59 = vpop.f32.mrb[60].mxu1 }
 0x3d9   : > { %v6213_v30 = vadd.f32 %v13197_v53, %v6212_v59  ;;  %v6214_v17 = vpop.f32.mrb[61].mxu1  ;;  %v10808_v59 = vld [vmem:[%s11267_s17 + $0x2b0] ss:$24 sps:$4 sm:$0xff]  }
 0x3da   : > { %v6215_v5 = vpop.f32.mrb[62].mxu1  ;;  %v10813_v17 = vld [vmem:[%s11267_s17 + $0x2e4] ss:$24 sps:$4 sm:$0xff]  }
 0x3db   : > { %v6216_v54 = vadd.f32 %v13205_v21, %v6215_v5  ;;  %v6217_v35 = vpop.f32.mrb[63].mxu1  ;;  %v13454_v37 = vadd.f32 %v13239_v46, %v6213_v30  ;;  %v7021_v21 = vld [vmem:[%s13461_s29] sm:$0xff]  ;;  %v7023_v5 = vld [vmem:[%s13461_s29 + $0x10] sm:$0xff] }
 0x3dc   : > { %v7085_v30 = vpack.c.bf16 %v7022_v9, %v7021_v21  ;;  %v7026_v35 = vld [vmem:[%s13461_s29 + $0x28] sm:$0xff] }
 0x3dd   : > { %6427 = vmatmul.mubr.bf16.gmra.mrb[160].mxu1 %v10799_v33  ;;  %6869 = vmatmul.mubr.bf16.gmra.mrb[88].mxu0 %v10802_v38  ;;  %v13464_v53 = vadd.f32 %v13247_v4, %v6216_v54 }
 0x3de   : > { %6434 = vmatprep.mubr.bf16.mxu1 %v10807_v57  ;;  %6876 = vmatprep.mubr.bf16.mxu0 %v10810_v62  ;;  %v7024_v57 = vld [vmem:[%s13461_s29 + $0x18] sm:$0xff]  ;;  %v7025_v62 = vld [vmem:[%s13461_s29 + $0x20] sm:$0xff] }
 0x3e0   : > { %v6220_v46 = vpop.f32.mrb[64].mxu1  ;;  %v13468_v45 = vpop.f32.mrb[52].mxu0 }
 0x3e1   : > { %v13471_v28 = vadd.f32 %v6220_v46, %v13217_v47  ;;  %v6222_v12 = vpop.f32.mrb[65].mxu1  ;;  %v6631_v55 = vpop.f32.mrb[53].mxu0 }
 0x3e2   : > { %v6223_v4 = vpop.f32.mrb[66].mxu1  ;;  %v13475_v54 = vpop.f32.mrb[54].mxu0  ;;  %v7086_v12 = vpack.c.bf16 %v7024_v57, %v7023_v5  ;;  %v7029_v5 = vld [vmem:[%s13461_s29 + $0x40] sm:$0xff]  ;;  %v7030_v57 = vld [vmem:[%s13461_s29 + $0x48] sm:$0xff] }
 0x3e3   : > { %v13479_v33 = vadd.f32 %v6223_v4, %v13225_v52  ;;  %v6634_v38 = vpop.f32.mrb[55].mxu0  ;;  %v6225_v47 = vpop.f32.mrb[67].mxu1  ;;  %v10811_v52 = vld [vmem:[%s11267_s17 + $0x2e0] ss:$24 sps:$4 sm:$0xff]  }
 0x3e4   : > { %v7027_v38 = vld [vmem:[%s13461_s29 + $0x30] sm:$0xff]  ;;  %v7028_v47 = vld [vmem:[%s13461_s29 + $0x38] sm:$0xff] }
 0x3e5   : > { %6435 = vmatmul.mubr.bf16.gmra.mrb[168].mxu1 %v10805_v58  ;;  %6877 = vmatmul.mubr.bf16.gmra.mrb[32].mxu0 %v10808_v59  ;;  %v7087_v58 = vpack.c.bf16 %v7026_v35, %v7025_v62  ;;  %v10816_v59 = vld [vmem:[%s11267_s17 + $0x314] ss:$24 sps:$4 sm:$0xff]  }
 0x3e6   : > { %9724 = vmatprep.mubr.msk.bf16.mxu1 %vm3815_vm1, %v7085_v30  ;;  %6884 = vmatprep.mubr.bf16.mxu0 %v10813_v17 }
 0x3e8   : > { %v6228_v46 = vpop.f32.mrb[68].mxu1 }
 0x3e9   : > { %v6229_v21 = vadd.f32 %v13213_v32, %v6228_v46  ;;  %v6230_v9 = vpop.f32.mrb[69].mxu1 }
 0x3ea   : > { %v6231_v55 = vpop.f32.mrb[70].mxu1 }
 0x3eb   : > { %v6232_v4 = vadd.f32 %v13221_v6, %v6231_v55  ;;  %v6233_v30 = vpop.f32.mrb[71].mxu1  ;;  %v13491_v17 = vadd.f32 %v13267_v18, %v6229_v21  ;;  %v7088_v21 = vpack.c.bf16 %v7028_v47, %v7027_v38  ;;  %v10819_v55 = vld [vmem:[%s11267_s17 + $0x344] ss:$24 sps:$4 sm:$0xff]   ;;  %v7034_v47 = vld [vmem:[%s13461_s29 + $0x68] sm:$0xff] }
 0x3ec   : > { %v7032_v30 = vld [vmem:[%s13461_s29 + $0x58] sm:$0xff]  ;;  %v7033_v38 = vld [vmem:[%s13461_s29 + $0x60] sm:$0xff] }
 0x3ed   : > { %9725 = vmatmul.mubr.msk.bf16.vlgmr.msra.gmra.mrb[176].mxu1 %vm3815_vm1, %v7086_v12  ;;  %6885 = vmatmul.mubr.bf16.gmra.mrb[156].mxu0 %v10811_v52  ;;  %v13495_v32 = vadd.f32 %v13275_v61, %v6232_v4  ;;  %v10814_v61 = vld [vmem:[%s11267_s17 + $0x310] ss:$24 sps:$4 sm:$0xff]   ;;  %v7089_v12 = vpack.c.bf16 %v7030_v57, %v7029_v5  ;;  %v10817_v57 = vld [vmem:[%s11267_s17 + $0x340] ss:$24 sps:$4 sm:$0xff]  }
 0x3ee   : > { %9728 = vmatprep.mubr.msk.bf16.mxu1 %vm3815_vm1, %v7087_v58  ;;  %6892 = vmatprep.mubr.bf16.mxu0 %v10816_v59  ;;  %v7031_v4 = vld [vmem:[%s13461_s29 + $0x50] sm:$0xff] }
 0x3f0   : > { %v6236_v6 = vpop.f32.mrb[72].mxu1  ;;  %v13502_v62 = vpop.f32.mrb[60].mxu0 }
 0x3f1   : > { %v13505_v18 = vadd.f32 %v6236_v6, %v13231_v50  ;;  %v6238_v35 = vpop.f32.mrb[73].mxu1  ;;  %v6647_v46 = vpop.f32.mrb[61].mxu0 }
 0x3f2   : > { %v6239_v9 = vpop.f32.mrb[74].mxu1  ;;  %v13508_v52 = vpop.f32.mrb[62].mxu0  ;;  %v7090_v35 = vpack.c.bf16 %v7032_v30, %v7031_v4  ;;  %v7037_v4 = vld [vmem:[%s13461_s29 + $0x80] sm:$0xff]  ;;  %v7038_v30 = vld [vmem:[%s13461_s29 + $0x88] sm:$0xff] }
 0x3f3   : > { %v13512_v58 = vadd.f32 %v6239_v9, %v13237_v11  ;;  %v6650_v59 = vpop.f32.mrb[63].mxu0  ;;  %v6241_v50 = vpop.f32.mrb[75].mxu1 }
 0x3f4   : > { %v7035_v59 = vld [vmem:[%s13461_s29 + $0x70] sm:$0xff]  ;;  %v7036_v50 = vld [vmem:[%s13461_s29 + $0x78] sm:$0xff] }
 0x3f5   : > { %9729 = vmatmul.mubr.msk.bf16.gmra.mrb[180].mxu1 %vm3815_vm1, %v7088_v21  ;;  %6893 = vmatmul.mubr.bf16.gmra.mrb[40].mxu0 %v10814_v61  ;;  %v7091_v21 = vpack.c.bf16 %v7034_v47, %v7033_v38  ;;  %v10822_v61 = vld [vmem:[%s11267_s17 + $0x374] ss:$24 sps:$4 sm:$0xff]  }
 0x3f6   : > { %9732 = vmatprep.mubr.msk.bf16.mxu1 %vm3815_vm1, %v7089_v12  ;;  %6900 = vmatprep.mubr.bf16.mxu0 %v10819_v55 }
 0x3f8   : > { %v6244_v6 = vpop.f32.mrb[76].mxu1 }
 0x3f9   : > { %v6245_v5 = vadd.f32 %v13227_v22, %v6244_v6  ;;  %v6246_v11 = vpop.f32.mrb[77].mxu1 }
 0x3fa   : > { %v6247_v46 = vpop.f32.mrb[78].mxu1 }
 0x3fb   : > { %v6248_v9 = vadd.f32 %v13233_v7, %v6247_v46  ;;  %v6249_v12 = vpop.f32.mrb[79].mxu1  ;;  %v13525_v55 = vadd.f32 %v13295_v26, %v6245_v5  ;;  %v7092_v5 = vpack.c.bf16 %v7036_v50, %v7035_v59  ;;  %v10825_v46 = vld [vmem:[%s11267_s17 + $0x3a4] ss:$24 sps:$4 sm:$0xff]   ;;  %v7042_v50 = vld [vmem:[%s13461_s29 + $0xa8] sm:$0xff] }
 0x3fc   : > { %v7040_v12 = vld [vmem:[%s13461_s29 + $0x98] sm:$0xff]  ;;  %v7041_v59 = vld [vmem:[%s13461_s29 + $0xa0] sm:$0xff] }
 0x3fd   : > { %9733 = vmatmul.mubr.msk.bf16.gmra.mrb[184].mxu1 %vm3815_vm1, %v7090_v35  ;;  %6901 = vmatmul.mubr.bf16.gmra.mrb[96].mxu0 %v10817_v57  ;;  %v13529_v22 = vadd.f32 %v13303_v60, %v6248_v9  ;;  %v10820_v60 = vld [vmem:[%s11267_s17 + $0x370] ss:$24 sps:$4 sm:$0xff]   ;;  %v7093_v35 = vpack.c.bf16 %v7038_v30, %v7037_v4  ;;  %v10823_v30 = vld [vmem:[%s11267_s17 + $0x3a0] ss:$24 sps:$4 sm:$0xff]  }
 0x3fe   : > { %9736 = vmatprep.mubr.msk.bf16.mxu1 %vm3815_vm1, %v7091_v21  ;;  %6908 = vmatprep.mubr.bf16.mxu0 %v10822_v61  ;;  %v7039_v9 = vld [vmem:[%s13461_s29 + $0x90] sm:$0xff] }
 0x400   : > { %v6252_v7 = vpop.f32.mrb[80].mxu1  ;;  %v13536_v38 = vpop.f32.mrb[76].mxu0 }
 0x401   : > { %v13539_v26 = vadd.f32 %v6252_v7, %v13245_v20  ;;  %v6254_v47 = vpop.f32.mrb[81].mxu1  ;;  %v6663_v6 = vpop.f32.mrb[77].mxu0 }
 0x402   : > { %v6255_v11 = vpop.f32.mrb[82].mxu1  ;;  %v13542_v57 = vpop.f32.mrb[78].mxu0  ;;  %v7094_v47 = vpack.c.bf16 %v7040_v12, %v7039_v9  ;;  %v7045_v9 = vld [vmem:[%s13461_s29 + $0xc0] sm:$0xff]  ;;  %v7046_v12 = vld [vmem:[%s13461_s29 + $0xc8] sm:$0xff] }
 0x403   : > { %v13546_v21 = vadd.f32 %v6255_v11, %v13253_v8  ;;  %v6666_v61 = vpop.f32.mrb[79].mxu0  ;;  %v6257_v20 = vpop.f32.mrb[83].mxu1 }
 0x404   : > { %v7043_v61 = vld [vmem:[%s13461_s29 + $0xb0] sm:$0xff]  ;;  %v7044_v20 = vld [vmem:[%s13461_s29 + $0xb8] sm:$0xff] }
 0x405   : > { %9737 = vmatmul.mubr.msk.bf16.gmra.mrb[188].mxu1 %vm3815_vm1, %v7092_v5  ;;  %6909 = vmatmul.mubr.bf16.gmra.mrb[48].mxu0 %v10820_v60  ;;  %v7095_v5 = vpack.c.bf16 %v7042_v50, %v7041_v59  ;;  %v10828_v60 = vld [vmem:[%s11267_s17 + $0x3d4] ss:$24 sps:$4 sm:$0xff]  }
 0x406   : > { %9740 = vmatprep.mubr.msk.bf16.mxu1 %vm3815_vm1, %v7093_v35  ;;  %6916 = vmatprep.mubr.bf16.mxu0 %v10825_v46 }
 0x408   : > { %v6260_v7 = vpop.f32.mrb[84].mxu1 }
 0x409   : > { %v6261_v4 = vadd.f32 %v13241_v14, %v6260_v7  ;;  %v6262_v8 = vpop.f32.mrb[85].mxu1 }
 0x40a   : > { %v6263_v6 = vpop.f32.mrb[86].mxu1 }
 0x40b   : > { %v6264_v11 = vadd.f32 %v13249_v29, %v6263_v6  ;;  %v6265_v35 = vpop.f32.mrb[87].mxu1  ;;  %v13559_v46 = vadd.f32 %v13323_v31, %v6261_v4  ;;  %v7096_v4 = vpack.c.bf16 %v7044_v20, %v7043_v61  ;;  %v10831_v6 = vld [vmem:[%s11267_s17 + $0x404] ss:$24 sps:$4 sm:$0xff]   ;;  %v7050_v20 = vld [vmem:[%s13461_s29 + $0xe8] sm:$0xff] }
 0x40c   : > { %v7048_v35 = vld [vmem:[%s13461_s29 + $0xd8] sm:$0xff]  ;;  %v7049_v61 = vld [vmem:[%s13461_s29 + $0xe0] sm:$0xff] }
 0x40d   : > { %9741 = vmatmul.mubr.msk.bf16.gmra.mrb[192].mxu1 %vm3815_vm1, %v7094_v47  ;;  %6917 = vmatmul.mubr.bf16.gmra.mrb[160].mxu0 %v10823_v30  ;;  %v13563_v14 = vadd.f32 %v13331_v56, %v6264_v11  ;;  %v10826_v56 = vld [vmem:[%s11267_s17 + $0x3d0] ss:$24 sps:$4 sm:$0xff]   ;;  %v7097_v47 = vpack.c.bf16 %v7046_v12, %v7045_v9  ;;  %v10829_v12 = vld [vmem:[%s11267_s17 + $0x400] ss:$24 sps:$4 sm:$0xff]  }
 0x40e   : > { %9744 = vmatprep.mubr.msk.bf16.mxu1 %vm3815_vm1, %v7095_v5  ;;  %6924 = vmatprep.mubr.bf16.mxu0 %v10828_v60  ;;  %v7047_v11 = vld [vmem:[%s13461_s29 + $0xd0] sm:$0xff] }
 0x410   : > { %v6268_v29 = vpop.f32.mrb[88].mxu1  ;;  %v13570_v59 = vpop.f32.mrb[92].mxu0 }
 0x411   : > { %v13573_v31 = vadd.f32 %v6268_v29, %v13259_v43  ;;  %v6270_v50 = vpop.f32.mrb[89].mxu1  ;;  %v6679_v7 = vpop.f32.mrb[93].mxu0 }
 0x412   : > { %v6271_v8 = vpop.f32.mrb[90].mxu1  ;;  %v13576_v30 = vpop.f32.mrb[94].mxu0  ;;  %v7098_v50 = vpack.c.bf16 %v7048_v35, %v7047_v11  ;;  %v7053_v11 = vld [vmem:[%s13461_s29 + $0x100] sm:$0xff]  ;;  %v7054_v35 = vld [vmem:[%s13461_s29 + $0x108] sm:$0xff] }
 0x413   : > { %v13580_v5 = vadd.f32 %v6271_v8, %v13265_v34  ;;  %v6682_v60 = vpop.f32.mrb[95].mxu0  ;;  %v6273_v43 = vpop.f32.mrb[91].mxu1 }
 0x414   : > { %v7051_v60 = vld [vmem:[%s13461_s29 + $0xf0] sm:$0xff]  ;;  %v7052_v43 = vld [vmem:[%s13461_s29 + $0xf8] sm:$0xff] }
 0x415   : > { %9745 = vmatmul.mubr.msk.bf16.gmra.mrb[196].mxu1 %vm3815_vm1, %v7096_v4  ;;  %6925 = vmatmul.mubr.bf16.gmra.mrb[56].mxu0 %v10826_v56  ;;  %v7099_v4 = vpack.c.bf16 %v7050_v20, %v7049_v61  ;;  %v10834_v56 = vld [vmem:[%s11267_s17 + $0x434] ss:$24 sps:$4 sm:$0xff]  }
 0x416   : > { %9748 = vmatprep.mubr.msk.bf16.mxu1 %vm3815_vm1, %v7097_v47  ;;  %6932 = vmatprep.mubr.bf16.mxu0 %v10831_v6 }
 0x418   : > { %v6276_v29 = vpop.f32.mrb[92].mxu1 }
 0x419   : > { %v6277_v9 = vadd.f32 %v13255_v10, %v6276_v29  ;;  %v6278_v34 = vpop.f32.mrb[93].mxu1 }
 0x41a   : > { %v6279_v7 = vpop.f32.mrb[94].mxu1 }
 0x41b   : > { %v6280_v8 = vadd.f32 %v13261_v39, %v6279_v7  ;;  %v6281_v47 = vpop.f32.mrb[95].mxu1  ;;  %v13593_v6 = vadd.f32 %v13351_v27, %v6277_v9  ;;  %v7100_v9 = vpack.c.bf16 %v7052_v43, %v7051_v60  ;;  %v10837_v7 = vld [vmem:[%s11267_s17 + $0x464] ss:$24 sps:$4 sm:$0xff]   ;;  %v7058_v43 = vld [vmem:[%s13461_s29 + $0x128] sm:$0xff] }
 0x41c   : > { %v7056_v47 = vld [vmem:[%s13461_s29 + $0x118] sm:$0xff]  ;;  %v7057_v60 = vld [vmem:[%s13461_s29 + $0x120] sm:$0xff] }
 0x41d   : > { %9749 = vmatmul.mubr.msk.bf16.gmra.mrb[200].mxu1 %vm3815_vm1, %v7098_v50  ;;  %6933 = vmatmul.mubr.bf16.gmra.mrb[104].mxu0 %v10829_v12  ;;  %v13597_v10 = vadd.f32 %v13359_v19, %v6280_v8  ;;  %v10832_v19 = vld [vmem:[%s11267_s17 + $0x430] ss:$24 sps:$4 sm:$0xff]   ;;  %v7101_v50 = vpack.c.bf16 %v7054_v35, %v7053_v11  ;;  %v10835_v35 = vld [vmem:[%s11267_s17 + $0x460] ss:$24 sps:$4 sm:$0xff]  }
 0x41e   : > { %9752 = vmatprep.mubr.msk.bf16.mxu1 %vm3815_vm1, %v7099_v4  ;;  %6940 = vmatprep.mubr.bf16.mxu0 %v10834_v56  ;;  %v7055_v8 = vld [vmem:[%s13461_s29 + $0x110] sm:$0xff] }
 0x420   : > { %v6284_v39 = vpop.f32.mrb[96].mxu1  ;;  %v13604_v61 = vpop.f32.mrb[108].mxu0 }
 0x421   : > { %v13607_v27 = vadd.f32 %v6284_v39, %v13273_v49  ;;  %v6286_v20 = vpop.f32.mrb[97].mxu1  ;;  %v6695_v29 = vpop.f32.mrb[109].mxu0 }
 0x422   : > { %v6287_v34 = vpop.f32.mrb[98].mxu1  ;;  %v13610_v12 = vpop.f32.mrb[110].mxu0  ;;  %v7102_v20 = vpack.c.bf16 %v7056_v47, %v7055_v8  ;;  %v7061_v8 = vld [vmem:[%s13461_s29 + $0x140] sm:$0xff]  ;;  %v7062_v47 = vld [vmem:[%s13461_s29 + $0x148] sm:$0xff] }
 0x423   : > { %v13614_v4 = vadd.f32 %v6287_v34, %v13281_v24  ;;  %v6698_v56 = vpop.f32.mrb[111].mxu0  ;;  %v6289_v49 = vpop.f32.mrb[99].mxu1 }
 0x424   : > { %v7059_v56 = vld [vmem:[%s13461_s29 + $0x130] sm:$0xff]  ;;  %v7060_v49 = vld [vmem:[%s13461_s29 + $0x138] sm:$0xff] }
 0x425   : > { %9753 = vmatmul.mubr.msk.bf16.gmra.mrb[204].mxu1 %vm3815_vm1, %v7100_v9  ;;  %6941 = vmatmul.mubr.bf16.gmra.mrb[68].mxu0 %v10832_v19  ;;  %v7103_v9 = vpack.c.bf16 %v7058_v43, %v7057_v60  ;;  %v10840_v19 = vld [vmem:[%s11267_s17 + $0x494] ss:$24 sps:$4 sm:$0xff]  }
 0x426   : > { %9756 = vmatprep.mubr.msk.bf16.mxu1 %vm3815_vm1, %v7101_v50  ;;  %6948 = vmatprep.mubr.bf16.mxu0 %v10837_v7 }
 0x428   : > { %v6292_v39 = vpop.f32.mrb[100].mxu1 }
 0x429   : > { %v6293_v11 = vadd.f32 %v13269_v0, %v6292_v39  ;;  %v6294_v24 = vpop.f32.mrb[101].mxu1 }
 0x42a   : > { %v6295_v29 = vpop.f32.mrb[102].mxu1 }
 0x42b   : > { %v6296_v34 = vadd.f32 %v13277_v1, %v6295_v29  ;;  %v6297_v50 = vpop.f32.mrb[103].mxu1  ;;  %v13627_v7 = vadd.f32 %v13379_v41, %v6293_v11  ;;  %v7104_v11 = vpack.c.bf16 %v7060_v49, %v7059_v56  ;;  %v10843_v29 = vld [vmem:[%s11267_s17 + $0x4c4] ss:$24 sps:$4 sm:$0xff]   ;;  %v7066_v49 = vld [vmem:[%s13461_s29 + $0x168] sm:$0xff] }
 0x42c   : > { %v7064_v50 = vld [vmem:[%s13461_s29 + $0x158] sm:$0xff]  ;;  %v7065_v56 = vld [vmem:[%s13461_s29 + $0x160] sm:$0xff] }
 0x42d   : > { %9757 = vmatmul.mubr.msk.bf16.gmra.mrb[208].mxu1 %vm3815_vm1, %v7102_v20  ;;  %6949 = vmatmul.mubr.bf16.gmra.mrb[164].mxu0 %v10835_v35  ;;  %v13631_v0 = vadd.f32 %v13387_v40, %v6296_v34  ;;  %v10838_v40 = vld [vmem:[%s11267_s17 + $0x490] ss:$24 sps:$4 sm:$0xff]   ;;  %v7105_v20 = vpack.c.bf16 %v7062_v47, %v7061_v8  ;;  %v10841_v47 = vld [vmem:[%s11267_s17 + $0x4c0] ss:$24 sps:$4 sm:$0xff]  }
 0x42e   : > { %9760 = vmatprep.mubr.msk.bf16.mxu1 %vm3815_vm1, %v7103_v9  ;;  %6956 = vmatprep.mubr.bf16.mxu0 %v10840_v19  ;;  %v7063_v34 = vld [vmem:[%s13461_s29 + $0x150] sm:$0xff] }
 0x430   : > { %v6300_v1 = vpop.f32.mrb[104].mxu1  ;;  %v13638_v60 = vpop.f32.mrb[124].mxu0 }
 0x431   : > { %v13641_v41 = vadd.f32 %v6300_v1, %v13287_v3  ;;  %v6302_v43 = vpop.f32.mrb[105].mxu1  ;;  %v6711_v39 = vpop.f32.mrb[125].mxu0 }
 0x432   : > { %v6303_v24 = vpop.f32.mrb[106].mxu1  ;;  %v13644_v35 = vpop.f32.mrb[126].mxu0  ;;  %v7106_v43 = vpack.c.bf16 %v7064_v50, %v7063_v34  ;;  %v7069_v34 = vld [vmem:[%s13461_s29 + $0x180] sm:$0xff]  ;;  %v7070_v50 = vld [vmem:[%s13461_s29 + $0x188] sm:$0xff] }
 0x433   : > { %v13648_v9 = vadd.f32 %v6303_v24, %v13293_v16  ;;  %v6714_v19 = vpop.f32.mrb[127].mxu0  ;;  %v6305_v3 = vpop.f32.mrb[107].mxu1 }
 0x434   : > { %v7067_v19 = vld [vmem:[%s13461_s29 + $0x170] sm:$0xff]  ;;  %v7068_v3 = vld [vmem:[%s13461_s29 + $0x178] sm:$0xff] }
 0x435   : > { %9761 = vmatmul.mubr.msk.bf16.gmra.mrb[212].mxu1 %vm3815_vm1, %v7104_v11  ;;  %6957 = vmatmul.mubr.bf16.gmra.mrb[84].mxu0 %v10838_v40  ;;  %v7107_v11 = vpack.c.bf16 %v7066_v49, %v7065_v56  ;;  %v10846_v40 = vld [vmem:[%s11267_s17 + $0x4f4] ss:$24 sps:$4 sm:$0xff]  }
 0x436   : > { %9764 = vmatprep.mubr.msk.bf16.mxu1 %vm3815_vm1, %v7105_v20  ;;  %6964 = vmatprep.mubr.bf16.mxu0 %v10843_v29 }
 0x438   : > { %v6308_v1 = vpop.f32.mrb[108].mxu1 }
 0x439   : > { %v6309_v8 = vadd.f32 %v13283_v36, %v6308_v1  ;;  %v6310_v16 = vpop.f32.mrb[109].mxu1 }
 0x43a   : > { %v6311_v39 = vpop.f32.mrb[110].mxu1 }
 0x43b   : > { %v6312_v24 = vadd.f32 %v13289_v2, %v6311_v39  ;;  %v6313_v20 = vpop.f32.mrb[111].mxu1  ;;  %v13661_v29 = vadd.f32 %v13407_v44, %v6309_v8  ;;  %v7108_v8 = vpack.c.bf16 %v7068_v3, %v7067_v19  ;;  %v10849_v39 = vld [vmem:[%s11267_s17 + $0x524] ss:$24 sps:$4 sm:$0xff]  }
 0x43c   : > { %v7071_v20 = vld [vmem:[%s13461_s29 + $0x190] sm:$0xff]  ;;  %v7072_v19 = vld [vmem:[%s13461_s29 + $0x198] sm:$0xff]  ;;  %v7073_v3 = vld [vmem:[%s13461_s29 + $0x1a0] sm:$0xff] }
 0x43d   : > { %14775 = vst [vmem:[#allocation42_spill] sm:$0xff] %v13661_v29  ;;  %9765 = vmatmul.mubr.msk.bf16.gmra.mrb[216].mxu1 %vm3815_vm1, %v7106_v43  ;;  %6965 = vmatmul.mubr.bf16.gmra.mrb[112].mxu0 %v10841_v47  ;;  %v13665_v36 = vadd.f32 %v13414_v42, %v6312_v24  ;;  %v10844_v42 = vld [vmem:[%s11267_s17 + $0x4f0] ss:$24 sps:$4 sm:$0xff]   ;;  %v7109_v43 = vpack.c.bf16 %v7070_v50, %v7069_v34  ;;  %v14781_v50 = vld [vmem:[#allocation13_spill] sm:$0xff] }
 0x43e   : > { %9768 = vmatprep.mubr.msk.bf16.mxu1 %vm3815_vm1, %v7107_v11  ;;  %6972 = vmatprep.mubr.bf16.mxu0 %v10846_v40  ;;  %v14779_v11 = vld [vmem:[#allocation15_spill] sm:$0xff] }
 0x43f   : > { %14776 = vst [vmem:[#allocation43_spill] sm:$0xff] %v13665_v36  ;;  %v14783_v36 = vld [vmem:[#allocation14_spill] sm:$0xff] }
 0x440   : > { %v6316_v2 = vpop.f32.mrb[112].mxu1  ;;  %v13672_v56 = vpop.f32.mrb[140].mxu0 }
 0x441   : > { %v13675_v44 = vadd.f32 %v6316_v2, %v13301_v25  ;;  %v6318_v49 = vpop.f32.mrb[113].mxu1  ;;  %v6727_v1 = vpop.f32.mrb[141].mxu0  ;;  %v7074_v2 = vld [vmem:[%s13461_s29 + $0x1a8] sm:$0xff] }
 0x442   : > { %v6319_v16 = vpop.f32.mrb[114].mxu1  ;;  %v13678_v47 = vpop.f32.mrb[142].mxu0 }
 0x443   : > { %14777 = vst [vmem:[#allocation44_spill] sm:$0xff] %v13675_v44  ;;  %14778 = vst [vmem:[#allocation45_spill] sm:$0xff] %v13678_v47  ;;  %v13682_v40 = vadd.f32 %v6319_v16, %v14779_v11  ;;  %v6730_v24 = vpop.f32.mrb[143].mxu0  ;;  %v6321_v25 = vpop.f32.mrb[115].mxu1  ;;  %v14782_v11 = vld [vmem:[#allocation40_spill] sm:$0xff] }
 0x444   : > { %v10852_v44 = vld [vmem:[%s11267_s17 + $0x554] ss:$24 sps:$4 sm:$0xff]  }
 0x445   : > { %14780 = vst [vmem:[#allocation15_spill] sm:$0xff] %v13682_v40  ;;  %9769 = vmatmul.mubr.msk.bf16.gmra.mrb[220].mxu1 %vm3815_vm1, %v7108_v8  ;;  %6973 = vmatmul.mubr.bf16.gmra.mrb[100].mxu0 %v10844_v42  ;;  %v10847_v40 = vld [vmem:[%s11267_s17 + $0x520] ss:$24 sps:$4 sm:$0xff]   ;;  %v7110_v42 = vpack.c.bf16 %v7072_v19, %v7071_v20 }
 0x446   : > { %9772 = vmatprep.mubr.msk.bf16.mxu1 %vm3815_vm1, %v7109_v43  ;;  %6980 = vmatprep.mubr.bf16.mxu0 %v10849_v39  ;;  %v7111_v39 = vpack.c.bf16 %v7074_v2, %v7073_v3  ;;  %v7076_v19 = vld [vmem:[%s13461_s29 + $0x1b8] sm:$0xff]  ;;  %v7078_v3 = vld [vmem:[%s13461_s29 + $0x1c8] sm:$0xff] }
 0x448   : > { %v6324_v49 = vpop.f32.mrb[116].mxu1  ;;  %v6766_v34 = vpop.f32.mrb[232].mxu0 }
 0x449   : > { %v6325_v1 = vadd.f32 %v14781_v50, %v6324_v49  ;;  %v6326_v16 = vpop.f32.mrb[117].mxu1  ;;  %v13692_v24 = vadd.f32 %v6766_v34, %v14782_v11  ;;  %v6768_v25 = vpop.f32.mrb[233].mxu0  ;;  %v14786_v11 = vld [vmem:[#allocation20_spill] sm:$0xff] }
 0x44a   : > { %v6327_v8 = vpop.f32.mrb[118].mxu1  ;;  %v6769_v43 = vpop.f32.mrb[234].mxu0 }
 0x44b   : > { %v6328_v29 = vadd.f32 %v14783_v36, %v6327_v8  ;;  %v13698_v47 = vadd.f32 %v6769_v43, %v13419_v63  ;;  %v6771_v49 = vpop.f32.mrb[235].mxu0  ;;  %v6329_v50 = vpop.f32.mrb[119].mxu1  ;;  %v13701_v34 = vadd.f32 %v13433_v51, %v6325_v1  ;;  %v7075_v36 = vld [vmem:[%s13461_s29 + $0x1b0] sm:$0xff]  ;;  %v7077_v63 = vld [vmem:[%s13461_s29 + $0x1c0] sm:$0xff] }
 0x44c   : > { %v7113_v8 = vpack.c.bf16 %v7078_v3, %v7077_v63  ;;  %v10855_v43 = vld [vmem:[%s11267_s17 + $0x584] ss:$24 sps:$4 sm:$0xff]   ;;  %v7082_v3 = vld [vmem:[%s13461_s29 + $0x1e8] sm:$0xff] }
 0x44d   : > { %14784 = vst [vmem:[#allocation13_spill] sm:$0xff] %v13701_v34  ;;  %9773 = vmatmul.mubr.msk.bf16.gmra.mrb[224].mxu1 %vm3815_vm1, %v7110_v42  ;;  %6981 = vmatmul.mubr.bf16.gmra.mrb[168].mxu0 %v10847_v40  ;;  %v13705_v20 = vadd.f32 %v13440_v15, %v6328_v29  ;;  %v10850_v29 = vld [vmem:[%s11267_s17 + $0x550] ss:$24 sps:$4 sm:$0xff]   ;;  %v7081_v63 = vld [vmem:[%s13461_s29 + $0x1e0] sm:$0xff] }
 0x44e   : > { %9776 = vmatprep.mubr.msk.bf16.mxu1 %vm3815_vm1, %v7111_v39  ;;  %6988 = vmatprep.mubr.bf16.mxu0 %v10852_v44  ;;  %v7112_v44 = vpack.c.bf16 %v7076_v19, %v7075_v36  ;;  %v14788_v39 = vld [vmem:[#allocation25_spill] sm:$0xff]  ;;  %v7079_v36 = vld [vmem:[%s13461_s29 + $0x1d0] sm:$0xff]  ;;  %v7080_v19 = vld [vmem:[%s13461_s29 + $0x1d8] sm:$0xff] }
 0x44f   : > { %14785 = vst [vmem:[#allocation40_spill] sm:$0xff] %v13705_v20 }
 0x450   : > { %v6332_v2 = vpop.f32.mrb[120].mxu1  ;;  %v6774_v16 = vpop.f32.mrb[64].mxu0 }
 0x451   : > { %v13713_v51 = vadd.f32 %v6332_v2, %v14786_v11  ;;  %v6334_v1 = vpop.f32.mrb[121].mxu1  ;;  %v13716_v25 = vadd.f32 %v6774_v16, %v13428_v48  ;;  %v6776_v15 = vpop.f32.mrb[65].mxu0 }
 0x452   : > { %v6335_v40 = vpop.f32.mrb[122].mxu1  ;;  %v6777_v42 = vpop.f32.mrb[66].mxu0  ;;  %v14790_v1 = vld [vmem:[#allocation16_spill] sm:$0xff] }
 0x453   : > { %14787 = vst [vmem:[#allocation14_spill] sm:$0xff] %v13713_v51  ;;  %v13721_v49 = vadd.f32 %v6335_v40, %v14788_v39  ;;  %v13724_v50 = vadd.f32 %v6777_v42, %v13431_v23  ;;  %v6779_v2 = vpop.f32.mrb[67].mxu0  ;;  %v6337_v48 = vpop.f32.mrb[123].mxu1  ;;  %v14791_v40 = vld [vmem:[#allocation41_spill] sm:$0xff] }
 0x454   : > { %v10853_v2 = vld [vmem:[%s11267_s17 + $0x580] ss:$24 sps:$4 sm:$0xff]   ;;  %v7115_v48 = vpack.c.bf16 %v7082_v3, %v7081_v63 }
 0x455   : > { %14789 = vst [vmem:[#allocation20_spill] sm:$0xff] %v13721_v49  ;;  %9777 = vmatmul.mubr.msk.bf16.gmra.mrb[228].mxu1 %vm3815_vm1, %v7112_v44  ;;  %6989 = vmatmul.mubr.bf16.gmra.mrb[116].mxu0 %v10850_v29  ;;  %v7114_v29 = vpack.c.bf16 %v7080_v19, %v7079_v36  ;;  %v14792_v49 = vld [vmem:[#allocation23_spill] sm:$0xff]  ;;  %v7084_v19 = vld [vmem:[%s13461_s29 + $0x1f8] sm:$0xff] }
 0x456   : > { %9780 = vmatprep.mubr.msk.bf16.mxu1 %vm3815_vm1, %v7113_v8  ;;  %6996 = vmatprep.mubr.bf16.mxu0 %v10855_v43  ;;  %v10858_v43 = vld [vmem:[%s11267_s17 + $0x5b4] ss:$24 sps:$4 sm:$0xff]  }
 0x458   : > { %v6340_v16 = vpop.f32.mrb[124].mxu1  ;;  %v6782_v11 = vpop.f32.mrb[240].mxu0 }
 0x459   : > { %v6341_v15 = vadd.f32 %v14790_v1, %v6340_v16  ;;  %v6342_v23 = vpop.f32.mrb[125].mxu1  ;;  %v13734_v42 = vadd.f32 %v6782_v11, %v14791_v40  ;;  %v6784_v39 = vpop.f32.mrb[241].mxu0 }
 0x45a   : > { %v6343_v44 = vpop.f32.mrb[126].mxu1  ;;  %v6785_v8 = vpop.f32.mrb[242].mxu0  ;;  %v10856_v23 = vld [vmem:[%s11267_s17 + $0x5b0] ss:$24 sps:$4 sm:$0xff]  }
 0x45b   : > { %v6344_v51 = vadd.f32 %v14792_v49, %v6343_v44  ;;  %v13740_v20 = vadd.f32 %v6785_v8, %v13445_v13  ;;  %v6787_v34 = vpop.f32.mrb[243].mxu0  ;;  %v6345_v16 = vpop.f32.mrb[127].mxu1  ;;  %v13743_v11 = vadd.f32 %v13468_v45, %v6341_v15  ;;  %v7083_v49 = vld [vmem:[%s13461_s29 + $0x1f0] sm:$0xff] }
 0x45c   : > { %v14793_v34 = vld [vmem:[#allocation31_spill] sm:$0xff]  ;;  %v7116_v40 = vpack.c.bf16 %v7084_v19, %v7083_v49  ;;  %v14795_v16 = vld [vmem:[#allocation26_spill] sm:$0xff] }
 0x45d   : > { %9781 = vmatmul.mubr.msk.bf16.gmra.mrb[232].mxu1 %vm3815_vm1, %v7114_v29  ;;  %6997 = vmatmul.mubr.bf16.gmra.mrb[120].mxu0 %v10853_v2  ;;  %v13747_v36 = vadd.f32 %v13475_v54, %v6344_v51  ;;  %v10861_v51 = vld [vmem:[%s11267_s17 + $0x5e4] ss:$24 sps:$4 sm:$0xff]   ;;  %v14794_v2 = vld [vmem:[#allocation27_spill] sm:$0xff] }
 0x45e   : > { %7004 = vmatprep.mubr.bf16.mxu0 %v10858_v43  ;;  %9784 = vmatprep.mubr.msk.bf16.mxu1 %vm3815_vm1, %v7115_v48 }
 0x460   : > { %v6348_v13 = vpop.f32.mrb[132].mxu1  ;;  %v6790_v63 = vpop.f32.mrb[144].mxu0 }
 0x461   : > { %v13753_v3 = vadd.f32 %v6348_v13, %v14793_v34  ;;  %v6350_v1 = vpop.f32.mrb[133].mxu1  ;;  %v13756_v45 = vadd.f32 %v6790_v63, %v13454_v37  ;;  %v6792_v15 = vpop.f32.mrb[145].mxu0  ;;  %v10859_v34 = vld [vmem:[%s11267_s17 + $0x5e0] ss:$24 sps:$4 sm:$0xff]  }
 0x462   : > { %v6351_v39 = vpop.f32.mrb[134].mxu1  ;;  %v6793_v54 = vpop.f32.mrb[146].mxu0 }
 0x463   : > { %v13761_v29 = vadd.f32 %v6351_v39, %v14794_v2  ;;  %v13764_v44 = vadd.f32 %v6793_v54, %v13464_v53  ;;  %v6795_v8 = vpop.f32.mrb[147].mxu0  ;;  %v6353_v43 = vpop.f32.mrb[135].mxu1  ;;  %v14796_v53 = vld [vmem:[#allocation17_spill] sm:$0xff] }
 0x464   : > { %v14797_v43 = vld [vmem:[#allocation32_spill] sm:$0xff] }
 0x465   : > { %7005 = vmatmul.mubr.bf16.gmra.mrb[132].mxu0 %v10856_v23  ;;  %9785 = vmatmul.mubr.msk.bf16.gmra.mrb[236].mxu1 %vm3815_vm1, %v7116_v40 }
 0x466   : > { %7012 = vmatprep.mubr.bf16.mxu0 %v10861_v51 }
 0x468   : > { %v6356_v37 = vpop.f32.mrb[140].mxu1  ;;  %v6798_v48 = vpop.f32.mrb[248].mxu0 }
 0x469   : > { %v6357_v49 = vadd.f32 %v14795_v16, %v6356_v37  ;;  %v6358_v19 = vpop.f32.mrb[141].mxu1  ;;  %v13769_v13 = vadd.f32 %v6798_v48, %v13471_v28  ;;  %v6800_v63 = vpop.f32.mrb[249].mxu0 }
 0x46a   : > { %v6359_v1 = vpop.f32.mrb[142].mxu1  ;;  %v6801_v15 = vpop.f32.mrb[250].mxu0 }
 0x46b   : > { %v6360_v39 = vadd.f32 %v14796_v53, %v6359_v1  ;;  %v13774_v54 = vadd.f32 %v6801_v15, %v13479_v33  ;;  %v6803_v23 = vpop.f32.mrb[251].mxu0  ;;  %v6361_v40 = vpop.f32.mrb[143].mxu1  ;;  %v13777_v51 = vadd.f32 %v13502_v62, %v6357_v49  ;;  %v14798_v1 = vld [vmem:[#allocation29_spill] sm:$0xff] }
 0x46d   : > { %7013 = vmatmul.mubr.bf16.gmra.mrb[172].mxu0 %v10859_v34  ;;  %v13780_v2 = vadd.f32 %v13508_v52, %v6360_v39  ;;  %v14799_v39 = vld [vmem:[#allocation28_spill] sm:$0xff] }
 0x470   : > { %v6364_v28 = vpop.f32.mrb[148].mxu1  ;;  %v6806_v8 = vpop.f32.mrb[72].mxu0 }
 0x471   : > { %v13783_v37 = vadd.f32 %v6364_v28, %v14797_v43  ;;  %v6366_v48 = vpop.f32.mrb[149].mxu1  ;;  %v13786_v16 = vadd.f32 %v6806_v8, %v13491_v17  ;;  %v6808_v33 = vpop.f32.mrb[73].mxu0 }
 0x472   : > { %v6367_v19 = vpop.f32.mrb[150].mxu1  ;;  %v6809_v63 = vpop.f32.mrb[74].mxu0  ;;  %v14800_v48 = vld [vmem:[#allocation33_spill] sm:$0xff] }
 0x473   : > { %v13789_v15 = vadd.f32 %v6367_v19, %v14798_v1  ;;  %v13792_v62 = vadd.f32 %v6809_v63, %v13495_v32  ;;  %v6811_v52 = vpop.f32.mrb[75].mxu0  ;;  %v6369_v49 = vpop.f32.mrb[151].mxu1 }
 0x478   : > { %v6372_v34 = vpop.f32.mrb[156].mxu1  ;;  %v6814_v53 = vpop.f32.mrb[0].mxu0 }
 0x479   : > { %v6373_v23 = vadd.f32 %v14799_v39, %v6372_v34  ;;  %v6374_v40 = vpop.f32.mrb[157].mxu1  ;;  %v13796_v28 = vadd.f32 %v6814_v53, %v13505_v18  ;;  %v6816_v17 = vpop.f32.mrb[1].mxu0  ;;  %v14802_v18 = vld [vmem:[#allocation34_spill] sm:$0xff] }
 0x47a   : > { %v6375_v8 = vpop.f32.mrb[158].mxu1  ;;  %v6817_v43 = vpop.f32.mrb[2].mxu0 }
 0x47b   : > { %v6376_v33 = vadd.f32 %v14800_v48, %v6375_v8  ;;  %v13800_v19 = vadd.f32 %v6817_v43, %v13512_v58  ;;  %v6819_v32 = vpop.f32.mrb[3].mxu0  ;;  %v6377_v63 = vpop.f32.mrb[159].mxu1  ;;  %v13803_v1 = vadd.f32 %v13536_v38, %v6373_v23  ;;  %v14804_v43 = vld [vmem:[#allocation9_spill] sm:$0xff] }
 0x47c   : > { %v14805_v63 = vld [vmem:[#allocation30_spill] sm:$0xff] }
 0x47d   : > { %v13806_v52 = vadd.f32 %v13542_v57, %v6376_v33 }
 0x47f   : > { %14801 = vst [vmem:[#allocation25_spill] sm:$0xff] %v13806_v52 }
 0x480   : > { %v6380_v49 = vpop.f32.mrb[164].mxu1  ;;  %v6822_v34 = vpop.f32.mrb[148].mxu0 }
 0x481   : > { %v13809_v53 = vadd.f32 %v6380_v49, %v14802_v18  ;;  %v6382_v39 = vpop.f32.mrb[165].mxu1  ;;  %v13812_v40 = vadd.f32 %v6822_v34, %v13525_v55  ;;  %v6824_v17 = vpop.f32.mrb[149].mxu0 }
 0x482   : > { %v6383_v58 = vpop.f32.mrb[166].mxu1  ;;  %v6825_v8 = vpop.f32.mrb[150].mxu0 }
 0x483   : > { %14803 = vst [vmem:[#allocation16_spill] sm:$0xff] %v13809_v53  ;;  %v13815_v48 = vadd.f32 %v6383_v58, %v14804_v43  ;;  %v13818_v38 = vadd.f32 %v6825_v8, %v13529_v22  ;;  %v6827_v57 = vpop.f32.mrb[151].mxu0  ;;  %v6385_v23 = vpop.f32.mrb[167].mxu1  ;;  %v14806_v53 = vld [vmem:[#allocation35_spill] sm:$0xff] }
 0x488   : > { %v6388_v33 = vpop.f32.mrb[172].mxu1  ;;  %v6830_v32 = vpop.f32.mrb[8].mxu0 }
 0x489   : > { %v6389_v49 = vadd.f32 %v14805_v63, %v6388_v33  ;;  %v6390_v18 = vpop.f32.mrb[173].mxu1  ;;  %v13822_v39 = vadd.f32 %v6830_v32, %v13539_v26  ;;  %v6832_v55 = vpop.f32.mrb[9].mxu0  ;;  %v14808_v26 = vld [vmem:[#allocation10_spill] sm:$0xff] }
 0x48a   : > { %v6391_v34 = vpop.f32.mrb[174].mxu1  ;;  %v6833_v17 = vpop.f32.mrb[10].mxu0 }
 0x48b   : > { %v6392_v52 = vadd.f32 %v14806_v53, %v6391_v34  ;;  %v13826_v58 = vadd.f32 %v6833_v17, %v13546_v21  ;;  %v6835_v22 = vpop.f32.mrb[11].mxu0  ;;  %v6393_v8 = vpop.f32.mrb[175].mxu1  ;;  %v13829_v43 = vadd.f32 %v13570_v59, %v6389_v49  ;;  %v14810_v34 = vld [vmem:[#allocation24_spill] sm:$0xff] }
 0x48c   : > { %v14811_v8 = vld [vmem:[#allocation18_spill] sm:$0xff] }
 0x48d   : > { %v13832_v57 = vadd.f32 %v13576_v30, %v6392_v52 }
 0x48f   : > { %14807 = vst [vmem:[#allocation41_spill] sm:$0xff] %v13832_v57 }
 0x490   : > { %v6396_v23 = vpop.f32.mrb[128].mxu1  ;;  %v6838_v33 = vpop.f32.mrb[80].mxu0 }
 0x491   : > { %v13835_v32 = vadd.f32 %v6396_v23, %v14808_v26  ;;  %v6398_v63 = vpop.f32.mrb[129].mxu1  ;;  %v13838_v18 = vadd.f32 %v6838_v33, %v13559_v46  ;;  %v6840_v53 = vpop.f32.mrb[81].mxu0 }
 0x492   : > { %v6399_v21 = vpop.f32.mrb[130].mxu1  ;;  %v6841_v55 = vpop.f32.mrb[82].mxu0 }
 0x493   : > { %14809 = vst [vmem:[#allocation23_spill] sm:$0xff] %v13835_v32  ;;  %v13841_v17 = vadd.f32 %v6399_v21, %v14810_v34  ;;  %v13844_v59 = vadd.f32 %v6841_v55, %v13563_v14  ;;  %v6843_v30 = vpop.f32.mrb[83].mxu0  ;;  %v6401_v52 = vpop.f32.mrb[131].mxu1  ;;  %v14812_v32 = vld [vmem:[#allocation21_spill] sm:$0xff] }
 0x498   : > { %v6404_v49 = vpop.f32.mrb[136].mxu1  ;;  %v6846_v22 = vpop.f32.mrb[16].mxu0 }
 0x499   : > { %v6405_v23 = vadd.f32 %v14811_v8, %v6404_v49  ;;  %v6406_v26 = vpop.f32.mrb[137].mxu1  ;;  %v13848_v63 = vadd.f32 %v6846_v22, %v13573_v31  ;;  %v6848_v46 = vpop.f32.mrb[17].mxu0  ;;  %v14814_v31 = vld [vmem:[#allocation11_spill] sm:$0xff] }
 0x49a   : > { %v6407_v33 = vpop.f32.mrb[138].mxu1  ;;  %v6849_v53 = vpop.f32.mrb[18].mxu0 }
 0x49b   : > { %v6408_v57 = vadd.f32 %v14812_v32, %v6407_v33  ;;  %v13852_v21 = vadd.f32 %v6849_v53, %v13580_v5  ;;  %v6851_v14 = vpop.f32.mrb[19].mxu0  ;;  %v6409_v55 = vpop.f32.mrb[139].mxu1  ;;  %v13855_v34 = vadd.f32 %v13604_v61, %v6405_v23  ;;  %v14816_v33 = vld [vmem:[#allocation12_spill] sm:$0xff] }
 0x49c   : > { %v14817_v55 = vld [vmem:[#allocation19_spill] sm:$0xff] }
 0x49d   : > { %v13858_v30 = vadd.f32 %v13610_v12, %v6408_v57 }
 0x49f   : > { %14813 = vst [vmem:[#allocation31_spill] sm:$0xff] %v13858_v30 }
 0x4a0   : > { %v6412_v52 = vpop.f32.mrb[144].mxu1  ;;  %v6854_v49 = vpop.f32.mrb[152].mxu0 }
 0x4a1   : > { %v13861_v22 = vadd.f32 %v6412_v52, %v14814_v31  ;;  %v6414_v8 = vpop.f32.mrb[145].mxu1  ;;  %v13864_v26 = vadd.f32 %v6854_v49, %v13593_v6  ;;  %v6856_v32 = vpop.f32.mrb[153].mxu0 }
 0x4a2   : > { %v6415_v5 = vpop.f32.mrb[146].mxu1  ;;  %v6857_v46 = vpop.f32.mrb[154].mxu0 }
 0x4a3   : > { %14815 = vst [vmem:[#allocation27_spill] sm:$0xff] %v13861_v22  ;;  %v13867_v53 = vadd.f32 %v6415_v5, %v14816_v33  ;;  %v13870_v61 = vadd.f32 %v6857_v46, %v13597_v10  ;;  %v6859_v12 = vpop.f32.mrb[155].mxu0  ;;  %v6417_v57 = vpop.f32.mrb[147].mxu1  ;;  %v14818_v22 = vld [vmem:[#allocation22_spill] sm:$0xff] }
 0x4a8   : > { %v6420_v23 = vpop.f32.mrb[152].mxu1  ;;  %v6862_v14 = vpop.f32.mrb[24].mxu0 }
 0x4a9   : > { %v6421_v52 = vadd.f32 %v14817_v55, %v6420_v23  ;;  %v6422_v31 = vpop.f32.mrb[153].mxu1  ;;  %v13874_v8 = vadd.f32 %v6862_v14, %v13607_v27  ;;  %v6864_v6 = vpop.f32.mrb[25].mxu0  ;;  %v14820_v27 = vld [vmem:[#allocation37_spill] sm:$0xff] }
 0x4aa   : > { %v6423_v49 = vpop.f32.mrb[154].mxu1  ;;  %v6865_v32 = vpop.f32.mrb[26].mxu0 }
 0x4ab   : > { %v6424_v30 = vadd.f32 %v14818_v22, %v6423_v49  ;;  %v13878_v5 = vadd.f32 %v6865_v32, %v13614_v4  ;;  %v6867_v10 = vpop.f32.mrb[27].mxu0  ;;  %v6425_v46 = vpop.f32.mrb[155].mxu1  ;;  %v13881_v33 = vadd.f32 %v13638_v60, %v6421_v52  ;;  %v14822_v49 = vld [vmem:[#allocation39_spill] sm:$0xff] }
 0x4ac   : > { %v14823_v46 = vld [vmem:[#allocation36_spill] sm:$0xff] }
 0x4ad   : > { %v13884_v12 = vadd.f32 %v13644_v35, %v6424_v30 }
 0x4af   : > { %14819 = vst [vmem:[#allocation26_spill] sm:$0xff] %v13884_v12 }
 0x4b0   : > { %v6428_v57 = vpop.f32.mrb[160].mxu1  ;;  %v6870_v23 = vpop.f32.mrb[88].mxu0 }
 0x4b1   : > { %v13887_v14 = vadd.f32 %v6428_v57, %v14820_v27  ;;  %v6430_v55 = vpop.f32.mrb[161].mxu1  ;;  %v13890_v31 = vadd.f32 %v6870_v23, %v13627_v7  ;;  %v6872_v22 = vpop.f32.mrb[89].mxu0 }
 0x4b2   : > { %v6431_v4 = vpop.f32.mrb[162].mxu1  ;;  %v6873_v6 = vpop.f32.mrb[90].mxu0 }
 0x4b3   : > { %14821 = vst [vmem:[#allocation17_spill] sm:$0xff] %v13887_v14  ;;  %v13893_v32 = vadd.f32 %v6431_v4, %v14822_v49  ;;  %v13896_v60 = vadd.f32 %v6873_v6, %v13631_v0  ;;  %v6875_v35 = vpop.f32.mrb[91].mxu0  ;;  %v6433_v30 = vpop.f32.mrb[163].mxu1  ;;  %v14824_v14 = vld [vmem:[#allocation38_spill] sm:$0xff] }
 0x4b4   : > { %v14825_v35 = vld [vmem:[#allocation45_spill] sm:$0xff] }
 0x4b8   : > { %v6436_v52 = vpop.f32.mrb[168].mxu1  ;;  %v6878_v10 = vpop.f32.mrb[32].mxu0 }
 0x4b9   : > { %v6437_v57 = vadd.f32 %v14823_v46, %v6436_v52  ;;  %v6438_v27 = vpop.f32.mrb[169].mxu1  ;;  %v13900_v55 = vadd.f32 %v6878_v10, %v13641_v41  ;;  %v6880_v7 = vpop.f32.mrb[33].mxu0  ;;  %v14826_v10 = vld [vmem:[#allocation42_spill] sm:$0xff] }
 0x4ba   : > { %v6439_v23 = vpop.f32.mrb[170].mxu1  ;;  %v6881_v22 = vpop.f32.mrb[34].mxu0 }
 0x4bb   : > { %v6440_v12 = vadd.f32 %v14824_v14, %v6439_v23  ;;  %v13904_v4 = vadd.f32 %v6881_v22, %v13648_v9  ;;  %v6883_v0 = vpop.f32.mrb[35].mxu0  ;;  %v6441_v6 = vpop.f32.mrb[171].mxu1  ;;  %v13907_v49 = vadd.f32 %v13672_v56, %v6437_v57  ;;  %v13920_v56 = vld [vmem:[%s14651_s9] ss:$0 sm:$0xff] }
 0x4bc   : > { %v14827_v0 = vld [vmem:[#allocation43_spill] sm:$0xff] }
 0x4bd   : > { %v13910_v30 = vadd.f32 %v14825_v35, %v6440_v12 }
 0x4c0   : > { %v9726_v52 = vpop.f32.mrb[176].mxu1  ;;  %v6886_v46 = vpop.f32.mrb[156].mxu0 }
 0x4c1   : > { %v7504_v41 = vadd.f32 %v9726_v52, %v13716_v25  ;;  %v13914_v27 = vadd.f32 %v6886_v46, %v14826_v10  ;;  %v7247_v14 = vpop.f32.mrb[177].mxu1  ;;  %v6888_v7 = vpop.f32.mrb[157].mxu0 }
 0x4c2   : > { %v7502_v9 = vadd.f32 %v13692_v24, %v7247_v14  ;;  %v9727_v23 = vpop.f32.mrb[178].mxu1  ;;  %v6889_v22 = vpop.f32.mrb[158].mxu0  ;;  %v14828_v14 = vld [vmem:[#allocation44_spill] sm:$0xff] }
 0x4c3   : > { %v7568_v12 = vadd.f32 %v13920_v56, %v7504_v41  ;;  %v7505_v57 = vadd.f32 %v9727_v23, %v13724_v50  ;;  %v13925_v25 = vadd.f32 %v6889_v22, %v14827_v0  ;;  %v7250_v6 = vpop.f32.mrb[179].mxu1  ;;  %v6891_v35 = vpop.f32.mrb[159].mxu0 }
 0x4c4   : > { %v7566_v52 = vadd.f32 %v13920_v56, %v7502_v9  ;;  %v7503_v24 = vadd.f32 %v13698_v47, %v7250_v6  ;;  %v14829_v35 = vld [vmem:[#allocation15_spill] sm:$0xff] }
 0x4c5   : > { %7632 = vst.msk [vmem:[%s13931_s23 + $0x10] sm:$0xff] %vm1194_vm0, %v7568_v12  ;;  %v7569_v50 = vadd.f32 %v13920_v56, %v7505_v57 }
 0x4c6   : > { %7630 = vst.msk [vmem:[%s13931_s23] sm:$0xff] %vm1194_vm0, %v7566_v52  ;;  %v7567_v46 = vadd.f32 %v13920_v56, %v7503_v24 }
 0x4c7   : > { %7633 = vst.msk [vmem:[%s13931_s23 + $0x18] sm:$0xff] %vm1194_vm0, %v7569_v50 }
 0x4c8   : > { %7631 = vst.msk [vmem:[%s13931_s23 + $0x8] sm:$0xff] %vm1194_vm0, %v7567_v46  ;;  %v9730_v47 = vpop.f32.mrb[180].mxu1  ;;  %v6894_v41 = vpop.f32.mrb[40].mxu0 }
 0x4c9   : > { %v7508_v10 = vadd.f32 %v9730_v47, %v13756_v45  ;;  %v13945_v7 = vadd.f32 %v6894_v41, %v14828_v14  ;;  %v7263_v9 = vpop.f32.mrb[181].mxu1  ;;  %v6896_v23 = vpop.f32.mrb[41].mxu0  ;;  %v14830_v14 = vld [vmem:[#allocation13_spill] sm:$0xff] }
 0x4ca   : > { %v7506_v22 = vadd.f32 %v13734_v42, %v7263_v9  ;;  %v9731_v12 = vpop.f32.mrb[182].mxu1  ;;  %v6897_v57 = vpop.f32.mrb[42].mxu0 }
 0x4cb   : > { %v7572_v0 = vadd.f32 %v13920_v56, %v7508_v10  ;;  %v7509_v6 = vadd.f32 %v9731_v12, %v13764_v44  ;;  %v13951_v52 = vadd.f32 %v6897_v57, %v14829_v35  ;;  %v7266_v45 = vpop.f32.mrb[183].mxu1  ;;  %v6899_v24 = vpop.f32.mrb[43].mxu0  ;;  %v14831_v35 = vld [vmem:[#allocation40_spill] sm:$0xff] }
 0x4cc   : > { %v7570_v50 = vadd.f32 %v13920_v56, %v7506_v22  ;;  %v7507_v46 = vadd.f32 %v13740_v20, %v7266_v45 }
 0x4cd   : > { %7636 = vst.msk [vmem:[%s13931_s23 + $0x30] sm:$0xff] %vm1194_vm0, %v7572_v0  ;;  %v7573_v47 = vadd.f32 %v13920_v56, %v7509_v6 }
 0x4ce   : > { %7634 = vst.msk [vmem:[%s13931_s23 + $0x20] sm:$0xff] %vm1194_vm0, %v7570_v50  ;;  %v7571_v42 = vadd.f32 %v13920_v56, %v7507_v46 }
 0x4cf   : > { %7637 = vst.msk [vmem:[%s13931_s23 + $0x38] sm:$0xff] %vm1194_vm0, %v7573_v47 }
 0x4d0   : > { %7635 = vst.msk [vmem:[%s13931_s23 + $0x28] sm:$0xff] %vm1194_vm0, %v7571_v42  ;;  %v9734_v44 = vpop.f32.mrb[184].mxu1  ;;  %v6902_v41 = vpop.f32.mrb[96].mxu0 }
 0x4d1   : > { %v7512_v10 = vadd.f32 %v9734_v44, %v13786_v16  ;;  %v13967_v20 = vadd.f32 %v6902_v41, %v14830_v14  ;;  %v7279_v9 = vpop.f32.mrb[185].mxu1  ;;  %v6904_v23 = vpop.f32.mrb[97].mxu0  ;;  %v14832_v41 = vld [vmem:[#allocation14_spill] sm:$0xff] }
 0x4d2   : > { %v7510_v22 = vadd.f32 %v13769_v13, %v7279_v9  ;;  %v9735_v12 = vpop.f32.mrb[186].mxu1  ;;  %v6905_v57 = vpop.f32.mrb[98].mxu0 }
 0x4d3   : > { %v7576_v0 = vadd.f32 %v13920_v56, %v7512_v10  ;;  %v7513_v6 = vadd.f32 %v9735_v12, %v13792_v62  ;;  %v13973_v45 = vadd.f32 %v6905_v57, %v14831_v35  ;;  %v7282_v16 = vpop.f32.mrb[187].mxu1  ;;  %v6907_v24 = vpop.f32.mrb[99].mxu0 }
 0x4d4   : > { %v7574_v50 = vadd.f32 %v13920_v56, %v7510_v22  ;;  %v7511_v46 = vadd.f32 %v13774_v54, %v7282_v16 }
 0x4d5   : > { %7640 = vst.msk [vmem:[%s13931_s23 + $0x50] sm:$0xff] %vm1194_vm0, %v7576_v0  ;;  %v7577_v47 = vadd.f32 %v13920_v56, %v7513_v6  ;;  %v14833_v0 = vld [vmem:[#allocation20_spill] sm:$0xff] }
 0x4d6   : > { %7638 = vst.msk [vmem:[%s13931_s23 + $0x40] sm:$0xff] %vm1194_vm0, %v7574_v50  ;;  %v7575_v13 = vadd.f32 %v13920_v56, %v7511_v46 }
 0x4d7   : > { %7641 = vst.msk [vmem:[%s13931_s23 + $0x58] sm:$0xff] %vm1194_vm0, %v7577_v47 }
 0x4d8   : > { %7639 = vst.msk [vmem:[%s13931_s23 + $0x48] sm:$0xff] %vm1194_vm0, %v7575_v13  ;;  %v9738_v62 = vpop.f32.mrb[188].mxu1  ;;  %v6910_v42 = vpop.f32.mrb[48].mxu0 }
 0x4d9   : > { %v7516_v44 = vadd.f32 %v9738_v62, %v13812_v40  ;;  %v13989_v54 = vadd.f32 %v6910_v42, %v14832_v41  ;;  %v7295_v10 = vpop.f32.mrb[189].mxu1  ;;  %v6912_v14 = vpop.f32.mrb[49].mxu0 }
 0x4da   : > { %v7514_v9 = vadd.f32 %v13796_v28, %v7295_v10  ;;  %v9739_v23 = vpop.f32.mrb[190].mxu1  ;;  %v6913_v22 = vpop.f32.mrb[50].mxu0 }
 0x4db   : > { %v7580_v12 = vadd.f32 %v13920_v56, %v7516_v44  ;;  %v7517_v57 = vadd.f32 %v9739_v23, %v13818_v38  ;;  %v13995_v6 = vadd.f32 %v6913_v22, %v14833_v0  ;;  %v7298_v40 = vpop.f32.mrb[191].mxu1  ;;  %v6915_v35 = vpop.f32.mrb[51].mxu0 }
 0x4dc   : > { %v7578_v16 = vadd.f32 %v13920_v56, %v7514_v9  ;;  %v7515_v24 = vadd.f32 %v13800_v19, %v7298_v40 }
 0x4dd   : > { %7644 = vst.msk [vmem:[%s13931_s23 + $0x70] sm:$0xff] %vm1194_vm0, %v7580_v12  ;;  %v7581_v50 = vadd.f32 %v13920_v56, %v7517_v57 }
 0x4de   : > { %7642 = vst.msk [vmem:[%s13931_s23 + $0x60] sm:$0xff] %vm1194_vm0, %v7578_v16  ;;  %v7579_v28 = vadd.f32 %v13920_v56, %v7515_v24 }
 0x4df   : > { %7645 = vst.msk [vmem:[%s13931_s23 + $0x78] sm:$0xff] %vm1194_vm0, %v7581_v50 }
 0x4e0   : > { %7643 = vst.msk [vmem:[%s13931_s23 + $0x68] sm:$0xff] %vm1194_vm0, %v7579_v28  ;;  %v9742_v38 = vpop.f32.mrb[192].mxu1  ;;  %v6918_v46 = vpop.f32.mrb[160].mxu0 }
 0x4e1   : > { %v7520_v47 = vadd.f32 %v9742_v38, %v13838_v18  ;;  %v14011_v19 = vadd.f32 %v6918_v46, %v13743_v11  ;;  %v7311_v13 = vpop.f32.mrb[193].mxu1  ;;  %v6920_v62 = vpop.f32.mrb[161].mxu0 }
 0x4e2   : > { %v7518_v42 = vadd.f32 %v13822_v39, %v7311_v13  ;;  %v9743_v44 = vpop.f32.mrb[194].mxu1  ;;  %v6921_v41 = vpop.f32.mrb[162].mxu0 }
 0x4e3   : > { %v7584_v10 = vadd.f32 %v13920_v56, %v7520_v47  ;;  %v7521_v14 = vadd.f32 %v9743_v44, %v13844_v59  ;;  %v14017_v9 = vadd.f32 %v6921_v41, %v13747_v36  ;;  %v7314_v18 = vpop.f32.mrb[195].mxu1  ;;  %v6923_v23 = vpop.f32.mrb[163].mxu0 }
 0x4e4   : > { %v7582_v11 = vadd.f32 %v13920_v56, %v7518_v42  ;;  %v7519_v22 = vadd.f32 %v13826_v58, %v7314_v18 }
 0x4e5   : > { %7648 = vst.msk [vmem:[%s13931_s23 + $0x90] sm:$0xff] %vm1194_vm0, %v7584_v10  ;;  %v7585_v12 = vadd.f32 %v13920_v56, %v7521_v14 }
 0x4e6   : > { %7646 = vst.msk [vmem:[%s13931_s23 + $0x80] sm:$0xff] %vm1194_vm0, %v7582_v11  ;;  %v7583_v39 = vadd.f32 %v13920_v56, %v7519_v22 }
 0x4e7   : > { %7649 = vst.msk [vmem:[%s13931_s23 + $0x98] sm:$0xff] %vm1194_vm0, %v7585_v12 }
 0x4e8   : > { %7647 = vst.msk [vmem:[%s13931_s23 + $0x88] sm:$0xff] %vm1194_vm0, %v7583_v39  ;;  %v9746_v36 = vpop.f32.mrb[196].mxu1  ;;  %v6926_v59 = vpop.f32.mrb[56].mxu0 }
 0x4e9   : > { %v7524_v57 = vadd.f32 %v9746_v36, %v13864_v26  ;;  %v14033_v58 = vadd.f32 %v6926_v59, %v13753_v3  ;;  %v7327_v0 = vpop.f32.mrb[197].mxu1  ;;  %v6928_v40 = vpop.f32.mrb[57].mxu0 }
 0x4ea   : > { %v7522_v35 = vadd.f32 %v13848_v63, %v7327_v0  ;;  %v9747_v16 = vpop.f32.mrb[198].mxu1  ;;  %v6929_v24 = vpop.f32.mrb[58].mxu0 }
 0x4eb   : > { %v7588_v50 = vadd.f32 %v13920_v56, %v7524_v57  ;;  %v7525_v28 = vadd.f32 %v9747_v16, %v13870_v61  ;;  %v14039_v38 = vadd.f32 %v6929_v24, %v13761_v29  ;;  %v7330_v26 = vpop.f32.mrb[199].mxu1  ;;  %v6931_v46 = vpop.f32.mrb[59].mxu0 }
 0x4ec   : > { %v7586_v3 = vadd.f32 %v13920_v56, %v7522_v35  ;;  %v7523_v47 = vadd.f32 %v13852_v21, %v7330_v26 }
 0x4ed   : > { %7652 = vst.msk [vmem:[%s13931_s23 + $0xb0] sm:$0xff] %vm1194_vm0, %v7588_v50  ;;  %v7589_v13 = vadd.f32 %v13920_v56, %v7525_v28 }
 0x4ee   : > { %7650 = vst.msk [vmem:[%s13931_s23 + $0xa0] sm:$0xff] %vm1194_vm0, %v7586_v3  ;;  %v7587_v63 = vadd.f32 %v13920_v56, %v7523_v47 }
 0x4ef   : > { %7653 = vst.msk [vmem:[%s13931_s23 + $0xb8] sm:$0xff] %vm1194_vm0, %v7589_v13 }
 0x4f0   : > { %7651 = vst.msk [vmem:[%s13931_s23 + $0xa8] sm:$0xff] %vm1194_vm0, %v7587_v63  ;;  %v9750_v29 = vpop.f32.mrb[200].mxu1  ;;  %v6934_v61 = vpop.f32.mrb[104].mxu0 }
 0x4f1   : > { %v7528_v62 = vadd.f32 %v9750_v29, %v13890_v31  ;;  %v14055_v21 = vadd.f32 %v6934_v61, %v13777_v51  ;;  %v7343_v42 = vpop.f32.mrb[201].mxu1  ;;  %v6936_v44 = vpop.f32.mrb[105].mxu0 }
 0x4f2   : > { %v7526_v41 = vadd.f32 %v13874_v8, %v7343_v42  ;;  %v9751_v10 = vpop.f32.mrb[202].mxu1  ;;  %v6937_v14 = vpop.f32.mrb[106].mxu0  ;;  %v14834_v44 = vld [vmem:[#allocation25_spill] sm:$0xff] }
 0x4f3   : > { %v7592_v18 = vadd.f32 %v13920_v56, %v7528_v62  ;;  %v7529_v23 = vadd.f32 %v9751_v10, %v13896_v60  ;;  %v14061_v11 = vadd.f32 %v6937_v14, %v13780_v2  ;;  %v7346_v31 = vpop.f32.mrb[203].mxu1  ;;  %v6939_v22 = vpop.f32.mrb[107].mxu0 }
 0x4f4   : > { %v7590_v51 = vadd.f32 %v13920_v56, %v7526_v41  ;;  %v7527_v12 = vadd.f32 %v13878_v5, %v7346_v31  ;;  %v14835_v22 = vld [vmem:[#allocation16_spill] sm:$0xff] }
 0x4f5   : > { %7656 = vst.msk [vmem:[%s13931_s23 + $0xd0] sm:$0xff] %vm1194_vm0, %v7592_v18  ;;  %v7593_v39 = vadd.f32 %v13920_v56, %v7529_v23 }
 0x4f6   : > { %7654 = vst.msk [vmem:[%s13931_s23 + $0xc0] sm:$0xff] %vm1194_vm0, %v7590_v51  ;;  %v7591_v8 = vadd.f32 %v13920_v56, %v7527_v12 }
 0x4f7   : > { %7657 = vst.msk [vmem:[%s13931_s23 + $0xd8] sm:$0xff] %vm1194_vm0, %v7593_v39 }
 0x4f8   : > { %7655 = vst.msk [vmem:[%s13931_s23 + $0xc8] sm:$0xff] %vm1194_vm0, %v7591_v8  ;;  %v9754_v2 = vpop.f32.mrb[204].mxu1  ;;  %v6942_v60 = vpop.f32.mrb[68].mxu0 }
 0x4f9   : > { %v7532_v36 = vadd.f32 %v9754_v2, %v13914_v27  ;;  %v14077_v5 = vadd.f32 %v6942_v60, %v13783_v37  ;;  %v7359_v59 = vpop.f32.mrb[205].mxu1  ;;  %v6944_v57 = vpop.f32.mrb[69].mxu0 }
 0x4fa   : > { %v7530_v0 = vadd.f32 %v13900_v55, %v7359_v59  ;;  %v9755_v40 = vpop.f32.mrb[206].mxu1  ;;  %v6945_v35 = vpop.f32.mrb[70].mxu0 }
 0x4fb   : > { %v7596_v16 = vadd.f32 %v13920_v56, %v7532_v36  ;;  %v7533_v24 = vadd.f32 %v9755_v40, %v13925_v25  ;;  %v14083_v50 = vadd.f32 %v6945_v35, %v13789_v15  ;;  %v7362_v27 = vpop.f32.mrb[207].mxu1  ;;  %v6947_v28 = vpop.f32.mrb[71].mxu0 }
 0x4fc   : > { %v7594_v37 = vadd.f32 %v13920_v56, %v7530_v0  ;;  %v7531_v26 = vadd.f32 %v13904_v4, %v7362_v27 }
 0x4fd   : > { %7660 = vst.msk [vmem:[%s13931_s23 + $0xf0] sm:$0xff] %vm1194_vm0, %v7596_v16  ;;  %v7597_v46 = vadd.f32 %v13920_v56, %v7533_v24 }
 0x4fe   : > { %7658 = vst.msk [vmem:[%s13931_s23 + $0xe0] sm:$0xff] %vm1194_vm0, %v7594_v37  ;;  %v7595_v55 = vadd.f32 %v13920_v56, %v7531_v26 }
 0x4ff   : > { %7661 = vst.msk [vmem:[%s13931_s23 + $0xf8] sm:$0xff] %vm1194_vm0, %v7597_v46 }
 0x500   : > { %7659 = vst.msk [vmem:[%s13931_s23 + $0xe8] sm:$0xff] %vm1194_vm0, %v7595_v55  ;;  %v9758_v15 = vpop.f32.mrb[208].mxu1  ;;  %v6950_v25 = vpop.f32.mrb[164].mxu0 }
 0x501   : > { %v7536_v3 = vadd.f32 %v9758_v15, %v13967_v20  ;;  %v14099_v4 = vadd.f32 %v6950_v25, %v13803_v1  ;;  %v7375_v47 = vpop.f32.mrb[209].mxu1  ;;  %v6952_v13 = vpop.f32.mrb[165].mxu0  ;;  %v14836_v15 = vld [vmem:[#allocation41_spill] sm:$0xff] }
 0x502   : > { %v7534_v63 = vadd.f32 %v13945_v7, %v7375_v47  ;;  %v9759_v29 = vpop.f32.mrb[210].mxu1  ;;  %v6953_v61 = vpop.f32.mrb[166].mxu0 }
 0x503   : > { %v7600_v62 = vadd.f32 %v13920_v56, %v7536_v3  ;;  %v7537_v42 = vadd.f32 %v9759_v29, %v13973_v45  ;;  %v14105_v41 = vadd.f32 %v6953_v61, %v14834_v44  ;;  %v7378_v20 = vpop.f32.mrb[211].mxu1  ;;  %v6955_v10 = vpop.f32.mrb[167].mxu0  ;;  %v14837_v61 = vld [vmem:[#allocation23_spill] sm:$0xff] }
 0x504   : > { %v7598_v1 = vadd.f32 %v13920_v56, %v7534_v63  ;;  %v7535_v14 = vadd.f32 %v13951_v52, %v7378_v20 }
 0x505   : > { %7664 = vst.msk [vmem:[%s13931_s23 + $0x110] sm:$0xff] %vm1194_vm0, %v7600_v62  ;;  %v7601_v18 = vadd.f32 %v13920_v56, %v7537_v42 }
 0x506   : > { %7662 = vst.msk [vmem:[%s13931_s23 + $0x100] sm:$0xff] %vm1194_vm0, %v7598_v1  ;;  %v7599_v7 = vadd.f32 %v13920_v56, %v7535_v14 }
 0x507   : > { %7665 = vst.msk [vmem:[%s13931_s23 + $0x118] sm:$0xff] %vm1194_vm0, %v7601_v18 }
 0x508   : > { %7663 = vst.msk [vmem:[%s13931_s23 + $0x108] sm:$0xff] %vm1194_vm0, %v7599_v7  ;;  %v9762_v45 = vpop.f32.mrb[212].mxu1  ;;  %v6958_v23 = vpop.f32.mrb[84].mxu0 }
 0x509   : > { %v7540_v31 = vadd.f32 %v9762_v45, %v14011_v19  ;;  %v14121_v52 = vadd.f32 %v6958_v23, %v14835_v22  ;;  %v7391_v51 = vpop.f32.mrb[213].mxu1  ;;  %v6960_v12 = vpop.f32.mrb[85].mxu0 }
 0x50a   : > { %v7538_v39 = vadd.f32 %v13989_v54, %v7391_v51  ;;  %v9763_v8 = vpop.f32.mrb[214].mxu1  ;;  %v6961_v2 = vpop.f32.mrb[86].mxu0 }
 0x50b   : > { %v7604_v60 = vadd.f32 %v13920_v56, %v7540_v31  ;;  %v7541_v36 = vadd.f32 %v9763_v8, %v14017_v9  ;;  %v14127_v59 = vadd.f32 %v6961_v2, %v13815_v48  ;;  %v7394_v19 = vpop.f32.mrb[215].mxu1  ;;  %v6963_v57 = vpop.f32.mrb[87].mxu0 }
 0x50c   : > { %v7602_v0 = vadd.f32 %v13920_v56, %v7538_v39  ;;  %v7539_v40 = vadd.f32 %v13995_v6, %v7394_v19  ;;  %v14838_v19 = vld [vmem:[#allocation31_spill] sm:$0xff] }
 0x50d   : > { %7668 = vst.msk [vmem:[%s13931_s23 + $0x130] sm:$0xff] %vm1194_vm0, %v7604_v60  ;;  %v7605_v35 = vadd.f32 %v13920_v56, %v7541_v36 }
 0x50e   : > { %7666 = vst.msk [vmem:[%s13931_s23 + $0x120] sm:$0xff] %vm1194_vm0, %v7602_v0  ;;  %v7603_v54 = vadd.f32 %v13920_v56, %v7539_v40 }
 0x50f   : > { %7669 = vst.msk [vmem:[%s13931_s23 + $0x138] sm:$0xff] %vm1194_vm0, %v7605_v35 }
 0x510   : > { %7667 = vst.msk [vmem:[%s13931_s23 + $0x128] sm:$0xff] %vm1194_vm0, %v7603_v54  ;;  %v9766_v48 = vpop.f32.mrb[216].mxu1  ;;  %v6966_v9 = vpop.f32.mrb[112].mxu0 }
 0x511   : > { %v7544_v16 = vadd.f32 %v9766_v48, %v14055_v21  ;;  %v6967_v6 = vadd.f32 %v6966_v9, %v13829_v43  ;;  %v7407_v24 = vpop.f32.mrb[217].mxu1  ;;  %v6968_v27 = vpop.f32.mrb[113].mxu0 }
 0x512   : > { %v7542_v28 = vadd.f32 %v14033_v58, %v7407_v24  ;;  %v9767_v37 = vpop.f32.mrb[218].mxu1  ;;  %v6969_v26 = vpop.f32.mrb[114].mxu0 }
 0x513   : > { %v7608_v46 = vadd.f32 %v13920_v56, %v7544_v16  ;;  %v7545_v55 = vadd.f32 %v9767_v37, %v14061_v11  ;;  %v6970_v25 = vadd.f32 %v6969_v26, %v14836_v15  ;;  %v7410_v3 = vpop.f32.mrb[219].mxu1  ;;  %v6971_v47 = vpop.f32.mrb[115].mxu0 }
 0x514   : > { %v7606_v21 = vadd.f32 %v13920_v56, %v7542_v28  ;;  %v7543_v43 = vadd.f32 %v14039_v38, %v7410_v3 }
 0x515   : > { %7672 = vst.msk [vmem:[%s13931_s23 + $0x150] sm:$0xff] %vm1194_vm0, %v7608_v46  ;;  %v7609_v13 = vadd.f32 %v13920_v56, %v7545_v55 }
 0x516   : > { %7670 = vst.msk [vmem:[%s13931_s23 + $0x140] sm:$0xff] %vm1194_vm0, %v7606_v21  ;;  %v7607_v58 = vadd.f32 %v13920_v56, %v7543_v43 }
 0x517   : > { %7673 = vst.msk [vmem:[%s13931_s23 + $0x158] sm:$0xff] %vm1194_vm0, %v7609_v13 }
 0x518   : > { %7671 = vst.msk [vmem:[%s13931_s23 + $0x148] sm:$0xff] %vm1194_vm0, %v7607_v58  ;;  %v9770_v11 = vpop.f32.mrb[220].mxu1  ;;  %v6974_v63 = vpop.f32.mrb[100].mxu0 }
 0x519   : > { %v7548_v29 = vadd.f32 %v9770_v11, %v14099_v4  ;;  %v9890_v38 = vadd.f32 %v6974_v63, %v14837_v61  ;;  %v7423_v62 = vpop.f32.mrb[221].mxu1  ;;  %v6976_v42 = vpop.f32.mrb[101].mxu0 }
 0x51a   : > { %v7546_v44 = vadd.f32 %v14077_v5, %v7423_v62  ;;  %v9771_v20 = vpop.f32.mrb[222].mxu1  ;;  %v6977_v10 = vpop.f32.mrb[102].mxu0 }
 0x51b   : > { %v7612_v1 = vadd.f32 %v13920_v56, %v7548_v29  ;;  %v7549_v14 = vadd.f32 %v9771_v20, %v14105_v41  ;;  %v9891_v18 = vadd.f32 %v6977_v10, %v13841_v17  ;;  %v7426_v7 = vpop.f32.mrb[223].mxu1  ;;  %v6979_v45 = vpop.f32.mrb[103].mxu0 }
 0x51c   : > { %v7610_v4 = vadd.f32 %v13920_v56, %v7546_v44  ;;  %v7547_v23 = vadd.f32 %v14083_v50, %v7426_v7  ;;  %v14840_v44 = vld [vmem:[#allocation26_spill] sm:$0xff] }
 0x51d   : > { %7676 = vst.msk [vmem:[%s13931_s23 + $0x170] sm:$0xff] %vm1194_vm0, %v7612_v1  ;;  %v7613_v31 = vadd.f32 %v13920_v56, %v7549_v14 }
 0x51e   : > { %7674 = vst.msk [vmem:[%s13931_s23 + $0x160] sm:$0xff] %vm1194_vm0, %v7610_v4  ;;  %v7611_v5 = vadd.f32 %v13920_v56, %v7547_v23 }
 0x51f   : > { %7677 = vst.msk [vmem:[%s13931_s23 + $0x178] sm:$0xff] %vm1194_vm0, %v7613_v31 }
 0x520   : > { %7675 = vst.msk [vmem:[%s13931_s23 + $0x168] sm:$0xff] %vm1194_vm0, %v7611_v5  ;;  %v9774_v41 = vpop.f32.mrb[224].mxu1  ;;  %v6982_v17 = vpop.f32.mrb[168].mxu0  ;;  %v14841_v5 = vld [vmem:[#allocation17_spill] sm:$0xff] }
 0x521   : > { %v7552_v22 = vadd.f32 %v9774_v41, %v6967_v6  ;;  %v6983_v51 = vadd.f32 %v6982_v17, %v13855_v34  ;;  %v7439_v50 = vpop.f32.mrb[225].mxu1  ;;  %v6984_v12 = vpop.f32.mrb[169].mxu0  ;;  %v14839_v6 = vld [vmem:[#allocation27_spill] sm:$0xff] }
 0x522   : > { %v7550_v39 = vadd.f32 %v14121_v52, %v7439_v50  ;;  %v9775_v8 = vpop.f32.mrb[226].mxu1  ;;  %v6985_v2 = vpop.f32.mrb[170].mxu0 }
 0x523   : > { %v7616_v60 = vadd.f32 %v13920_v56, %v7552_v22  ;;  %v7553_v36 = vadd.f32 %v9775_v8, %v6970_v25  ;;  %v6986_v57 = vadd.f32 %v6985_v2, %v14838_v19  ;;  %v7442_v0 = vpop.f32.mrb[227].mxu1  ;;  %v6987_v40 = vpop.f32.mrb[171].mxu0 }
 0x524   : > { %v7614_v35 = vadd.f32 %v13920_v56, %v7550_v39  ;;  %v7551_v54 = vadd.f32 %v14127_v59, %v7442_v0 }
 0x525   : > { %7680 = vst.msk [vmem:[%s13931_s23 + $0x190] sm:$0xff] %vm1194_vm0, %v7616_v60  ;;  %v7617_v34 = vadd.f32 %v13920_v56, %v7553_v36 }
 0x526   : > { %7678 = vst.msk [vmem:[%s13931_s23 + $0x180] sm:$0xff] %vm1194_vm0, %v7614_v35  ;;  %v7615_v52 = vadd.f32 %v13920_v56, %v7551_v54 }
 0x527   : > { %7681 = vst.msk [vmem:[%s13931_s23 + $0x198] sm:$0xff] %vm1194_vm0, %v7617_v34 }
 0x528   : > { %7679 = vst.msk [vmem:[%s13931_s23 + $0x188] sm:$0xff] %vm1194_vm0, %v7615_v52  ;;  %v9778_v48 = vpop.f32.mrb[228].mxu1  ;;  %v6990_v9 = vpop.f32.mrb[116].mxu0 }
 0x529   : > { %v7556_v16 = vadd.f32 %v9778_v48, %v6983_v51  ;;  %v9892_v24 = vadd.f32 %v6990_v9, %v14839_v6  ;;  %v7455_v59 = vpop.f32.mrb[229].mxu1  ;;  %v6992_v27 = vpop.f32.mrb[117].mxu0 }
 0x52a   : > { %v7554_v28 = vadd.f32 %v9890_v38, %v7455_v59  ;;  %v9779_v37 = vpop.f32.mrb[230].mxu1  ;;  %v6993_v26 = vpop.f32.mrb[118].mxu0 }
 0x52b   : > { %v7620_v46 = vadd.f32 %v13920_v56, %v7556_v16  ;;  %v7557_v55 = vadd.f32 %v9779_v37, %v6986_v57  ;;  %v9893_v15 = vadd.f32 %v6993_v26, %v13867_v53  ;;  %v7458_v25 = vpop.f32.mrb[231].mxu1  ;;  %v6995_v3 = vpop.f32.mrb[119].mxu0 }
 0x52c   : > { %v7618_v47 = vadd.f32 %v13920_v56, %v7554_v28  ;;  %v7555_v21 = vadd.f32 %v9891_v18, %v7458_v25 }
 0x52d   : > { %7684 = vst.msk [vmem:[%s13931_s23 + $0x1b0] sm:$0xff] %vm1194_vm0, %v7620_v46  ;;  %v7621_v43 = vadd.f32 %v13920_v56, %v7557_v55 }
 0x52e   : > { %7682 = vst.msk [vmem:[%s13931_s23 + $0x1a0] sm:$0xff] %vm1194_vm0, %v7618_v47  ;;  %v7619_v13 = vadd.f32 %v13920_v56, %v7555_v21 }
 0x52f   : > { %7685 = vst.msk [vmem:[%s13931_s23 + $0x1b8] sm:$0xff] %vm1194_vm0, %v7621_v43 }
 0x530   : > { %7683 = vst.msk [vmem:[%s13931_s23 + $0x1a8] sm:$0xff] %vm1194_vm0, %v7619_v13  ;;  %v9782_v58 = vpop.f32.mrb[232].mxu1  ;;  %v6998_v53 = vpop.f32.mrb[120].mxu0 }
 0x531   : > { %v6999_v11 = vadd.f32 %v6998_v53, %v13881_v33  ;;  %v7471_v63 = vpop.f32.mrb[233].mxu1  ;;  %v7000_v29 = vpop.f32.mrb[121].mxu0 }
 0x532   : > { %v7558_v61 = vadd.f32 %v9892_v24, %v7471_v63  ;;  %v9783_v38 = vpop.f32.mrb[234].mxu1  ;;  %v7001_v62 = vpop.f32.mrb[122].mxu0 }
 0x533   : > { %v7560_v42 = vadd.f32 %v9782_v58, %v6999_v11  ;;  %v7002_v20 = vadd.f32 %v7001_v62, %v14840_v44  ;;  %v7474_v10 = vpop.f32.mrb[235].mxu1  ;;  %v7003_v1 = vpop.f32.mrb[123].mxu0 }
 0x534   : > { %v7622_v14 = vadd.f32 %v13920_v56, %v7558_v61  ;;  %v7559_v18 = vadd.f32 %v9893_v15, %v7474_v10 }
 0x535   : > { %v7624_v7 = vadd.f32 %v13920_v56, %v7560_v42  ;;  %v7561_v45 = vadd.f32 %v9783_v38, %v7002_v20 }
 0x536   : > { %7686 = vst.msk [vmem:[%s13931_s23 + $0x1c0] sm:$0xff] %vm1194_vm0, %v7622_v14  ;;  %v7623_v33 = vadd.f32 %v13920_v56, %v7559_v18 }
 0x537   : > { %7688 = vst.msk [vmem:[%s13931_s23 + $0x1d0] sm:$0xff] %vm1194_vm0, %v7624_v7  ;;  %v7625_v4 = vadd.f32 %v13920_v56, %v7561_v45 }
 0x538   : > { %7687 = vst.msk [vmem:[%s13931_s23 + $0x1c8] sm:$0xff] %vm1194_vm0, %v7623_v33  ;;  %v7006_v23 = vpop.f32.mrb[132].mxu0  ;;  %v9786_v31 = vpop.f32.mrb[236].mxu1 }
 0x539   : > { %7689 = vst.msk [vmem:[%s13931_s23 + $0x1d8] sm:$0xff] %vm1194_vm0, %v7625_v4  ;;  %v9894_v41 = vadd.f32 %v7006_v23, %v14841_v5  ;;  %v7008_v17 = vpop.f32.mrb[133].mxu0  ;;  %v7487_v22 = vpop.f32.mrb[237].mxu1 }
 0x53a   : > { %v7009_v51 = vpop.f32.mrb[134].mxu0  ;;  %v9787_v50 = vpop.f32.mrb[238].mxu1 }
 0x53b   : > { %v9895_v12 = vadd.f32 %v7009_v51, %v13893_v32  ;;  %v7562_v39 = vadd.f32 %v9894_v41, %v7487_v22  ;;  %v7011_v8 = vpop.f32.mrb[135].mxu0  ;;  %v7490_v2 = vpop.f32.mrb[239].mxu1 }
 0x53d   : > { %v7626_v60 = vadd.f32 %v13920_v56, %v7562_v39  ;;  %v7563_v36 = vadd.f32 %v9895_v12, %v7490_v2 }
 0x53f   : > { %7690 = vst.msk [vmem:[%s13931_s23 + $0x1e0] sm:$0xff] %vm1194_vm0, %v7626_v60  ;;  %v7627_v19 = vadd.f32 %v13920_v56, %v7563_v36 }
 0x540   : > { %v7014_v57 = vpop.f32.mrb[172].mxu0 }
 0x541   : > { %7691 = vst.msk [vmem:[%s13931_s23 + $0x1e8] sm:$0xff] %vm1194_vm0, %v7627_v19  ;;  %v7015_v0 = vadd.f32 %v7014_v57, %v13907_v49  ;;  %v7016_v40 = vpop.f32.mrb[173].mxu0 }
 0x542   : > { %v7017_v35 = vpop.f32.mrb[174].mxu0 }
 0x543   : > { %v7564_v32 = vadd.f32 %v9786_v31, %v7015_v0  ;;  %v7018_v54 = vadd.f32 %v7017_v35, %v13910_v30  ;;  %v7019_v34 = vpop.f32.mrb[175].mxu0  ;;  %7704 = sbr.rel (!%p11213_p8) target bundleno = 1426 (0x592), region = 68 }
 0x545   : > { %v7628_v52 = vadd.f32 %v13920_v56, %v7564_v32  ;;  %v7565_v48 = vadd.f32 %v9787_v50, %v7018_v54 }
 0x547   : > { %7692 = vst.msk [vmem:[%s13931_s23 + $0x1f0] sm:$0xff] %vm1194_vm0, %v7628_v52  ;;  %v7629_v9 = vadd.f32 %v13920_v56, %v7565_v48 }
 0x549   : > { %7693 = vst.msk [vmem:[%s13931_s23 + $0x1f8] sm:$0xff] %vm1194_vm0, %v7629_v9 }
 0x54a   : > { %s14860_s12 = smov (!%p7707_p7, %s7706_s12), 64 }
 0x54b   : > { %s9333_s28 = sshll.u32 %s14860_s12, 7 }
 0x54c   : > { %p9336_p6 = scmp.eq.s32.totalorder %s9333_s28, 0 }
 0x54d   : > { %s14250_s16 = sshrl.u32 (!%p9336_p6), %s14860_s12, 6 }
 0x54e   : > { %7715 = sbr.rel (%p9336_p6) target bundleno = 1426 (0x592), region = 72  ;;  %p9337_p9 = scmp.le.s32.totalorder (!%p9336_p6), %s14250_s16, 0 }
 0x555   : > { %8562 = sbr.rel (%p9337_p9) target bundleno = 1405 (0x57d), region = 241  ;;  %s14842_s15 = smov (!%p9337_p9), %s14244_s19 }
 0x556   : > { %s14843_s26 = smov (!%p9337_p9), %s12796_s24  ;;  %s14259_s29 = smov (!%p9337_p9), 0  }
 0x557   : > { %s14261_s17 = smov (!%p9337_p9), 0  }
 0x55c LB: >> { %v7903_v49 = vld [vmem:[%s11051_s26] sm:$0xff]  ;;  %v7905_v30 = vld [vmem:[%s11051_s26 + $0x8] sm:$0xff]  ;;  %v7907_v56 = vld [vmem:[%s11051_s26 + $0x10] sm:$0xff]  ;;  %s8031_s20 = sadd.s32 1, %s11055_s29  ;;  %s7897_s17 = sadd.s32 1, %s11059_s17   ;;  %s11059_s17 = sphi %s14261_s17, %s7897_s17   ;;  %s11055_s29 = sphi %s14259_s29, %s14846_s29   ;;  %s11051_s26 = sphi %s14843_s26, %s14845_s26   ;;  %s11047_s15 = sphi %s14842_s15, %s14844_s15  }
 0x55d   : >> { %7904 = vst [vmem:[%s11047_s15] sm:$0xff] %v7903_v49  ;;  %7906 = vst [vmem:[%s11047_s15 + $0x8] sm:$0xff] %v7905_v30  ;;  %v7909_v16 = vld [vmem:[%s11051_s26 + $0x18] sm:$0xff]  ;;  %v7911_v6 = vld [vmem:[%s11051_s26 + $0x20] sm:$0xff]  ;;  %p8032_p10 = scmp.ge.s32.totalorder %s8031_s20, %s14250_s16  ;;  %p7896_p12 = scmp.ge.s32.totalorder %s7897_s17, %s14250_s16 }
 0x55e   : >> { %7908 = vst [vmem:[%s11047_s15 + $0x10] sm:$0xff] %v7907_v56  ;;  %v7913_v24 = vld [vmem:[%s11051_s26 + $0x28] sm:$0xff]  ;;  %7910 = vst [vmem:[%s11047_s15 + $0x18] sm:$0xff] %v7909_v16  ;;  %v7915_v59 = vld [vmem:[%s11051_s26 + $0x30] sm:$0xff] }
 0x55f   : >> { %7912 = vst [vmem:[%s11047_s15 + $0x20] sm:$0xff] %v7911_v6  ;;  %7914 = vst [vmem:[%s11047_s15 + $0x28] sm:$0xff] %v7913_v24  ;;  %v7917_v27 = vld [vmem:[%s11051_s26 + $0x38] sm:$0xff]  ;;  %v7919_v28 = vld [vmem:[%s11051_s26 + $0x40] sm:$0xff]  ;;  %s14862_s20 = smov (%p8032_p10, %s8031_s20), 0 }
 0x560   : >> { %7916 = vst [vmem:[%s11047_s15 + $0x30] sm:$0xff] %v7915_v59  ;;  %7918 = vst [vmem:[%s11047_s15 + $0x38] sm:$0xff] %v7917_v27  ;;  %v7921_v37 = vld [vmem:[%s11051_s26 + $0x48] sm:$0xff]  ;;  %v7923_v26 = vld [vmem:[%s11051_s26 + $0x50] sm:$0xff]  ;;  %s9338_s13 = sshll.u32 %s14862_s20, 9  ;;  %s14846_s29 = smov %s14862_s20 }
 0x561   : >> { %7920 = vst [vmem:[%s11047_s15 + $0x40] sm:$0xff] %v7919_v28  ;;  %v7925_v46 = vld [vmem:[%s11051_s26 + $0x58] sm:$0xff]  ;;  %7922 = vst [vmem:[%s11047_s15 + $0x48] sm:$0xff] %v7921_v37  ;;  %v7927_v55 = vld [vmem:[%s11051_s26 + $0x60] sm:$0xff]  ;;  %s14317_s30 = scalar_lea.vmem %s12796_s24, %s9338_s13 [#allocation4]   ;;  %s14320_s14 = scalar_lea.vmem %s14244_s19, %s9338_s13  }
 0x562   : >> { %7924 = vst [vmem:[%s11047_s15 + $0x50] sm:$0xff] %v7923_v26  ;;  %7926 = vst [vmem:[%s11047_s15 + $0x58] sm:$0xff] %v7925_v46  ;;  %v7929_v15 = vld [vmem:[%s11051_s26 + $0x68] sm:$0xff]  ;;  %v7931_v25 = vld [vmem:[%s11051_s26 + $0x70] sm:$0xff] }
 0x563   : >> { %7928 = vst [vmem:[%s11047_s15 + $0x60] sm:$0xff] %v7927_v55  ;;  %7930 = vst [vmem:[%s11047_s15 + $0x68] sm:$0xff] %v7929_v15  ;;  %v7933_v3 = vld [vmem:[%s11051_s26 + $0x78] sm:$0xff]  ;;  %v7935_v47 = vld [vmem:[%s11051_s26 + $0x80] sm:$0xff] }
 0x564   : >> { %7932 = vst [vmem:[%s11047_s15 + $0x70] sm:$0xff] %v7931_v25  ;;  %v7937_v21 = vld [vmem:[%s11051_s26 + $0x88] sm:$0xff]  ;;  %7934 = vst [vmem:[%s11047_s15 + $0x78] sm:$0xff] %v7933_v3  ;;  %v7939_v43 = vld [vmem:[%s11051_s26 + $0x90] sm:$0xff] }
 0x565   : >> { %7936 = vst [vmem:[%s11047_s15 + $0x80] sm:$0xff] %v7935_v47  ;;  %7938 = vst [vmem:[%s11047_s15 + $0x88] sm:$0xff] %v7937_v21  ;;  %v7941_v13 = vld [vmem:[%s11051_s26 + $0x98] sm:$0xff]  ;;  %v7943_v58 = vld [vmem:[%s11051_s26 + $0xa0] sm:$0xff] }
 0x566   : >> { %7940 = vst [vmem:[%s11047_s15 + $0x90] sm:$0xff] %v7939_v43  ;;  %7942 = vst [vmem:[%s11047_s15 + $0x98] sm:$0xff] %v7941_v13  ;;  %v7945_v53 = vld [vmem:[%s11051_s26 + $0xa8] sm:$0xff]  ;;  %v7947_v11 = vld [vmem:[%s11051_s26 + $0xb0] sm:$0xff] }
 0x567   : >> { %7944 = vst [vmem:[%s11047_s15 + $0xa0] sm:$0xff] %v7943_v58  ;;  %v7949_v63 = vld [vmem:[%s11051_s26 + $0xb8] sm:$0xff]  ;;  %7946 = vst [vmem:[%s11047_s15 + $0xa8] sm:$0xff] %v7945_v53  ;;  %v7951_v29 = vld [vmem:[%s11051_s26 + $0xc0] sm:$0xff] }
 0x568   : >> { %7948 = vst [vmem:[%s11047_s15 + $0xb0] sm:$0xff] %v7947_v11  ;;  %7950 = vst [vmem:[%s11047_s15 + $0xb8] sm:$0xff] %v7949_v63  ;;  %v7953_v61 = vld [vmem:[%s11051_s26 + $0xc8] sm:$0xff]  ;;  %v7955_v38 = vld [vmem:[%s11051_s26 + $0xd0] sm:$0xff] }
 0x569   : >> { %7952 = vst [vmem:[%s11047_s15 + $0xc0] sm:$0xff] %v7951_v29  ;;  %7954 = vst [vmem:[%s11047_s15 + $0xc8] sm:$0xff] %v7953_v61  ;;  %v7957_v62 = vld [vmem:[%s11051_s26 + $0xd8] sm:$0xff]  ;;  %v7959_v42 = vld [vmem:[%s11051_s26 + $0xe0] sm:$0xff] }
 0x56a   : >> { %7956 = vst [vmem:[%s11047_s15 + $0xd0] sm:$0xff] %v7955_v38  ;;  %v7961_v44 = vld [vmem:[%s11051_s26 + $0xe8] sm:$0xff]  ;;  %7958 = vst [vmem:[%s11047_s15 + $0xd8] sm:$0xff] %v7957_v62  ;;  %v7963_v20 = vld [vmem:[%s11051_s26 + $0xf0] sm:$0xff] }
 0x56b   : >> { %7960 = vst [vmem:[%s11047_s15 + $0xe0] sm:$0xff] %v7959_v42  ;;  %7962 = vst [vmem:[%s11047_s15 + $0xe8] sm:$0xff] %v7961_v44  ;;  %v7965_v10 = vld [vmem:[%s11051_s26 + $0xf8] sm:$0xff]  ;;  %v7967_v1 = vld [vmem:[%s11051_s26 + $0x100] sm:$0xff] }
 0x56c   : >> { %7964 = vst [vmem:[%s11047_s15 + $0xf0] sm:$0xff] %v7963_v20  ;;  %7966 = vst [vmem:[%s11047_s15 + $0xf8] sm:$0xff] %v7965_v10  ;;  %v7969_v14 = vld [vmem:[%s11051_s26 + $0x108] sm:$0xff]  ;;  %v7971_v18 = vld [vmem:[%s11051_s26 + $0x110] sm:$0xff] }
 0x56d   : >> { %7968 = vst [vmem:[%s11047_s15 + $0x100] sm:$0xff] %v7967_v1  ;;  %v7973_v7 = vld [vmem:[%s11051_s26 + $0x118] sm:$0xff]  ;;  %7970 = vst [vmem:[%s11047_s15 + $0x108] sm:$0xff] %v7969_v14  ;;  %v7975_v45 = vld [vmem:[%s11051_s26 + $0x120] sm:$0xff] }
 0x56e   : >> { %7972 = vst [vmem:[%s11047_s15 + $0x110] sm:$0xff] %v7971_v18  ;;  %7974 = vst [vmem:[%s11047_s15 + $0x118] sm:$0xff] %v7973_v7  ;;  %v7977_v33 = vld [vmem:[%s11051_s26 + $0x128] sm:$0xff]  ;;  %v7979_v4 = vld [vmem:[%s11051_s26 + $0x130] sm:$0xff] }
 0x56f   : >> { %7976 = vst [vmem:[%s11047_s15 + $0x120] sm:$0xff] %v7975_v45  ;;  %7978 = vst [vmem:[%s11047_s15 + $0x128] sm:$0xff] %v7977_v33  ;;  %v7981_v23 = vld [vmem:[%s11051_s26 + $0x138] sm:$0xff]  ;;  %v7983_v31 = vld [vmem:[%s11051_s26 + $0x140] sm:$0xff] }
 0x570   : >> { %7980 = vst [vmem:[%s11047_s15 + $0x130] sm:$0xff] %v7979_v4  ;;  %v7985_v5 = vld [vmem:[%s11051_s26 + $0x148] sm:$0xff]  ;;  %7982 = vst [vmem:[%s11047_s15 + $0x138] sm:$0xff] %v7981_v23  ;;  %v7987_v41 = vld [vmem:[%s11051_s26 + $0x150] sm:$0xff] }
 0x571   : >> { %7984 = vst [vmem:[%s11047_s15 + $0x140] sm:$0xff] %v7983_v31  ;;  %7986 = vst [vmem:[%s11047_s15 + $0x148] sm:$0xff] %v7985_v5  ;;  %v7989_v17 = vld [vmem:[%s11051_s26 + $0x158] sm:$0xff]  ;;  %v7991_v22 = vld [vmem:[%s11051_s26 + $0x160] sm:$0xff] }
 0x572   : >> { %7988 = vst [vmem:[%s11047_s15 + $0x150] sm:$0xff] %v7987_v41  ;;  %7990 = vst [vmem:[%s11047_s15 + $0x158] sm:$0xff] %v7989_v17  ;;  %v7993_v51 = vld [vmem:[%s11051_s26 + $0x168] sm:$0xff]  ;;  %v7995_v50 = vld [vmem:[%s11051_s26 + $0x170] sm:$0xff] }
 0x573   : >> { %7992 = vst [vmem:[%s11047_s15 + $0x160] sm:$0xff] %v7991_v22  ;;  %v7997_v12 = vld [vmem:[%s11051_s26 + $0x178] sm:$0xff]  ;;  %7994 = vst [vmem:[%s11047_s15 + $0x168] sm:$0xff] %v7993_v51  ;;  %v7999_v39 = vld [vmem:[%s11051_s26 + $0x180] sm:$0xff] }
 0x574   : >> { %7996 = vst [vmem:[%s11047_s15 + $0x170] sm:$0xff] %v7995_v50  ;;  %7998 = vst [vmem:[%s11047_s15 + $0x178] sm:$0xff] %v7997_v12  ;;  %v8001_v8 = vld [vmem:[%s11051_s26 + $0x188] sm:$0xff]  ;;  %v8003_v2 = vld [vmem:[%s11051_s26 + $0x190] sm:$0xff] }
 0x575   : >> { %8000 = vst [vmem:[%s11047_s15 + $0x180] sm:$0xff] %v7999_v39  ;;  %8002 = vst [vmem:[%s11047_s15 + $0x188] sm:$0xff] %v8001_v8  ;;  %v8005_v60 = vld [vmem:[%s11051_s26 + $0x198] sm:$0xff]  ;;  %v8007_v36 = vld [vmem:[%s11051_s26 + $0x1a0] sm:$0xff] }
 0x576   : >> { %8004 = vst [vmem:[%s11047_s15 + $0x190] sm:$0xff] %v8003_v2  ;;  %v8009_v19 = vld [vmem:[%s11051_s26 + $0x1a8] sm:$0xff]  ;;  %8006 = vst [vmem:[%s11047_s15 + $0x198] sm:$0xff] %v8005_v60  ;;  %v8011_v57 = vld [vmem:[%s11051_s26 + $0x1b0] sm:$0xff]  ;;  %7899 = sbr.rel (!%p7896_p12) target bundleno = 1372 (0x55c), region = 247 }
 0x577   : >> { %8008 = vst [vmem:[%s11047_s15 + $0x1a0] sm:$0xff] %v8007_v36  ;;  %8010 = vst [vmem:[%s11047_s15 + $0x1a8] sm:$0xff] %v8009_v19  ;;  %v8013_v0 = vld [vmem:[%s11051_s26 + $0x1b8] sm:$0xff]  ;;  %v8015_v40 = vld [vmem:[%s11051_s26 + $0x1c0] sm:$0xff] }
 0x578   : >> { %8012 = vst [vmem:[%s11047_s15 + $0x1b0] sm:$0xff] %v8011_v57  ;;  %8014 = vst [vmem:[%s11047_s15 + $0x1b8] sm:$0xff] %v8013_v0  ;;  %v8017_v35 = vld [vmem:[%s11051_s26 + $0x1c8] sm:$0xff]  ;;  %v8019_v32 = vld [vmem:[%s11051_s26 + $0x1d0] sm:$0xff] }
 0x579   : >> { %8016 = vst [vmem:[%s11047_s15 + $0x1c0] sm:$0xff] %v8015_v40  ;;  %v8021_v54 = vld [vmem:[%s11051_s26 + $0x1d8] sm:$0xff]  ;;  %8018 = vst [vmem:[%s11047_s15 + $0x1c8] sm:$0xff] %v8017_v35  ;;  %v8023_v34 = vld [vmem:[%s11051_s26 + $0x1e0] sm:$0xff] }
 0x57a   : >> { %8020 = vst [vmem:[%s11047_s15 + $0x1d0] sm:$0xff] %v8019_v32  ;;  %8022 = vst [vmem:[%s11047_s15 + $0x1d8] sm:$0xff] %v8021_v54  ;;  %v8025_v52 = vld [vmem:[%s11051_s26 + $0x1e8] sm:$0xff]  ;;  %v8027_v48 = vld [vmem:[%s11051_s26 + $0x1f0] sm:$0xff] }
 0x57b   : >> { %8024 = vst [vmem:[%s11047_s15 + $0x1e0] sm:$0xff] %v8023_v34  ;;  %8026 = vst [vmem:[%s11047_s15 + $0x1e8] sm:$0xff] %v8025_v52  ;;  %v8029_v9 = vld [vmem:[%s11051_s26 + $0x1f8] sm:$0xff]  ;;  %s14845_s26 = smov %s14317_s30 }
 0x57c   : >> { %8028 = vst [vmem:[%s11047_s15 + $0x1f0] sm:$0xff] %v8027_v48  ;;  %8030 = vst [vmem:[%s11047_s15 + $0x1f8] sm:$0xff] %v8029_v9  ;;  %s14844_s15 = smov %s14320_s14 }
 0x57d PF: > { %s14425_s28 = sand.u32 63, %s14860_s12   ;;  %s9363_s13 = sshll.u32 %s14250_s16, 9 }
 0x57e   : > { %s8042_s0 = scalar_lea.vmem %s12796_s24, %s9363_s13 [#allocation4]   ;;  %s8044_s1 = scalar_lea.vmem %s14244_s19, %s9363_s13  }
 0x57f   : > { %p9343_p13 = scmp.le.s32.totalorder %s14425_s28, 0 }
 0x580   : > { %s11061_s14 = smov (!%p9343_p13), %s8044_s1   ;;  %s11065_s30 = smov (!%p9343_p13), %s8042_s0  }
 0x581   : > { %8576 = sbr.rel (%p9343_p13) target bundleno = 1426 (0x592), region = 252  ;;  %s11069_s2 = smov (!%p9343_p13), 0  }
 0x582   : > { %s11073_s20 = smov (!%p9343_p13), 0  }
 0x588 LB: >> { %v8054_v49 = vld [vmem:[%s11067_s30] sm:$0xff]  ;;  %s8056_s12 = sadd.s32 1, %s11071_s2  ;;  %s8048_s20 = sadd.s32 1, %s11075_s20   ;;  %s11075_s20 = sphi %s11073_s20, %s8048_s20   ;;  %s11071_s2 = sphi %s11069_s2, %s11070_s2   ;;  %s11067_s30 = sphi %s11065_s30, %s8061_s30   ;;  %s11063_s14 = sphi %s11061_s14, %s8062_s14  }
 0x589   : >> { %8055 = vst [vmem:[%s11063_s14] sm:$0xff] %v8054_v49  ;;  %p8057_p1 = scmp.ge.s32.totalorder %s8056_s12, %s14425_s28  ;;  %p8047_p2 = scmp.ge.s32.totalorder %s8048_s20, %s14425_s28 }
 0x58b   : >> { %s14864_s12 = smov (%p8057_p1, %s8056_s12), 0  ;;  %8050 = sbr.rel (!%p8047_p2) target bundleno = 1416 (0x588), region = 258 }
 0x58c   : >> { %s9344_s24 = sshll.u32 %s14864_s12, 3  ;;  %s11070_s2 = smov %s14864_s12  }
 0x58d   : >> { %s8061_s30 = scalar_lea.vmem %s8042_s0, %s9344_s24 [#allocation4]   ;;  %s8062_s14 = scalar_lea.vmem %s8044_s1, %s9344_s24  }
 0x592 PF: > { %8068 = sbr.rel (!%p11213_p8) target bundleno = 1505 (0x5e1), region = 120  ;;  %s8070_s2 = ssub.s32 (%p11213_p8), 80, %s11274_s25 }
 0x593   : > { %s9365_s19 = sshll.u32 (%p11213_p8), %s11192_s21, 9  ;;  %p8071_p3 = scmp.lt.s32.totalorder (%p11213_p8), %s8070_s2, 64 }
 0x594   : > { %s14440_s26 = scalar_lea.vmem (%p11213_p8), %s14653_s11, %s9365_s19  }
 0x599   : > { %s14866_s2 = smov (!%p8071_p3, %s8070_s2), 64 }
 0x59a   : > { %s9347_s29 = sshll.u32 %s14866_s2, 7 }
 0x59b   : > { %p9350_p0 = scmp.eq.s32.totalorder %s9347_s29, 0 }
 0x59c   : > { %s14446_s0 = sshrl.u32 (!%p9350_p0), %s14866_s2, 6 }
 0x59d   : > { %8079 = sbr.rel (%p9350_p0) target bundleno = 1505 (0x5e1), region = 124  ;;  %p9351_p8 = scmp.le.s32.totalorder (!%p9350_p0), %s14446_s0, 0 }
 0x5a4   : > { %8590 = sbr.rel (%p9351_p8) target bundleno = 1484 (0x5cc), region = 263  ;;  %s14847_s1 = smov (!%p9351_p8), %s14440_s26 }
 0x5a5   : > { %s14848_s21 = smov (!%p9351_p8), %s13931_s23  ;;  %s14455_s27 = smov (!%p9351_p8), 0  }
 0x5a6   : > { %s14457_s25 = smov (!%p9351_p8), 0  }
 0x5ab LB: >> { %v8267_v30 = vld [vmem:[%s11083_s21] sm:$0xff]  ;;  %v8269_v56 = vld [vmem:[%s11083_s21 + $0x8] sm:$0xff]  ;;  %v8271_v16 = vld [vmem:[%s11083_s21 + $0x10] sm:$0xff]  ;;  %s8395_s17 = sadd.s32 1, %s11087_s27  ;;  %s8261_s25 = sadd.s32 1, %s11091_s25   ;;  %s11091_s25 = sphi %s14457_s25, %s8261_s25   ;;  %s11087_s27 = sphi %s14455_s27, %s14851_s27   ;;  %s11083_s21 = sphi %s14848_s21, %s14850_s21   ;;  %s11079_s1 = sphi %s14847_s1, %s14849_s1  }
 0x5ac   : >> { %8268 = vst [vmem:[%s11079_s1] sm:$0xff] %v8267_v30  ;;  %8270 = vst [vmem:[%s11079_s1 + $0x8] sm:$0xff] %v8269_v56  ;;  %v8273_v6 = vld [vmem:[%s11083_s21 + $0x18] sm:$0xff]  ;;  %v8275_v24 = vld [vmem:[%s11083_s21 + $0x20] sm:$0xff]  ;;  %p8396_p4 = scmp.ge.s32.totalorder %s8395_s17, %s14446_s0  ;;  %p8260_p5 = scmp.ge.s32.totalorder %s8261_s25, %s14446_s0 }
 0x5ad   : >> { %8272 = vst [vmem:[%s11079_s1 + $0x10] sm:$0xff] %v8271_v16  ;;  %v8277_v59 = vld [vmem:[%s11083_s21 + $0x28] sm:$0xff]  ;;  %8274 = vst [vmem:[%s11079_s1 + $0x18] sm:$0xff] %v8273_v6  ;;  %v8279_v27 = vld [vmem:[%s11083_s21 + $0x30] sm:$0xff] }
 0x5ae   : >> { %8276 = vst [vmem:[%s11079_s1 + $0x20] sm:$0xff] %v8275_v24  ;;  %8278 = vst [vmem:[%s11079_s1 + $0x28] sm:$0xff] %v8277_v59  ;;  %v8281_v28 = vld [vmem:[%s11083_s21 + $0x38] sm:$0xff]  ;;  %v8283_v37 = vld [vmem:[%s11083_s21 + $0x40] sm:$0xff]  ;;  %s14868_s17 = smov (%p8396_p4, %s8395_s17), 0 }
 0x5af   : >> { %8280 = vst [vmem:[%s11079_s1 + $0x30] sm:$0xff] %v8279_v27  ;;  %8282 = vst [vmem:[%s11079_s1 + $0x38] sm:$0xff] %v8281_v28  ;;  %v8285_v26 = vld [vmem:[%s11083_s21 + $0x48] sm:$0xff]  ;;  %v8287_v46 = vld [vmem:[%s11083_s21 + $0x50] sm:$0xff]  ;;  %s9352_s28 = sshll.u32 %s14868_s17, 9  ;;  %s14851_s27 = smov %s14868_s17 }
 0x5b0   : >> { %8284 = vst [vmem:[%s11079_s1 + $0x40] sm:$0xff] %v8283_v37  ;;  %v8289_v55 = vld [vmem:[%s11083_s21 + $0x58] sm:$0xff]  ;;  %8286 = vst [vmem:[%s11079_s1 + $0x48] sm:$0xff] %v8285_v26  ;;  %v8291_v15 = vld [vmem:[%s11083_s21 + $0x60] sm:$0xff]  ;;  %s14513_s13 = scalar_lea.vmem %s13931_s23, %s9352_s28 [#allocation5]   ;;  %s14516_s14 = scalar_lea.vmem %s14440_s26, %s9352_s28  }
 0x5b1   : >> { %8288 = vst [vmem:[%s11079_s1 + $0x50] sm:$0xff] %v8287_v46  ;;  %8290 = vst [vmem:[%s11079_s1 + $0x58] sm:$0xff] %v8289_v55  ;;  %v8293_v25 = vld [vmem:[%s11083_s21 + $0x68] sm:$0xff]  ;;  %v8295_v3 = vld [vmem:[%s11083_s21 + $0x70] sm:$0xff] }
 0x5b2   : >> { %8292 = vst [vmem:[%s11079_s1 + $0x60] sm:$0xff] %v8291_v15  ;;  %8294 = vst [vmem:[%s11079_s1 + $0x68] sm:$0xff] %v8293_v25  ;;  %v8297_v47 = vld [vmem:[%s11083_s21 + $0x78] sm:$0xff]  ;;  %v8299_v21 = vld [vmem:[%s11083_s21 + $0x80] sm:$0xff] }
 0x5b3   : >> { %8296 = vst [vmem:[%s11079_s1 + $0x70] sm:$0xff] %v8295_v3  ;;  %v8301_v43 = vld [vmem:[%s11083_s21 + $0x88] sm:$0xff]  ;;  %8298 = vst [vmem:[%s11079_s1 + $0x78] sm:$0xff] %v8297_v47  ;;  %v8303_v13 = vld [vmem:[%s11083_s21 + $0x90] sm:$0xff] }
 0x5b4   : >> { %8300 = vst [vmem:[%s11079_s1 + $0x80] sm:$0xff] %v8299_v21  ;;  %8302 = vst [vmem:[%s11079_s1 + $0x88] sm:$0xff] %v8301_v43  ;;  %v8305_v58 = vld [vmem:[%s11083_s21 + $0x98] sm:$0xff]  ;;  %v8307_v53 = vld [vmem:[%s11083_s21 + $0xa0] sm:$0xff] }
 0x5b5   : >> { %8304 = vst [vmem:[%s11079_s1 + $0x90] sm:$0xff] %v8303_v13  ;;  %8306 = vst [vmem:[%s11079_s1 + $0x98] sm:$0xff] %v8305_v58  ;;  %v8309_v11 = vld [vmem:[%s11083_s21 + $0xa8] sm:$0xff]  ;;  %v8311_v63 = vld [vmem:[%s11083_s21 + $0xb0] sm:$0xff] }
 0x5b6   : >> { %8308 = vst [vmem:[%s11079_s1 + $0xa0] sm:$0xff] %v8307_v53  ;;  %v8313_v29 = vld [vmem:[%s11083_s21 + $0xb8] sm:$0xff]  ;;  %8310 = vst [vmem:[%s11079_s1 + $0xa8] sm:$0xff] %v8309_v11  ;;  %v8315_v61 = vld [vmem:[%s11083_s21 + $0xc0] sm:$0xff] }
 0x5b7   : >> { %8312 = vst [vmem:[%s11079_s1 + $0xb0] sm:$0xff] %v8311_v63  ;;  %8314 = vst [vmem:[%s11079_s1 + $0xb8] sm:$0xff] %v8313_v29  ;;  %v8317_v38 = vld [vmem:[%s11083_s21 + $0xc8] sm:$0xff]  ;;  %v8319_v62 = vld [vmem:[%s11083_s21 + $0xd0] sm:$0xff] }
 0x5b8   : >> { %8316 = vst [vmem:[%s11079_s1 + $0xc0] sm:$0xff] %v8315_v61  ;;  %8318 = vst [vmem:[%s11079_s1 + $0xc8] sm:$0xff] %v8317_v38  ;;  %v8321_v42 = vld [vmem:[%s11083_s21 + $0xd8] sm:$0xff]  ;;  %v8323_v44 = vld [vmem:[%s11083_s21 + $0xe0] sm:$0xff] }
 0x5b9   : >> { %8320 = vst [vmem:[%s11079_s1 + $0xd0] sm:$0xff] %v8319_v62  ;;  %v8325_v20 = vld [vmem:[%s11083_s21 + $0xe8] sm:$0xff]  ;;  %8322 = vst [vmem:[%s11079_s1 + $0xd8] sm:$0xff] %v8321_v42  ;;  %v8327_v10 = vld [vmem:[%s11083_s21 + $0xf0] sm:$0xff] }
 0x5ba   : >> { %8324 = vst [vmem:[%s11079_s1 + $0xe0] sm:$0xff] %v8323_v44  ;;  %8326 = vst [vmem:[%s11079_s1 + $0xe8] sm:$0xff] %v8325_v20  ;;  %v8329_v1 = vld [vmem:[%s11083_s21 + $0xf8] sm:$0xff]  ;;  %v8331_v14 = vld [vmem:[%s11083_s21 + $0x100] sm:$0xff] }
 0x5bb   : >> { %8328 = vst [vmem:[%s11079_s1 + $0xf0] sm:$0xff] %v8327_v10  ;;  %8330 = vst [vmem:[%s11079_s1 + $0xf8] sm:$0xff] %v8329_v1  ;;  %v8333_v18 = vld [vmem:[%s11083_s21 + $0x108] sm:$0xff]  ;;  %v8335_v7 = vld [vmem:[%s11083_s21 + $0x110] sm:$0xff] }
 0x5bc   : >> { %8332 = vst [vmem:[%s11079_s1 + $0x100] sm:$0xff] %v8331_v14  ;;  %v8337_v45 = vld [vmem:[%s11083_s21 + $0x118] sm:$0xff]  ;;  %8334 = vst [vmem:[%s11079_s1 + $0x108] sm:$0xff] %v8333_v18  ;;  %v8339_v33 = vld [vmem:[%s11083_s21 + $0x120] sm:$0xff] }
 0x5bd   : >> { %8336 = vst [vmem:[%s11079_s1 + $0x110] sm:$0xff] %v8335_v7  ;;  %8338 = vst [vmem:[%s11079_s1 + $0x118] sm:$0xff] %v8337_v45  ;;  %v8341_v4 = vld [vmem:[%s11083_s21 + $0x128] sm:$0xff]  ;;  %v8343_v23 = vld [vmem:[%s11083_s21 + $0x130] sm:$0xff] }
 0x5be   : >> { %8340 = vst [vmem:[%s11079_s1 + $0x120] sm:$0xff] %v8339_v33  ;;  %8342 = vst [vmem:[%s11079_s1 + $0x128] sm:$0xff] %v8341_v4  ;;  %v8345_v31 = vld [vmem:[%s11083_s21 + $0x138] sm:$0xff]  ;;  %v8347_v5 = vld [vmem:[%s11083_s21 + $0x140] sm:$0xff] }
 0x5bf   : >> { %8344 = vst [vmem:[%s11079_s1 + $0x130] sm:$0xff] %v8343_v23  ;;  %v8349_v41 = vld [vmem:[%s11083_s21 + $0x148] sm:$0xff]  ;;  %8346 = vst [vmem:[%s11079_s1 + $0x138] sm:$0xff] %v8345_v31  ;;  %v8351_v17 = vld [vmem:[%s11083_s21 + $0x150] sm:$0xff] }
 0x5c0   : >> { %8348 = vst [vmem:[%s11079_s1 + $0x140] sm:$0xff] %v8347_v5  ;;  %8350 = vst [vmem:[%s11079_s1 + $0x148] sm:$0xff] %v8349_v41  ;;  %v8353_v22 = vld [vmem:[%s11083_s21 + $0x158] sm:$0xff]  ;;  %v8355_v51 = vld [vmem:[%s11083_s21 + $0x160] sm:$0xff] }
 0x5c1   : >> { %8352 = vst [vmem:[%s11079_s1 + $0x150] sm:$0xff] %v8351_v17  ;;  %8354 = vst [vmem:[%s11079_s1 + $0x158] sm:$0xff] %v8353_v22  ;;  %v8357_v50 = vld [vmem:[%s11083_s21 + $0x168] sm:$0xff]  ;;  %v8359_v12 = vld [vmem:[%s11083_s21 + $0x170] sm:$0xff] }
 0x5c2   : >> { %8356 = vst [vmem:[%s11079_s1 + $0x160] sm:$0xff] %v8355_v51  ;;  %v8361_v39 = vld [vmem:[%s11083_s21 + $0x178] sm:$0xff]  ;;  %8358 = vst [vmem:[%s11079_s1 + $0x168] sm:$0xff] %v8357_v50  ;;  %v8363_v8 = vld [vmem:[%s11083_s21 + $0x180] sm:$0xff] }
 0x5c3   : >> { %8360 = vst [vmem:[%s11079_s1 + $0x170] sm:$0xff] %v8359_v12  ;;  %8362 = vst [vmem:[%s11079_s1 + $0x178] sm:$0xff] %v8361_v39  ;;  %v8365_v2 = vld [vmem:[%s11083_s21 + $0x188] sm:$0xff]  ;;  %v8367_v60 = vld [vmem:[%s11083_s21 + $0x190] sm:$0xff] }
 0x5c4   : >> { %8364 = vst [vmem:[%s11079_s1 + $0x180] sm:$0xff] %v8363_v8  ;;  %8366 = vst [vmem:[%s11079_s1 + $0x188] sm:$0xff] %v8365_v2  ;;  %v8369_v36 = vld [vmem:[%s11083_s21 + $0x198] sm:$0xff]  ;;  %v8371_v19 = vld [vmem:[%s11083_s21 + $0x1a0] sm:$0xff] }
 0x5c5   : >> { %8368 = vst [vmem:[%s11079_s1 + $0x190] sm:$0xff] %v8367_v60  ;;  %v8373_v57 = vld [vmem:[%s11083_s21 + $0x1a8] sm:$0xff]  ;;  %8370 = vst [vmem:[%s11079_s1 + $0x198] sm:$0xff] %v8369_v36  ;;  %v8375_v0 = vld [vmem:[%s11083_s21 + $0x1b0] sm:$0xff]  ;;  %8263 = sbr.rel (!%p8260_p5) target bundleno = 1451 (0x5ab), region = 269 }
 0x5c6   : >> { %8372 = vst [vmem:[%s11079_s1 + $0x1a0] sm:$0xff] %v8371_v19  ;;  %8374 = vst [vmem:[%s11079_s1 + $0x1a8] sm:$0xff] %v8373_v57  ;;  %v8377_v40 = vld [vmem:[%s11083_s21 + $0x1b8] sm:$0xff]  ;;  %v8379_v35 = vld [vmem:[%s11083_s21 + $0x1c0] sm:$0xff] }
 0x5c7   : >> { %8376 = vst [vmem:[%s11079_s1 + $0x1b0] sm:$0xff] %v8375_v0  ;;  %8378 = vst [vmem:[%s11079_s1 + $0x1b8] sm:$0xff] %v8377_v40  ;;  %v8381_v32 = vld [vmem:[%s11083_s21 + $0x1c8] sm:$0xff]  ;;  %v8383_v54 = vld [vmem:[%s11083_s21 + $0x1d0] sm:$0xff] }
 0x5c8   : >> { %8380 = vst [vmem:[%s11079_s1 + $0x1c0] sm:$0xff] %v8379_v35  ;;  %v8385_v34 = vld [vmem:[%s11083_s21 + $0x1d8] sm:$0xff]  ;;  %8382 = vst [vmem:[%s11079_s1 + $0x1c8] sm:$0xff] %v8381_v32  ;;  %v8387_v52 = vld [vmem:[%s11083_s21 + $0x1e0] sm:$0xff] }
 0x5c9   : >> { %8384 = vst [vmem:[%s11079_s1 + $0x1d0] sm:$0xff] %v8383_v54  ;;  %8386 = vst [vmem:[%s11079_s1 + $0x1d8] sm:$0xff] %v8385_v34  ;;  %v8389_v48 = vld [vmem:[%s11083_s21 + $0x1e8] sm:$0xff]  ;;  %v8391_v9 = vld [vmem:[%s11083_s21 + $0x1f0] sm:$0xff] }
 0x5ca   : >> { %8388 = vst [vmem:[%s11079_s1 + $0x1e0] sm:$0xff] %v8387_v52  ;;  %8390 = vst [vmem:[%s11079_s1 + $0x1e8] sm:$0xff] %v8389_v48  ;;  %v8393_v49 = vld [vmem:[%s11083_s21 + $0x1f8] sm:$0xff]  ;;  %s14850_s21 = smov %s14513_s13 }
 0x5cb   : >> { %8392 = vst [vmem:[%s11079_s1 + $0x1f0] sm:$0xff] %v8391_v9  ;;  %8394 = vst [vmem:[%s11079_s1 + $0x1f8] sm:$0xff] %v8393_v49  ;;  %s14849_s1 = smov %s14516_s14 }
 0x5cc PF: > { %s14621_s30 = sand.u32 63, %s14866_s2   ;;  %s9366_s20 = sshll.u32 %s14446_s0, 9 }
 0x5cd   : > { %s8406_s12 = scalar_lea.vmem %s13931_s23, %s9366_s20 [#allocation5]   ;;  %s8408_s24 = scalar_lea.vmem %s14440_s26, %s9366_s20  }
 0x5ce   : > { %p9357_p11 = scmp.le.s32.totalorder %s14621_s30, 0 }
 0x5cf   : > { %s11093_s19 = smov (!%p9357_p11), %s8408_s24   ;;  %s11097_s16 = smov (!%p9357_p11), %s8406_s12  }
 0x5d0   : > { %8604 = sbr.rel (%p9357_p11) target bundleno = 1505 (0x5e1), region = 274  ;;  %s11101_s15 = smov (!%p9357_p11), 0  }
 0x5d1   : > { %s11105_s29 = smov (!%p9357_p11), 0  }
 0x5d7 LB: >> { %v8418_v30 = vld [vmem:[%s11099_s16] sm:$0xff]  ;;  %s8420_s2 = sadd.s32 1, %s11103_s15  ;;  %s8412_s29 = sadd.s32 1, %s11107_s29   ;;  %s11107_s29 = sphi %s11105_s29, %s8412_s29   ;;  %s11103_s15 = sphi %s11101_s15, %s11102_s15   ;;  %s11099_s16 = sphi %s11097_s16, %s8425_s16   ;;  %s11095_s19 = sphi %s11093_s19, %s8426_s19  }
 0x5d8   : >> { %8419 = vst [vmem:[%s11095_s19] sm:$0xff] %v8418_v30  ;;  %p8421_p7 = scmp.ge.s32.totalorder %s8420_s2, %s14621_s30  ;;  %p8411_p6 = scmp.ge.s32.totalorder %s8412_s29, %s14621_s30 }
 0x5da   : >> { %s14870_s2 = smov (%p8421_p7, %s8420_s2), 0  ;;  %8414 = sbr.rel (!%p8411_p6) target bundleno = 1495 (0x5d7), region = 280 }
 0x5db   : >> { %s9358_s23 = sshll.u32 %s14870_s2, 3  ;;  %s11102_s15 = smov %s14870_s2  }
 0x5dc   : >> { %s8425_s16 = scalar_lea.vmem %s8406_s12, %s9358_s23 [#allocation5]   ;;  %s8426_s19 = scalar_lea.vmem %s8408_s24, %s9358_s23  }
 0x5e1 PF: > { %s14852_s26 = sld [smem:[#allocation7_spill]]  ;;  %s14853_s19 = sld [smem:[#allocation8_spill]] }
 0x5e2   : > { %p22_p9 = scmp.ge.s32.totalorder %s11195_s22, 4   ;;  %s14854_s17 = smov %s11035_s18 }
 0x5e3   : > { %s14856_s20 = smov %s11195_s22 }
 0x5e4   :  { %24 = sbr.rel (!%p22_p9) target bundleno = 7 (0x7), region = 291 }
 0x5e7   : > { %s14855_s18 = smov %s14852_s26 }
 0x5eb   :  { %8449 = vsyncpa [#allocation3], 1 }
 0x5ec   :  { %8451 = vsyncpa [#allocation3 + $0x1], 1 }

</bundles_post_ra>
